<compile_context>
chip_gen: v6e
topology: v6e:2x2x1
jax: 0.10.0
libtpu: 0.0.40
codegen_flags: <defaults>
</compile_context>

<pallas_src>
import functools

import numpy as np
import jax
import jax.numpy as jnp
from jax import lax
from jax.experimental import pallas as pl
from jax.experimental.pallas import tpu as pltpu

_EPS = 1e-5


def _ru(x, m):
    return ((x + m - 1) // m) * m


def _geom(H, W):
    """Static geometry of the fused conv stack for an HxW input."""
    H1 = (H + 2 - 4) // 2 + 1            # conv1: k4, s2, p1
    W1 = (W + 2 - 4) // 2 + 1
    Hp, Wp = H1 + 2, W1 + 2              # +1 halo ring on the feature grid
    R = Hp * Wp                          # flat padded-grid rows
    G = _ru(Wp + 1, 8)                   # guard band (covers all 3x3 offsets)
    CH = min(512, _ru(R, 64))            # row-chunk size (mult of 64)
    Rp = _ru(R, CH)                      # chunk-padded row count
    return H1, W1, Hp, Wp, R, G, CH, Rp


# -----------------------------------------------------------------------------
# Kernel 1: fully fused conv stack (conv1 + 2x ResidualBlock + conv5 + ReLU)
# -----------------------------------------------------------------------------
def _stack_kernel(p1_ref, w1_ref, s1_ref, wres_ref, sres_ref, w5_ref, s5_ref,
                  o_ref, buf_a, buf_b, *, R, Rp, CH, G, Wp, Hp):
    """One pack-group of images per grid step.

    Feature maps live in two f32 VMEM buffers laid out as a zero-padded flat
    (Rp, pack*32) grid with a G-row guard band; every 3x3 conv is 9 shifted
    (CH, C) @ (C, Co) bf16 matmuls accumulated in f32, chunked over rows.
    """
    NC = Rp // CH
    C = buf_a.shape[1]

    # Guard rows must be zero before the first shifted read.  Zeroed every
    # grid step (cheap: 4*G rows) so the kernel stays correct even if the
    # "parallel" batch axis is split across TensorCores.
    zg = jnp.zeros((G, C), buf_a.dtype)
    buf_a[pl.ds(0, G), :] = zg
    buf_a[pl.ds(G + Rp, G), :] = zg
    buf_b[pl.ds(0, G), :] = zg
    buf_b[pl.ds(G + Rp, G), :] = zg

    Kmax = Rp // Wp + 1                   # enough multiples of Wp to cover Rp

    def interior(row0):
        # In-kernel interior mask (replaces the old (R,1) HBM mask input).
        # Avoids vector integer div/mod: w==0 / w==Wp-1 detected by comparing
        # against the (static count of) multiples of Wp and lane-summing.
        idx = row0 + lax.broadcasted_iota(jnp.int32, (CH, 1), 0)
        kk = lax.broadcasted_iota(jnp.int32, (1, Kmax), 1)
        mult = kk * Wp
        eq0 = (idx == mult).astype(jnp.int32)               # w == 0
        eql = (idx == mult + (Wp - 1)).astype(jnp.int32)    # w == Wp - 1
        border_w = jnp.sum(eq0 + eql, axis=1, keepdims=True) > 0
        return (idx >= Wp) & (idx < R - Wp) & jnp.logical_not(border_w)

    # ---- conv1 (stride-2 stem, im2col'd in the wrapper) + folded BN + ReLU --
    def conv1_body(c, carry):
        row0 = pl.multiple_of(c * CH, CH)
        x = p1_ref[0, pl.ds(row0, CH), :]                   # bf16, aligned
        y = jnp.dot(x, w1_ref[...], preferred_element_type=jnp.float32)
        y = jnp.maximum(y + s1_ref[...], 0.0)
        y = jnp.where(interior(row0), y, 0.0)
        buf_a[pl.ds(G + row0, CH), :] = y
        return carry

    lax.fori_loop(0, NC, conv1_body, 0)

    def conv3x3(src, tap_w, shift, store, *, relu, masked, add_from=None):
        """One 3x3 conv layer = 9 shifted bf16 matmuls per row chunk."""
        def body(c, carry):
            row0 = pl.multiple_of(c * CH, CH)
            acc = None
            for di in range(3):
                for dj in range(3):
                    off = (di - 1) * Wp + (dj - 1)
                    xs = src[pl.ds(G + row0 + off, CH), :].astype(jnp.bfloat16)
                    p = jnp.dot(xs, tap_w(di * 3 + dj),
                                preferred_element_type=jnp.float32)
                    acc = p if acc is None else acc + p
            y = acc + shift
            if relu:
                y = jnp.maximum(y, 0.0)
            if masked:
                y = jnp.where(interior(row0), y, 0.0)
            if add_from is not None:
                y = y + add_from[pl.ds(G + row0, CH), :]
            store(row0, y)
            return carry

        lax.fori_loop(0, NC, body, 0)

    def store_buf(buf):
        def f(row0, y):
            buf[pl.ds(G + row0, CH), :] = y
        return f

    def store_out(row0, y):
        o_ref[0, pl.ds(row0, CH), :] = y.astype(o_ref.dtype)

    # ---- two ResidualBlock(32, 32): identity shortcut, no ReLU after add ----
    for l in range(2):
        conv3x3(buf_a, lambda t, l=l: wres_ref[(2 * l + 0) * 9 + t],
                sres_ref[2 * l + 0], store_buf(buf_b), relu=True, masked=True)
        conv3x3(buf_b, lambda t, l=l: wres_ref[(2 * l + 1) * 9 + t],
                sres_ref[2 * l + 1], store_buf(buf_a), relu=False, masked=True,
                add_from=buf_a)

    # ---- conv5 (32 -> 64 per image) + bias + ReLU ----------------------------
    conv3x3(buf_a, lambda t: w5_ref[t], s5_ref[...], store_out,
            relu=True, masked=False)


# -----------------------------------------------------------------------------
# Kernel 2: K-tiled Linear, bf16 MXU inputs, f32 VMEM accumulator (P3 pattern)
# -----------------------------------------------------------------------------
def _linear_kernel(x_ref, w_ref, b_ref, o_ref, acc_ref):
    @pl.when(pl.program_id(2) == 0)
    def _():
        acc_ref[...] = jnp.zeros_like(acc_ref)

    acc_ref[...] += jnp.dot(x_ref[...], w_ref[...],
                            preferred_element_type=jnp.float32)

    @pl.when(pl.program_id(2) == pl.num_programs(2) - 1)
    def _():
        o_ref[...] = (acc_ref[...] + b_ref[...]).astype(o_ref.dtype)


def _linear(x_bf16, w_bf16, bias_f32, *, tn=128, tk=4096):
    """out = x @ w + bias ; bf16 inputs, f32 accumulation, K tiled over grid."""
    M, K = x_bf16.shape
    Kw, Nf = w_bf16.shape
    assert Kw == K
    tk = min(tk, K)
    assert K % tk == 0 and Nf % tn == 0
    tm = min(128, _ru(M, 16))
    M_pad = _ru(M, tm)
    x_p = jnp.pad(x_bf16, ((0, M_pad - M), (0, 0)))

    out = pl.pallas_call(
        _linear_kernel,
        out_shape=jax.ShapeDtypeStruct((M_pad, Nf), jnp.float32),
        grid=(M_pad // tm, Nf // tn, K // tk),
        in_specs=[
            pl.BlockSpec((tm, tk), lambda i, j, k: (i, k)),
            pl.BlockSpec((tk, tn), lambda i, j, k: (k, j)),
            pl.BlockSpec((1, tn), lambda i, j, k: (0, j)),
        ],
        out_specs=pl.BlockSpec((tm, tn), lambda i, j, k: (i, j)),
        scratch_shapes=[pltpu.VMEM((tm, tn), jnp.float32)],
        compiler_params=pltpu.CompilerParams(
            dimension_semantics=("parallel", "parallel", "arbitrary"),
            vmem_limit_bytes=32 * 1024 * 1024),
        cost_estimate=pl.CostEstimate(
            flops=2 * M_pad * Nf * K, transcendentals=0,
            bytes_accessed=int(2 * (x_p.size + w_bf16.size) + 4 * M_pad * Nf)),
    )(x_p, w_bf16, bias_f32)
    return out[:M]


# -----------------------------------------------------------------------------
# One-time parameter packing (BN folding, block-diag batch packing, Linear perm)
# -----------------------------------------------------------------------------
def _conv_w_taps(w_oihw):
    # (O, I, KH, KW) -> (KH*KW, I, O); tap index = kh*KW + kw
    o, i, kh, kw = w_oihw.shape
    return jnp.transpose(w_oihw, (2, 3, 1, 0)).reshape(kh * kw, i, o)


def _bn_fold(bn, bias=None):
    scale = bn["gamma"] / jnp.sqrt(bn["var"] + _EPS)
    shift = bn["beta"] - bn["mean"] * scale
    if bias is not None:
        shift = shift + bias * scale
    return scale, shift


def _block_diag_taps(taps, pack):
    # (T, Ci, Co) -> (T, pack*Ci, pack*Co) with identical diagonal blocks:
    # `pack` images share one matmul at full 128/256-lane occupancy.
    T, Ci, Co = taps.shape
    eye = jnp.eye(pack, dtype=taps.dtype)
    out = jnp.einsum("pq,tij->tpiqj", eye, taps)
    return out.reshape(T, pack * Ci, pack * Co)


def pack_params(params, *, in_ch, in_hw, pack):
    """Fold BN into conv weights, build bf16 block-diagonal packed weights, and
    permute/zero-pad the Linear weight to the kernel-native padded layout."""
    H, W = in_hw
    H1, W1, Hp, Wp, R, G, CH, Rp = _geom(H, W)

    # conv1 (+BN, +bias) -> block-diag (pack*16*C, pack*32)
    scale1, shift1 = _bn_fold(params["bn1"], params["conv1_b"])
    w1 = _conv_w_taps(params["conv1_w"]).reshape(-1, 32) * scale1[None, :]
    w1 = _block_diag_taps(w1[None], pack)[0]
    s1 = jnp.tile(shift1.reshape(1, 32), (1, pack))

    # residual blocks (+BN, bias=False)
    wres, sres = [], []
    for r in ("res1", "res2"):
        pr = params[r]
        for wk, bk in (("w1", "bn1"), ("w2", "bn2")):
            sc, sh = _bn_fold(pr[bk])
            taps = _conv_w_taps(pr[wk]) * sc[None, None, :]      # (9, 32, 32)
            wres.append(_block_diag_taps(taps, pack))
            sres.append(jnp.tile(sh.reshape(1, 32), (1, pack)))
    wres = jnp.concatenate(wres, axis=0)                         # (36, P32, P32)
    sres = jnp.stack(sres, axis=0)                               # (4, 1, P32)

    # conv5 (+bias)
    w5 = _block_diag_taps(_conv_w_taps(params["conv5_w"]), pack)  # (9, P32, P64)
    s5 = jnp.tile(params["conv5_b"].reshape(1, 64), (1, pack))

    # Linear: permute weight rows once so the kernel's padded (Rp, 64) NHWC-
    # flat bf16 output feeds the matmul directly (zero rows for border/pad).
    lin_w_t = params["lin_w"].T.astype(jnp.bfloat16)              # (64*H1*W1, 256)
    rr = np.arange(Rp)
    hh, ww = rr // Wp, rr % Wp
    inter = (rr < R) & (hh >= 1) & (hh < Hp - 1) & (ww >= 1) & (ww < Wp - 1)
    spatial = np.where(inter, (hh - 1) * W1 + (ww - 1), 0)
    src = (np.arange(64)[None, :] * (H1 * W1) + spatial[:, None]).reshape(-1)
    wlin = jnp.take(lin_w_t, jnp.asarray(src, dtype=jnp.int32), axis=0)
    keep = jnp.asarray(np.repeat(inter, 64))[:, None]
    wlin = jnp.where(keep, wlin, jnp.zeros((), jnp.bfloat16))     # (Rp*64, 256)

    return dict(
        w1=w1.astype(jnp.bfloat16), s1=s1.astype(jnp.float32),
        wres=wres.astype(jnp.bfloat16), sres=sres.astype(jnp.float32),
        w5=w5.astype(jnp.bfloat16), s5=s5.astype(jnp.float32),
        wlin=wlin, blin=params["lin_b"].reshape(1, -1).astype(jnp.float32),
    )


def _conv1_patches(x_nhwc, H1, W1, Hp, Wp, R, Rp):
    """bf16 im2col for the stride-2 stem conv, on the zero-padded (Hp, Wp)
    grid used inside the fused kernel (rows >= R and the halo ring are zero)."""
    N, H, W, C = x_nhwc.shape
    xp = jnp.pad(x_nhwc, ((0, 0), (1, 1), (1, 1), (0, 0)))
    cols = []
    for i in range(4):
        for j in range(4):
            cols.append(xp[:, i:i + 2 * (H1 - 1) + 1:2,
                            j:j + 2 * (W1 - 1) + 1:2, :])
    patches = jnp.concatenate(cols, axis=-1)                      # (N,H1,W1,16C)
    patches = jnp.pad(patches, ((0, 0), (1, 1), (1, 1), (0, 0)))  # (N,Hp,Wp,16C)
    patches = patches.reshape(N, R, 16 * C)
    patches = jnp.pad(patches, ((0, 0), (0, Rp - R), (0, 0)))
    return patches.astype(jnp.bfloat16)


# -----------------------------------------------------------------------------
# DRANet_Encoder forward
# -----------------------------------------------------------------------------
def dranet_encoder_forward(x_nchw, packed):
    N, C, H, W = x_nchw.shape
    pack = packed["w1"].shape[1] // 32        # images lane-packed per grid step
    K1 = 16 * C
    H1, W1, Hp, Wp, R, G, CH, Rp = _geom(H, W)
    Ng = (N + pack - 1) // pack
    Np = Ng * pack

    x = jnp.transpose(x_nchw, (0, 2, 3, 1)).astype(jnp.float32)        # NHWC
    p1 = _conv1_patches(x, H1, W1, Hp, Wp, R, Rp)                      # (N,Rp,K1)
    if Np != N:
        p1 = jnp.pad(p1, ((0, Np - N), (0, 0), (0, 0)))
    # pack `pack` images along the lane axis (image-major, channel-minor)
    p1 = p1.reshape(Ng, pack, Rp, K1).transpose(0, 2, 1, 3)
    p1 = p1.reshape(Ng, Rp, pack * K1)

    flops = 2 * Ng * pack * Rp * (K1 * 32 + 4 * 9 * 32 * 32 + 9 * 32 * 64)
    bytes_accessed = int(2 * (p1.size + packed["w1"].size + packed["wres"].size
                              + packed["w5"].size + Ng * Rp * pack * 64))

    out = pl.pallas_call(
        functools.partial(_stack_kernel, R=R, Rp=Rp, CH=CH, G=G, Wp=Wp, Hp=Hp),
        out_shape=jax.ShapeDtypeStruct((Ng, Rp, pack * 64), jnp.bfloat16),
        grid=(Ng,),
        in_specs=[
            pl.BlockSpec((1, Rp, pack * K1), lambda b: (b, 0, 0)),     # patches
            pl.BlockSpec((pack * K1, pack * 32), lambda b: (0, 0)),    # conv1 w
            pl.BlockSpec((1, pack * 32), lambda b: (0, 0)),            # conv1 shift
            pl.BlockSpec((36, pack * 32, pack * 32), lambda b: (0, 0, 0)),  # res taps
            pl.BlockSpec((4, 1, pack * 32), lambda b: (0, 0, 0)),      # res shifts
            pl.BlockSpec((9, pack * 32, pack * 64), lambda b: (0, 0, 0)),   # conv5 taps
            pl.BlockSpec((1, pack * 64), lambda b: (0, 0)),            # conv5 bias
        ],
        out_specs=pl.BlockSpec((1, Rp, pack * 64), lambda b: (b, 0, 0)),
        scratch_shapes=[pltpu.VMEM((2 * G + Rp, pack * 32), jnp.float32),
                        pltpu.VMEM((2 * G + Rp, pack * 32), jnp.float32)],
        compiler_params=pltpu.CompilerParams(
            dimension_semantics=("parallel",),
            vmem_limit_bytes=48 * 1024 * 1024),
        cost_estimate=pl.CostEstimate(flops=flops, transcendentals=0,
                                      bytes_accessed=bytes_accessed),
    )(p1, packed["w1"], packed["s1"], packed["wres"], packed["sres"],
      packed["w5"], packed["s5"])

    # de-interleave lane-packed images -> (N, Rp, 64) bf16, kernel-native layout
    fm = out.reshape(Ng, Rp, pack, 64).transpose(0, 2, 1, 3)
    fm = fm.reshape(Np, Rp, 64)[:N]

    # returned feature map: strip halo/pad rows, back to NCHW f32 like PyTorch
    f_map = fm[:, :R, :].reshape(N, Hp, Wp, 64)[:, 1:-1, 1:-1, :]
    f_map = jnp.transpose(f_map, (0, 3, 1, 2)).astype(jnp.float32)

    # Linear consumes the kernel-native layout directly (bf16, no transpose /
    # recast); its weight was permuted + zero-row padded once in pack_params.
    vector = _linear(fm.reshape(N, Rp * 64), packed["wlin"], packed["blin"])
    return f_map, vector


# -----------------------------------------------------------------------------
# Deterministic parameter init
# -----------------------------------------------------------------------------
def init_params(key, in_ch, feat_hw):
    keys = iter(jax.random.split(key, 64))

    def rnd(shape, scale=0.1):
        return scale * jax.random.normal(next(keys), shape, dtype=jnp.float32)

    def bn_params(c):
        return dict(
            gamma=1.0 + 0.1 * jax.random.normal(next(keys), (c,), dtype=jnp.float32),
            beta=rnd((c,)),
            mean=rnd((c,)),
            var=0.5 + jax.random.uniform(next(keys), (c,), dtype=jnp.float32),
        )

    def resblock(c):
        return dict(w1=rnd((c, c, 3, 3)), bn1=bn_params(c),
                    w2=rnd((c, c, 3, 3)), bn2=bn_params(c))

    return dict(
        conv1_w=rnd((32, in_ch, 4, 4)), conv1_b=rnd((32,)), bn1=bn_params(32),
        res1=resblock(32),
        res2=resblock(32),
        conv5_w=rnd((64, 32, 3, 3)), conv5_b=rnd((64,)),
        lin_w=rnd((256, 64 * feat_hw * feat_hw)), lin_b=rnd((256,)),
    )


# -----------------------------------------------------------------------------
# Pure-JAX f32 reference (XLA convs, HIGHEST precision) for correctness check
# -----------------------------------------------------------------------------
def _ref_conv(x, w, stride, pad, bias=None):
    y = lax.conv_general_dilated(x, w, (stride, stride),
                                 ((pad, pad), (pad, pad)),
                                 dimension_numbers=("NCHW", "OIHW", "NCHW"),
                                 precision=lax.Precision.HIGHEST)
    if bias is not None:
        y = y + bias[None, :, None, None]
    return y


def _ref_bn(x, bn):
    c = lambda v: v[None, :, None, None]
    return (x - c(bn["mean"])) / jnp.sqrt(c(bn["var"]) + _EPS) * c(bn["gamma"]) + c(bn["beta"])


def ref_forward(x, params):
    h = jax.nn.relu(_ref_bn(_ref_conv(x, params["conv1_w"], 2, 1,
                                      params["conv1_b"]), params["bn1"]))
    for r in ("res1", "res2"):
        pr = params[r]
        t = jax.nn.relu(_ref_bn(_ref_conv(h, pr["w1"], 1, 1), pr["bn1"]))
        t = _ref_bn(_ref_conv(t, pr["w2"], 1, 1), pr["bn2"])
        h = t + h
    h = jax.nn.relu(_ref_conv(h, params["conv5_w"], 1, 1, params["conv5_b"]))
    vec = jnp.matmul(h.reshape(h.shape[0], -1), params["lin_w"].T,
                     precision=lax.Precision.HIGHEST) + params["lin_b"]
    return h, vec


if __name__ == "__main__":
    key = jax.random.PRNGKey(0)
    kx, kp = jax.random.split(key)

    # Small demo shapes: batch=2, channels=3, spatial=16x16 -> f_map (2, 64, 8, 8)
    N, C, H, W = 2, 3, 16, 16
    x = jax.random.normal(kx, (N, C, H, W), dtype=jnp.float32)
    params = init_params(kp, in_ch=C, feat_hw=H // 2)

    pack = min(4, N)   # images lane-packed per conv-stack grid step (<= 4)
    packed = pack_params(params, in_ch=C, in_hw=(H, W), pack=pack)

    fwd = jax.jit(dranet_encoder_forward)
    f_map, vector = fwd(x, packed)
    f_map, vector = jax.block_until_ready((f_map, vector))

    assert f_map.shape == (N, 64, H // 2, W // 2)
    assert vector.shape == (N, 256)

    f_ref, v_ref = ref_forward(x, params)
    # bf16 MXU inputs + bf16 feature-map storage vs. a full-f32 XLA reference:
    # tolerances sized for ~0.5-1% relative error on O(1)-O(3) activations.
    np.testing.assert_allclose(np.asarray(f_map), np.asarray(f_ref),
                               rtol=5e-2, atol=1e-1)
    np.testing.assert_allclose(np.asarray(vector), np.asarray(v_ref),
                               rtol=5e-2, atol=5e-1)

    print("KERNEL_OK")
</pallas_src>

<mosaic_0001>
module attributes {stable_mosaic.version = 11 : i64} {
  func.func @_stack_kernel(%arg0: i32, %arg1: memref<1x128x96xbf16, #tpu.memory_space<vmem>>, %arg2: memref<96x64xbf16, #tpu.memory_space<vmem>>, %arg3: memref<1x64xf32, #tpu.memory_space<vmem>>, %arg4: memref<36x64x64xbf16, #tpu.memory_space<vmem>>, %arg5: memref<4x1x64xf32, #tpu.memory_space<vmem>>, %arg6: memref<9x64x128xbf16, #tpu.memory_space<vmem>>, %arg7: memref<1x128xf32, #tpu.memory_space<vmem>>, %arg8: memref<1x128x128xbf16, #tpu.memory_space<vmem>>, %arg9: memref<160x64xf32, #tpu.memory_space<vmem>>, %arg10: memref<160x64xf32, #tpu.memory_space<vmem>>) attributes {dimension_semantics = [#tpu.dimension_semantics<parallel>], iteration_bounds = array<i64: 1>, scalar_prefetch = 0 : i64, scratch_operands = 2 : i64, tpu.core_type = #tpu.core_type<tc>, window_params = [{transform_indices = @transform_0, window_bounds = array<i64: 1, 128, 96>}, {pipeline_mode = #tpu.pipeline_mode<synchronous>, transform_indices = @transform_1, window_bounds = array<i64: 96, 64>}, {pipeline_mode = #tpu.pipeline_mode<synchronous>, transform_indices = @transform_2, window_bounds = array<i64: 1, 64>}, {pipeline_mode = #tpu.pipeline_mode<synchronous>, transform_indices = @transform_3, window_bounds = array<i64: 36, 64, 64>}, {pipeline_mode = #tpu.pipeline_mode<synchronous>, transform_indices = @transform_4, window_bounds = array<i64: 4, 1, 64>}, {pipeline_mode = #tpu.pipeline_mode<synchronous>, transform_indices = @transform_5, window_bounds = array<i64: 9, 64, 128>}, {pipeline_mode = #tpu.pipeline_mode<synchronous>, transform_indices = @transform_6, window_bounds = array<i64: 1, 128>}, {transform_indices = @transform_7, window_bounds = array<i64: 1, 128, 128>}]} {
    %cst = arith.constant 0.000000e+00 : f32
    %0 = vector.broadcast %cst : f32 to vector<16x64xf32>
    %c0 = arith.constant 0 : index
    %c0_0 = arith.constant 0 : index
    %1 = vector.load %arg9[%c0, %c0_0] : memref<160x64xf32, #tpu.memory_space<vmem>>, vector<16x64xf32>
    tpu.vector_store %arg9[%c0, %c0_0], %0 {strides = array<i32>} : memref<160x64xf32, #tpu.memory_space<vmem>>, vector<16x64xf32>,
    %c144 = arith.constant 144 : index
    %c0_1 = arith.constant 0 : index
    %2 = vector.load %arg9[%c144, %c0_1] : memref<160x64xf32, #tpu.memory_space<vmem>>, vector<16x64xf32>
    tpu.vector_store %arg9[%c144, %c0_1], %0 {strides = array<i32>} : memref<160x64xf32, #tpu.memory_space<vmem>>, vector<16x64xf32>,
    %c0_2 = arith.constant 0 : index
    %c0_3 = arith.constant 0 : index
    %3 = vector.load %arg10[%c0_2, %c0_3] : memref<160x64xf32, #tpu.memory_space<vmem>>, vector<16x64xf32>
    tpu.vector_store %arg10[%c0_2, %c0_3], %0 {strides = array<i32>} : memref<160x64xf32, #tpu.memory_space<vmem>>, vector<16x64xf32>,
    %c144_4 = arith.constant 144 : index
    %c0_5 = arith.constant 0 : index
    %4 = vector.load %arg10[%c144_4, %c0_5] : memref<160x64xf32, #tpu.memory_space<vmem>>, vector<16x64xf32>
    tpu.vector_store %arg10[%c144_4, %c0_5], %0 {strides = array<i32>} : memref<160x64xf32, #tpu.memory_space<vmem>>, vector<16x64xf32>,
    %c0_i32 = arith.constant 0 : i32
    %c128_i32 = arith.constant 128 : i32
    %5 = arith.muli %c0_i32, %c128_i32 : i32
    %6 = tpu.assume_multiple %5, 128 : i32
    %c0_6 = arith.constant 0 : index
    %7 = arith.index_cast %6 : i32 to index
    %c0_7 = arith.constant 0 : index
    %8 = vector.load %arg1[%c0_6, %7, %c0_7] : memref<1x128x96xbf16, #tpu.memory_space<vmem>>, vector<1x128x96xbf16>
    %9 = vector.shape_cast %8 : vector<1x128x96xbf16> to vector<128x96xbf16>
    %c0_8 = arith.constant 0 : index
    %c0_9 = arith.constant 0 : index
    %10 = vector.load %arg2[%c0_8, %c0_9] : memref<96x64xbf16, #tpu.memory_space<vmem>>, vector<96x64xbf16>
    %cst_10 = arith.constant dense<0.000000e+00> : vector<128x64xf32>
    %11 = tpu.matmul %9, %10, %cst_10 {dimension_numbers = #tpu.dot_dimension_numbers<[1], [0], [0], [1], [0, 0, 1, 1], [], []>} : vector<128x96xbf16>, vector<96x64xbf16>, vector<128x64xf32> -> vector<128x64xf32>
    %c0_11 = arith.constant 0 : index
    %c0_12 = arith.constant 0 : index
    %12 = vector.load %arg3[%c0_11, %c0_12] : memref<1x64xf32, #tpu.memory_space<vmem>>, vector<1x64xf32>
    %13 = vector.broadcast %12 : vector<1x64xf32> to vector<128x64xf32>
    %14 = arith.addf %11, %13 : vector<128x64xf32>
    %cst_13 = arith.constant 0.000000e+00 : f32
    %15 = vector.broadcast %cst_13 : f32 to vector<128x64xf32>
    %16 = arith.maximumf %14, %15 : vector<128x64xf32>
    %17 = tpu.iota {dimensions = array<i32: 0>} : vector<128x1xi32>
    %18 = vector.broadcast %6 : i32 to vector<128x1xi32>
    %19 = arith.addi %18, %17 : vector<128x1xi32>
    %20 = tpu.iota {dimensions = array<i32: 1>} : vector<1x13xi32>
    %c10_i32 = arith.constant 10 : i32
    %21 = vector.broadcast %c10_i32 : i32 to vector<1x13xi32>
    %22 = arith.muli %20, %21 : vector<1x13xi32>
    %23 = vector.broadcast %19 : vector<128x1xi32> to vector<128x13xi32>
    %24 = vector.broadcast %22 : vector<1x13xi32> to vector<128x13xi32>
    %25 = arith.cmpi eq, %23, %24 : vector<128x13xi32>
    %26 = arith.extui %25 : vector<128x13xi1> to vector<128x13xi32>
    %c9_i32 = arith.constant 9 : i32
    %27 = vector.broadcast %c9_i32 : i32 to vector<1x13xi32>
    %28 = arith.addi %22, %27 : vector<1x13xi32>
    %29 = vector.broadcast %19 : vector<128x1xi32> to vector<128x13xi32>
    %30 = vector.broadcast %28 : vector<1x13xi32> to vector<128x13xi32>
    %31 = arith.cmpi eq, %29, %30 : vector<128x13xi32>
    %32 = arith.extui %31 : vector<128x13xi1> to vector<128x13xi32>
    %33 = arith.addi %26, %32 : vector<128x13xi32>
    %cst_14 = arith.constant dense<0> : vector<128xi32>
    %34 = vector.multi_reduction <add>, %33, %cst_14 [1] : vector<128x13xi32> to vector<128xi32>
    %35 = vector.shape_cast %34 : vector<128xi32> to vector<128x1xi32>
    %c0_i32_15 = arith.constant 0 : i32
    %36 = vector.broadcast %c0_i32_15 : i32 to vector<128x1xi32>
    %37 = arith.cmpi sgt, %35, %36 : vector<128x1xi32>
    %c10_i32_16 = arith.constant 10 : i32
    %38 = vector.broadcast %c10_i32_16 : i32 to vector<128x1xi32>
    %39 = arith.cmpi sge, %19, %38 : vector<128x1xi32>
    %c90_i32 = arith.constant 90 : i32
    %40 = vector.broadcast %c90_i32 : i32 to vector<128x1xi32>
    %41 = arith.cmpi slt, %19, %40 : vector<128x1xi32>
    %42 = arith.andi %39, %41 : vector<128x1xi1>
    %cst_17 = arith.constant dense<true> : vector<128x1xi1>
    %43 = arith.xori %37, %cst_17 : vector<128x1xi1>
    %44 = arith.andi %42, %43 : vector<128x1xi1>
    %cst_18 = arith.constant 0.000000e+00 : f32
    %45 = vector.shape_cast %44 : vector<128x1xi1> to vector<128x1xi1>
    %46 = vector.broadcast %45 : vector<128x1xi1> to vector<128x64xi1>
    %47 = vector.broadcast %cst_18 : f32 to vector<128x64xf32>
    %48 = arith.select %46, %16, %47 : vector<128x64xi1>, vector<128x64xf32>
    %c16_i32 = arith.constant 16 : i32
    %49 = arith.addi %c16_i32, %6 : i32
    %50 = arith.index_cast %49 : i32 to index
    %c0_19 = arith.constant 0 : index
    %51 = vector.load %arg9[%50, %c0_19] : memref<160x64xf32, #tpu.memory_space<vmem>>, vector<128x64xf32>
    tpu.vector_store %arg9[%50, %c0_19], %48 {strides = array<i32>} : memref<160x64xf32, #tpu.memory_space<vmem>>, vector<128x64xf32>,
    %c1_i32 = arith.constant 1 : i32
    %c0_20 = arith.constant 0 : index
    %c0_21 = arith.constant 0 : index
    %c0_22 = arith.constant 0 : index
    %52 = vector.load %arg5[%c0_20, %c0_21, %c0_22] : memref<4x1x64xf32, #tpu.memory_space<vmem>>, vector<1x1x64xf32>
    %53 = vector.shape_cast %52 : vector<1x1x64xf32> to vector<1x64xf32>
    %c0_i32_23 = arith.constant 0 : i32
    %c128_i32_24 = arith.constant 128 : i32
    %54 = arith.muli %c0_i32_23, %c128_i32_24 : i32
    %55 = tpu.assume_multiple %54, 128 : i32
    %c16_i32_25 = arith.constant 16 : i32
    %56 = arith.addi %c16_i32_25, %55 : i32
    %c-11_i32 = arith.constant -11 : i32
    %57 = arith.addi %56, %c-11_i32 : i32
    %58 = arith.index_cast %57 : i32 to index
    %c0_26 = arith.constant 0 : index
    %59 = vector.load %arg9[%58, %c0_26] : memref<160x64xf32, #tpu.memory_space<vmem>>, vector<128x64xf32>
    %60 = arith.truncf %59 : vector<128x64xf32> to vector<128x64xbf16>
    %c0_27 = arith.constant 0 : index
    %c0_28 = arith.constant 0 : index
    %c0_29 = arith.constant 0 : index
    %61 = vector.load %arg4[%c0_27, %c0_28, %c0_29] : memref<36x64x64xbf16, #tpu.memory_space<vmem>>, vector<1x64x64xbf16>
    %62 = vector.shape_cast %61 : vector<1x64x64xbf16> to vector<64x64xbf16>
    %cst_30 = arith.constant dense<0.000000e+00> : vector<128x64xf32>
    %63 = tpu.matmul %60, %62, %cst_30 {dimension_numbers = #tpu.dot_dimension_numbers<[1], [0], [0], [1], [0, 0, 1, 1], [], []>} : vector<128x64xbf16>, vector<64x64xbf16>, vector<128x64xf32> -> vector<128x64xf32>
    %c16_i32_31 = arith.constant 16 : i32
    %64 = arith.addi %c16_i32_31, %55 : i32
    %c-10_i32 = arith.constant -10 : i32
    %65 = arith.addi %64, %c-10_i32 : i32
    %66 = arith.index_cast %65 : i32 to index
    %c0_32 = arith.constant 0 : index
    %67 = vector.load %arg9[%66, %c0_32] : memref<160x64xf32, #tpu.memory_space<vmem>>, vector<128x64xf32>
    %68 = arith.truncf %67 : vector<128x64xf32> to vector<128x64xbf16>
    %c1 = arith.constant 1 : index
    %c0_33 = arith.constant 0 : index
    %c0_34 = arith.constant 0 : index
    %69 = vector.load %arg4[%c1, %c0_33, %c0_34] : memref<36x64x64xbf16, #tpu.memory_space<vmem>>, vector<1x64x64xbf16>
    %70 = vector.shape_cast %69 : vector<1x64x64xbf16> to vector<64x64xbf16>
    %cst_35 = arith.constant dense<0.000000e+00> : vector<128x64xf32>
    %71 = tpu.matmul %68, %70, %cst_35 {dimension_numbers = #tpu.dot_dimension_numbers<[1], [0], [0], [1], [0, 0, 1, 1], [], []>} : vector<128x64xbf16>, vector<64x64xbf16>, vector<128x64xf32> -> vector<128x64xf32>
    %72 = arith.addf %63, %71 : vector<128x64xf32>
    %c16_i32_36 = arith.constant 16 : i32
    %73 = arith.addi %c16_i32_36, %55 : i32
    %c-9_i32 = arith.constant -9 : i32
    %74 = arith.addi %73, %c-9_i32 : i32
    %75 = arith.index_cast %74 : i32 to index
    %c0_37 = arith.constant 0 : index
    %76 = vector.load %arg9[%75, %c0_37] : memref<160x64xf32, #tpu.memory_space<vmem>>, vector<128x64xf32>
    %77 = arith.truncf %76 : vector<128x64xf32> to vector<128x64xbf16>
    %c2 = arith.constant 2 : index
    %c0_38 = arith.constant 0 : index
    %c0_39 = arith.constant 0 : index
    %78 = vector.load %arg4[%c2, %c0_38, %c0_39] : memref<36x64x64xbf16, #tpu.memory_space<vmem>>, vector<1x64x64xbf16>
    %79 = vector.shape_cast %78 : vector<1x64x64xbf16> to vector<64x64xbf16>
    %cst_40 = arith.constant dense<0.000000e+00> : vector<128x64xf32>
    %80 = tpu.matmul %77, %79, %cst_40 {dimension_numbers = #tpu.dot_dimension_numbers<[1], [0], [0], [1], [0, 0, 1, 1], [], []>} : vector<128x64xbf16>, vector<64x64xbf16>, vector<128x64xf32> -> vector<128x64xf32>
    %81 = arith.addf %72, %80 : vector<128x64xf32>
    %c16_i32_41 = arith.constant 16 : i32
    %82 = arith.addi %c16_i32_41, %55 : i32
    %c-1_i32 = arith.constant -1 : i32
    %83 = arith.addi %82, %c-1_i32 : i32
    %84 = arith.index_cast %83 : i32 to index
    %c0_42 = arith.constant 0 : index
    %85 = vector.load %arg9[%84, %c0_42] : memref<160x64xf32, #tpu.memory_space<vmem>>, vector<128x64xf32>
    %86 = arith.truncf %85 : vector<128x64xf32> to vector<128x64xbf16>
    %c3 = arith.constant 3 : index
    %c0_43 = arith.constant 0 : index
    %c0_44 = arith.constant 0 : index
    %87 = vector.load %arg4[%c3, %c0_43, %c0_44] : memref<36x64x64xbf16, #tpu.memory_space<vmem>>, vector<1x64x64xbf16>
    %88 = vector.shape_cast %87 : vector<1x64x64xbf16> to vector<64x64xbf16>
    %cst_45 = arith.constant dense<0.000000e+00> : vector<128x64xf32>
    %89 = tpu.matmul %86, %88, %cst_45 {dimension_numbers = #tpu.dot_dimension_numbers<[1], [0], [0], [1], [0, 0, 1, 1], [], []>} : vector<128x64xbf16>, vector<64x64xbf16>, vector<128x64xf32> -> vector<128x64xf32>
    %90 = arith.addf %81, %89 : vector<128x64xf32>
    %c16_i32_46 = arith.constant 16 : i32
    %91 = arith.addi %c16_i32_46, %55 : i32
    %c0_i32_47 = arith.constant 0 : i32
    %92 = arith.addi %91, %c0_i32_47 : i32
    %93 = arith.index_cast %92 : i32 to index
    %c0_48 = arith.constant 0 : index
    %94 = vector.load %arg9[%93, %c0_48] : memref<160x64xf32, #tpu.memory_space<vmem>>, vector<128x64xf32>
    %95 = arith.truncf %94 : vector<128x64xf32> to vector<128x64xbf16>
    %c4 = arith.constant 4 : index
    %c0_49 = arith.constant 0 : index
    %c0_50 = arith.constant 0 : index
    %96 = vector.load %arg4[%c4, %c0_49, %c0_50] : memref<36x64x64xbf16, #tpu.memory_space<vmem>>, vector<1x64x64xbf16>
    %97 = vector.shape_cast %96 : vector<1x64x64xbf16> to vector<64x64xbf16>
    %cst_51 = arith.constant dense<0.000000e+00> : vector<128x64xf32>
    %98 = tpu.matmul %95, %97, %cst_51 {dimension_numbers = #tpu.dot_dimension_numbers<[1], [0], [0], [1], [0, 0, 1, 1], [], []>} : vector<128x64xbf16>, vector<64x64xbf16>, vector<128x64xf32> -> vector<128x64xf32>
    %99 = arith.addf %90, %98 : vector<128x64xf32>
    %c16_i32_52 = arith.constant 16 : i32
    %100 = arith.addi %c16_i32_52, %55 : i32
    %c1_i32_53 = arith.constant 1 : i32
    %101 = arith.addi %100, %c1_i32_53 : i32
    %102 = arith.index_cast %101 : i32 to index
    %c0_54 = arith.constant 0 : index
    %103 = vector.load %arg9[%102, %c0_54] : memref<160x64xf32, #tpu.memory_space<vmem>>, vector<128x64xf32>
    %104 = arith.truncf %103 : vector<128x64xf32> to vector<128x64xbf16>
    %c5 = arith.constant 5 : index
    %c0_55 = arith.constant 0 : index
    %c0_56 = arith.constant 0 : index
    %105 = vector.load %arg4[%c5, %c0_55, %c0_56] : memref<36x64x64xbf16, #tpu.memory_space<vmem>>, vector<1x64x64xbf16>
    %106 = vector.shape_cast %105 : vector<1x64x64xbf16> to vector<64x64xbf16>
    %cst_57 = arith.constant dense<0.000000e+00> : vector<128x64xf32>
    %107 = tpu.matmul %104, %106, %cst_57 {dimension_numbers = #tpu.dot_dimension_numbers<[1], [0], [0], [1], [0, 0, 1, 1], [], []>} : vector<128x64xbf16>, vector<64x64xbf16>, vector<128x64xf32> -> vector<128x64xf32>
    %108 = arith.addf %99, %107 : vector<128x64xf32>
    %c16_i32_58 = arith.constant 16 : i32
    %109 = arith.addi %c16_i32_58, %55 : i32
    %c9_i32_59 = arith.constant 9 : i32
    %110 = arith.addi %109, %c9_i32_59 : i32
    %111 = arith.index_cast %110 : i32 to index
    %c0_60 = arith.constant 0 : index
    %112 = vector.load %arg9[%111, %c0_60] : memref<160x64xf32, #tpu.memory_space<vmem>>, vector<128x64xf32>
    %113 = arith.truncf %112 : vector<128x64xf32> to vector<128x64xbf16>
    %c6 = arith.constant 6 : index
    %c0_61 = arith.constant 0 : index
    %c0_62 = arith.constant 0 : index
    %114 = vector.load %arg4[%c6, %c0_61, %c0_62] : memref<36x64x64xbf16, #tpu.memory_space<vmem>>, vector<1x64x64xbf16>
    %115 = vector.shape_cast %114 : vector<1x64x64xbf16> to vector<64x64xbf16>
    %cst_63 = arith.constant dense<0.000000e+00> : vector<128x64xf32>
    %116 = tpu.matmul %113, %115, %cst_63 {dimension_numbers = #tpu.dot_dimension_numbers<[1], [0], [0], [1], [0, 0, 1, 1], [], []>} : vector<128x64xbf16>, vector<64x64xbf16>, vector<128x64xf32> -> vector<128x64xf32>
    %117 = arith.addf %108, %116 : vector<128x64xf32>
    %c16_i32_64 = arith.constant 16 : i32
    %118 = arith.addi %c16_i32_64, %55 : i32
    %c10_i32_65 = arith.constant 10 : i32
    %119 = arith.addi %118, %c10_i32_65 : i32
    %120 = arith.index_cast %119 : i32 to index
    %c0_66 = arith.constant 0 : index
    %121 = vector.load %arg9[%120, %c0_66] : memref<160x64xf32, #tpu.memory_space<vmem>>, vector<128x64xf32>
    %122 = arith.truncf %121 : vector<128x64xf32> to vector<128x64xbf16>
    %c7 = arith.constant 7 : index
    %c0_67 = arith.constant 0 : index
    %c0_68 = arith.constant 0 : index
    %123 = vector.load %arg4[%c7, %c0_67, %c0_68] : memref<36x64x64xbf16, #tpu.memory_space<vmem>>, vector<1x64x64xbf16>
    %124 = vector.shape_cast %123 : vector<1x64x64xbf16> to vector<64x64xbf16>
    %cst_69 = arith.constant dense<0.000000e+00> : vector<128x64xf32>
    %125 = tpu.matmul %122, %124, %cst_69 {dimension_numbers = #tpu.dot_dimension_numbers<[1], [0], [0], [1], [0, 0, 1, 1], [], []>} : vector<128x64xbf16>, vector<64x64xbf16>, vector<128x64xf32> -> vector<128x64xf32>
    %126 = arith.addf %117, %125 : vector<128x64xf32>
    %c16_i32_70 = arith.constant 16 : i32
    %127 = arith.addi %c16_i32_70, %55 : i32
    %c11_i32 = arith.constant 11 : i32
    %128 = arith.addi %127, %c11_i32 : i32
    %129 = arith.index_cast %128 : i32 to index
    %c0_71 = arith.constant 0 : index
    %130 = vector.load %arg9[%129, %c0_71] : memref<160x64xf32, #tpu.memory_space<vmem>>, vector<128x64xf32>
    %131 = arith.truncf %130 : vector<128x64xf32> to vector<128x64xbf16>
    %c8 = arith.constant 8 : index
    %c0_72 = arith.constant 0 : index
    %c0_73 = arith.constant 0 : index
    %132 = vector.load %arg4[%c8, %c0_72, %c0_73] : memref<36x64x64xbf16, #tpu.memory_space<vmem>>, vector<1x64x64xbf16>
    %133 = vector.shape_cast %132 : vector<1x64x64xbf16> to vector<64x64xbf16>
    %cst_74 = arith.constant dense<0.000000e+00> : vector<128x64xf32>
    %134 = tpu.matmul %131, %133, %cst_74 {dimension_numbers = #tpu.dot_dimension_numbers<[1], [0], [0], [1], [0, 0, 1, 1], [], []>} : vector<128x64xbf16>, vector<64x64xbf16>, vector<128x64xf32> -> vector<128x64xf32>
    %135 = arith.addf %126, %134 : vector<128x64xf32>
    %136 = vector.broadcast %53 : vector<1x64xf32> to vector<128x64xf32>
    %137 = arith.addf %135, %136 : vector<128x64xf32>
    %cst_75 = arith.constant 0.000000e+00 : f32
    %138 = vector.broadcast %cst_75 : f32 to vector<128x64xf32>
    %139 = arith.maximumf %137, %138 : vector<128x64xf32>
    %140 = tpu.iota {dimensions = array<i32: 0>} : vector<128x1xi32>
    %141 = vector.broadcast %55 : i32 to vector<128x1xi32>
    %142 = arith.addi %141, %140 : vector<128x1xi32>
    %143 = tpu.iota {dimensions = array<i32: 1>} : vector<1x13xi32>
    %c10_i32_76 = arith.constant 10 : i32
    %144 = vector.broadcast %c10_i32_76 : i32 to vector<1x13xi32>
    %145 = arith.muli %143, %144 : vector<1x13xi32>
    %146 = vector.broadcast %142 : vector<128x1xi32> to vector<128x13xi32>
    %147 = vector.broadcast %145 : vector<1x13xi32> to vector<128x13xi32>
    %148 = arith.cmpi eq, %146, %147 : vector<128x13xi32>
    %149 = arith.extui %148 : vector<128x13xi1> to vector<128x13xi32>
    %c9_i32_77 = arith.constant 9 : i32
    %150 = vector.broadcast %c9_i32_77 : i32 to vector<1x13xi32>
    %151 = arith.addi %145, %150 : vector<1x13xi32>
    %152 = vector.broadcast %142 : vector<128x1xi32> to vector<128x13xi32>
    %153 = vector.broadcast %151 : vector<1x13xi32> to vector<128x13xi32>
    %154 = arith.cmpi eq, %152, %153 : vector<128x13xi32>
    %155 = arith.extui %154 : vector<128x13xi1> to vector<128x13xi32>
    %156 = arith.addi %149, %155 : vector<128x13xi32>
    %cst_78 = arith.constant dense<0> : vector<128xi32>
    %157 = vector.multi_reduction <add>, %156, %cst_78 [1] : vector<128x13xi32> to vector<128xi32>
    %158 = vector.shape_cast %157 : vector<128xi32> to vector<128x1xi32>
    %c0_i32_79 = arith.constant 0 : i32
    %159 = vector.broadcast %c0_i32_79 : i32 to vector<128x1xi32>
    %160 = arith.cmpi sgt, %158, %159 : vector<128x1xi32>
    %c10_i32_80 = arith.constant 10 : i32
    %161 = vector.broadcast %c10_i32_80 : i32 to vector<128x1xi32>
    %162 = arith.cmpi sge, %142, %161 : vector<128x1xi32>
    %c90_i32_81 = arith.constant 90 : i32
    %163 = vector.broadcast %c90_i32_81 : i32 to vector<128x1xi32>
    %164 = arith.cmpi slt, %142, %163 : vector<128x1xi32>
    %165 = arith.andi %162, %164 : vector<128x1xi1>
    %cst_82 = arith.constant dense<true> : vector<128x1xi1>
    %166 = arith.xori %160, %cst_82 : vector<128x1xi1>
    %167 = arith.andi %165, %166 : vector<128x1xi1>
    %cst_83 = arith.constant 0.000000e+00 : f32
    %168 = vector.shape_cast %167 : vector<128x1xi1> to vector<128x1xi1>
    %169 = vector.broadcast %168 : vector<128x1xi1> to vector<128x64xi1>
    %170 = vector.broadcast %cst_83 : f32 to vector<128x64xf32>
    %171 = arith.select %169, %139, %170 : vector<128x64xi1>, vector<128x64xf32>
    %c16_i32_84 = arith.constant 16 : i32
    %172 = arith.addi %c16_i32_84, %55 : i32
    %173 = arith.index_cast %172 : i32 to index
    %c0_85 = arith.constant 0 : index
    %174 = vector.load %arg10[%173, %c0_85] : memref<160x64xf32, #tpu.memory_space<vmem>>, vector<128x64xf32>
    tpu.vector_store %arg10[%173, %c0_85], %171 {strides = array<i32>} : memref<160x64xf32, #tpu.memory_space<vmem>>, vector<128x64xf32>,
    %c1_i32_86 = arith.constant 1 : i32
    %c1_87 = arith.constant 1 : index
    %c0_88 = arith.constant 0 : index
    %c0_89 = arith.constant 0 : index
    %175 = vector.load %arg5[%c1_87, %c0_88, %c0_89] : memref<4x1x64xf32, #tpu.memory_space<vmem>>, vector<1x1x64xf32>
    %176 = vector.shape_cast %175 : vector<1x1x64xf32> to vector<1x64xf32>
    %c0_i32_90 = arith.constant 0 : i32
    %c128_i32_91 = arith.constant 128 : i32
    %177 = arith.muli %c0_i32_90, %c128_i32_91 : i32
    %178 = tpu.assume_multiple %177, 128 : i32
    %c16_i32_92 = arith.constant 16 : i32
    %179 = arith.addi %c16_i32_92, %178 : i32
    %c-11_i32_93 = arith.constant -11 : i32
    %180 = arith.addi %179, %c-11_i32_93 : i32
    %181 = arith.index_cast %180 : i32 to index
    %c0_94 = arith.constant 0 : index
    %182 = vector.load %arg10[%181, %c0_94] : memref<160x64xf32, #tpu.memory_space<vmem>>, vector<128x64xf32>
    %183 = arith.truncf %182 : vector<128x64xf32> to vector<128x64xbf16>
    %c9 = arith.constant 9 : index
    %c0_95 = arith.constant 0 : index
    %c0_96 = arith.constant 0 : index
    %184 = vector.load %arg4[%c9, %c0_95, %c0_96] : memref<36x64x64xbf16, #tpu.memory_space<vmem>>, vector<1x64x64xbf16>
    %185 = vector.shape_cast %184 : vector<1x64x64xbf16> to vector<64x64xbf16>
    %cst_97 = arith.constant dense<0.000000e+00> : vector<128x64xf32>
    %186 = tpu.matmul %183, %185, %cst_97 {dimension_numbers = #tpu.dot_dimension_numbers<[1], [0], [0], [1], [0, 0, 1, 1], [], []>} : vector<128x64xbf16>, vector<64x64xbf16>, vector<128x64xf32> -> vector<128x64xf32>
    %c16_i32_98 = arith.constant 16 : i32
    %187 = arith.addi %c16_i32_98, %178 : i32
    %c-10_i32_99 = arith.constant -10 : i32
    %188 = arith.addi %187, %c-10_i32_99 : i32
    %189 = arith.index_cast %188 : i32 to index
    %c0_100 = arith.constant 0 : index
    %190 = vector.load %arg10[%189, %c0_100] : memref<160x64xf32, #tpu.memory_space<vmem>>, vector<128x64xf32>
    %191 = arith.truncf %190 : vector<128x64xf32> to vector<128x64xbf16>
    %c10 = arith.constant 10 : index
    %c0_101 = arith.constant 0 : index
    %c0_102 = arith.constant 0 : index
    %192 = vector.load %arg4[%c10, %c0_101, %c0_102] : memref<36x64x64xbf16, #tpu.memory_space<vmem>>, vector<1x64x64xbf16>
    %193 = vector.shape_cast %192 : vector<1x64x64xbf16> to vector<64x64xbf16>
    %cst_103 = arith.constant dense<0.000000e+00> : vector<128x64xf32>
    %194 = tpu.matmul %191, %193, %cst_103 {dimension_numbers = #tpu.dot_dimension_numbers<[1], [0], [0], [1], [0, 0, 1, 1], [], []>} : vector<128x64xbf16>, vector<64x64xbf16>, vector<128x64xf32> -> vector<128x64xf32>
    %195 = arith.addf %186, %194 : vector<128x64xf32>
    %c16_i32_104 = arith.constant 16 : i32
    %196 = arith.addi %c16_i32_104, %178 : i32
    %c-9_i32_105 = arith.constant -9 : i32
    %197 = arith.addi %196, %c-9_i32_105 : i32
    %198 = arith.index_cast %197 : i32 to index
    %c0_106 = arith.constant 0 : index
    %199 = vector.load %arg10[%198, %c0_106] : memref<160x64xf32, #tpu.memory_space<vmem>>, vector<128x64xf32>
    %200 = arith.truncf %199 : vector<128x64xf32> to vector<128x64xbf16>
    %c11 = arith.constant 11 : index
    %c0_107 = arith.constant 0 : index
    %c0_108 = arith.constant 0 : index
    %201 = vector.load %arg4[%c11, %c0_107, %c0_108] : memref<36x64x64xbf16, #tpu.memory_space<vmem>>, vector<1x64x64xbf16>
    %202 = vector.shape_cast %201 : vector<1x64x64xbf16> to vector<64x64xbf16>
    %cst_109 = arith.constant dense<0.000000e+00> : vector<128x64xf32>
    %203 = tpu.matmul %200, %202, %cst_109 {dimension_numbers = #tpu.dot_dimension_numbers<[1], [0], [0], [1], [0, 0, 1, 1], [], []>} : vector<128x64xbf16>, vector<64x64xbf16>, vector<128x64xf32> -> vector<128x64xf32>
    %204 = arith.addf %195, %203 : vector<128x64xf32>
    %c16_i32_110 = arith.constant 16 : i32
    %205 = arith.addi %c16_i32_110, %178 : i32
    %c-1_i32_111 = arith.constant -1 : i32
    %206 = arith.addi %205, %c-1_i32_111 : i32
    %207 = arith.index_cast %206 : i32 to index
    %c0_112 = arith.constant 0 : index
    %208 = vector.load %arg10[%207, %c0_112] : memref<160x64xf32, #tpu.memory_space<vmem>>, vector<128x64xf32>
    %209 = arith.truncf %208 : vector<128x64xf32> to vector<128x64xbf16>
    %c12 = arith.constant 12 : index
    %c0_113 = arith.constant 0 : index
    %c0_114 = arith.constant 0 : index
    %210 = vector.load %arg4[%c12, %c0_113, %c0_114] : memref<36x64x64xbf16, #tpu.memory_space<vmem>>, vector<1x64x64xbf16>
    %211 = vector.shape_cast %210 : vector<1x64x64xbf16> to vector<64x64xbf16>
    %cst_115 = arith.constant dense<0.000000e+00> : vector<128x64xf32>
    %212 = tpu.matmul %209, %211, %cst_115 {dimension_numbers = #tpu.dot_dimension_numbers<[1], [0], [0], [1], [0, 0, 1, 1], [], []>} : vector<128x64xbf16>, vector<64x64xbf16>, vector<128x64xf32> -> vector<128x64xf32>
    %213 = arith.addf %204, %212 : vector<128x64xf32>
    %c16_i32_116 = arith.constant 16 : i32
    %214 = arith.addi %c16_i32_116, %178 : i32
    %c0_i32_117 = arith.constant 0 : i32
    %215 = arith.addi %214, %c0_i32_117 : i32
    %216 = arith.index_cast %215 : i32 to index
    %c0_118 = arith.constant 0 : index
    %217 = vector.load %arg10[%216, %c0_118] : memref<160x64xf32, #tpu.memory_space<vmem>>, vector<128x64xf32>
    %218 = arith.truncf %217 : vector<128x64xf32> to vector<128x64xbf16>
    %c13 = arith.constant 13 : index
    %c0_119 = arith.constant 0 : index
    %c0_120 = arith.constant 0 : index
    %219 = vector.load %arg4[%c13, %c0_119, %c0_120] : memref<36x64x64xbf16, #tpu.memory_space<vmem>>, vector<1x64x64xbf16>
    %220 = vector.shape_cast %219 : vector<1x64x64xbf16> to vector<64x64xbf16>
    %cst_121 = arith.constant dense<0.000000e+00> : vector<128x64xf32>
    %221 = tpu.matmul %218, %220, %cst_121 {dimension_numbers = #tpu.dot_dimension_numbers<[1], [0], [0], [1], [0, 0, 1, 1], [], []>} : vector<128x64xbf16>, vector<64x64xbf16>, vector<128x64xf32> -> vector<128x64xf32>
    %222 = arith.addf %213, %221 : vector<128x64xf32>
    %c16_i32_122 = arith.constant 16 : i32
    %223 = arith.addi %c16_i32_122, %178 : i32
    %c1_i32_123 = arith.constant 1 : i32
    %224 = arith.addi %223, %c1_i32_123 : i32
    %225 = arith.index_cast %224 : i32 to index
    %c0_124 = arith.constant 0 : index
    %226 = vector.load %arg10[%225, %c0_124] : memref<160x64xf32, #tpu.memory_space<vmem>>, vector<128x64xf32>
    %227 = arith.truncf %226 : vector<128x64xf32> to vector<128x64xbf16>
    %c14 = arith.constant 14 : index
    %c0_125 = arith.constant 0 : index
    %c0_126 = arith.constant 0 : index
    %228 = vector.load %arg4[%c14, %c0_125, %c0_126] : memref<36x64x64xbf16, #tpu.memory_space<vmem>>, vector<1x64x64xbf16>
    %229 = vector.shape_cast %228 : vector<1x64x64xbf16> to vector<64x64xbf16>
    %cst_127 = arith.constant dense<0.000000e+00> : vector<128x64xf32>
    %230 = tpu.matmul %227, %229, %cst_127 {dimension_numbers = #tpu.dot_dimension_numbers<[1], [0], [0], [1], [0, 0, 1, 1], [], []>} : vector<128x64xbf16>, vector<64x64xbf16>, vector<128x64xf32> -> vector<128x64xf32>
    %231 = arith.addf %222, %230 : vector<128x64xf32>
    %c16_i32_128 = arith.constant 16 : i32
    %232 = arith.addi %c16_i32_128, %178 : i32
    %c9_i32_129 = arith.constant 9 : i32
    %233 = arith.addi %232, %c9_i32_129 : i32
    %234 = arith.index_cast %233 : i32 to index
    %c0_130 = arith.constant 0 : index
    %235 = vector.load %arg10[%234, %c0_130] : memref<160x64xf32, #tpu.memory_space<vmem>>, vector<128x64xf32>
    %236 = arith.truncf %235 : vector<128x64xf32> to vector<128x64xbf16>
    %c15 = arith.constant 15 : index
    %c0_131 = arith.constant 0 : index
    %c0_132 = arith.constant 0 : index
    %237 = vector.load %arg4[%c15, %c0_131, %c0_132] : memref<36x64x64xbf16, #tpu.memory_space<vmem>>, vector<1x64x64xbf16>
    %238 = vector.shape_cast %237 : vector<1x64x64xbf16> to vector<64x64xbf16>
    %cst_133 = arith.constant dense<0.000000e+00> : vector<128x64xf32>
    %239 = tpu.matmul %236, %238, %cst_133 {dimension_numbers = #tpu.dot_dimension_numbers<[1], [0], [0], [1], [0, 0, 1, 1], [], []>} : vector<128x64xbf16>, vector<64x64xbf16>, vector<128x64xf32> -> vector<128x64xf32>
    %240 = arith.addf %231, %239 : vector<128x64xf32>
    %c16_i32_134 = arith.constant 16 : i32
    %241 = arith.addi %c16_i32_134, %178 : i32
    %c10_i32_135 = arith.constant 10 : i32
    %242 = arith.addi %241, %c10_i32_135 : i32
    %243 = arith.index_cast %242 : i32 to index
    %c0_136 = arith.constant 0 : index
    %244 = vector.load %arg10[%243, %c0_136] : memref<160x64xf32, #tpu.memory_space<vmem>>, vector<128x64xf32>
    %245 = arith.truncf %244 : vector<128x64xf32> to vector<128x64xbf16>
    %c16 = arith.constant 16 : index
    %c0_137 = arith.constant 0 : index
    %c0_138 = arith.constant 0 : index
    %246 = vector.load %arg4[%c16, %c0_137, %c0_138] : memref<36x64x64xbf16, #tpu.memory_space<vmem>>, vector<1x64x64xbf16>
    %247 = vector.shape_cast %246 : vector<1x64x64xbf16> to vector<64x64xbf16>
    %cst_139 = arith.constant dense<0.000000e+00> : vector<128x64xf32>
    %248 = tpu.matmul %245, %247, %cst_139 {dimension_numbers = #tpu.dot_dimension_numbers<[1], [0], [0], [1], [0, 0, 1, 1], [], []>} : vector<128x64xbf16>, vector<64x64xbf16>, vector<128x64xf32> -> vector<128x64xf32>
    %249 = arith.addf %240, %248 : vector<128x64xf32>
    %c16_i32_140 = arith.constant 16 : i32
    %250 = arith.addi %c16_i32_140, %178 : i32
    %c11_i32_141 = arith.constant 11 : i32
    %251 = arith.addi %250, %c11_i32_141 : i32
    %252 = arith.index_cast %251 : i32 to index
    %c0_142 = arith.constant 0 : index
    %253 = vector.load %arg10[%252, %c0_142] : memref<160x64xf32, #tpu.memory_space<vmem>>, vector<128x64xf32>
    %254 = arith.truncf %253 : vector<128x64xf32> to vector<128x64xbf16>
    %c17 = arith.constant 17 : index
    %c0_143 = arith.constant 0 : index
    %c0_144 = arith.constant 0 : index
    %255 = vector.load %arg4[%c17, %c0_143, %c0_144] : memref<36x64x64xbf16, #tpu.memory_space<vmem>>, vector<1x64x64xbf16>
    %256 = vector.shape_cast %255 : vector<1x64x64xbf16> to vector<64x64xbf16>
    %cst_145 = arith.constant dense<0.000000e+00> : vector<128x64xf32>
    %257 = tpu.matmul %254, %256, %cst_145 {dimension_numbers = #tpu.dot_dimension_numbers<[1], [0], [0], [1], [0, 0, 1, 1], [], []>} : vector<128x64xbf16>, vector<64x64xbf16>, vector<128x64xf32> -> vector<128x64xf32>
    %258 = arith.addf %249, %257 : vector<128x64xf32>
    %259 = vector.broadcast %176 : vector<1x64xf32> to vector<128x64xf32>
    %260 = arith.addf %258, %259 : vector<128x64xf32>
    %261 = tpu.iota {dimensions = array<i32: 0>} : vector<128x1xi32>
    %262 = vector.broadcast %178 : i32 to vector<128x1xi32>
    %263 = arith.addi %262, %261 : vector<128x1xi32>
    %264 = tpu.iota {dimensions = array<i32: 1>} : vector<1x13xi32>
    %c10_i32_146 = arith.constant 10 : i32
    %265 = vector.broadcast %c10_i32_146 : i32 to vector<1x13xi32>
    %266 = arith.muli %264, %265 : vector<1x13xi32>
    %267 = vector.broadcast %263 : vector<128x1xi32> to vector<128x13xi32>
    %268 = vector.broadcast %266 : vector<1x13xi32> to vector<128x13xi32>
    %269 = arith.cmpi eq, %267, %268 : vector<128x13xi32>
    %270 = arith.extui %269 : vector<128x13xi1> to vector<128x13xi32>
    %c9_i32_147 = arith.constant 9 : i32
    %271 = vector.broadcast %c9_i32_147 : i32 to vector<1x13xi32>
    %272 = arith.addi %266, %271 : vector<1x13xi32>
    %273 = vector.broadcast %263 : vector<128x1xi32> to vector<128x13xi32>
    %274 = vector.broadcast %272 : vector<1x13xi32> to vector<128x13xi32>
    %275 = arith.cmpi eq, %273, %274 : vector<128x13xi32>
    %276 = arith.extui %275 : vector<128x13xi1> to vector<128x13xi32>
    %277 = arith.addi %270, %276 : vector<128x13xi32>
    %cst_148 = arith.constant dense<0> : vector<128xi32>
    %278 = vector.multi_reduction <add>, %277, %cst_148 [1] : vector<128x13xi32> to vector<128xi32>
    %279 = vector.shape_cast %278 : vector<128xi32> to vector<128x1xi32>
    %c0_i32_149 = arith.constant 0 : i32
    %280 = vector.broadcast %c0_i32_149 : i32 to vector<128x1xi32>
    %281 = arith.cmpi sgt, %279, %280 : vector<128x1xi32>
    %c10_i32_150 = arith.constant 10 : i32
    %282 = vector.broadcast %c10_i32_150 : i32 to vector<128x1xi32>
    %283 = arith.cmpi sge, %263, %282 : vector<128x1xi32>
    %c90_i32_151 = arith.constant 90 : i32
    %284 = vector.broadcast %c90_i32_151 : i32 to vector<128x1xi32>
    %285 = arith.cmpi slt, %263, %284 : vector<128x1xi32>
    %286 = arith.andi %283, %285 : vector<128x1xi1>
    %cst_152 = arith.constant dense<true> : vector<128x1xi1>
    %287 = arith.xori %281, %cst_152 : vector<128x1xi1>
    %288 = arith.andi %286, %287 : vector<128x1xi1>
    %cst_153 = arith.constant 0.000000e+00 : f32
    %289 = vector.shape_cast %288 : vector<128x1xi1> to vector<128x1xi1>
    %290 = vector.broadcast %289 : vector<128x1xi1> to vector<128x64xi1>
    %291 = vector.broadcast %cst_153 : f32 to vector<128x64xf32>
    %292 = arith.select %290, %260, %291 : vector<128x64xi1>, vector<128x64xf32>
    %c16_i32_154 = arith.constant 16 : i32
    %293 = arith.addi %c16_i32_154, %178 : i32
    %294 = arith.index_cast %293 : i32 to index
    %c0_155 = arith.constant 0 : index
    %295 = vector.load %arg9[%294, %c0_155] : memref<160x64xf32, #tpu.memory_space<vmem>>, vector<128x64xf32>
    %296 = arith.addf %292, %295 : vector<128x64xf32>
    %c16_i32_156 = arith.constant 16 : i32
    %297 = arith.addi %c16_i32_156, %178 : i32
    %298 = arith.index_cast %297 : i32 to index
    %c0_157 = arith.constant 0 : index
    %299 = vector.load %arg9[%298, %c0_157] : memref<160x64xf32, #tpu.memory_space<vmem>>, vector<128x64xf32>
    tpu.vector_store %arg9[%298, %c0_157], %296 {strides = array<i32>} : memref<160x64xf32, #tpu.memory_space<vmem>>, vector<128x64xf32>,
    %c1_i32_158 = arith.constant 1 : i32
    %c2_159 = arith.constant 2 : index
    %c0_160 = arith.constant 0 : index
    %c0_161 = arith.constant 0 : index
    %300 = vector.load %arg5[%c2_159, %c0_160, %c0_161] : memref<4x1x64xf32, #tpu.memory_space<vmem>>, vector<1x1x64xf32>
    %301 = vector.shape_cast %300 : vector<1x1x64xf32> to vector<1x64xf32>
    %c0_i32_162 = arith.constant 0 : i32
    %c128_i32_163 = arith.constant 128 : i32
    %302 = arith.muli %c0_i32_162, %c128_i32_163 : i32
    %303 = tpu.assume_multiple %302, 128 : i32
    %c16_i32_164 = arith.constant 16 : i32
    %304 = arith.addi %c16_i32_164, %303 : i32
    %c-11_i32_165 = arith.constant -11 : i32
    %305 = arith.addi %304, %c-11_i32_165 : i32
    %306 = arith.index_cast %305 : i32 to index
    %c0_166 = arith.constant 0 : index
    %307 = vector.load %arg9[%306, %c0_166] : memref<160x64xf32, #tpu.memory_space<vmem>>, vector<128x64xf32>
    %308 = arith.truncf %307 : vector<128x64xf32> to vector<128x64xbf16>
    %c18 = arith.constant 18 : index
    %c0_167 = arith.constant 0 : index
    %c0_168 = arith.constant 0 : index
    %309 = vector.load %arg4[%c18, %c0_167, %c0_168] : memref<36x64x64xbf16, #tpu.memory_space<vmem>>, vector<1x64x64xbf16>
    %310 = vector.shape_cast %309 : vector<1x64x64xbf16> to vector<64x64xbf16>
    %cst_169 = arith.constant dense<0.000000e+00> : vector<128x64xf32>
    %311 = tpu.matmul %308, %310, %cst_169 {dimension_numbers = #tpu.dot_dimension_numbers<[1], [0], [0], [1], [0, 0, 1, 1], [], []>} : vector<128x64xbf16>, vector<64x64xbf16>, vector<128x64xf32> -> vector<128x64xf32>
    %c16_i32_170 = arith.constant 16 : i32
    %312 = arith.addi %c16_i32_170, %303 : i32
    %c-10_i32_171 = arith.constant -10 : i32
    %313 = arith.addi %312, %c-10_i32_171 : i32
    %314 = arith.index_cast %313 : i32 to index
    %c0_172 = arith.constant 0 : index
    %315 = vector.load %arg9[%314, %c0_172] : memref<160x64xf32, #tpu.memory_space<vmem>>, vector<128x64xf32>
    %316 = arith.truncf %315 : vector<128x64xf32> to vector<128x64xbf16>
    %c19 = arith.constant 19 : index
    %c0_173 = arith.constant 0 : index
    %c0_174 = arith.constant 0 : index
    %317 = vector.load %arg4[%c19, %c0_173, %c0_174] : memref<36x64x64xbf16, #tpu.memory_space<vmem>>, vector<1x64x64xbf16>
    %318 = vector.shape_cast %317 : vector<1x64x64xbf16> to vector<64x64xbf16>
    %cst_175 = arith.constant dense<0.000000e+00> : vector<128x64xf32>
    %319 = tpu.matmul %316, %318, %cst_175 {dimension_numbers = #tpu.dot_dimension_numbers<[1], [0], [0], [1], [0, 0, 1, 1], [], []>} : vector<128x64xbf16>, vector<64x64xbf16>, vector<128x64xf32> -> vector<128x64xf32>
    %320 = arith.addf %311, %319 : vector<128x64xf32>
    %c16_i32_176 = arith.constant 16 : i32
    %321 = arith.addi %c16_i32_176, %303 : i32
    %c-9_i32_177 = arith.constant -9 : i32
    %322 = arith.addi %321, %c-9_i32_177 : i32
    %323 = arith.index_cast %322 : i32 to index
    %c0_178 = arith.constant 0 : index
    %324 = vector.load %arg9[%323, %c0_178] : memref<160x64xf32, #tpu.memory_space<vmem>>, vector<128x64xf32>
    %325 = arith.truncf %324 : vector<128x64xf32> to vector<128x64xbf16>
    %c20 = arith.constant 20 : index
    %c0_179 = arith.constant 0 : index
    %c0_180 = arith.constant 0 : index
    %326 = vector.load %arg4[%c20, %c0_179, %c0_180] : memref<36x64x64xbf16, #tpu.memory_space<vmem>>, vector<1x64x64xbf16>
    %327 = vector.shape_cast %326 : vector<1x64x64xbf16> to vector<64x64xbf16>
    %cst_181 = arith.constant dense<0.000000e+00> : vector<128x64xf32>
    %328 = tpu.matmul %325, %327, %cst_181 {dimension_numbers = #tpu.dot_dimension_numbers<[1], [0], [0], [1], [0, 0, 1, 1], [], []>} : vector<128x64xbf16>, vector<64x64xbf16>, vector<128x64xf32> -> vector<128x64xf32>
    %329 = arith.addf %320, %328 : vector<128x64xf32>
    %c16_i32_182 = arith.constant 16 : i32
    %330 = arith.addi %c16_i32_182, %303 : i32
    %c-1_i32_183 = arith.constant -1 : i32
    %331 = arith.addi %330, %c-1_i32_183 : i32
    %332 = arith.index_cast %331 : i32 to index
    %c0_184 = arith.constant 0 : index
    %333 = vector.load %arg9[%332, %c0_184] : memref<160x64xf32, #tpu.memory_space<vmem>>, vector<128x64xf32>
    %334 = arith.truncf %333 : vector<128x64xf32> to vector<128x64xbf16>
    %c21 = arith.constant 21 : index
    %c0_185 = arith.constant 0 : index
    %c0_186 = arith.constant 0 : index
    %335 = vector.load %arg4[%c21, %c0_185, %c0_186] : memref<36x64x64xbf16, #tpu.memory_space<vmem>>, vector<1x64x64xbf16>
    %336 = vector.shape_cast %335 : vector<1x64x64xbf16> to vector<64x64xbf16>
    %cst_187 = arith.constant dense<0.000000e+00> : vector<128x64xf32>
    %337 = tpu.matmul %334, %336, %cst_187 {dimension_numbers = #tpu.dot_dimension_numbers<[1], [0], [0], [1], [0, 0, 1, 1], [], []>} : vector<128x64xbf16>, vector<64x64xbf16>, vector<128x64xf32> -> vector<128x64xf32>
    %338 = arith.addf %329, %337 : vector<128x64xf32>
    %c16_i32_188 = arith.constant 16 : i32
    %339 = arith.addi %c16_i32_188, %303 : i32
    %c0_i32_189 = arith.constant 0 : i32
    %340 = arith.addi %339, %c0_i32_189 : i32
    %341 = arith.index_cast %340 : i32 to index
    %c0_190 = arith.constant 0 : index
    %342 = vector.load %arg9[%341, %c0_190] : memref<160x64xf32, #tpu.memory_space<vmem>>, vector<128x64xf32>
    %343 = arith.truncf %342 : vector<128x64xf32> to vector<128x64xbf16>
    %c22 = arith.constant 22 : index
    %c0_191 = arith.constant 0 : index
    %c0_192 = arith.constant 0 : index
    %344 = vector.load %arg4[%c22, %c0_191, %c0_192] : memref<36x64x64xbf16, #tpu.memory_space<vmem>>, vector<1x64x64xbf16>
    %345 = vector.shape_cast %344 : vector<1x64x64xbf16> to vector<64x64xbf16>
    %cst_193 = arith.constant dense<0.000000e+00> : vector<128x64xf32>
    %346 = tpu.matmul %343, %345, %cst_193 {dimension_numbers = #tpu.dot_dimension_numbers<[1], [0], [0], [1], [0, 0, 1, 1], [], []>} : vector<128x64xbf16>, vector<64x64xbf16>, vector<128x64xf32> -> vector<128x64xf32>
    %347 = arith.addf %338, %346 : vector<128x64xf32>
    %c16_i32_194 = arith.constant 16 : i32
    %348 = arith.addi %c16_i32_194, %303 : i32
    %c1_i32_195 = arith.constant 1 : i32
    %349 = arith.addi %348, %c1_i32_195 : i32
    %350 = arith.index_cast %349 : i32 to index
    %c0_196 = arith.constant 0 : index
    %351 = vector.load %arg9[%350, %c0_196] : memref<160x64xf32, #tpu.memory_space<vmem>>, vector<128x64xf32>
    %352 = arith.truncf %351 : vector<128x64xf32> to vector<128x64xbf16>
    %c23 = arith.constant 23 : index
    %c0_197 = arith.constant 0 : index
    %c0_198 = arith.constant 0 : index
    %353 = vector.load %arg4[%c23, %c0_197, %c0_198] : memref<36x64x64xbf16, #tpu.memory_space<vmem>>, vector<1x64x64xbf16>
    %354 = vector.shape_cast %353 : vector<1x64x64xbf16> to vector<64x64xbf16>
    %cst_199 = arith.constant dense<0.000000e+00> : vector<128x64xf32>
    %355 = tpu.matmul %352, %354, %cst_199 {dimension_numbers = #tpu.dot_dimension_numbers<[1], [0], [0], [1], [0, 0, 1, 1], [], []>} : vector<128x64xbf16>, vector<64x64xbf16>, vector<128x64xf32> -> vector<128x64xf32>
    %356 = arith.addf %347, %355 : vector<128x64xf32>
    %c16_i32_200 = arith.constant 16 : i32
    %357 = arith.addi %c16_i32_200, %303 : i32
    %c9_i32_201 = arith.constant 9 : i32
    %358 = arith.addi %357, %c9_i32_201 : i32
    %359 = arith.index_cast %358 : i32 to index
    %c0_202 = arith.constant 0 : index
    %360 = vector.load %arg9[%359, %c0_202] : memref<160x64xf32, #tpu.memory_space<vmem>>, vector<128x64xf32>
    %361 = arith.truncf %360 : vector<128x64xf32> to vector<128x64xbf16>
    %c24 = arith.constant 24 : index
    %c0_203 = arith.constant 0 : index
    %c0_204 = arith.constant 0 : index
    %362 = vector.load %arg4[%c24, %c0_203, %c0_204] : memref<36x64x64xbf16, #tpu.memory_space<vmem>>, vector<1x64x64xbf16>
    %363 = vector.shape_cast %362 : vector<1x64x64xbf16> to vector<64x64xbf16>
    %cst_205 = arith.constant dense<0.000000e+00> : vector<128x64xf32>
    %364 = tpu.matmul %361, %363, %cst_205 {dimension_numbers = #tpu.dot_dimension_numbers<[1], [0], [0], [1], [0, 0, 1, 1], [], []>} : vector<128x64xbf16>, vector<64x64xbf16>, vector<128x64xf32> -> vector<128x64xf32>
    %365 = arith.addf %356, %364 : vector<128x64xf32>
    %c16_i32_206 = arith.constant 16 : i32
    %366 = arith.addi %c16_i32_206, %303 : i32
    %c10_i32_207 = arith.constant 10 : i32
    %367 = arith.addi %366, %c10_i32_207 : i32
    %368 = arith.index_cast %367 : i32 to index
    %c0_208 = arith.constant 0 : index
    %369 = vector.load %arg9[%368, %c0_208] : memref<160x64xf32, #tpu.memory_space<vmem>>, vector<128x64xf32>
    %370 = arith.truncf %369 : vector<128x64xf32> to vector<128x64xbf16>
    %c25 = arith.constant 25 : index
    %c0_209 = arith.constant 0 : index
    %c0_210 = arith.constant 0 : index
    %371 = vector.load %arg4[%c25, %c0_209, %c0_210] : memref<36x64x64xbf16, #tpu.memory_space<vmem>>, vector<1x64x64xbf16>
    %372 = vector.shape_cast %371 : vector<1x64x64xbf16> to vector<64x64xbf16>
    %cst_211 = arith.constant dense<0.000000e+00> : vector<128x64xf32>
    %373 = tpu.matmul %370, %372, %cst_211 {dimension_numbers = #tpu.dot_dimension_numbers<[1], [0], [0], [1], [0, 0, 1, 1], [], []>} : vector<128x64xbf16>, vector<64x64xbf16>, vector<128x64xf32> -> vector<128x64xf32>
    %374 = arith.addf %365, %373 : vector<128x64xf32>
    %c16_i32_212 = arith.constant 16 : i32
    %375 = arith.addi %c16_i32_212, %303 : i32
    %c11_i32_213 = arith.constant 11 : i32
    %376 = arith.addi %375, %c11_i32_213 : i32
    %377 = arith.index_cast %376 : i32 to index
    %c0_214 = arith.constant 0 : index
    %378 = vector.load %arg9[%377, %c0_214] : memref<160x64xf32, #tpu.memory_space<vmem>>, vector<128x64xf32>
    %379 = arith.truncf %378 : vector<128x64xf32> to vector<128x64xbf16>
    %c26 = arith.constant 26 : index
    %c0_215 = arith.constant 0 : index
    %c0_216 = arith.constant 0 : index
    %380 = vector.load %arg4[%c26, %c0_215, %c0_216] : memref<36x64x64xbf16, #tpu.memory_space<vmem>>, vector<1x64x64xbf16>
    %381 = vector.shape_cast %380 : vector<1x64x64xbf16> to vector<64x64xbf16>
    %cst_217 = arith.constant dense<0.000000e+00> : vector<128x64xf32>
    %382 = tpu.matmul %379, %381, %cst_217 {dimension_numbers = #tpu.dot_dimension_numbers<[1], [0], [0], [1], [0, 0, 1, 1], [], []>} : vector<128x64xbf16>, vector<64x64xbf16>, vector<128x64xf32> -> vector<128x64xf32>
    %383 = arith.addf %374, %382 : vector<128x64xf32>
    %384 = vector.broadcast %301 : vector<1x64xf32> to vector<128x64xf32>
    %385 = arith.addf %383, %384 : vector<128x64xf32>
    %cst_218 = arith.constant 0.000000e+00 : f32
    %386 = vector.broadcast %cst_218 : f32 to vector<128x64xf32>
    %387 = arith.maximumf %385, %386 : vector<128x64xf32>
    %388 = tpu.iota {dimensions = array<i32: 0>} : vector<128x1xi32>
    %389 = vector.broadcast %303 : i32 to vector<128x1xi32>
    %390 = arith.addi %389, %388 : vector<128x1xi32>
    %391 = tpu.iota {dimensions = array<i32: 1>} : vector<1x13xi32>
    %c10_i32_219 = arith.constant 10 : i32
    %392 = vector.broadcast %c10_i32_219 : i32 to vector<1x13xi32>
    %393 = arith.muli %391, %392 : vector<1x13xi32>
    %394 = vector.broadcast %390 : vector<128x1xi32> to vector<128x13xi32>
    %395 = vector.broadcast %393 : vector<1x13xi32> to vector<128x13xi32>
    %396 = arith.cmpi eq, %394, %395 : vector<128x13xi32>
    %397 = arith.extui %396 : vector<128x13xi1> to vector<128x13xi32>
    %c9_i32_220 = arith.constant 9 : i32
    %398 = vector.broadcast %c9_i32_220 : i32 to vector<1x13xi32>
    %399 = arith.addi %393, %398 : vector<1x13xi32>
    %400 = vector.broadcast %390 : vector<128x1xi32> to vector<128x13xi32>
    %401 = vector.broadcast %399 : vector<1x13xi32> to vector<128x13xi32>
    %402 = arith.cmpi eq, %400, %401 : vector<128x13xi32>
    %403 = arith.extui %402 : vector<128x13xi1> to vector<128x13xi32>
    %404 = arith.addi %397, %403 : vector<128x13xi32>
    %cst_221 = arith.constant dense<0> : vector<128xi32>
    %405 = vector.multi_reduction <add>, %404, %cst_221 [1] : vector<128x13xi32> to vector<128xi32>
    %406 = vector.shape_cast %405 : vector<128xi32> to vector<128x1xi32>
    %c0_i32_222 = arith.constant 0 : i32
    %407 = vector.broadcast %c0_i32_222 : i32 to vector<128x1xi32>
    %408 = arith.cmpi sgt, %406, %407 : vector<128x1xi32>
    %c10_i32_223 = arith.constant 10 : i32
    %409 = vector.broadcast %c10_i32_223 : i32 to vector<128x1xi32>
    %410 = arith.cmpi sge, %390, %409 : vector<128x1xi32>
    %c90_i32_224 = arith.constant 90 : i32
    %411 = vector.broadcast %c90_i32_224 : i32 to vector<128x1xi32>
    %412 = arith.cmpi slt, %390, %411 : vector<128x1xi32>
    %413 = arith.andi %410, %412 : vector<128x1xi1>
    %cst_225 = arith.constant dense<true> : vector<128x1xi1>
    %414 = arith.xori %408, %cst_225 : vector<128x1xi1>
    %415 = arith.andi %413, %414 : vector<128x1xi1>
    %cst_226 = arith.constant 0.000000e+00 : f32
    %416 = vector.shape_cast %415 : vector<128x1xi1> to vector<128x1xi1>
    %417 = vector.broadcast %416 : vector<128x1xi1> to vector<128x64xi1>
    %418 = vector.broadcast %cst_226 : f32 to vector<128x64xf32>
    %419 = arith.select %417, %387, %418 : vector<128x64xi1>, vector<128x64xf32>
    %c16_i32_227 = arith.constant 16 : i32
    %420 = arith.addi %c16_i32_227, %303 : i32
    %421 = arith.index_cast %420 : i32 to index
    %c0_228 = arith.constant 0 : index
    %422 = vector.load %arg10[%421, %c0_228] : memref<160x64xf32, #tpu.memory_space<vmem>>, vector<128x64xf32>
    tpu.vector_store %arg10[%421, %c0_228], %419 {strides = array<i32>} : memref<160x64xf32, #tpu.memory_space<vmem>>, vector<128x64xf32>,
    %c1_i32_229 = arith.constant 1 : i32
    %c3_230 = arith.constant 3 : index
    %c0_231 = arith.constant 0 : index
    %c0_232 = arith.constant 0 : index
    %423 = vector.load %arg5[%c3_230, %c0_231, %c0_232] : memref<4x1x64xf32, #tpu.memory_space<vmem>>, vector<1x1x64xf32>
    %424 = vector.shape_cast %423 : vector<1x1x64xf32> to vector<1x64xf32>
    %c0_i32_233 = arith.constant 0 : i32
    %c128_i32_234 = arith.constant 128 : i32
    %425 = arith.muli %c0_i32_233, %c128_i32_234 : i32
    %426 = tpu.assume_multiple %425, 128 : i32
    %c16_i32_235 = arith.constant 16 : i32
    %427 = arith.addi %c16_i32_235, %426 : i32
    %c-11_i32_236 = arith.constant -11 : i32
    %428 = arith.addi %427, %c-11_i32_236 : i32
    %429 = arith.index_cast %428 : i32 to index
    %c0_237 = arith.constant 0 : index
    %430 = vector.load %arg10[%429, %c0_237] : memref<160x64xf32, #tpu.memory_space<vmem>>, vector<128x64xf32>
    %431 = arith.truncf %430 : vector<128x64xf32> to vector<128x64xbf16>
    %c27 = arith.constant 27 : index
    %c0_238 = arith.constant 0 : index
    %c0_239 = arith.constant 0 : index
    %432 = vector.load %arg4[%c27, %c0_238, %c0_239] : memref<36x64x64xbf16, #tpu.memory_space<vmem>>, vector<1x64x64xbf16>
    %433 = vector.shape_cast %432 : vector<1x64x64xbf16> to vector<64x64xbf16>
    %cst_240 = arith.constant dense<0.000000e+00> : vector<128x64xf32>
    %434 = tpu.matmul %431, %433, %cst_240 {dimension_numbers = #tpu.dot_dimension_numbers<[1], [0], [0], [1], [0, 0, 1, 1], [], []>} : vector<128x64xbf16>, vector<64x64xbf16>, vector<128x64xf32> -> vector<128x64xf32>
    %c16_i32_241 = arith.constant 16 : i32
    %435 = arith.addi %c16_i32_241, %426 : i32
    %c-10_i32_242 = arith.constant -10 : i32
    %436 = arith.addi %435, %c-10_i32_242 : i32
    %437 = arith.index_cast %436 : i32 to index
    %c0_243 = arith.constant 0 : index
    %438 = vector.load %arg10[%437, %c0_243] : memref<160x64xf32, #tpu.memory_space<vmem>>, vector<128x64xf32>
    %439 = arith.truncf %438 : vector<128x64xf32> to vector<128x64xbf16>
    %c28 = arith.constant 28 : index
    %c0_244 = arith.constant 0 : index
    %c0_245 = arith.constant 0 : index
    %440 = vector.load %arg4[%c28, %c0_244, %c0_245] : memref<36x64x64xbf16, #tpu.memory_space<vmem>>, vector<1x64x64xbf16>
    %441 = vector.shape_cast %440 : vector<1x64x64xbf16> to vector<64x64xbf16>
    %cst_246 = arith.constant dense<0.000000e+00> : vector<128x64xf32>
    %442 = tpu.matmul %439, %441, %cst_246 {dimension_numbers = #tpu.dot_dimension_numbers<[1], [0], [0], [1], [0, 0, 1, 1], [], []>} : vector<128x64xbf16>, vector<64x64xbf16>, vector<128x64xf32> -> vector<128x64xf32>
    %443 = arith.addf %434, %442 : vector<128x64xf32>
    %c16_i32_247 = arith.constant 16 : i32
    %444 = arith.addi %c16_i32_247, %426 : i32
    %c-9_i32_248 = arith.constant -9 : i32
    %445 = arith.addi %444, %c-9_i32_248 : i32
    %446 = arith.index_cast %445 : i32 to index
    %c0_249 = arith.constant 0 : index
    %447 = vector.load %arg10[%446, %c0_249] : memref<160x64xf32, #tpu.memory_space<vmem>>, vector<128x64xf32>
    %448 = arith.truncf %447 : vector<128x64xf32> to vector<128x64xbf16>
    %c29 = arith.constant 29 : index
    %c0_250 = arith.constant 0 : index
    %c0_251 = arith.constant 0 : index
    %449 = vector.load %arg4[%c29, %c0_250, %c0_251] : memref<36x64x64xbf16, #tpu.memory_space<vmem>>, vector<1x64x64xbf16>
    %450 = vector.shape_cast %449 : vector<1x64x64xbf16> to vector<64x64xbf16>
    %cst_252 = arith.constant dense<0.000000e+00> : vector<128x64xf32>
    %451 = tpu.matmul %448, %450, %cst_252 {dimension_numbers = #tpu.dot_dimension_numbers<[1], [0], [0], [1], [0, 0, 1, 1], [], []>} : vector<128x64xbf16>, vector<64x64xbf16>, vector<128x64xf32> -> vector<128x64xf32>
    %452 = arith.addf %443, %451 : vector<128x64xf32>
    %c16_i32_253 = arith.constant 16 : i32
    %453 = arith.addi %c16_i32_253, %426 : i32
    %c-1_i32_254 = arith.constant -1 : i32
    %454 = arith.addi %453, %c-1_i32_254 : i32
    %455 = arith.index_cast %454 : i32 to index
    %c0_255 = arith.constant 0 : index
    %456 = vector.load %arg10[%455, %c0_255] : memref<160x64xf32, #tpu.memory_space<vmem>>, vector<128x64xf32>
    %457 = arith.truncf %456 : vector<128x64xf32> to vector<128x64xbf16>
    %c30 = arith.constant 30 : index
    %c0_256 = arith.constant 0 : index
    %c0_257 = arith.constant 0 : index
    %458 = vector.load %arg4[%c30, %c0_256, %c0_257] : memref<36x64x64xbf16, #tpu.memory_space<vmem>>, vector<1x64x64xbf16>
    %459 = vector.shape_cast %458 : vector<1x64x64xbf16> to vector<64x64xbf16>
    %cst_258 = arith.constant dense<0.000000e+00> : vector<128x64xf32>
    %460 = tpu.matmul %457, %459, %cst_258 {dimension_numbers = #tpu.dot_dimension_numbers<[1], [0], [0], [1], [0, 0, 1, 1], [], []>} : vector<128x64xbf16>, vector<64x64xbf16>, vector<128x64xf32> -> vector<128x64xf32>
    %461 = arith.addf %452, %460 : vector<128x64xf32>
    %c16_i32_259 = arith.constant 16 : i32
    %462 = arith.addi %c16_i32_259, %426 : i32
    %c0_i32_260 = arith.constant 0 : i32
    %463 = arith.addi %462, %c0_i32_260 : i32
    %464 = arith.index_cast %463 : i32 to index
    %c0_261 = arith.constant 0 : index
    %465 = vector.load %arg10[%464, %c0_261] : memref<160x64xf32, #tpu.memory_space<vmem>>, vector<128x64xf32>
    %466 = arith.truncf %465 : vector<128x64xf32> to vector<128x64xbf16>
    %c31 = arith.constant 31 : index
    %c0_262 = arith.constant 0 : index
    %c0_263 = arith.constant 0 : index
    %467 = vector.load %arg4[%c31, %c0_262, %c0_263] : memref<36x64x64xbf16, #tpu.memory_space<vmem>>, vector<1x64x64xbf16>
    %468 = vector.shape_cast %467 : vector<1x64x64xbf16> to vector<64x64xbf16>
    %cst_264 = arith.constant dense<0.000000e+00> : vector<128x64xf32>
    %469 = tpu.matmul %466, %468, %cst_264 {dimension_numbers = #tpu.dot_dimension_numbers<[1], [0], [0], [1], [0, 0, 1, 1], [], []>} : vector<128x64xbf16>, vector<64x64xbf16>, vector<128x64xf32> -> vector<128x64xf32>
    %470 = arith.addf %461, %469 : vector<128x64xf32>
    %c16_i32_265 = arith.constant 16 : i32
    %471 = arith.addi %c16_i32_265, %426 : i32
    %c1_i32_266 = arith.constant 1 : i32
    %472 = arith.addi %471, %c1_i32_266 : i32
    %473 = arith.index_cast %472 : i32 to index
    %c0_267 = arith.constant 0 : index
    %474 = vector.load %arg10[%473, %c0_267] : memref<160x64xf32, #tpu.memory_space<vmem>>, vector<128x64xf32>
    %475 = arith.truncf %474 : vector<128x64xf32> to vector<128x64xbf16>
    %c32 = arith.constant 32 : index
    %c0_268 = arith.constant 0 : index
    %c0_269 = arith.constant 0 : index
    %476 = vector.load %arg4[%c32, %c0_268, %c0_269] : memref<36x64x64xbf16, #tpu.memory_space<vmem>>, vector<1x64x64xbf16>
    %477 = vector.shape_cast %476 : vector<1x64x64xbf16> to vector<64x64xbf16>
    %cst_270 = arith.constant dense<0.000000e+00> : vector<128x64xf32>
    %478 = tpu.matmul %475, %477, %cst_270 {dimension_numbers = #tpu.dot_dimension_numbers<[1], [0], [0], [1], [0, 0, 1, 1], [], []>} : vector<128x64xbf16>, vector<64x64xbf16>, vector<128x64xf32> -> vector<128x64xf32>
    %479 = arith.addf %470, %478 : vector<128x64xf32>
    %c16_i32_271 = arith.constant 16 : i32
    %480 = arith.addi %c16_i32_271, %426 : i32
    %c9_i32_272 = arith.constant 9 : i32
    %481 = arith.addi %480, %c9_i32_272 : i32
    %482 = arith.index_cast %481 : i32 to index
    %c0_273 = arith.constant 0 : index
    %483 = vector.load %arg10[%482, %c0_273] : memref<160x64xf32, #tpu.memory_space<vmem>>, vector<128x64xf32>
    %484 = arith.truncf %483 : vector<128x64xf32> to vector<128x64xbf16>
    %c33 = arith.constant 33 : index
    %c0_274 = arith.constant 0 : index
    %c0_275 = arith.constant 0 : index
    %485 = vector.load %arg4[%c33, %c0_274, %c0_275] : memref<36x64x64xbf16, #tpu.memory_space<vmem>>, vector<1x64x64xbf16>
    %486 = vector.shape_cast %485 : vector<1x64x64xbf16> to vector<64x64xbf16>
    %cst_276 = arith.constant dense<0.000000e+00> : vector<128x64xf32>
    %487 = tpu.matmul %484, %486, %cst_276 {dimension_numbers = #tpu.dot_dimension_numbers<[1], [0], [0], [1], [0, 0, 1, 1], [], []>} : vector<128x64xbf16>, vector<64x64xbf16>, vector<128x64xf32> -> vector<128x64xf32>
    %488 = arith.addf %479, %487 : vector<128x64xf32>
    %c16_i32_277 = arith.constant 16 : i32
    %489 = arith.addi %c16_i32_277, %426 : i32
    %c10_i32_278 = arith.constant 10 : i32
    %490 = arith.addi %489, %c10_i32_278 : i32
    %491 = arith.index_cast %490 : i32 to index
    %c0_279 = arith.constant 0 : index
    %492 = vector.load %arg10[%491, %c0_279] : memref<160x64xf32, #tpu.memory_space<vmem>>, vector<128x64xf32>
    %493 = arith.truncf %492 : vector<128x64xf32> to vector<128x64xbf16>
    %c34 = arith.constant 34 : index
    %c0_280 = arith.constant 0 : index
    %c0_281 = arith.constant 0 : index
    %494 = vector.load %arg4[%c34, %c0_280, %c0_281] : memref<36x64x64xbf16, #tpu.memory_space<vmem>>, vector<1x64x64xbf16>
    %495 = vector.shape_cast %494 : vector<1x64x64xbf16> to vector<64x64xbf16>
    %cst_282 = arith.constant dense<0.000000e+00> : vector<128x64xf32>
    %496 = tpu.matmul %493, %495, %cst_282 {dimension_numbers = #tpu.dot_dimension_numbers<[1], [0], [0], [1], [0, 0, 1, 1], [], []>} : vector<128x64xbf16>, vector<64x64xbf16>, vector<128x64xf32> -> vector<128x64xf32>
    %497 = arith.addf %488, %496 : vector<128x64xf32>
    %c16_i32_283 = arith.constant 16 : i32
    %498 = arith.addi %c16_i32_283, %426 : i32
    %c11_i32_284 = arith.constant 11 : i32
    %499 = arith.addi %498, %c11_i32_284 : i32
    %500 = arith.index_cast %499 : i32 to index
    %c0_285 = arith.constant 0 : index
    %501 = vector.load %arg10[%500, %c0_285] : memref<160x64xf32, #tpu.memory_space<vmem>>, vector<128x64xf32>
    %502 = arith.truncf %501 : vector<128x64xf32> to vector<128x64xbf16>
    %c35 = arith.constant 35 : index
    %c0_286 = arith.constant 0 : index
    %c0_287 = arith.constant 0 : index
    %503 = vector.load %arg4[%c35, %c0_286, %c0_287] : memref<36x64x64xbf16, #tpu.memory_space<vmem>>, vector<1x64x64xbf16>
    %504 = vector.shape_cast %503 : vector<1x64x64xbf16> to vector<64x64xbf16>
    %cst_288 = arith.constant dense<0.000000e+00> : vector<128x64xf32>
    %505 = tpu.matmul %502, %504, %cst_288 {dimension_numbers = #tpu.dot_dimension_numbers<[1], [0], [0], [1], [0, 0, 1, 1], [], []>} : vector<128x64xbf16>, vector<64x64xbf16>, vector<128x64xf32> -> vector<128x64xf32>
    %506 = arith.addf %497, %505 : vector<128x64xf32>
    %507 = vector.broadcast %424 : vector<1x64xf32> to vector<128x64xf32>
    %508 = arith.addf %506, %507 : vector<128x64xf32>
    %509 = tpu.iota {dimensions = array<i32: 0>} : vector<128x1xi32>
    %510 = vector.broadcast %426 : i32 to vector<128x1xi32>
    %511 = arith.addi %510, %509 : vector<128x1xi32>
    %512 = tpu.iota {dimensions = array<i32: 1>} : vector<1x13xi32>
    %c10_i32_289 = arith.constant 10 : i32
    %513 = vector.broadcast %c10_i32_289 : i32 to vector<1x13xi32>
    %514 = arith.muli %512, %513 : vector<1x13xi32>
    %515 = vector.broadcast %511 : vector<128x1xi32> to vector<128x13xi32>
    %516 = vector.broadcast %514 : vector<1x13xi32> to vector<128x13xi32>
    %517 = arith.cmpi eq, %515, %516 : vector<128x13xi32>
    %518 = arith.extui %517 : vector<128x13xi1> to vector<128x13xi32>
    %c9_i32_290 = arith.constant 9 : i32
    %519 = vector.broadcast %c9_i32_290 : i32 to vector<1x13xi32>
    %520 = arith.addi %514, %519 : vector<1x13xi32>
    %521 = vector.broadcast %511 : vector<128x1xi32> to vector<128x13xi32>
    %522 = vector.broadcast %520 : vector<1x13xi32> to vector<128x13xi32>
    %523 = arith.cmpi eq, %521, %522 : vector<128x13xi32>
    %524 = arith.extui %523 : vector<128x13xi1> to vector<128x13xi32>
    %525 = arith.addi %518, %524 : vector<128x13xi32>
    %cst_291 = arith.constant dense<0> : vector<128xi32>
    %526 = vector.multi_reduction <add>, %525, %cst_291 [1] : vector<128x13xi32> to vector<128xi32>
    %527 = vector.shape_cast %526 : vector<128xi32> to vector<128x1xi32>
    %c0_i32_292 = arith.constant 0 : i32
    %528 = vector.broadcast %c0_i32_292 : i32 to vector<128x1xi32>
    %529 = arith.cmpi sgt, %527, %528 : vector<128x1xi32>
    %c10_i32_293 = arith.constant 10 : i32
    %530 = vector.broadcast %c10_i32_293 : i32 to vector<128x1xi32>
    %531 = arith.cmpi sge, %511, %530 : vector<128x1xi32>
    %c90_i32_294 = arith.constant 90 : i32
    %532 = vector.broadcast %c90_i32_294 : i32 to vector<128x1xi32>
    %533 = arith.cmpi slt, %511, %532 : vector<128x1xi32>
    %534 = arith.andi %531, %533 : vector<128x1xi1>
    %cst_295 = arith.constant dense<true> : vector<128x1xi1>
    %535 = arith.xori %529, %cst_295 : vector<128x1xi1>
    %536 = arith.andi %534, %535 : vector<128x1xi1>
    %cst_296 = arith.constant 0.000000e+00 : f32
    %537 = vector.shape_cast %536 : vector<128x1xi1> to vector<128x1xi1>
    %538 = vector.broadcast %537 : vector<128x1xi1> to vector<128x64xi1>
    %539 = vector.broadcast %cst_296 : f32 to vector<128x64xf32>
    %540 = arith.select %538, %508, %539 : vector<128x64xi1>, vector<128x64xf32>
    %c16_i32_297 = arith.constant 16 : i32
    %541 = arith.addi %c16_i32_297, %426 : i32
    %542 = arith.index_cast %541 : i32 to index
    %c0_298 = arith.constant 0 : index
    %543 = vector.load %arg9[%542, %c0_298] : memref<160x64xf32, #tpu.memory_space<vmem>>, vector<128x64xf32>
    %544 = arith.addf %540, %543 : vector<128x64xf32>
    %c16_i32_299 = arith.constant 16 : i32
    %545 = arith.addi %c16_i32_299, %426 : i32
    %546 = arith.index_cast %545 : i32 to index
    %c0_300 = arith.constant 0 : index
    %547 = vector.load %arg9[%546, %c0_300] : memref<160x64xf32, #tpu.memory_space<vmem>>, vector<128x64xf32>
    tpu.vector_store %arg9[%546, %c0_300], %544 {strides = array<i32>} : memref<160x64xf32, #tpu.memory_space<vmem>>, vector<128x64xf32>,
    %c1_i32_301 = arith.constant 1 : i32
    %c0_302 = arith.constant 0 : index
    %c0_303 = arith.constant 0 : index
    %548 = vector.load %arg7[%c0_302, %c0_303] : memref<1x128xf32, #tpu.memory_space<vmem>>, vector<1x128xf32>
    %c0_i32_304 = arith.constant 0 : i32
    %c128_i32_305 = arith.constant 128 : i32
    %549 = arith.muli %c0_i32_304, %c128_i32_305 : i32
    %550 = tpu.assume_multiple %549, 128 : i32
    %c16_i32_306 = arith.constant 16 : i32
    %551 = arith.addi %c16_i32_306, %550 : i32
    %c-11_i32_307 = arith.constant -11 : i32
    %552 = arith.addi %551, %c-11_i32_307 : i32
    %553 = arith.index_cast %552 : i32 to index
    %c0_308 = arith.constant 0 : index
    %554 = vector.load %arg9[%553, %c0_308] : memref<160x64xf32, #tpu.memory_space<vmem>>, vector<128x64xf32>
    %555 = arith.truncf %554 : vector<128x64xf32> to vector<128x64xbf16>
    %c0_309 = arith.constant 0 : index
    %c0_310 = arith.constant 0 : index
    %c0_311 = arith.constant 0 : index
    %556 = vector.load %arg6[%c0_309, %c0_310, %c0_311] : memref<9x64x128xbf16, #tpu.memory_space<vmem>>, vector<1x64x128xbf16>
    %557 = vector.shape_cast %556 : vector<1x64x128xbf16> to vector<64x128xbf16>
    %cst_312 = arith.constant dense<0.000000e+00> : vector<128x128xf32>
    %558 = tpu.matmul %555, %557, %cst_312 {dimension_numbers = #tpu.dot_dimension_numbers<[1], [0], [0], [1], [0, 0, 1, 1], [], []>} : vector<128x64xbf16>, vector<64x128xbf16>, vector<128x128xf32> -> vector<128x128xf32>
    %c16_i32_313 = arith.constant 16 : i32
    %559 = arith.addi %c16_i32_313, %550 : i32
    %c-10_i32_314 = arith.constant -10 : i32
    %560 = arith.addi %559, %c-10_i32_314 : i32
    %561 = arith.index_cast %560 : i32 to index
    %c0_315 = arith.constant 0 : index
    %562 = vector.load %arg9[%561, %c0_315] : memref<160x64xf32, #tpu.memory_space<vmem>>, vector<128x64xf32>
    %563 = arith.truncf %562 : vector<128x64xf32> to vector<128x64xbf16>
    %c1_316 = arith.constant 1 : index
    %c0_317 = arith.constant 0 : index
    %c0_318 = arith.constant 0 : index
    %564 = vector.load %arg6[%c1_316, %c0_317, %c0_318] : memref<9x64x128xbf16, #tpu.memory_space<vmem>>, vector<1x64x128xbf16>
    %565 = vector.shape_cast %564 : vector<1x64x128xbf16> to vector<64x128xbf16>
    %cst_319 = arith.constant dense<0.000000e+00> : vector<128x128xf32>
    %566 = tpu.matmul %563, %565, %cst_319 {dimension_numbers = #tpu.dot_dimension_numbers<[1], [0], [0], [1], [0, 0, 1, 1], [], []>} : vector<128x64xbf16>, vector<64x128xbf16>, vector<128x128xf32> -> vector<128x128xf32>
    %567 = arith.addf %558, %566 : vector<128x128xf32>
    %c16_i32_320 = arith.constant 16 : i32
    %568 = arith.addi %c16_i32_320, %550 : i32
    %c-9_i32_321 = arith.constant -9 : i32
    %569 = arith.addi %568, %c-9_i32_321 : i32
    %570 = arith.index_cast %569 : i32 to index
    %c0_322 = arith.constant 0 : index
    %571 = vector.load %arg9[%570, %c0_322] : memref<160x64xf32, #tpu.memory_space<vmem>>, vector<128x64xf32>
    %572 = arith.truncf %571 : vector<128x64xf32> to vector<128x64xbf16>
    %c2_323 = arith.constant 2 : index
    %c0_324 = arith.constant 0 : index
    %c0_325 = arith.constant 0 : index
    %573 = vector.load %arg6[%c2_323, %c0_324, %c0_325] : memref<9x64x128xbf16, #tpu.memory_space<vmem>>, vector<1x64x128xbf16>
    %574 = vector.shape_cast %573 : vector<1x64x128xbf16> to vector<64x128xbf16>
    %cst_326 = arith.constant dense<0.000000e+00> : vector<128x128xf32>
    %575 = tpu.matmul %572, %574, %cst_326 {dimension_numbers = #tpu.dot_dimension_numbers<[1], [0], [0], [1], [0, 0, 1, 1], [], []>} : vector<128x64xbf16>, vector<64x128xbf16>, vector<128x128xf32> -> vector<128x128xf32>
    %576 = arith.addf %567, %575 : vector<128x128xf32>
    %c16_i32_327 = arith.constant 16 : i32
    %577 = arith.addi %c16_i32_327, %550 : i32
    %c-1_i32_328 = arith.constant -1 : i32
    %578 = arith.addi %577, %c-1_i32_328 : i32
    %579 = arith.index_cast %578 : i32 to index
    %c0_329 = arith.constant 0 : index
    %580 = vector.load %arg9[%579, %c0_329] : memref<160x64xf32, #tpu.memory_space<vmem>>, vector<128x64xf32>
    %581 = arith.truncf %580 : vector<128x64xf32> to vector<128x64xbf16>
    %c3_330 = arith.constant 3 : index
    %c0_331 = arith.constant 0 : index
    %c0_332 = arith.constant 0 : index
    %582 = vector.load %arg6[%c3_330, %c0_331, %c0_332] : memref<9x64x128xbf16, #tpu.memory_space<vmem>>, vector<1x64x128xbf16>
    %583 = vector.shape_cast %582 : vector<1x64x128xbf16> to vector<64x128xbf16>
    %cst_333 = arith.constant dense<0.000000e+00> : vector<128x128xf32>
    %584 = tpu.matmul %581, %583, %cst_333 {dimension_numbers = #tpu.dot_dimension_numbers<[1], [0], [0], [1], [0, 0, 1, 1], [], []>} : vector<128x64xbf16>, vector<64x128xbf16>, vector<128x128xf32> -> vector<128x128xf32>
    %585 = arith.addf %576, %584 : vector<128x128xf32>
    %c16_i32_334 = arith.constant 16 : i32
    %586 = arith.addi %c16_i32_334, %550 : i32
    %c0_i32_335 = arith.constant 0 : i32
    %587 = arith.addi %586, %c0_i32_335 : i32
    %588 = arith.index_cast %587 : i32 to index
    %c0_336 = arith.constant 0 : index
    %589 = vector.load %arg9[%588, %c0_336] : memref<160x64xf32, #tpu.memory_space<vmem>>, vector<128x64xf32>
    %590 = arith.truncf %589 : vector<128x64xf32> to vector<128x64xbf16>
    %c4_337 = arith.constant 4 : index
    %c0_338 = arith.constant 0 : index
    %c0_339 = arith.constant 0 : index
    %591 = vector.load %arg6[%c4_337, %c0_338, %c0_339] : memref<9x64x128xbf16, #tpu.memory_space<vmem>>, vector<1x64x128xbf16>
    %592 = vector.shape_cast %591 : vector<1x64x128xbf16> to vector<64x128xbf16>
    %cst_340 = arith.constant dense<0.000000e+00> : vector<128x128xf32>
    %593 = tpu.matmul %590, %592, %cst_340 {dimension_numbers = #tpu.dot_dimension_numbers<[1], [0], [0], [1], [0, 0, 1, 1], [], []>} : vector<128x64xbf16>, vector<64x128xbf16>, vector<128x128xf32> -> vector<128x128xf32>
    %594 = arith.addf %585, %593 : vector<128x128xf32>
    %c16_i32_341 = arith.constant 16 : i32
    %595 = arith.addi %c16_i32_341, %550 : i32
    %c1_i32_342 = arith.constant 1 : i32
    %596 = arith.addi %595, %c1_i32_342 : i32
    %597 = arith.index_cast %596 : i32 to index
    %c0_343 = arith.constant 0 : index
    %598 = vector.load %arg9[%597, %c0_343] : memref<160x64xf32, #tpu.memory_space<vmem>>, vector<128x64xf32>
    %599 = arith.truncf %598 : vector<128x64xf32> to vector<128x64xbf16>
    %c5_344 = arith.constant 5 : index
    %c0_345 = arith.constant 0 : index
    %c0_346 = arith.constant 0 : index
    %600 = vector.load %arg6[%c5_344, %c0_345, %c0_346] : memref<9x64x128xbf16, #tpu.memory_space<vmem>>, vector<1x64x128xbf16>
    %601 = vector.shape_cast %600 : vector<1x64x128xbf16> to vector<64x128xbf16>
    %cst_347 = arith.constant dense<0.000000e+00> : vector<128x128xf32>
    %602 = tpu.matmul %599, %601, %cst_347 {dimension_numbers = #tpu.dot_dimension_numbers<[1], [0], [0], [1], [0, 0, 1, 1], [], []>} : vector<128x64xbf16>, vector<64x128xbf16>, vector<128x128xf32> -> vector<128x128xf32>
    %603 = arith.addf %594, %602 : vector<128x128xf32>
    %c16_i32_348 = arith.constant 16 : i32
    %604 = arith.addi %c16_i32_348, %550 : i32
    %c9_i32_349 = arith.constant 9 : i32
    %605 = arith.addi %604, %c9_i32_349 : i32
    %606 = arith.index_cast %605 : i32 to index
    %c0_350 = arith.constant 0 : index
    %607 = vector.load %arg9[%606, %c0_350] : memref<160x64xf32, #tpu.memory_space<vmem>>, vector<128x64xf32>
    %608 = arith.truncf %607 : vector<128x64xf32> to vector<128x64xbf16>
    %c6_351 = arith.constant 6 : index
    %c0_352 = arith.constant 0 : index
    %c0_353 = arith.constant 0 : index
    %609 = vector.load %arg6[%c6_351, %c0_352, %c0_353] : memref<9x64x128xbf16, #tpu.memory_space<vmem>>, vector<1x64x128xbf16>
    %610 = vector.shape_cast %609 : vector<1x64x128xbf16> to vector<64x128xbf16>
    %cst_354 = arith.constant dense<0.000000e+00> : vector<128x128xf32>
    %611 = tpu.matmul %608, %610, %cst_354 {dimension_numbers = #tpu.dot_dimension_numbers<[1], [0], [0], [1], [0, 0, 1, 1], [], []>} : vector<128x64xbf16>, vector<64x128xbf16>, vector<128x128xf32> -> vector<128x128xf32>
    %612 = arith.addf %603, %611 : vector<128x128xf32>
    %c16_i32_355 = arith.constant 16 : i32
    %613 = arith.addi %c16_i32_355, %550 : i32
    %c10_i32_356 = arith.constant 10 : i32
    %614 = arith.addi %613, %c10_i32_356 : i32
    %615 = arith.index_cast %614 : i32 to index
    %c0_357 = arith.constant 0 : index
    %616 = vector.load %arg9[%615, %c0_357] : memref<160x64xf32, #tpu.memory_space<vmem>>, vector<128x64xf32>
    %617 = arith.truncf %616 : vector<128x64xf32> to vector<128x64xbf16>
    %c7_358 = arith.constant 7 : index
    %c0_359 = arith.constant 0 : index
    %c0_360 = arith.constant 0 : index
    %618 = vector.load %arg6[%c7_358, %c0_359, %c0_360] : memref<9x64x128xbf16, #tpu.memory_space<vmem>>, vector<1x64x128xbf16>
    %619 = vector.shape_cast %618 : vector<1x64x128xbf16> to vector<64x128xbf16>
    %cst_361 = arith.constant dense<0.000000e+00> : vector<128x128xf32>
    %620 = tpu.matmul %617, %619, %cst_361 {dimension_numbers = #tpu.dot_dimension_numbers<[1], [0], [0], [1], [0, 0, 1, 1], [], []>} : vector<128x64xbf16>, vector<64x128xbf16>, vector<128x128xf32> -> vector<128x128xf32>
    %621 = arith.addf %612, %620 : vector<128x128xf32>
    %c16_i32_362 = arith.constant 16 : i32
    %622 = arith.addi %c16_i32_362, %550 : i32
    %c11_i32_363 = arith.constant 11 : i32
    %623 = arith.addi %622, %c11_i32_363 : i32
    %624 = arith.index_cast %623 : i32 to index
    %c0_364 = arith.constant 0 : index
    %625 = vector.load %arg9[%624, %c0_364] : memref<160x64xf32, #tpu.memory_space<vmem>>, vector<128x64xf32>
    %626 = arith.truncf %625 : vector<128x64xf32> to vector<128x64xbf16>
    %c8_365 = arith.constant 8 : index
    %c0_366 = arith.constant 0 : index
    %c0_367 = arith.constant 0 : index
    %627 = vector.load %arg6[%c8_365, %c0_366, %c0_367] : memref<9x64x128xbf16, #tpu.memory_space<vmem>>, vector<1x64x128xbf16>
    %628 = vector.shape_cast %627 : vector<1x64x128xbf16> to vector<64x128xbf16>
    %cst_368 = arith.constant dense<0.000000e+00> : vector<128x128xf32>
    %629 = tpu.matmul %626, %628, %cst_368 {dimension_numbers = #tpu.dot_dimension_numbers<[1], [0], [0], [1], [0, 0, 1, 1], [], []>} : vector<128x64xbf16>, vector<64x128xbf16>, vector<128x128xf32> -> vector<128x128xf32>
    %630 = arith.addf %621, %629 : vector<128x128xf32>
    %631 = vector.broadcast %548 : vector<1x128xf32> to vector<128x128xf32>
    %632 = arith.addf %630, %631 : vector<128x128xf32>
    %cst_369 = arith.constant 0.000000e+00 : f32
    %633 = vector.broadcast %cst_369 : f32 to vector<128x128xf32>
    %634 = arith.maximumf %632, %633 : vector<128x128xf32>
    %635 = arith.truncf %634 : vector<128x128xf32> to vector<128x128xbf16>
    %c0_370 = arith.constant 0 : index
    %636 = arith.index_cast %550 : i32 to index
    %c0_371 = arith.constant 0 : index
    %637 = vector.load %arg8[%c0_370, %636, %c0_371] : memref<1x128x128xbf16, #tpu.memory_space<vmem>>, vector<1x128x128xbf16>
    %638 = vector.shape_cast %637 : vector<1x128x128xbf16> to vector<128x128xbf16>
    %639 = vector.shape_cast %635 : vector<128x128xbf16> to vector<1x128x128xbf16>
    tpu.vector_store %arg8[%c0_370, %636, %c0_371], %639 {strides = array<i32>} : memref<1x128x128xbf16, #tpu.memory_space<vmem>>, vector<1x128x128xbf16>,
    %c1_i32_372 = arith.constant 1 : i32
    return
  }
  func.func @transform_0(%arg0: i32) -> (i32, i32, i32) {
    %c0_i32 = arith.constant 0 : i32
    %c0_i32_0 = arith.constant 0 : i32
    %c0_i32_1 = arith.constant 0 : i32
    return %arg0, %c0_i32, %c0_i32_0 : i32, i32, i32
  }
  func.func @transform_1(%arg0: i32) -> (i32, i32) {
    %c0_i32 = arith.constant 0 : i32
    %c0_i32_0 = arith.constant 0 : i32
    %c0_i32_1 = arith.constant 0 : i32
    return %c0_i32, %c0_i32_0 : i32, i32
  }
  func.func @transform_2(%arg0: i32) -> (i32, i32) {
    %c0_i32 = arith.constant 0 : i32
    %c0_i32_0 = arith.constant 0 : i32
    %c0_i32_1 = arith.constant 0 : i32
    return %c0_i32, %c0_i32_0 : i32, i32
  }
  func.func @transform_3(%arg0: i32) -> (i32, i32, i32) {
    %c0_i32 = arith.constant 0 : i32
    %c0_i32_0 = arith.constant 0 : i32
    %c0_i32_1 = arith.constant 0 : i32
    %c0_i32_2 = arith.constant 0 : i32
    return %c0_i32, %c0_i32_0, %c0_i32_1 : i32, i32, i32
  }
  func.func @transform_4(%arg0: i32) -> (i32, i32, i32) {
    %c0_i32 = arith.constant 0 : i32
    %c0_i32_0 = arith.constant 0 : i32
    %c0_i32_1 = arith.constant 0 : i32
    %c0_i32_2 = arith.constant 0 : i32
    return %c0_i32, %c0_i32_0, %c0_i32_1 : i32, i32, i32
  }
  func.func @transform_5(%arg0: i32) -> (i32, i32, i32) {
    %c0_i32 = arith.constant 0 : i32
    %c0_i32_0 = arith.constant 0 : i32
    %c0_i32_1 = arith.constant 0 : i32
    %c0_i32_2 = arith.constant 0 : i32
    return %c0_i32, %c0_i32_0, %c0_i32_1 : i32, i32, i32
  }
  func.func @transform_6(%arg0: i32) -> (i32, i32) {
    %c0_i32 = arith.constant 0 : i32
    %c0_i32_0 = arith.constant 0 : i32
    %c0_i32_1 = arith.constant 0 : i32
    return %c0_i32, %c0_i32_0 : i32, i32
  }
  func.func @transform_7(%arg0: i32) -> (i32, i32, i32) {
    %c0_i32 = arith.constant 0 : i32
    %c0_i32_0 = arith.constant 0 : i32
    %c0_i32_1 = arith.constant 0 : i32
    return %arg0, %c0_i32, %c0_i32_0 : i32, i32, i32
  }
}

module attributes {stable_mosaic.version = 11 : i64} {
  func.func @_linear_kernel(%arg0: i32, %arg1: i32, %arg2: i32, %arg3: memref<16x4096xbf16, #tpu.memory_space<vmem>>, %arg4: memref<4096x128xbf16, #tpu.memory_space<vmem>>, %arg5: memref<1x128xf32, #tpu.memory_space<vmem>>, %arg6: memref<16x128xf32, #tpu.memory_space<vmem>>, %arg7: memref<16x128xf32, #tpu.memory_space<vmem>>) attributes {dimension_semantics = [#tpu.dimension_semantics<parallel>, #tpu.dimension_semantics<parallel>, #tpu.dimension_semantics<arbitrary>], iteration_bounds = array<i64: 1, 2, 2>, scalar_prefetch = 0 : i64, scratch_operands = 1 : i64, tpu.core_type = #tpu.core_type<tc>, window_params = [{transform_indices = @transform_0, window_bounds = array<i64: 16, 4096>}, {transform_indices = @transform_1, window_bounds = array<i64: 4096, 128>}, {transform_indices = @transform_2, window_bounds = array<i64: 1, 128>}, {transform_indices = @transform_3, window_bounds = array<i64: 16, 128>}]} {
    %c0_i32 = arith.constant 0 : i32
    %0 = arith.cmpi eq, %arg2, %c0_i32 : i32
    %1 = arith.extui %0 : i1 to i32
    %c0_i32_0 = arith.constant 0 : i32
    %2 = arith.cmpi ne, %1, %c0_i32_0 : i32
    scf.if %2 {
      %cst_9 = arith.constant 0.000000e+00 : f32
      %12 = vector.broadcast %cst_9 : f32 to vector<16x128xf32>
      %c0_10 = arith.constant 0 : index
      %c0_11 = arith.constant 0 : index
      %13 = vector.load %arg7[%c0_10, %c0_11] : memref<16x128xf32, #tpu.memory_space<vmem>>, vector<16x128xf32>
      tpu.vector_store %arg7[%c0_10, %c0_11], %12 {strides = array<i32>} : memref<16x128xf32, #tpu.memory_space<vmem>>, vector<16x128xf32>,
    } else {
    }
    %c0 = arith.constant 0 : index
    %c0_1 = arith.constant 0 : index
    %3 = vector.load %arg7[%c0, %c0_1] : memref<16x128xf32, #tpu.memory_space<vmem>>, vector<16x128xf32>
    %c0_2 = arith.constant 0 : index
    %c0_3 = arith.constant 0 : index
    %4 = vector.load %arg3[%c0_2, %c0_3] : memref<16x4096xbf16, #tpu.memory_space<vmem>>, vector<16x4096xbf16>
    %c0_4 = arith.constant 0 : index
    %c0_5 = arith.constant 0 : index
    %5 = vector.load %arg4[%c0_4, %c0_5] : memref<4096x128xbf16, #tpu.memory_space<vmem>>, vector<4096x128xbf16>
    %cst = arith.constant dense<0.000000e+00> : vector<16x128xf32>
    %6 = tpu.matmul %4, %5, %cst {dimension_numbers = #tpu.dot_dimension_numbers<[1], [0], [0], [1], [0, 0, 1, 1], [], []>} : vector<16x4096xbf16>, vector<4096x128xbf16>, vector<16x128xf32> -> vector<16x128xf32>
    %7 = arith.addf %3, %6 : vector<16x128xf32>
    %c0_6 = arith.constant 0 : index
    %c0_7 = arith.constant 0 : index
    %8 = vector.load %arg7[%c0_6, %c0_7] : memref<16x128xf32, #tpu.memory_space<vmem>>, vector<16x128xf32>
    tpu.vector_store %arg7[%c0_6, %c0_7], %7 {strides = array<i32>} : memref<16x128xf32, #tpu.memory_space<vmem>>, vector<16x128xf32>,
    %c1_i32 = arith.constant 1 : i32
    %9 = arith.cmpi eq, %arg2, %c1_i32 : i32
    %10 = arith.extui %9 : i1 to i32
    %c0_i32_8 = arith.constant 0 : i32
    %11 = arith.cmpi ne, %10, %c0_i32_8 : i32
    scf.if %11 {
      %c0_9 = arith.constant 0 : index
      %c0_10 = arith.constant 0 : index
      %12 = vector.load %arg7[%c0_9, %c0_10] : memref<16x128xf32, #tpu.memory_space<vmem>>, vector<16x128xf32>
      %c0_11 = arith.constant 0 : index
      %c0_12 = arith.constant 0 : index
      %13 = vector.load %arg5[%c0_11, %c0_12] : memref<1x128xf32, #tpu.memory_space<vmem>>, vector<1x128xf32>
      %14 = vector.broadcast %13 : vector<1x128xf32> to vector<16x128xf32>
      %15 = arith.addf %12, %14 : vector<16x128xf32>
      %c0_13 = arith.constant 0 : index
      %c0_14 = arith.constant 0 : index
      %16 = vector.load %arg6[%c0_13, %c0_14] : memref<16x128xf32, #tpu.memory_space<vmem>>, vector<16x128xf32>
      tpu.vector_store %arg6[%c0_13, %c0_14], %15 {strides = array<i32>} : memref<16x128xf32, #tpu.memory_space<vmem>>, vector<16x128xf32>,
    } else {
    }
    return
  }
  func.func @transform_0(%arg0: i32, %arg1: i32, %arg2: i32) -> (i32, i32) {
    %c0_i32 = arith.constant 0 : i32
    return %arg0, %arg2 : i32, i32
  }
  func.func @transform_1(%arg0: i32, %arg1: i32, %arg2: i32) -> (i32, i32) {
    %c0_i32 = arith.constant 0 : i32
    return %arg2, %arg1 : i32, i32
  }
  func.func @transform_2(%arg0: i32, %arg1: i32, %arg2: i32) -> (i32, i32) {
    %c0_i32 = arith.constant 0 : i32
    %c0_i32_0 = arith.constant 0 : i32
    return %c0_i32, %arg1 : i32, i32
  }
  func.func @transform_3(%arg0: i32, %arg1: i32, %arg2: i32) -> (i32, i32) {
    %c0_i32 = arith.constant 0 : i32
    return %arg0, %arg1 : i32, i32
  }
}

</mosaic_0001>

<bundles_post_ra>
// kernel: dranet_encoder_forward.3
= control target key start
LH: loop header
LB: loop body
LE: loop exit
PB: predicated region body
PF: predicated region fallthrough
CT: control target
= control target key end

     0   :  { %s5274_s0 = inlined_call_operand.vmem [shape: bf16[16,8192], index: 0, kind: input, shape index: {}]   ;;  %s5275_s1 = inlined_call_operand.hbm [shape: bf16[8192,256], index: 1, kind: input, shape index: {}]   ;;  %s5276_s2 = inlined_call_operand.hbm [shape: f32[1,256], index: 2, kind: input, shape index: {}]   ;;  %s5277_s3 = inlined_call_operand.vmem [shape: f32[16,256], index: 3, kind: output, shape index: {}]  }
   0x1   :  { %5284 = sst [smem:[#allocation20_spill]] %s5274_s0 }
   0x2   :  { %5285 = sst [smem:[#allocation21_spill]] %s5275_s1 }
   0x3   :  { %5286 = sst [smem:[#allocation22_spill]] %s5277_s3 }
   0x4   :  { %8 = vsyncpa [#allocation5], 0 }
   0x5   :  { %10 = vsyncpa [#allocation5 + $0x1], 0 }
   0x6   :  { %11 = vsyncpa [#allocation7], 0 }
   0x7   :  { %13 = vsyncpa [#allocation7 + $0x1], 0  ;;  %s4674_s12 = smov 0   ;;  %s4676_s13 = smov 0  }
   0x8   :  { %s4678_s14 = smov 0   ;;  %s4680_s15 = smov 0  }
   0x9   :  { %s4682_s16 = smov 0   ;;  %s4684_s17 = smov 0  }
   0xa   :  { %s4686_s18 = smov 0   ;;  %s4688_s19 = smov 0  }
   0xb   :  { %s4690_s20 = smov 0   ;;  %s4692_s21 = smov 0  }
   0xc   :  { %s4694_s22 = smov 0   ;;  %s4696_s23 = smov 0  }
   0xd   :  { %s4698_s24 = smov 0  }
   0xe LB: > { %5287 = sst [smem:[#allocation11_spill]] %s4606_s14  ;;  %s3451_s25 = sadd.s32 4294967295, %s4646_s24   ;;  %s4646_s24 = sphi %s4698_s24, %s19_s24   ;;  %s4642_s23 = sphi %s4696_s23, %s5320_s23   ;;  %s4638_s22 = sphi %s4694_s22, %s5313_s22   ;;  %s4634_s21 = sphi %s4692_s21, %s5319_s21   ;;  %s4630_s20 = sphi %s4690_s20, %s5312_s20   ;;  %s4626_s19 = sphi %s4688_s19, %s5311_s19   ;;  %s4622_s18 = sphi %s4686_s18, %s5310_s18   ;;  %s4618_s17 = sphi %s4684_s17, %s5309_s17   ;;  %s4614_s16 = sphi %s4682_s16, %s5318_s16   ;;  %s4610_s15 = sphi %s4680_s15, %s5317_s15   ;;  %s4606_s14 = sphi %s4678_s14, %s5307_s14   ;;  %s4602_s13 = sphi %s4676_s13, %s5316_s13   ;;  %s4598_s12 = sphi %s4674_s12, %s5315_s12  }
   0xf   : > { %5288 = sst [smem:[#allocation12_spill]] %s4618_s17  ;;  %s31_s26 = sadd.s32 1, %s4638_s22 }
  0x10   : > { %5289 = sst [smem:[#allocation13_spill]] %s4626_s19  ;;  %p32_p0 = scmp.ge.s32.totalorder %s31_s26, 2 }
  0x11   : > { %5290 = sst [smem:[#allocation14_spill]] %s4638_s22  ;;  %s34_s27 = sadd.s32 1, %s4642_s23 }
  0x12   : > { %s47_s28 = sadd.s32 1, %s4626_s19  ;;  %p54_p1 = scmp.ne.s32.totalorder %s4626_s19, %s4622_s18 }
  0x13   : > { %s5322_s26 = smov (%p32_p0, %s31_s26), 0  ;;  %s5324_s27 = smov (!%p32_p0, %s34_s27), %s4642_s23 }
  0x14   : > { %5291 = sst [smem:[#allocation15_spill]] %s5322_s26  ;;  %s43_s29 = ssub.s32 %s4638_s22, %s5322_s26 }
  0x15   : > { %p55_p2 = scmp.eq.s32.totalorder %s4646_s24, 0  ;;  %p36_p3 = scmp.ge.s32.totalorder %s5324_s27, 2 }
  0x16   : > { %p45_p4 = scmp.eq.s32.totalorder %s43_s29, 0  ;;  %s75_s4 = sadd.s32 1, %s4618_s17 }
  0x17   : > { %p4753_p5 = por %p55_p2, %p54_p1  ;;  %s5326_s27 = smov (%p36_p3, %s5324_s27), 0 }
  0x18   : > { %5293 = sst [smem:[#allocation16_spill]] %s5326_s27  ;;  %s71_s6 = ssub.s32 %s4642_s23, %s5326_s27 }
  0x19   : > { %s4761_s5 = scalar_select %p45_p4, %s4626_s19, %s47_s28  }
  0x1a   : > { %p82_p6 = scmp.ne.s32.totalorder %s4618_s17, %s4614_s16  ;;  %s72_s7 = sor.u32 %s71_s6, %s43_s29 }
  0x1b   : > { %5294 = sst [smem:[#allocation17_spill]] %s4761_s5  ;;  %p88_p7 = scmp.ne.s32.totalorder %s4614_s16, %s4610_s15 }
  0x1c   : > { %p73_p8 = scmp.eq.s32.totalorder %s72_s7, 0  ;;  %p4771_p9 = por %p82_p6, %p55_p2 }
  0x1d   : > { %p89_p10 = scmp.eq.s32.totalorder %s3451_s25, 0  ;;  %p99_p11 = scmp.eq.s32.totalorder %s71_s6, 0 }
  0x1e   : > { %s4778_s9 = scalar_select %p73_p8, %s4618_s17, %s75_s4  }
  0x1f   : > { %p4780_p12 = por %p89_p10, %p88_p7  ;;  %s101_s11 = sadd.s32 1, %s4606_s14 }
  0x20   : > { %5296 = sst [smem:[#allocation18_spill]] %s4778_s9  ;;  %p108_p13 = scmp.ne.s32.totalorder %s4606_s14, %s4602_s13 }
  0x21   : > { %s4786_s28 = scalar_select %p99_p11, %s4606_s14, %s101_s11  }
  0x22   : > { %p114_p0 = scmp.ne.s32.totalorder %s4602_s13, %s4598_s12  ;;  %p140_p1 = scmp.eq.s32.totalorder %s3451_s25, 3 }
  0x23   : > { %5298 = sst [smem:[#allocation19_spill]] %s4786_s28  ;;  %p4796_p3 = por %p108_p13, %p55_p2 }
  0x24   : > { %p4800_p4 = por %p114_p0, %p89_p10  ;;  %p4804_p6 = por %p140_p1, %p108_p13 }
  0x25   : > { %p3454_p7 = scmp.ge.s32.totalorder %s4646_s24, 4 }
  0x27   : > { %162 = sbr.rel (%p3454_p7) target bundleno = 101 (0x65), region = 16 }
  0x2c   : > { %165 = sbr.rel (!%p4753_p5) target bundleno = 70 (0x46), region = 20  ;;  %s167_s12 = sand.u32 (%p4753_p5), 1, %s4626_s19  }
  0x2d   : > { %s3762_s25 = sshll.u32 (%p4753_p5), %s4638_s22, 7  ;;  %s3455_s6 = sshll.u32 (%p4753_p5), %s167_s12, 8 }
  0x2e   : > { %s5302_s0 = sld [smem:[#allocation20_spill]] (%p4753_p5)  ;;  %s4821_s30 = scalar_lea.vmem (%p4753_p5), [#allocation3], %s3455_s6 }
  0x34   : > { %s4816_s27 = scalar_lea.vmem %s5302_s0, %s3762_s25 }
  0x35   : > { %v188_v0 = vld [vmem:[%s4816_s27] sm:$0xff]  ;;  %v190_v1 = vld [vmem:[%s4816_s27 + $0x8] sm:$0xff]  ;;  %v192_v2 = vld [vmem:[%s4816_s27 + $0x10] sm:$0xff] }
  0x36   : > { %189 = vst [vmem:[%s4821_s30] sm:$0xff] %v188_v0  ;;  %191 = vst [vmem:[%s4821_s30 + $0x8] sm:$0xff] %v190_v1  ;;  %v194_v3 = vld [vmem:[%s4816_s27 + $0x18] sm:$0xff]  ;;  %v196_v4 = vld [vmem:[%s4816_s27 + $0x20] sm:$0xff] }
  0x37   : > { %193 = vst [vmem:[%s4821_s30 + $0x10] sm:$0xff] %v192_v2  ;;  %v198_v5 = vld [vmem:[%s4816_s27 + $0x28] sm:$0xff]  ;;  %195 = vst [vmem:[%s4821_s30 + $0x18] sm:$0xff] %v194_v3  ;;  %v200_v6 = vld [vmem:[%s4816_s27 + $0x30] sm:$0xff] }
  0x38   : > { %197 = vst [vmem:[%s4821_s30 + $0x20] sm:$0xff] %v196_v4  ;;  %199 = vst [vmem:[%s4821_s30 + $0x28] sm:$0xff] %v198_v5  ;;  %v202_v7 = vld [vmem:[%s4816_s27 + $0x38] sm:$0xff]  ;;  %v204_v8 = vld [vmem:[%s4816_s27 + $0x40] sm:$0xff] }
  0x39   : > { %201 = vst [vmem:[%s4821_s30 + $0x30] sm:$0xff] %v200_v6  ;;  %203 = vst [vmem:[%s4821_s30 + $0x38] sm:$0xff] %v202_v7  ;;  %v206_v9 = vld [vmem:[%s4816_s27 + $0x48] sm:$0xff]  ;;  %v208_v10 = vld [vmem:[%s4816_s27 + $0x50] sm:$0xff] }
  0x3a   : > { %205 = vst [vmem:[%s4821_s30 + $0x40] sm:$0xff] %v204_v8  ;;  %v210_v11 = vld [vmem:[%s4816_s27 + $0x58] sm:$0xff]  ;;  %207 = vst [vmem:[%s4821_s30 + $0x48] sm:$0xff] %v206_v9  ;;  %v212_v12 = vld [vmem:[%s4816_s27 + $0x60] sm:$0xff] }
  0x3b   : > { %209 = vst [vmem:[%s4821_s30 + $0x50] sm:$0xff] %v208_v10  ;;  %211 = vst [vmem:[%s4821_s30 + $0x58] sm:$0xff] %v210_v11  ;;  %v214_v13 = vld [vmem:[%s4816_s27 + $0x68] sm:$0xff]  ;;  %v216_v14 = vld [vmem:[%s4816_s27 + $0x70] sm:$0xff] }
  0x3c   : > { %213 = vst [vmem:[%s4821_s30 + $0x60] sm:$0xff] %v212_v12  ;;  %215 = vst [vmem:[%s4821_s30 + $0x68] sm:$0xff] %v214_v13  ;;  %v218_v15 = vld [vmem:[%s4816_s27 + $0x78] sm:$0xff]  ;;  %v220_v16 = vld [vmem:[%s4816_s27 + $0x100] sm:$0xff] }
  0x3d   : > { %217 = vst [vmem:[%s4821_s30 + $0x70] sm:$0xff] %v216_v14  ;;  %v222_v17 = vld [vmem:[%s4816_s27 + $0x108] sm:$0xff]  ;;  %219 = vst [vmem:[%s4821_s30 + $0x78] sm:$0xff] %v218_v15  ;;  %v224_v18 = vld [vmem:[%s4816_s27 + $0x110] sm:$0xff] }
  0x3e   : > { %221 = vst [vmem:[%s4821_s30 + $0x80] sm:$0xff] %v220_v16  ;;  %223 = vst [vmem:[%s4821_s30 + $0x88] sm:$0xff] %v222_v17  ;;  %v226_v19 = vld [vmem:[%s4816_s27 + $0x118] sm:$0xff]  ;;  %v228_v20 = vld [vmem:[%s4816_s27 + $0x120] sm:$0xff] }
  0x3f   : > { %225 = vst [vmem:[%s4821_s30 + $0x90] sm:$0xff] %v224_v18  ;;  %227 = vst [vmem:[%s4821_s30 + $0x98] sm:$0xff] %v226_v19  ;;  %v230_v21 = vld [vmem:[%s4816_s27 + $0x128] sm:$0xff]  ;;  %v232_v22 = vld [vmem:[%s4816_s27 + $0x130] sm:$0xff] }
  0x40   : > { %229 = vst [vmem:[%s4821_s30 + $0xa0] sm:$0xff] %v228_v20  ;;  %v234_v23 = vld [vmem:[%s4816_s27 + $0x138] sm:$0xff]  ;;  %231 = vst [vmem:[%s4821_s30 + $0xa8] sm:$0xff] %v230_v21  ;;  %v236_v24 = vld [vmem:[%s4816_s27 + $0x140] sm:$0xff] }
  0x41   : > { %233 = vst [vmem:[%s4821_s30 + $0xb0] sm:$0xff] %v232_v22  ;;  %235 = vst [vmem:[%s4821_s30 + $0xb8] sm:$0xff] %v234_v23  ;;  %v238_v25 = vld [vmem:[%s4816_s27 + $0x148] sm:$0xff]  ;;  %v240_v26 = vld [vmem:[%s4816_s27 + $0x150] sm:$0xff] }
  0x42   : > { %237 = vst [vmem:[%s4821_s30 + $0xc0] sm:$0xff] %v236_v24  ;;  %239 = vst [vmem:[%s4821_s30 + $0xc8] sm:$0xff] %v238_v25  ;;  %v242_v27 = vld [vmem:[%s4816_s27 + $0x158] sm:$0xff]  ;;  %v244_v28 = vld [vmem:[%s4816_s27 + $0x160] sm:$0xff] }
  0x43   : > { %241 = vst [vmem:[%s4821_s30 + $0xd0] sm:$0xff] %v240_v26  ;;  %v246_v29 = vld [vmem:[%s4816_s27 + $0x168] sm:$0xff]  ;;  %243 = vst [vmem:[%s4821_s30 + $0xd8] sm:$0xff] %v242_v27  ;;  %v248_v30 = vld [vmem:[%s4816_s27 + $0x170] sm:$0xff] }
  0x44   : > { %245 = vst [vmem:[%s4821_s30 + $0xe0] sm:$0xff] %v244_v28  ;;  %247 = vst [vmem:[%s4821_s30 + $0xe8] sm:$0xff] %v246_v29  ;;  %v250_v31 = vld [vmem:[%s4816_s27 + $0x178] sm:$0xff] }
  0x45   : > { %249 = vst [vmem:[%s4821_s30 + $0xf0] sm:$0xff] %v248_v30  ;;  %251 = vst [vmem:[%s4821_s30 + $0xf8] sm:$0xff] %v250_v31 }
  0x46 PF: > { %s258_s12 = sand.u32 1, %s4618_s17   ;;  %s3763_s25 = sshll.u32 %s4638_s22, 10 }
  0x47   : > { %s3458_s6 = sshll.u32 %s258_s12, 11  ;;  %s268_s7 = sadd.s32 %s4642_s23, %s3763_s25 }
  0x48   : > { %s3461_s11 = sshll.u32 %s268_s7, 6  ;;  %s262_s0 = scalar_lea.vmem [#allocation4], %s3458_s6 }
  0x49   : > { %s271_s26 = sshll.u32 %s262_s0, 4  ;;  %s5303_s1 = sld [smem:[#allocation21_spill]]  ;;  %s272_s26 = int_to_ptr.vmem [resolvable:$true] %s271_s26 }
  0x4a   : > { %s281_s27 = sand.u32 1, %s4606_s14   ;;  %s259_s30 = scalar_lea.sflag [#allocation5], %s258_s12 }
  0x4b   : > { %s4496_s28 = scalar_lea.vmem %s272_s26, 32768  ;;  %s4648_s3 = smov [#allocation4]  }
  0x4c   : > { %p4497_p2 = scmp.ne.s32.totalorder %s272_s26, %s4496_s28  ;;  %s4500_s17 = sshll.u32 %s4648_s3, 4  ;;  %s4501_s17 = int_to_ptr.vmem [resolvable:$false] %s4500_s17 }
  0x4d   : > { %s4502_s22 = scalar_lea.vmem %s4501_s17, 65536  ;;  %p4503_p10 = scmp.lt.s32.totalorder %s272_s26, %s4501_s17 }
  0x4e   : > { %p4498_p5 = pnand %p4497_p2, %p4771_p9  ;;  %p4504_p11 = scmp.lt.s32.totalorder %s4502_s22, %s4496_s28 }
  0x4f   : > { %s270_s9 = scalar_lea.hbm %s5303_s1, %s3461_s11 }
  0x50   : > { %p4499_p8 = pneg %p4498_p5  ;;  %p4505_p13 = por %p4504_p11, %p4503_p10 }
  0x52   : > { %p4506_p0 = pnand %p4505_p13, %p4499_p8 }
  0x54   : > { %4509 = shalt.err (!%p4506_p0)
}
  0x55   : > { %s4649_s0 = smov 128   ;;  %s4650_s19 = smov 64  }
  0x56   : > { %s4651_s5 = smov 4   ;;  %s3462_s12 = sshll.u32 %s4642_s23, 4 }
  0x57   : > { %4116 = dma.hbm_to_vmem [thread:$0]  (%p4771_p9), %s270_s9, 32768, %s272_s26, %s259_s30, %s4649_s0, %s4650_s19, %s4651_s5  }
  0x58   : > { %s284_s25 = scalar_lea.vmem [#allocation6], %s281_s27  ;;  %s289_s11 = scalar_lea.hbm %s5276_s2, %s3462_s12 }
  0x59   : > { %s291_s6 = sshll.u32 %s284_s25, 4  ;;  %s282_s17 = scalar_lea.sflag [#allocation7], %s281_s27  ;;  %s292_s6 = int_to_ptr.vmem [resolvable:$true] %s291_s6 }
  0x5a   : > { %s4522_s22 = scalar_lea.vmem %s292_s6, 16  ;;  %s4652_s28 = smov [#allocation6]  }
  0x5b   : > { %p4523_p1 = scmp.ne.s32.totalorder %s292_s6, %s4522_s22  ;;  %s4526_s1 = sshll.u32 %s4652_s28, 4  ;;  %s4527_s1 = int_to_ptr.vmem [resolvable:$false] %s4526_s1 }
  0x5c   : > { %s4528_s14 = scalar_lea.vmem %s4527_s1, 32  ;;  %p4529_p5 = scmp.lt.s32.totalorder %s292_s6, %s4527_s1 }
  0x5d   : > { %p4524_p7 = pnand %p4523_p1, %p4796_p3  ;;  %p4530_p9 = scmp.lt.s32.totalorder %s4528_s14, %s4522_s22 }
  0x5f   : > { %p4525_p2 = pneg %p4524_p7  ;;  %p4531_p8 = por %p4530_p9, %p4529_p5 }
  0x61   : > { %p4532_p10 = pnand %p4531_p8, %p4525_p2 }
  0x63   : > { %4535 = shalt.err (!%p4532_p10)
}
  0x64   : > { %4117 = dma.hbm_to_vmem [thread:$0]  (%p4796_p3), %s289_s11, 16, %s292_s6, %s282_s17  }
  0x65 PF: > { %p3463_p11 = scmp.ge.s32.totalorder %s4646_s24, 1  ;;  %p296_p13 = scmp.lt.s32.totalorder %s4646_s24, 5 }
  0x67   : > { %p297_p0 = pnand %p3463_p11, %p296_p13 }
  0x68   : > { %s303_s26 = sand.u32 (!%p297_p0), 1, %s4622_s18   ;;  %s309_s8 = sand.u32 (!%p297_p0), 1, %s4614_s16  }
  0x69   : > { %300 = sbr.rel (%p297_p0) target bundleno = 608 (0x260), region = 51  ;;  %s3464_s1 = sshll.u32 (!%p297_p0), %s303_s26, 8 }
  0x6a   : > { %s3465_s14 = sshll.u32 (!%p297_p0), %s309_s8, 11  ;;  %s4907_s9 = scalar_lea.vmem (!%p297_p0), [#allocation3], %s3464_s1 }
  0x6b   : > { %s310_s27 = scalar_lea.sflag (!%p297_p0), [#allocation5], %s309_s8  ;;  %s4909_s30 = scalar_lea.vmem (!%p297_p0), [#allocation4], %s3465_s14 }
  0x6e   : > { %4589 = dma.done.wait (%p4780_p12), %s310_s27, 32768  }
  0x6f   : > { %4591 = vsyncadd (%p4780_p12), %s310_s27, 4294934528  ;;  %s4916_s15 = sand.u32 1, %s4602_s13  }
  0x70   : > { %s319_s18 = scalar_lea.sflag [#allocation7], %s4916_s15  ;;  %s321_s0 = scalar_lea.vmem [#allocation6], %s4916_s15 }
  0x71   : > { %4593 = dma.done.wait (%p4800_p4), %s319_s18, 16  }
  0x72   : > { %4595 = vsyncadd (%p4800_p4), %s319_s18, 4294967280  ;;  %s3466_s19 = sshll.u32 %s4916_s15, 4  ;;  %p3467_p3 = scmp.ne.s32.totalorder %s4630_s20, 0 }
  0x73   : > { %s4925_s5 = scalar_lea.vmem [#allocation8], %s3466_s19 }
  0x74   : > { %359 = sbr.rel (%p3467_p3) target bundleno = 123 (0x7b), region = 67 }
  0x79   : > { %v4653_v32 = vmov 0.0  }
  0x7a   : > { %360 = vst [vmem:[#allocation2] sm:$0xff] %v4653_v32  ;;  %361 = vst [vmem:[#allocation2 + $0x8] sm:$0xff] %v4653_v32 }
  0x7b PF: > { %v4228_v33 = vld [vmem:[%s4909_s30 + $0x78] sm:$0xff]   ;;  %v4232_v37 = vld [vmem:[%s4909_s30 + $0x70] sm:$0xff]   ;;  %v4236_v41 = vld [vmem:[%s4909_s30 + $0x68] sm:$0xff]   ;;  %p3756_p12 = scmp.ne.s32.totalorder %s4630_s20, 1 }
  0x7c   : > { %v4229_v34 = vld [vmem:[%s4909_s30 + $0xf8] sm:$0xff]   ;;  %3764 = vmatprep.subr.bf16.mxu0 %v4228_v33  ;;  %v4233_v38 = vld [vmem:[%s4909_s30 + $0xf0] sm:$0xff]   ;;  %v4237_v42 = vld [vmem:[%s4909_s30 + $0xe8] sm:$0xff]  }
  0x7d   : > { %v4230_v35 = vld [vmem:[%s4909_s30 + $0x38] sm:$0xff]   ;;  %3786 = vmatprep.subr.bf16.mxu1 %v4229_v34  ;;  %v4234_v39 = vld [vmem:[%s4909_s30 + $0x30] sm:$0xff]   ;;  %v4238_v43 = vld [vmem:[%s4909_s30 + $0x28] sm:$0xff]  }
  0x7e   : > { %v4231_v36 = vld [vmem:[%s4909_s30 + $0xb8] sm:$0xff]   ;;  %3765 = vmatpush3.bf16.msra.mxu0 %v4230_v35  ;;  %v4235_v40 = vld [vmem:[%s4909_s30 + $0xb0] sm:$0xff]   ;;  %v4239_v44 = vld [vmem:[%s4909_s30 + $0xa8] sm:$0xff]  }
  0x7f   : > { %3787 = vmatpush3.bf16.msra.mxu1 %v4231_v36  ;;  %3766 = vmatprep.subr.bf16.mxu0 %v4232_v37  ;;  %v4240_v45 = vld [vmem:[%s4909_s30 + $0x60] sm:$0xff]   ;;  %v4244_v49 = vld [vmem:[%s4909_s30 + $0x58] sm:$0xff]   ;;  %v4248_v53 = vld [vmem:[%s4909_s30 + $0x50] sm:$0xff]  }
  0x80   : > { %3788 = vmatprep.subr.bf16.mxu1 %v4233_v38  ;;  %v4241_v46 = vld [vmem:[%s4909_s30 + $0xe0] sm:$0xff]   ;;  %v4245_v50 = vld [vmem:[%s4909_s30 + $0xd8] sm:$0xff]   ;;  %v4249_v54 = vld [vmem:[%s4909_s30 + $0xd0] sm:$0xff]  }
  0x81   : > { %v4242_v47 = vld [vmem:[%s4909_s30 + $0x20] sm:$0xff]   ;;  %v4246_v51 = vld [vmem:[%s4909_s30 + $0x18] sm:$0xff]   ;;  %v4250_v55 = vld [vmem:[%s4909_s30 + $0x10] sm:$0xff]  }
  0x82   : > { %3767 = vmatpush3.bf16.msra.mxu0 %v4234_v39  ;;  %v4243_v48 = vld [vmem:[%s4909_s30 + $0xa0] sm:$0xff]   ;;  %v4247_v52 = vld [vmem:[%s4909_s30 + $0x98] sm:$0xff]   ;;  %v4251_v56 = vld [vmem:[%s4909_s30 + $0x90] sm:$0xff]  }
  0x83   : > { %3789 = vmatpush3.bf16.msra.mxu1 %v4235_v40  ;;  %3768 = vmatprep.subr.bf16.mxu0 %v4236_v41  ;;  %v4252_v57 = vld [vmem:[%s4909_s30 + $0x48] sm:$0xff]   ;;  %v4256_v61 = vld [vmem:[%s4909_s30 + $0x40] sm:$0xff]   ;;  %v4260_v9 = vld [vmem:[%s4909_s30 + $0x178] sm:$0xff]  }
  0x84   : > { %3790 = vmatprep.subr.bf16.mxu1 %v4237_v42  ;;  %v4253_v58 = vld [vmem:[%s4909_s30 + $0xc8] sm:$0xff]   ;;  %v4257_v62 = vld [vmem:[%s4909_s30 + $0xc0] sm:$0xff]   ;;  %v4261_v10 = vld [vmem:[%s4909_s30 + $0x1f8] sm:$0xff]  }
  0x85   : > { %v4254_v59 = vld [vmem:[%s4909_s30 + $0x8] sm:$0xff]   ;;  %v4258_v63 = vld [vmem:[%s4909_s30] sm:$0xff]   ;;  %v4262_v11 = vld [vmem:[%s4909_s30 + $0x138] sm:$0xff]  }
  0x86   : > { %3769 = vmatpush3.bf16.msra.mxu0 %v4238_v43  ;;  %v4255_v60 = vld [vmem:[%s4909_s30 + $0x88] sm:$0xff]   ;;  %v4259_v0 = vld [vmem:[%s4909_s30 + $0x80] sm:$0xff]   ;;  %v4263_v12 = vld [vmem:[%s4909_s30 + $0x1b8] sm:$0xff]  }
  0x87   : > { %3791 = vmatpush3.bf16.msra.mxu1 %v4239_v44  ;;  %3770 = vmatprep.subr.bf16.mxu0 %v4240_v45  ;;  %v364_v1 = vld [vmem:[%s4907_s9] sm:$0xff]  ;;  %v365_v3 = vld [vmem:[%s4907_s9 + $0x8] sm:$0xff]  ;;  %v4264_v13 = vld [vmem:[%s4909_s30 + $0x170] sm:$0xff]  }
  0x88   : > { %3792 = vmatprep.subr.bf16.mxu1 %v4241_v46  ;;  %v380_v2 = vld [vmem:[%s4907_s9 + $0x80] sm:$0xff]  ;;  %v381_v6 = vld [vmem:[%s4907_s9 + $0x88] sm:$0xff]  ;;  %v4265_v14 = vld [vmem:[%s4909_s30 + $0x1f0] sm:$0xff]  }
  0x89   : > { %v3468_v4 = vcombine.low %v364_v1, %v380_v2  ;;  %v3469_v5 = vcombine.high %v364_v1, %v380_v2  ;;  %v3470_v7 = vcombine.low %v365_v3, %v381_v6  ;;  %v3471_v8 = vcombine.high %v365_v3, %v381_v6  ;;  %v4266_v15 = vld [vmem:[%s4909_s30 + $0x130] sm:$0xff]   ;;  %v4268_v17 = vld [vmem:[%s4909_s30 + $0x168] sm:$0xff]   ;;  %v4272_v21 = vld [vmem:[%s4909_s30 + $0x160] sm:$0xff]  }
  0x8a   : > { %3771 = vmatpush3.bf16.msra.mxu0 %v4242_v47  ;;  %v4267_v16 = vld [vmem:[%s4909_s30 + $0x1b0] sm:$0xff]   ;;  %v4269_v18 = vld [vmem:[%s4909_s30 + $0x1e8] sm:$0xff]   ;;  %v4273_v22 = vld [vmem:[%s4909_s30 + $0x1e0] sm:$0xff]  }
  0x8b   : > { %3793 = vmatpush3.bf16.msra.mxu1 %v4243_v48  ;;  %3772 = vmatprep.subr.bf16.mxu0 %v4244_v49  ;;  %v4270_v19 = vld [vmem:[%s4909_s30 + $0x128] sm:$0xff]   ;;  %v4274_v23 = vld [vmem:[%s4909_s30 + $0x120] sm:$0xff]   ;;  %v4276_v25 = vld [vmem:[%s4909_s30 + $0x158] sm:$0xff]  }
  0x8c   : > { %3794 = vmatprep.subr.bf16.mxu1 %v4245_v50  ;;  %2636 = vmatprep.mubr.bf16.mxu0 %v3469_v5  ;;  %v4271_v20 = vld [vmem:[%s4909_s30 + $0x1a8] sm:$0xff]   ;;  %v4275_v24 = vld [vmem:[%s4909_s30 + $0x1a0] sm:$0xff]   ;;  %v4277_v26 = vld [vmem:[%s4909_s30 + $0x1d8] sm:$0xff]  }
  0x8d   : > { %2677 = vmatprep.mubr.bf16.mxu1 %v3471_v8  ;;  %v4278_v27 = vld [vmem:[%s4909_s30 + $0x118] sm:$0xff]   ;;  %v4280_v29 = vld [vmem:[%s4909_s30 + $0x150] sm:$0xff]   ;;  %v4284_v33 = vld [vmem:[%s4909_s30 + $0x148] sm:$0xff]  }
  0x8e   : > { %3773 = vmatpush3.bf16.msra.mxu0 %v4246_v51  ;;  %v4279_v28 = vld [vmem:[%s4909_s30 + $0x198] sm:$0xff]   ;;  %v4281_v30 = vld [vmem:[%s4909_s30 + $0x1d0] sm:$0xff]   ;;  %v4285_v34 = vld [vmem:[%s4909_s30 + $0x1c8] sm:$0xff]  }
  0x8f   : > { %3795 = vmatpush3.bf16.msra.mxu1 %v4247_v52  ;;  %3774 = vmatprep.subr.bf16.mxu0 %v4248_v53  ;;  %v4282_v31 = vld [vmem:[%s4909_s30 + $0x110] sm:$0xff]   ;;  %v4286_v35 = vld [vmem:[%s4909_s30 + $0x108] sm:$0xff]   ;;  %v4288_v37 = vld [vmem:[%s4909_s30 + $0x140] sm:$0xff]  }
  0x90   : > { %3796 = vmatprep.subr.bf16.mxu1 %v4249_v54  ;;  %v4283_v32 = vld [vmem:[%s4909_s30 + $0x190] sm:$0xff]   ;;  %v4287_v36 = vld [vmem:[%s4909_s30 + $0x188] sm:$0xff]   ;;  %v4289_v38 = vld [vmem:[%s4909_s30 + $0x1c0] sm:$0xff]  }
  0x91   : > { %v4290_v39 = vld [vmem:[%s4909_s30 + $0x100] sm:$0xff]   ;;  %v366_v41 = vld [vmem:[%s4907_s9 + $0x10] sm:$0xff]  ;;  %v367_v45 = vld [vmem:[%s4907_s9 + $0x18] sm:$0xff] }
  0x92   : > { %3775 = vmatpush3.bf16.msra.mxu0 %v4250_v55  ;;  %v4291_v40 = vld [vmem:[%s4909_s30 + $0x180] sm:$0xff]   ;;  %v382_v42 = vld [vmem:[%s4907_s9 + $0x90] sm:$0xff]  ;;  %v383_v46 = vld [vmem:[%s4907_s9 + $0x98] sm:$0xff] }
  0x93   : > { %3797 = vmatpush3.bf16.msra.mxu1 %v4251_v56  ;;  %3776 = vmatprep.subr.bf16.mxu0 %v4252_v57  ;;  %v3472_v43 = vcombine.low %v366_v41, %v382_v42  ;;  %v3473_v44 = vcombine.high %v366_v41, %v382_v42  ;;  %v3474_v47 = vcombine.low %v367_v45, %v383_v46  ;;  %v4292_v49 = vld [vmem:[%s4909_s30 + $0x278] sm:$0xff]   ;;  %v4296_v53 = vld [vmem:[%s4909_s30 + $0x270] sm:$0xff]   ;;  %v4300_v57 = vld [vmem:[%s4909_s30 + $0x268] sm:$0xff]  }
  0x94   : > { %3798 = vmatprep.subr.bf16.mxu1 %v4253_v58  ;;  %v3475_v48 = vcombine.high %v367_v45, %v383_v46  ;;  %v4293_v50 = vld [vmem:[%s4909_s30 + $0x2f8] sm:$0xff]   ;;  %v4297_v54 = vld [vmem:[%s4909_s30 + $0x2f0] sm:$0xff]   ;;  %v4301_v58 = vld [vmem:[%s4909_s30 + $0x2e8] sm:$0xff]  }
  0x95   : > { %v4294_v51 = vld [vmem:[%s4909_s30 + $0x238] sm:$0xff]   ;;  %v4298_v55 = vld [vmem:[%s4909_s30 + $0x230] sm:$0xff]  }
  0x96   : > { %3777 = vmatpush3.bf16.msra.mxu0 %v4254_v59  ;;  %v4295_v52 = vld [vmem:[%s4909_s30 + $0x2b8] sm:$0xff]   ;;  %v4299_v56 = vld [vmem:[%s4909_s30 + $0x2b0] sm:$0xff]   ;;  %v4302_v59 = vld [vmem:[%s4909_s30 + $0x228] sm:$0xff]  }
  0x97   : > { %3799 = vmatpush3.bf16.msra.mxu1 %v4255_v60  ;;  %3778 = vmatprep.subr.bf16.mxu0 %v4256_v61  ;;  %v4303_v60 = vld [vmem:[%s4909_s30 + $0x2a8] sm:$0xff]   ;;  %v4304_v61 = vld [vmem:[%s4909_s30 + $0x260] sm:$0xff]   ;;  %v4308_v1 = vld [vmem:[%s4909_s30 + $0x258] sm:$0xff]  }
  0x98   : > { %3800 = vmatprep.subr.bf16.mxu1 %v4257_v62  ;;  %v4305_v62 = vld [vmem:[%s4909_s30 + $0x2e0] sm:$0xff]   ;;  %v4309_v2 = vld [vmem:[%s4909_s30 + $0x2d8] sm:$0xff]   ;;  %v4312_v5 = vld [vmem:[%s4909_s30 + $0x250] sm:$0xff]  }
  0x99   : > { %v4310_v3 = vld [vmem:[%s4909_s30 + $0x218] sm:$0xff]   ;;  %v4313_v6 = vld [vmem:[%s4909_s30 + $0x2d0] sm:$0xff]  }
  0x9a   : > { %3779 = vmatpush3.bf16.msra.mxu0 %v4258_v63  ;;  %v4306_v63 = vld [vmem:[%s4909_s30 + $0x220] sm:$0xff]   ;;  %v4315_v8 = vld [vmem:[%s4909_s30 + $0x290] sm:$0xff]   ;;  %v4340_v41 = vld [vmem:[%s4909_s30 + $0x358] sm:$0xff]  }
  0x9b   : > { %3801 = vmatpush3.bf16.msra.mxu1 %v4259_v0  ;;  %3808 = vmatprep.subr.bf16.mxu0 %v4260_v9  ;;  %v4307_v0 = vld [vmem:[%s4909_s30 + $0x2a0] sm:$0xff]   ;;  %v4316_v9 = vld [vmem:[%s4909_s30 + $0x248] sm:$0xff]   ;;  %v4341_v42 = vld [vmem:[%s4909_s30 + $0x3d8] sm:$0xff]  }
  0x9c   : > { %3830 = vmatprep.subr.bf16.mxu1 %v4261_v10  ;;  %v4317_v10 = vld [vmem:[%s4909_s30 + $0x2c8] sm:$0xff]   ;;  %v4344_v45 = vld [vmem:[%s4909_s30 + $0x350] sm:$0xff]  }
  0x9d   : > { %2637 = vmatmul.mubr.bf16.vlgmr.msra.gmra.mxu0 %v3468_v4  ;;  %v4311_v4 = vld [vmem:[%s4909_s30 + $0x298] sm:$0xff]   ;;  %v4345_v46 = vld [vmem:[%s4909_s30 + $0x3d0] sm:$0xff]  }
  0x9e   : > { %2678 = vmatmul.mubr.bf16.vlgmr.msra.gmra.mxu1 %v3470_v7  ;;  %3809 = vmatpush3.bf16.msra.mxu0 %v4262_v11  ;;  %v4314_v7 = vld [vmem:[%s4909_s30 + $0x210] sm:$0xff]   ;;  %v4318_v11 = vld [vmem:[%s4909_s30 + $0x208] sm:$0xff]  }
  0x9f   : > { %3831 = vmatpush3.bf16.msra.mxu1 %v4263_v12  ;;  %3810 = vmatprep.subr.bf16.mxu0 %v4264_v13  ;;  %v4319_v12 = vld [vmem:[%s4909_s30 + $0x288] sm:$0xff]   ;;  %v4320_v13 = vld [vmem:[%s4909_s30 + $0x240] sm:$0xff]  }
  0xa0   : > { %3832 = vmatprep.subr.bf16.mxu1 %v4265_v14  ;;  %2718 = vmatprep.mubr.bf16.mxu0 %v3473_v44  ;;  %v4321_v14 = vld [vmem:[%s4909_s30 + $0x2c0] sm:$0xff]   ;;  %v4343_v44 = vld [vmem:[%s4909_s30 + $0x398] sm:$0xff]  }
  0xa1   : > { %2759 = vmatprep.mubr.bf16.mxu1 %v3475_v48  ;;  %v4347_v48 = vld [vmem:[%s4909_s30 + $0x390] sm:$0xff]  }
  0xa2   : > { %3811 = vmatpush3.bf16.msra.mxu0 %v4266_v15  ;;  %v4322_v15 = vld [vmem:[%s4909_s30 + $0x200] sm:$0xff]  }
  0xa3   : > { %3833 = vmatpush3.bf16.msra.mxu1 %v4267_v16  ;;  %3812 = vmatprep.subr.bf16.mxu0 %v4268_v17  ;;  %v4323_v16 = vld [vmem:[%s4909_s30 + $0x280] sm:$0xff]  }
  0xa4   : > { %3834 = vmatprep.subr.bf16.mxu1 %v4269_v18  ;;  %v368_v17 = vld [vmem:[%s4907_s9 + $0x20] sm:$0xff] }
  0xa5   : > { %v384_v18 = vld [vmem:[%s4907_s9 + $0xa0] sm:$0xff] }
  0xa6   : > { %3813 = vmatpush3.bf16.msra.mxu0 %v4270_v19  ;;  %v369_v19 = vld [vmem:[%s4907_s9 + $0x28] sm:$0xff] }
  0xa7   : > { %3835 = vmatpush3.bf16.msra.mxu1 %v4271_v20  ;;  %3814 = vmatprep.subr.bf16.mxu0 %v4272_v21  ;;  %v385_v20 = vld [vmem:[%s4907_s9 + $0xa8] sm:$0xff]  ;;  %v3476_v21 = vcombine.low %v368_v17, %v384_v18 }
  0xa8   : > { %3836 = vmatprep.subr.bf16.mxu1 %v4273_v22  ;;  %v3477_v22 = vcombine.high %v368_v17, %v384_v18  ;;  %v4372_v17 = vld [vmem:[%s4909_s30 + $0x458] sm:$0xff]  }
  0xa9   : > { %v4373_v18 = vld [vmem:[%s4909_s30 + $0x4d8] sm:$0xff]  }
  0xaa   : > { %3815 = vmatpush3.bf16.msra.mxu0 %v4274_v23  ;;  %v3478_v23 = vcombine.low %v369_v19, %v385_v20 }
  0xab   : > { %3837 = vmatpush3.bf16.msra.mxu1 %v4275_v24  ;;  %3816 = vmatprep.subr.bf16.mxu0 %v4276_v25  ;;  %v3479_v24 = vcombine.high %v369_v19, %v385_v20  ;;  %v4324_v25 = vld [vmem:[%s4909_s30 + $0x378] sm:$0xff]  }
  0xac   : > { %3838 = vmatprep.subr.bf16.mxu1 %v4277_v26  ;;  %v4325_v26 = vld [vmem:[%s4909_s30 + $0x3f8] sm:$0xff]  }
  0xad   : > { %v4374_v19 = vld [vmem:[%s4909_s30 + $0x418] sm:$0xff]  }
  0xae   : > { %3817 = vmatpush3.bf16.msra.mxu0 %v4278_v27  ;;  %v4326_v27 = vld [vmem:[%s4909_s30 + $0x338] sm:$0xff]  }
  0xaf   : > { %3839 = vmatpush3.bf16.msra.mxu1 %v4279_v28  ;;  %3818 = vmatprep.subr.bf16.mxu0 %v4280_v29  ;;  %v4327_v28 = vld [vmem:[%s4909_s30 + $0x3b8] sm:$0xff]   ;;  %v4328_v29 = vld [vmem:[%s4909_s30 + $0x370] sm:$0xff]  }
  0xb0   : > { %3840 = vmatprep.subr.bf16.mxu1 %v4281_v30  ;;  %v4329_v30 = vld [vmem:[%s4909_s30 + $0x3f0] sm:$0xff]   ;;  %v4375_v20 = vld [vmem:[%s4909_s30 + $0x498] sm:$0xff]  }
  0xb2   : > { %3819 = vmatpush3.bf16.msra.mxu0 %v4282_v31  ;;  %v4330_v31 = vld [vmem:[%s4909_s30 + $0x330] sm:$0xff]  }
  0xb3   : > { %3841 = vmatpush3.bf16.msra.mxu1 %v4283_v32  ;;  %3820 = vmatprep.subr.bf16.mxu0 %v4284_v33  ;;  %v4331_v32 = vld [vmem:[%s4909_s30 + $0x3b0] sm:$0xff]   ;;  %v4332_v33 = vld [vmem:[%s4909_s30 + $0x368] sm:$0xff]  }
  0xb4   : > { %3842 = vmatprep.subr.bf16.mxu1 %v4285_v34  ;;  %v4333_v34 = vld [vmem:[%s4909_s30 + $0x3e8] sm:$0xff]  }
  0xb6   : > { %3821 = vmatpush3.bf16.msra.mxu0 %v4286_v35  ;;  %v4334_v35 = vld [vmem:[%s4909_s30 + $0x328] sm:$0xff]  }
  0xb7   : > { %3843 = vmatpush3.bf16.msra.mxu1 %v4287_v36  ;;  %3822 = vmatprep.subr.bf16.mxu0 %v4288_v37  ;;  %v4335_v36 = vld [vmem:[%s4909_s30 + $0x3a8] sm:$0xff]   ;;  %v4336_v37 = vld [vmem:[%s4909_s30 + $0x360] sm:$0xff]  }
  0xb8   : > { %3844 = vmatprep.subr.bf16.mxu1 %v4289_v38  ;;  %v4337_v38 = vld [vmem:[%s4909_s30 + $0x3e0] sm:$0xff]  }
  0xba   : > { %3823 = vmatpush3.bf16.msra.mxu0 %v4290_v39  ;;  %v4338_v39 = vld [vmem:[%s4909_s30 + $0x320] sm:$0xff]  }
  0xbb   : > { %3845 = vmatpush3.bf16.msra.mxu1 %v4291_v40  ;;  %3852 = vmatprep.subr.bf16.mxu0 %v4292_v49  ;;  %v4339_v40 = vld [vmem:[%s4909_s30 + $0x3a0] sm:$0xff]   ;;  %v4348_v49 = vld [vmem:[%s4909_s30 + $0x348] sm:$0xff]  }
  0xbc   : > { %3874 = vmatprep.subr.bf16.mxu1 %v4293_v50  ;;  %v4349_v50 = vld [vmem:[%s4909_s30 + $0x3c8] sm:$0xff]  }
  0xbd   : > { %2719 = vmatmul.mubr.bf16.vlgmr.msra.gmra.mxu0 %v3472_v43  ;;  %v4342_v43 = vld [vmem:[%s4909_s30 + $0x318] sm:$0xff]  }
  0xbe   : > { %2760 = vmatmul.mubr.bf16.vlgmr.msra.gmra.mxu1 %v3474_v47  ;;  %3853 = vmatpush3.bf16.msra.mxu0 %v4294_v51  ;;  %v4346_v47 = vld [vmem:[%s4909_s30 + $0x310] sm:$0xff]   ;;  %v4350_v51 = vld [vmem:[%s4909_s30 + $0x308] sm:$0xff]  }
  0xbf   : > { %3875 = vmatpush3.bf16.msra.mxu1 %v4295_v52  ;;  %3854 = vmatprep.subr.bf16.mxu0 %v4296_v53  ;;  %v4351_v52 = vld [vmem:[%s4909_s30 + $0x388] sm:$0xff]   ;;  %v4352_v53 = vld [vmem:[%s4909_s30 + $0x340] sm:$0xff]  }
  0xc0   : > { %3876 = vmatprep.subr.bf16.mxu1 %v4297_v54  ;;  %2800 = vmatprep.mubr.bf16.mxu0 %v3477_v22  ;;  %v4353_v54 = vld [vmem:[%s4909_s30 + $0x3c0] sm:$0xff]   ;;  %v4377_v22 = vld [vmem:[%s4909_s30 + $0x4d0] sm:$0xff]  }
  0xc1   : > { %2841 = vmatprep.mubr.bf16.mxu1 %v3479_v24  ;;  %v4379_v24 = vld [vmem:[%s4909_s30 + $0x490] sm:$0xff]  }
  0xc2   : > { %3855 = vmatpush3.bf16.msra.mxu0 %v4298_v55  ;;  %v4354_v55 = vld [vmem:[%s4909_s30 + $0x300] sm:$0xff]  }
  0xc3   : > { %3877 = vmatpush3.bf16.msra.mxu1 %v4299_v56  ;;  %3856 = vmatprep.subr.bf16.mxu0 %v4300_v57  ;;  %v4355_v56 = vld [vmem:[%s4909_s30 + $0x380] sm:$0xff]   ;;  %v370_v57 = vld [vmem:[%s4907_s9 + $0x30] sm:$0xff] }
  0xc4   : > { %3878 = vmatprep.subr.bf16.mxu1 %v4301_v58  ;;  %v386_v58 = vld [vmem:[%s4907_s9 + $0xb0] sm:$0xff] }
  0xc6   : > { %3857 = vmatpush3.bf16.msra.mxu0 %v4302_v59  ;;  %v371_v59 = vld [vmem:[%s4907_s9 + $0x38] sm:$0xff] }
  0xc7   : > { %3879 = vmatpush3.bf16.msra.mxu1 %v4303_v60  ;;  %3858 = vmatprep.subr.bf16.mxu0 %v4304_v61  ;;  %v3480_v60 = vcombine.low %v370_v57, %v386_v58  ;;  %v3481_v61 = vcombine.high %v370_v57, %v386_v58  ;;  %v4404_v57 = vld [vmem:[%s4909_s30 + $0x558] sm:$0xff]  }
  0xc8   : > { %3880 = vmatprep.subr.bf16.mxu1 %v4305_v62  ;;  %v387_v62 = vld [vmem:[%s4907_s9 + $0xb8] sm:$0xff] }
  0xc9   : > { %v4405_v58 = vld [vmem:[%s4909_s30 + $0x5d8] sm:$0xff]  }
  0xca   : > { %3859 = vmatpush3.bf16.msra.mxu0 %v4306_v63  ;;  %v3482_v63 = vcombine.low %v371_v59, %v387_v62 }
  0xcb   : > { %3881 = vmatpush3.bf16.msra.mxu1 %v4307_v0  ;;  %3860 = vmatprep.subr.bf16.mxu0 %v4308_v1  ;;  %v3483_v0 = vcombine.high %v371_v59, %v387_v62  ;;  %v4356_v1 = vld [vmem:[%s4909_s30 + $0x478] sm:$0xff]   ;;  %v4409_v62 = vld [vmem:[%s4909_s30 + $0x5d0] sm:$0xff]  }
  0xcc   : > { %3882 = vmatprep.subr.bf16.mxu1 %v4309_v2  ;;  %v4357_v2 = vld [vmem:[%s4909_s30 + $0x4f8] sm:$0xff]  }
  0xcd   : > { %v4406_v59 = vld [vmem:[%s4909_s30 + $0x518] sm:$0xff]  }
  0xce   : > { %3861 = vmatpush3.bf16.msra.mxu0 %v4310_v3  ;;  %v4358_v3 = vld [vmem:[%s4909_s30 + $0x438] sm:$0xff]  }
  0xcf   : > { %3883 = vmatpush3.bf16.msra.mxu1 %v4311_v4  ;;  %3862 = vmatprep.subr.bf16.mxu0 %v4312_v5  ;;  %v4359_v4 = vld [vmem:[%s4909_s30 + $0x4b8] sm:$0xff]   ;;  %v4360_v5 = vld [vmem:[%s4909_s30 + $0x470] sm:$0xff]  }
  0xd0   : > { %3884 = vmatprep.subr.bf16.mxu1 %v4313_v6  ;;  %v4361_v6 = vld [vmem:[%s4909_s30 + $0x4f0] sm:$0xff]  }
  0xd2   : > { %3863 = vmatpush3.bf16.msra.mxu0 %v4314_v7  ;;  %v4362_v7 = vld [vmem:[%s4909_s30 + $0x430] sm:$0xff]  }
  0xd3   : > { %3885 = vmatpush3.bf16.msra.mxu1 %v4315_v8  ;;  %3864 = vmatprep.subr.bf16.mxu0 %v4316_v9  ;;  %v4363_v8 = vld [vmem:[%s4909_s30 + $0x4b0] sm:$0xff]   ;;  %v4364_v9 = vld [vmem:[%s4909_s30 + $0x468] sm:$0xff]  }
  0xd4   : > { %3886 = vmatprep.subr.bf16.mxu1 %v4317_v10  ;;  %v4365_v10 = vld [vmem:[%s4909_s30 + $0x4e8] sm:$0xff]  }
  0xd6   : > { %3865 = vmatpush3.bf16.msra.mxu0 %v4318_v11  ;;  %v4366_v11 = vld [vmem:[%s4909_s30 + $0x428] sm:$0xff]  }
  0xd7   : > { %3887 = vmatpush3.bf16.msra.mxu1 %v4319_v12  ;;  %3866 = vmatprep.subr.bf16.mxu0 %v4320_v13  ;;  %v4367_v12 = vld [vmem:[%s4909_s30 + $0x4a8] sm:$0xff]   ;;  %v4368_v13 = vld [vmem:[%s4909_s30 + $0x460] sm:$0xff]  }
  0xd8   : > { %3888 = vmatprep.subr.bf16.mxu1 %v4321_v14  ;;  %v4369_v14 = vld [vmem:[%s4909_s30 + $0x4e0] sm:$0xff]  }
  0xda   : > { %3867 = vmatpush3.bf16.msra.mxu0 %v4322_v15  ;;  %v4370_v15 = vld [vmem:[%s4909_s30 + $0x420] sm:$0xff]  }
  0xdb   : > { %3889 = vmatpush3.bf16.msra.mxu1 %v4323_v16  ;;  %3896 = vmatprep.subr.bf16.mxu0 %v4324_v25  ;;  %v4371_v16 = vld [vmem:[%s4909_s30 + $0x4a0] sm:$0xff]   ;;  %v4380_v25 = vld [vmem:[%s4909_s30 + $0x448] sm:$0xff]  }
  0xdc   : > { %3918 = vmatprep.subr.bf16.mxu1 %v4325_v26  ;;  %v4381_v26 = vld [vmem:[%s4909_s30 + $0x4c8] sm:$0xff]  }
  0xdd   : > { %2801 = vmatmul.mubr.bf16.vlgmr.msra.gmra.mxu0 %v3476_v21  ;;  %v4376_v21 = vld [vmem:[%s4909_s30 + $0x450] sm:$0xff]  }
  0xde   : > { %2842 = vmatmul.mubr.bf16.vlgmr.msra.gmra.mxu1 %v3478_v23  ;;  %3897 = vmatpush3.bf16.msra.mxu0 %v4326_v27  ;;  %v4378_v23 = vld [vmem:[%s4909_s30 + $0x410] sm:$0xff]   ;;  %v4382_v27 = vld [vmem:[%s4909_s30 + $0x408] sm:$0xff]  }
  0xdf   : > { %3919 = vmatpush3.bf16.msra.mxu1 %v4327_v28  ;;  %3898 = vmatprep.subr.bf16.mxu0 %v4328_v29  ;;  %v4383_v28 = vld [vmem:[%s4909_s30 + $0x488] sm:$0xff]   ;;  %v4384_v29 = vld [vmem:[%s4909_s30 + $0x440] sm:$0xff]  }
  0xe0   : > { %3920 = vmatprep.subr.bf16.mxu1 %v4329_v30  ;;  %2882 = vmatprep.mubr.bf16.mxu0 %v3481_v61  ;;  %v4385_v30 = vld [vmem:[%s4909_s30 + $0x4c0] sm:$0xff]   ;;  %v4408_v61 = vld [vmem:[%s4909_s30 + $0x550] sm:$0xff]  }
  0xe1   : > { %2923 = vmatprep.mubr.bf16.mxu1 %v3483_v0  ;;  %v4411_v0 = vld [vmem:[%s4909_s30 + $0x590] sm:$0xff]  }
  0xe2   : > { %3899 = vmatpush3.bf16.msra.mxu0 %v4330_v31  ;;  %v4386_v31 = vld [vmem:[%s4909_s30 + $0x400] sm:$0xff]  }
  0xe3   : > { %3921 = vmatpush3.bf16.msra.mxu1 %v4331_v32  ;;  %3900 = vmatprep.subr.bf16.mxu0 %v4332_v33  ;;  %v4387_v32 = vld [vmem:[%s4909_s30 + $0x480] sm:$0xff]  }
  0xe4   : > { %3922 = vmatprep.subr.bf16.mxu1 %v4333_v34  ;;  %v372_v33 = vld [vmem:[%s4907_s9 + $0x40] sm:$0xff] }
  0xe5   : > { %v388_v34 = vld [vmem:[%s4907_s9 + $0xc0] sm:$0xff] }
  0xe6   : > { %3901 = vmatpush3.bf16.msra.mxu0 %v4334_v35  ;;  %v3484_v35 = vcombine.low %v372_v33, %v388_v34 }
  0xe7   : > { %3923 = vmatpush3.bf16.msra.mxu1 %v4335_v36  ;;  %3902 = vmatprep.subr.bf16.mxu0 %v4336_v37  ;;  %v3485_v36 = vcombine.high %v372_v33, %v388_v34  ;;  %v373_v37 = vld [vmem:[%s4907_s9 + $0x48] sm:$0xff]  ;;  %v4436_v33 = vld [vmem:[%s4909_s30 + $0x658] sm:$0xff]  }
  0xe8   : > { %3924 = vmatprep.subr.bf16.mxu1 %v4337_v38  ;;  %v389_v38 = vld [vmem:[%s4907_s9 + $0xc8] sm:$0xff]  ;;  %v4437_v34 = vld [vmem:[%s4909_s30 + $0x6d8] sm:$0xff]  }
  0xea   : > { %3903 = vmatpush3.bf16.msra.mxu0 %v4338_v39  ;;  %v3486_v39 = vcombine.low %v373_v37, %v389_v38 }
  0xeb   : > { %3925 = vmatpush3.bf16.msra.mxu1 %v4339_v40  ;;  %3904 = vmatprep.subr.bf16.mxu0 %v4340_v41  ;;  %v3487_v40 = vcombine.high %v373_v37, %v389_v38  ;;  %v4388_v41 = vld [vmem:[%s4909_s30 + $0x578] sm:$0xff]   ;;  %v4440_v37 = vld [vmem:[%s4909_s30 + $0x650] sm:$0xff]  }
  0xec   : > { %3926 = vmatprep.subr.bf16.mxu1 %v4341_v42  ;;  %v4389_v42 = vld [vmem:[%s4909_s30 + $0x5f8] sm:$0xff]   ;;  %v4441_v38 = vld [vmem:[%s4909_s30 + $0x6d0] sm:$0xff]  }
  0xee   : > { %3905 = vmatpush3.bf16.msra.mxu0 %v4342_v43  ;;  %v4390_v43 = vld [vmem:[%s4909_s30 + $0x538] sm:$0xff]  }
  0xef   : > { %3927 = vmatpush3.bf16.msra.mxu1 %v4343_v44  ;;  %3906 = vmatprep.subr.bf16.mxu0 %v4344_v45  ;;  %v4391_v44 = vld [vmem:[%s4909_s30 + $0x5b8] sm:$0xff]   ;;  %v4392_v45 = vld [vmem:[%s4909_s30 + $0x570] sm:$0xff]  }
  0xf0   : > { %3928 = vmatprep.subr.bf16.mxu1 %v4345_v46  ;;  %v4393_v46 = vld [vmem:[%s4909_s30 + $0x5f0] sm:$0xff]  }
  0xf2   : > { %3907 = vmatpush3.bf16.msra.mxu0 %v4346_v47  ;;  %v4394_v47 = vld [vmem:[%s4909_s30 + $0x530] sm:$0xff]  }
  0xf3   : > { %3929 = vmatpush3.bf16.msra.mxu1 %v4347_v48  ;;  %3908 = vmatprep.subr.bf16.mxu0 %v4348_v49  ;;  %v4395_v48 = vld [vmem:[%s4909_s30 + $0x5b0] sm:$0xff]   ;;  %v4396_v49 = vld [vmem:[%s4909_s30 + $0x568] sm:$0xff]  }
  0xf4   : > { %3930 = vmatprep.subr.bf16.mxu1 %v4349_v50  ;;  %v4397_v50 = vld [vmem:[%s4909_s30 + $0x5e8] sm:$0xff]  }
  0xf6   : > { %3909 = vmatpush3.bf16.msra.mxu0 %v4350_v51  ;;  %v4398_v51 = vld [vmem:[%s4909_s30 + $0x528] sm:$0xff]  }
  0xf7   : > { %3931 = vmatpush3.bf16.msra.mxu1 %v4351_v52  ;;  %3910 = vmatprep.subr.bf16.mxu0 %v4352_v53  ;;  %v4399_v52 = vld [vmem:[%s4909_s30 + $0x5a8] sm:$0xff]   ;;  %v4400_v53 = vld [vmem:[%s4909_s30 + $0x560] sm:$0xff]  }
  0xf8   : > { %3932 = vmatprep.subr.bf16.mxu1 %v4353_v54  ;;  %v4401_v54 = vld [vmem:[%s4909_s30 + $0x5e0] sm:$0xff]  }
  0xfa   : > { %3911 = vmatpush3.bf16.msra.mxu0 %v4354_v55  ;;  %v4402_v55 = vld [vmem:[%s4909_s30 + $0x520] sm:$0xff]  }
  0xfb   : > { %3933 = vmatpush3.bf16.msra.mxu1 %v4355_v56  ;;  %3940 = vmatprep.subr.bf16.mxu0 %v4356_v1  ;;  %v4403_v56 = vld [vmem:[%s4909_s30 + $0x5a0] sm:$0xff]   ;;  %v4412_v1 = vld [vmem:[%s4909_s30 + $0x548] sm:$0xff]  }
  0xfc   : > { %3962 = vmatprep.subr.bf16.mxu1 %v4357_v2  ;;  %v4413_v2 = vld [vmem:[%s4909_s30 + $0x5c8] sm:$0xff]  }
  0xfd   : > { %2883 = vmatmul.mubr.bf16.vlgmr.msra.gmra.mxu0 %v3480_v60  ;;  %v4407_v60 = vld [vmem:[%s4909_s30 + $0x598] sm:$0xff]  }
  0xfe   : > { %2924 = vmatmul.mubr.bf16.vlgmr.msra.gmra.mxu1 %v3482_v63  ;;  %3941 = vmatpush3.bf16.msra.mxu0 %v4358_v3  ;;  %v4410_v63 = vld [vmem:[%s4909_s30 + $0x510] sm:$0xff]   ;;  %v4414_v3 = vld [vmem:[%s4909_s30 + $0x508] sm:$0xff]  }
  0xff   : > { %3963 = vmatpush3.bf16.msra.mxu1 %v4359_v4  ;;  %3942 = vmatprep.subr.bf16.mxu0 %v4360_v5  ;;  %v4415_v4 = vld [vmem:[%s4909_s30 + $0x588] sm:$0xff]   ;;  %v4416_v5 = vld [vmem:[%s4909_s30 + $0x540] sm:$0xff]  }
 0x100   : > { %3964 = vmatprep.subr.bf16.mxu1 %v4361_v6  ;;  %2964 = vmatprep.mubr.bf16.mxu0 %v3485_v36  ;;  %v4417_v6 = vld [vmem:[%s4909_s30 + $0x5c0] sm:$0xff]   ;;  %v4439_v36 = vld [vmem:[%s4909_s30 + $0x698] sm:$0xff]  }
 0x101   : > { %3005 = vmatprep.mubr.bf16.mxu1 %v3487_v40  ;;  %v4443_v40 = vld [vmem:[%s4909_s30 + $0x690] sm:$0xff]  }
 0x102   : > { %3943 = vmatpush3.bf16.msra.mxu0 %v4362_v7  ;;  %v4418_v7 = vld [vmem:[%s4909_s30 + $0x500] sm:$0xff]  }
 0x103   : > { %3965 = vmatpush3.bf16.msra.mxu1 %v4363_v8  ;;  %3944 = vmatprep.subr.bf16.mxu0 %v4364_v9  ;;  %v4419_v8 = vld [vmem:[%s4909_s30 + $0x580] sm:$0xff]   ;;  %v374_v9 = vld [vmem:[%s4907_s9 + $0x50] sm:$0xff] }
 0x104   : > { %3966 = vmatprep.subr.bf16.mxu1 %v4365_v10  ;;  %v390_v10 = vld [vmem:[%s4907_s9 + $0xd0] sm:$0xff] }
 0x106   : > { %3945 = vmatpush3.bf16.msra.mxu0 %v4366_v11  ;;  %v375_v11 = vld [vmem:[%s4907_s9 + $0x58] sm:$0xff] }
 0x107   : > { %3967 = vmatpush3.bf16.msra.mxu1 %v4367_v12  ;;  %3946 = vmatprep.subr.bf16.mxu0 %v4368_v13  ;;  %v391_v12 = vld [vmem:[%s4907_s9 + $0xd8] sm:$0xff]  ;;  %v3488_v13 = vcombine.low %v374_v9, %v390_v10 }
 0x108   : > { %3968 = vmatprep.subr.bf16.mxu1 %v4369_v14  ;;  %v3489_v14 = vcombine.high %v374_v9, %v390_v10  ;;  %v4468_v9 = vld [vmem:[%s4909_s30 + $0x758] sm:$0xff]  }
 0x109   : > { %v4469_v10 = vld [vmem:[%s4909_s30 + $0x7d8] sm:$0xff]  }
 0x10a   : > { %3947 = vmatpush3.bf16.msra.mxu0 %v4370_v15  ;;  %v3490_v15 = vcombine.low %v375_v11, %v391_v12 }
 0x10b   : > { %3969 = vmatpush3.bf16.msra.mxu1 %v4371_v16  ;;  %3948 = vmatprep.subr.bf16.mxu0 %v4372_v17  ;;  %v3491_v16 = vcombine.high %v375_v11, %v391_v12  ;;  %v4420_v17 = vld [vmem:[%s4909_s30 + $0x678] sm:$0xff]  }
 0x10c   : > { %3970 = vmatprep.subr.bf16.mxu1 %v4373_v18  ;;  %v4421_v18 = vld [vmem:[%s4909_s30 + $0x6f8] sm:$0xff]  }
 0x10d   : > { %v4470_v11 = vld [vmem:[%s4909_s30 + $0x718] sm:$0xff]  }
 0x10e   : > { %3949 = vmatpush3.bf16.msra.mxu0 %v4374_v19  ;;  %v4422_v19 = vld [vmem:[%s4909_s30 + $0x638] sm:$0xff]  }
 0x10f   : > { %3971 = vmatpush3.bf16.msra.mxu1 %v4375_v20  ;;  %3950 = vmatprep.subr.bf16.mxu0 %v4376_v21  ;;  %v4423_v20 = vld [vmem:[%s4909_s30 + $0x6b8] sm:$0xff]   ;;  %v4424_v21 = vld [vmem:[%s4909_s30 + $0x670] sm:$0xff]  }
 0x110   : > { %3972 = vmatprep.subr.bf16.mxu1 %v4377_v22  ;;  %v4425_v22 = vld [vmem:[%s4909_s30 + $0x6f0] sm:$0xff]   ;;  %v4471_v12 = vld [vmem:[%s4909_s30 + $0x798] sm:$0xff]  }
 0x112   : > { %3951 = vmatpush3.bf16.msra.mxu0 %v4378_v23  ;;  %v4426_v23 = vld [vmem:[%s4909_s30 + $0x630] sm:$0xff]  }
 0x113   : > { %3973 = vmatpush3.bf16.msra.mxu1 %v4379_v24  ;;  %3952 = vmatprep.subr.bf16.mxu0 %v4380_v25  ;;  %v4427_v24 = vld [vmem:[%s4909_s30 + $0x6b0] sm:$0xff]   ;;  %v4428_v25 = vld [vmem:[%s4909_s30 + $0x668] sm:$0xff]  }
 0x114   : > { %3974 = vmatprep.subr.bf16.mxu1 %v4381_v26  ;;  %v4429_v26 = vld [vmem:[%s4909_s30 + $0x6e8] sm:$0xff]  }
 0x116   : > { %3953 = vmatpush3.bf16.msra.mxu0 %v4382_v27  ;;  %v4430_v27 = vld [vmem:[%s4909_s30 + $0x628] sm:$0xff]  }
 0x117   : > { %3975 = vmatpush3.bf16.msra.mxu1 %v4383_v28  ;;  %3954 = vmatprep.subr.bf16.mxu0 %v4384_v29  ;;  %v4431_v28 = vld [vmem:[%s4909_s30 + $0x6a8] sm:$0xff]   ;;  %v4432_v29 = vld [vmem:[%s4909_s30 + $0x660] sm:$0xff]  }
 0x118   : > { %3976 = vmatprep.subr.bf16.mxu1 %v4385_v30  ;;  %v4433_v30 = vld [vmem:[%s4909_s30 + $0x6e0] sm:$0xff]  }
 0x11a   : > { %3955 = vmatpush3.bf16.msra.mxu0 %v4386_v31  ;;  %v4434_v31 = vld [vmem:[%s4909_s30 + $0x620] sm:$0xff]  }
 0x11b   : > { %3977 = vmatpush3.bf16.msra.mxu1 %v4387_v32  ;;  %3984 = vmatprep.subr.bf16.mxu0 %v4388_v41  ;;  %v4435_v32 = vld [vmem:[%s4909_s30 + $0x6a0] sm:$0xff]   ;;  %v4444_v41 = vld [vmem:[%s4909_s30 + $0x648] sm:$0xff]  }
 0x11c   : > { %4006 = vmatprep.subr.bf16.mxu1 %v4389_v42  ;;  %v4445_v42 = vld [vmem:[%s4909_s30 + $0x6c8] sm:$0xff]  }
 0x11d   : > { %2965 = vmatmul.mubr.bf16.vlgmr.msra.gmra.mxu0 %v3484_v35  ;;  %v4438_v35 = vld [vmem:[%s4909_s30 + $0x618] sm:$0xff]  }
 0x11e   : > { %3006 = vmatmul.mubr.bf16.vlgmr.msra.gmra.mxu1 %v3486_v39  ;;  %3985 = vmatpush3.bf16.msra.mxu0 %v4390_v43  ;;  %v4442_v39 = vld [vmem:[%s4909_s30 + $0x610] sm:$0xff]   ;;  %v4446_v43 = vld [vmem:[%s4909_s30 + $0x608] sm:$0xff]  }
 0x11f   : > { %4007 = vmatpush3.bf16.msra.mxu1 %v4391_v44  ;;  %3986 = vmatprep.subr.bf16.mxu0 %v4392_v45  ;;  %v4447_v44 = vld [vmem:[%s4909_s30 + $0x688] sm:$0xff]   ;;  %v4448_v45 = vld [vmem:[%s4909_s30 + $0x640] sm:$0xff]  }
 0x120   : > { %4008 = vmatprep.subr.bf16.mxu1 %v4393_v46  ;;  %3046 = vmatprep.mubr.bf16.mxu0 %v3489_v14  ;;  %v4449_v46 = vld [vmem:[%s4909_s30 + $0x6c0] sm:$0xff]   ;;  %v4473_v14 = vld [vmem:[%s4909_s30 + $0x7d0] sm:$0xff]  }
 0x121   : > { %3087 = vmatprep.mubr.bf16.mxu1 %v3491_v16  ;;  %v4475_v16 = vld [vmem:[%s4909_s30 + $0x790] sm:$0xff]  }
 0x122   : > { %3987 = vmatpush3.bf16.msra.mxu0 %v4394_v47  ;;  %v4450_v47 = vld [vmem:[%s4909_s30 + $0x600] sm:$0xff]  }
 0x123   : > { %4009 = vmatpush3.bf16.msra.mxu1 %v4395_v48  ;;  %3988 = vmatprep.subr.bf16.mxu0 %v4396_v49  ;;  %v4451_v48 = vld [vmem:[%s4909_s30 + $0x680] sm:$0xff]  }
 0x124   : > { %4010 = vmatprep.subr.bf16.mxu1 %v4397_v50  ;;  %v376_v49 = vld [vmem:[%s4907_s9 + $0x60] sm:$0xff] }
 0x125   : > { %v392_v50 = vld [vmem:[%s4907_s9 + $0xe0] sm:$0xff] }
 0x126   : > { %3989 = vmatpush3.bf16.msra.mxu0 %v4398_v51  ;;  %v377_v51 = vld [vmem:[%s4907_s9 + $0x68] sm:$0xff] }
 0x127   : > { %4011 = vmatpush3.bf16.msra.mxu1 %v4399_v52  ;;  %3990 = vmatprep.subr.bf16.mxu0 %v4400_v53  ;;  %v3492_v52 = vcombine.low %v376_v49, %v392_v50  ;;  %v3493_v53 = vcombine.high %v376_v49, %v392_v50 }
 0x128   : > { %4012 = vmatprep.subr.bf16.mxu1 %v4401_v54  ;;  %v393_v54 = vld [vmem:[%s4907_s9 + $0xe8] sm:$0xff] }
 0x12a   : > { %3991 = vmatpush3.bf16.msra.mxu0 %v4402_v55  ;;  %v3494_v55 = vcombine.low %v377_v51, %v393_v54 }
 0x12b   : > { %4013 = vmatpush3.bf16.msra.mxu1 %v4403_v56  ;;  %3992 = vmatprep.subr.bf16.mxu0 %v4404_v57  ;;  %v3495_v56 = vcombine.high %v377_v51, %v393_v54  ;;  %v4452_v57 = vld [vmem:[%s4909_s30 + $0x778] sm:$0xff]  }
 0x12c   : > { %4014 = vmatprep.subr.bf16.mxu1 %v4405_v58  ;;  %v4453_v58 = vld [vmem:[%s4909_s30 + $0x7f8] sm:$0xff]  }
 0x12e   : > { %3993 = vmatpush3.bf16.msra.mxu0 %v4406_v59  ;;  %v4454_v59 = vld [vmem:[%s4909_s30 + $0x738] sm:$0xff]  }
 0x12f   : > { %4015 = vmatpush3.bf16.msra.mxu1 %v4407_v60  ;;  %3994 = vmatprep.subr.bf16.mxu0 %v4408_v61  ;;  %v4455_v60 = vld [vmem:[%s4909_s30 + $0x7b8] sm:$0xff]   ;;  %v4456_v61 = vld [vmem:[%s4909_s30 + $0x770] sm:$0xff]  }
 0x130   : > { %4016 = vmatprep.subr.bf16.mxu1 %v4409_v62  ;;  %v4457_v62 = vld [vmem:[%s4909_s30 + $0x7f0] sm:$0xff]  }
 0x132   : > { %3995 = vmatpush3.bf16.msra.mxu0 %v4410_v63  ;;  %v4458_v63 = vld [vmem:[%s4909_s30 + $0x730] sm:$0xff]  }
 0x133   : > { %4017 = vmatpush3.bf16.msra.mxu1 %v4411_v0  ;;  %3996 = vmatprep.subr.bf16.mxu0 %v4412_v1  ;;  %v4459_v0 = vld [vmem:[%s4909_s30 + $0x7b0] sm:$0xff]   ;;  %v4460_v1 = vld [vmem:[%s4909_s30 + $0x768] sm:$0xff]  }
 0x134   : > { %4018 = vmatprep.subr.bf16.mxu1 %v4413_v2  ;;  %v4461_v2 = vld [vmem:[%s4909_s30 + $0x7e8] sm:$0xff]  }
 0x136   : > { %3997 = vmatpush3.bf16.msra.mxu0 %v4414_v3  ;;  %v4462_v3 = vld [vmem:[%s4909_s30 + $0x728] sm:$0xff]  }
 0x137   : > { %4019 = vmatpush3.bf16.msra.mxu1 %v4415_v4  ;;  %3998 = vmatprep.subr.bf16.mxu0 %v4416_v5  ;;  %v4463_v4 = vld [vmem:[%s4909_s30 + $0x7a8] sm:$0xff]   ;;  %v4464_v5 = vld [vmem:[%s4909_s30 + $0x760] sm:$0xff]  }
 0x138   : > { %4020 = vmatprep.subr.bf16.mxu1 %v4417_v6  ;;  %v4465_v6 = vld [vmem:[%s4909_s30 + $0x7e0] sm:$0xff]  }
 0x13a   : > { %3999 = vmatpush3.bf16.msra.mxu0 %v4418_v7  ;;  %v4466_v7 = vld [vmem:[%s4909_s30 + $0x720] sm:$0xff]  }
 0x13b   : > { %4021 = vmatpush3.bf16.msra.mxu1 %v4419_v8  ;;  %4028 = vmatprep.subr.bf16.mxu0 %v4420_v17  ;;  %v4467_v8 = vld [vmem:[%s4909_s30 + $0x7a0] sm:$0xff]   ;;  %v4476_v17 = vld [vmem:[%s4909_s30 + $0x748] sm:$0xff]  }
 0x13c   : > { %4050 = vmatprep.subr.bf16.mxu1 %v4421_v18  ;;  %v4477_v18 = vld [vmem:[%s4909_s30 + $0x7c8] sm:$0xff]  }
 0x13d   : > { %3047 = vmatmul.mubr.bf16.vlgmr.msra.gmra.mxu0 %v3488_v13  ;;  %v4472_v13 = vld [vmem:[%s4909_s30 + $0x750] sm:$0xff]  }
 0x13e   : > { %3088 = vmatmul.mubr.bf16.vlgmr.msra.gmra.mxu1 %v3490_v15  ;;  %4029 = vmatpush3.bf16.msra.mxu0 %v4422_v19  ;;  %v4474_v15 = vld [vmem:[%s4909_s30 + $0x710] sm:$0xff]   ;;  %v4478_v19 = vld [vmem:[%s4909_s30 + $0x708] sm:$0xff]  }
 0x13f   : > { %4051 = vmatpush3.bf16.msra.mxu1 %v4423_v20  ;;  %4030 = vmatprep.subr.bf16.mxu0 %v4424_v21  ;;  %v4479_v20 = vld [vmem:[%s4909_s30 + $0x788] sm:$0xff]   ;;  %v4480_v21 = vld [vmem:[%s4909_s30 + $0x740] sm:$0xff]  }
 0x140   : > { %4052 = vmatprep.subr.bf16.mxu1 %v4425_v22  ;;  %3128 = vmatprep.mubr.bf16.mxu0 %v3493_v53  ;;  %v4481_v22 = vld [vmem:[%s4909_s30 + $0x7c0] sm:$0xff]  }
 0x141   : > { %3169 = vmatprep.mubr.bf16.mxu1 %v3495_v56 }
 0x142   : > { %4031 = vmatpush3.bf16.msra.mxu0 %v4426_v23  ;;  %v4482_v23 = vld [vmem:[%s4909_s30 + $0x700] sm:$0xff]  }
 0x143   : > { %4053 = vmatpush3.bf16.msra.mxu1 %v4427_v24  ;;  %4032 = vmatprep.subr.bf16.mxu0 %v4428_v25  ;;  %v4483_v24 = vld [vmem:[%s4909_s30 + $0x780] sm:$0xff]   ;;  %v378_v25 = vld [vmem:[%s4907_s9 + $0x70] sm:$0xff] }
 0x144   : > { %4054 = vmatprep.subr.bf16.mxu1 %v4429_v26  ;;  %v394_v26 = vld [vmem:[%s4907_s9 + $0xf0] sm:$0xff] }
 0x146   : > { %4033 = vmatpush3.bf16.msra.mxu0 %v4430_v27  ;;  %v3496_v27 = vcombine.low %v378_v25, %v394_v26 }
 0x147   : > { %4055 = vmatpush3.bf16.msra.mxu1 %v4431_v28  ;;  %4034 = vmatprep.subr.bf16.mxu0 %v4432_v29  ;;  %v3497_v28 = vcombine.high %v378_v25, %v394_v26  ;;  %v379_v29 = vld [vmem:[%s4907_s9 + $0x78] sm:$0xff] }
 0x148   : > { %4056 = vmatprep.subr.bf16.mxu1 %v4433_v30  ;;  %v395_v30 = vld [vmem:[%s4907_s9 + $0xf8] sm:$0xff] }
 0x14a   : > { %4035 = vmatpush3.bf16.msra.mxu0 %v4434_v31  ;;  %v3498_v31 = vcombine.low %v379_v29, %v395_v30 }
 0x14b   : > { %4057 = vmatpush3.bf16.msra.mxu1 %v4435_v32  ;;  %4036 = vmatprep.subr.bf16.mxu0 %v4436_v33  ;;  %v3499_v32 = vcombine.high %v379_v29, %v395_v30 }
 0x14c   : > { %4058 = vmatprep.subr.bf16.mxu1 %v4437_v34 }
 0x14e   : > { %4037 = vmatpush3.bf16.msra.mxu0 %v4438_v35 }
 0x14f   : > { %4059 = vmatpush3.bf16.msra.mxu1 %v4439_v36  ;;  %4038 = vmatprep.subr.bf16.mxu0 %v4440_v37 }
 0x150   : > { %4060 = vmatprep.subr.bf16.mxu1 %v4441_v38 }
 0x152   : > { %4039 = vmatpush3.bf16.msra.mxu0 %v4442_v39 }
 0x153   : > { %4061 = vmatpush3.bf16.msra.mxu1 %v4443_v40  ;;  %4040 = vmatprep.subr.bf16.mxu0 %v4444_v41 }
 0x154   : > { %4062 = vmatprep.subr.bf16.mxu1 %v4445_v42 }
 0x156   : > { %4041 = vmatpush3.bf16.msra.mxu0 %v4446_v43 }
 0x157   : > { %4063 = vmatpush3.bf16.msra.mxu1 %v4447_v44  ;;  %4042 = vmatprep.subr.bf16.mxu0 %v4448_v45 }
 0x158   : > { %4064 = vmatprep.subr.bf16.mxu1 %v4449_v46 }
 0x15a   : > { %4043 = vmatpush3.bf16.msra.mxu0 %v4450_v47 }
 0x15b   : > { %4065 = vmatpush3.bf16.msra.mxu1 %v4451_v48  ;;  %4072 = vmatprep.subr.bf16.mxu0 %v4452_v57 }
 0x15c   : > { %4094 = vmatprep.subr.bf16.mxu1 %v4453_v58 }
 0x15d   : > { %3129 = vmatmul.mubr.bf16.vlgmr.msra.gmra.mxu0 %v3492_v52  ;;  %v3780_v33 = vpop.f32.mrf.mxu0 }
 0x15e   : > { %3170 = vmatmul.mubr.bf16.vlgmr.msra.gmra.mxu1 %v3494_v55  ;;  %4073 = vmatpush3.bf16.msra.mxu0 %v4454_v59  ;;  %v3802_v34 = vpop.f32.mrf.mxu1 }
 0x15f   : > { %4095 = vmatpush3.bf16.msra.mxu1 %v4455_v60  ;;  %4074 = vmatprep.subr.bf16.mxu0 %v4456_v61  ;;  %v3781_v35 = vpop.f32.mrf.mxu0 }
 0x160   : > { %4096 = vmatprep.subr.bf16.mxu1 %v4457_v62  ;;  %3210 = vmatprep.mubr.bf16.mxu0 %v3497_v28  ;;  %v3803_v36 = vpop.f32.mrf.mxu1 }
 0x161   : > { %3251 = vmatprep.mubr.bf16.mxu1 %v3499_v32  ;;  %v3783_v37 = vpop.f32.mrf.mxu0 }
 0x162   : > { %4075 = vmatpush3.bf16.msra.mxu0 %v4458_v63  ;;  %v3805_v38 = vpop.f32.mrf.mxu1 }
 0x163   : > { %4097 = vmatpush3.bf16.msra.mxu1 %v4459_v0  ;;  %4076 = vmatprep.subr.bf16.mxu0 %v4460_v1  ;;  %v3784_v39 = vpop.f32.mrf.mxu0 }
 0x164   : > { %4098 = vmatprep.subr.bf16.mxu1 %v4461_v2  ;;  %v3806_v41 = vpop.f32.mrf.mxu1 }
 0x166   : > { %4077 = vmatpush3.bf16.msra.mxu0 %v4462_v3 }
 0x167   : > { %4099 = vmatpush3.bf16.msra.mxu1 %v4463_v4  ;;  %4078 = vmatprep.subr.bf16.mxu0 %v4464_v5  ;;  %v3782_v4 = vadd.f32 %v3781_v35, %v3780_v33  ;;  %v3804_v5 = vadd.f32 %v3803_v36, %v3802_v34 }
 0x168   : > { %4100 = vmatprep.subr.bf16.mxu1 %v4465_v6 }
 0x16a   : > { %4079 = vmatpush3.bf16.msra.mxu0 %v4466_v7 }
 0x16b   : > { %4101 = vmatpush3.bf16.msra.mxu1 %v4467_v8  ;;  %4080 = vmatprep.subr.bf16.mxu0 %v4468_v9  ;;  %v2680_v9 = vadd.f32 %v3804_v5, %v3782_v4 }
 0x16c   : > { %4102 = vmatprep.subr.bf16.mxu1 %v4469_v10  ;;  %v3785_v10 = vadd.f32 %v3784_v39, %v3783_v37 }
 0x16e   : > { %4081 = vmatpush3.bf16.msra.mxu0 %v4470_v11  ;;  %v3807_v11 = vadd.f32 %v3806_v41, %v3805_v38 }
 0x16f   : > { %4103 = vmatpush3.bf16.msra.mxu1 %v4471_v12  ;;  %4082 = vmatprep.subr.bf16.mxu0 %v4472_v13 }
 0x170   : > { %4104 = vmatprep.subr.bf16.mxu1 %v4473_v14 }
 0x172   : > { %4083 = vmatpush3.bf16.msra.mxu0 %v4474_v15 }
 0x173   : > { %4105 = vmatpush3.bf16.msra.mxu1 %v4475_v16  ;;  %4084 = vmatprep.subr.bf16.mxu0 %v4476_v17 }
 0x174   : > { %4106 = vmatprep.subr.bf16.mxu1 %v4477_v18  ;;  %v2683_v18 = vadd.f32 %v3807_v11, %v3785_v10 }
 0x176   : > { %4085 = vmatpush3.bf16.msra.mxu0 %v4478_v19 }
 0x177   : > { %4107 = vmatpush3.bf16.msra.mxu1 %v4479_v20  ;;  %4086 = vmatprep.subr.bf16.mxu0 %v4480_v21 }
 0x178   : > { %4108 = vmatprep.subr.bf16.mxu1 %v4481_v22 }
 0x17a   : > { %4087 = vmatpush3.bf16.msra.mxu0 %v4482_v23 }
 0x17b   : > { %4109 = vmatpush3.bf16.msra.mxu1 %v4483_v24 }
 0x17d   : > { %3211 = vmatmul.mubr.bf16.vlgmr.msra.gmra.mxu0 %v3496_v27  ;;  %v3824_v40 = vpop.f32.mrf.mxu0 }
 0x17e   : > { %3252 = vmatmul.mubr.bf16.vlgmr.msra.gmra.mxu1 %v3498_v31  ;;  %v3846_v42 = vpop.f32.mrf.mxu1 }
 0x17f   : > { %v3825_v43 = vpop.f32.mrf.mxu0 }
 0x180   : > { %v3847_v44 = vpop.f32.mrf.mxu1  ;;  %v3826_v8 = vadd.f32 %v3825_v43, %v3824_v40 }
 0x181   : > { %v3827_v45 = vpop.f32.mrf.mxu0  ;;  %v3848_v15 = vadd.f32 %v3847_v44, %v3846_v42 }
 0x182   : > { %v3849_v46 = vpop.f32.mrf.mxu1  ;;  %v2721_v14 = vadd.f32 %v3826_v8, %v2680_v9 }
 0x183   : > { %v3828_v47 = vpop.f32.mrf.mxu0 }
 0x184   : > { %v3850_v49 = vpop.f32.mrf.mxu1  ;;  %v3829_v16 = vadd.f32 %v3828_v47, %v3827_v45  ;;  %v2762_v21 = vadd.f32 %v3848_v15, %v2721_v14 }
 0x185   : > { %v3851_v25 = vadd.f32 %v3850_v49, %v3849_v46 }
 0x186   : > { %v2724_v22 = vadd.f32 %v3829_v16, %v2683_v18 }
 0x188   : > { %v2765_v29 = vadd.f32 %v3851_v25, %v2724_v22 }
 0x19d   : > { %v3868_v48 = vpop.f32.mrf.mxu0 }
 0x19e   : > { %v3890_v50 = vpop.f32.mrf.mxu1 }
 0x19f   : > { %v3869_v51 = vpop.f32.mrf.mxu0 }
 0x1a0   : > { %v3891_v52 = vpop.f32.mrf.mxu1  ;;  %v3870_v19 = vadd.f32 %v3869_v51, %v3868_v48 }
 0x1a1   : > { %v3871_v53 = vpop.f32.mrf.mxu0  ;;  %v3892_v27 = vadd.f32 %v3891_v52, %v3890_v50 }
 0x1a2   : > { %v3893_v54 = vpop.f32.mrf.mxu1  ;;  %v2803_v26 = vadd.f32 %v3870_v19, %v2762_v21 }
 0x1a3   : > { %v3872_v55 = vpop.f32.mrf.mxu0 }
 0x1a4   : > { %v3894_v57 = vpop.f32.mrf.mxu1  ;;  %v3873_v28 = vadd.f32 %v3872_v55, %v3871_v53  ;;  %v2844_v33 = vadd.f32 %v3892_v27, %v2803_v26 }
 0x1a5   : > { %v3895_v35 = vadd.f32 %v3894_v57, %v3893_v54 }
 0x1a6   : > { %v2806_v34 = vadd.f32 %v3873_v28, %v2765_v29 }
 0x1a8   : > { %v2847_v41 = vadd.f32 %v3895_v35, %v2806_v34 }
 0x1bd   : > { %v3912_v56 = vpop.f32.mrf.mxu0 }
 0x1be   : > { %v3934_v58 = vpop.f32.mrf.mxu1 }
 0x1bf   : > { %v3913_v59 = vpop.f32.mrf.mxu0 }
 0x1c0   : > { %v3935_v60 = vpop.f32.mrf.mxu1  ;;  %v3914_v30 = vadd.f32 %v3913_v59, %v3912_v56 }
 0x1c1   : > { %v3915_v61 = vpop.f32.mrf.mxu0  ;;  %v3936_v37 = vadd.f32 %v3935_v60, %v3934_v58 }
 0x1c2   : > { %v3937_v62 = vpop.f32.mrf.mxu1  ;;  %v2885_v36 = vadd.f32 %v3914_v30, %v2844_v33 }
 0x1c3   : > { %v3916_v63 = vpop.f32.mrf.mxu0 }
 0x1c4   : > { %v3938_v1 = vpop.f32.mrf.mxu1  ;;  %v3917_v38 = vadd.f32 %v3916_v63, %v3915_v61  ;;  %v2926_v44 = vadd.f32 %v3936_v37, %v2885_v36 }
 0x1c5   : > { %v3939_v47 = vadd.f32 %v3938_v1, %v3937_v62 }
 0x1c6   : > { %v2888_v45 = vadd.f32 %v3917_v38, %v2847_v41 }
 0x1c8   : > { %v2929_v53 = vadd.f32 %v3939_v47, %v2888_v45 }
 0x1dd   : > { %v3956_v0 = vpop.f32.mrf.mxu0 }
 0x1de   : > { %v3978_v2 = vpop.f32.mrf.mxu1 }
 0x1df   : > { %v3957_v3 = vpop.f32.mrf.mxu0 }
 0x1e0   : > { %v3979_v6 = vpop.f32.mrf.mxu1  ;;  %v3958_v42 = vadd.f32 %v3957_v3, %v3956_v0 }
 0x1e1   : > { %v3959_v7 = vpop.f32.mrf.mxu0  ;;  %v3980_v49 = vadd.f32 %v3979_v6, %v3978_v2 }
 0x1e2   : > { %v3981_v12 = vpop.f32.mrf.mxu1  ;;  %v2967_v48 = vadd.f32 %v3958_v42, %v2926_v44 }
 0x1e3   : > { %v3960_v13 = vpop.f32.mrf.mxu0 }
 0x1e4   : > { %v3982_v20 = vpop.f32.mrf.mxu1  ;;  %v3961_v50 = vadd.f32 %v3960_v13, %v3959_v7  ;;  %v3008_v54 = vadd.f32 %v3980_v49, %v2967_v48 }
 0x1e5   : > { %v3983_v59 = vadd.f32 %v3982_v20, %v3981_v12 }
 0x1e6   : > { %v2970_v56 = vadd.f32 %v3961_v50, %v2929_v53 }
 0x1e8   : > { %v3011_v0 = vadd.f32 %v3983_v59, %v2970_v56 }
 0x1fd   : > { %v4000_v17 = vpop.f32.mrf.mxu0 }
 0x1fe   : > { %v4022_v23 = vpop.f32.mrf.mxu1 }
 0x1ff   : > { %v4001_v24 = vpop.f32.mrf.mxu0 }
 0x200   : > { %v4023_v31 = vpop.f32.mrf.mxu1  ;;  %v4002_v55 = vadd.f32 %v4001_v24, %v4000_v17 }
 0x201   : > { %v4003_v32 = vpop.f32.mrf.mxu0  ;;  %v4024_v61 = vadd.f32 %v4023_v31, %v4022_v23  ;;  %v362_v23 = vld [vmem:[#allocation2] sm:$0xff] }
 0x202   : > { %v4025_v39 = vpop.f32.mrf.mxu1  ;;  %v3049_v60 = vadd.f32 %v4002_v55, %v3008_v54 }
 0x203   : > { %v4004_v40 = vpop.f32.mrf.mxu0 }
 0x204   : > { %v4026_v46 = vpop.f32.mrf.mxu1  ;;  %v4005_v63 = vadd.f32 %v4004_v40, %v4003_v32  ;;  %v3090_v62 = vadd.f32 %v4024_v61, %v3049_v60  ;;  %v363_v32 = vld [vmem:[#allocation2 + $0x8] sm:$0xff] }
 0x205   : > { %v4027_v2 = vadd.f32 %v4026_v46, %v4025_v39 }
 0x206   : > { %v3052_v1 = vadd.f32 %v4005_v63, %v3011_v0 }
 0x208   : > { %v3093_v11 = vadd.f32 %v4027_v2, %v3052_v1 }
 0x21d   : > { %v4044_v43 = vpop.f32.mrf.mxu0 }
 0x21e   : > { %v4066_v51 = vpop.f32.mrf.mxu1 }
 0x21f   : > { %v4045_v52 = vpop.f32.mrf.mxu0 }
 0x220   : > { %v4067_v57 = vpop.f32.mrf.mxu1  ;;  %v4046_v3 = vadd.f32 %v4045_v52, %v4044_v43 }
 0x221   : > { %v4047_v58 = vpop.f32.mrf.mxu0  ;;  %v4068_v7 = vadd.f32 %v4067_v57, %v4066_v51 }
 0x222   : > { %v4069_v4 = vpop.f32.mrf.mxu1  ;;  %v3131_v6 = vadd.f32 %v4046_v3, %v3090_v62 }
 0x223   : > { %v4048_v5 = vpop.f32.mrf.mxu0 }
 0x224   : > { %v4049_v8 = vadd.f32 %v4048_v5, %v4047_v58  ;;  %v4070_v9 = vpop.f32.mrf.mxu1  ;;  %v3172_v15 = vadd.f32 %v4068_v7, %v3131_v6 }
 0x225   : > { %v4071_v19 = vadd.f32 %v4070_v9, %v4069_v4 }
 0x226   : > { %v3134_v12 = vadd.f32 %v4049_v8, %v3093_v11 }
 0x228   : > { %v3175_v25 = vadd.f32 %v4071_v19, %v3134_v12 }
 0x23d   : > { %v4088_v10 = vpop.f32.mrf.mxu0 }
 0x23e   : > { %v4110_v13 = vpop.f32.mrf.mxu1 }
 0x23f   : > { %v4089_v14 = vpop.f32.mrf.mxu0 }
 0x240   : > { %v4090_v16 = vadd.f32 %v4089_v14, %v4088_v10  ;;  %v4111_v17 = vpop.f32.mrf.mxu1 }
 0x241   : > { %v4091_v18 = vpop.f32.mrf.mxu0  ;;  %v4112_v21 = vadd.f32 %v4111_v17, %v4110_v13 }
 0x242   : > { %v3213_v20 = vadd.f32 %v4090_v16, %v3172_v15  ;;  %v4113_v22 = vpop.f32.mrf.mxu1 }
 0x243   : > { %v4092_v24 = vpop.f32.mrf.mxu0 }
 0x244   : > { %v3254_v26 = vadd.f32 %v4112_v21, %v3213_v20  ;;  %v4093_v27 = vadd.f32 %v4092_v24, %v4091_v18  ;;  %v4114_v28 = vpop.f32.mrf.mxu1 }
 0x245   : > { %v4115_v31 = vadd.f32 %v4114_v28, %v4113_v22 }
 0x246   : > { %v3260_v29 = vadd.f32 %v3254_v26, %v362_v23  ;;  %v3216_v30 = vadd.f32 %v4093_v27, %v3175_v25 }
 0x248   : > { %3262 = vst [vmem:[#allocation2] sm:$0xff] %v3260_v29  ;;  %v3257_v33 = vadd.f32 %v4115_v31, %v3216_v30  ;;  %3267 = sbr.rel (%p3756_p12) target bundleno = 599 (0x257), region = 71 }
 0x24a   : > { %v3261_v34 = vadd.f32 %v3257_v33, %v363_v32 }
 0x24c   : > { %3263 = vst [vmem:[#allocation2 + $0x8] sm:$0xff] %v3261_v34 }
 0x24d   : > { %v3757_v36 = vld [vmem:[%s321_s0] ss:$0 sm:$0xff] }
 0x24f   : > { %v3268_v35 = vld [vmem:[#allocation2] sm:$0xff] }
 0x250   : > { %v3277_v38 = vadd.f32 %v3757_v36, %v3268_v35 }
 0x252   : > { %3279 = vst [vmem:[%s4925_s5] sm:$0xff] %v3277_v38 }
 0x253   : > { %v3269_v37 = vld [vmem:[#allocation2 + $0x8] sm:$0xff] }
 0x254   : > { %v3278_v39 = vadd.f32 %v3757_v36, %v3269_v37 }
 0x256   : > { %3280 = vst [vmem:[%s4925_s5 + $0x8] sm:$0xff] %v3278_v39 }
 0x257 PF: > { %3287 = sbr.rel (!%p4804_p6) target bundleno = 608 (0x260), region = 75  ;;  %s3759_s20 = sshll.u32 (%p4804_p6), %s4634_s21, 3 }
 0x258   : > { %s5304_s12 = sld [smem:[#allocation22_spill]] (%p4804_p6) }
 0x259   : > { %v3323_v40 = vld [vmem:[%s4925_s5] sm:$0xff] (%p4804_p6) }
 0x25d   : > { %v3325_v41 = vld [vmem:[%s4925_s5 + $0x8] sm:$0xff] }
 0x25e   : > { %s3292_s25 = scalar_lea.vmem %s5304_s12, %s3759_s20 }
 0x25f   : > { %3324 = vst [vmem:[%s3292_s25] sm:$0xff] %v3323_v40  ;;  %3326 = vst [vmem:[%s3292_s25 + $0x10] sm:$0xff] %v3325_v41 }
 0x260 PF: > { %s19_s24 = sadd.s32 1, %s4646_s24   ;;  %s5306_s4 = sld [smem:[#allocation11_spill]] }
 0x261   : > { %p5230_p4 = scmp.ge.s32.totalorder %s19_s24, 6   ;;  %s5307_s14 = sld [smem:[#allocation19_spill]] }
 0x262   : > { %s5308_s21 = sld [smem:[#allocation12_spill]]  ;;  %s5315_s12 = smov %s4602_s13 }
 0x263   : > { %s5309_s17 = sld [smem:[#allocation18_spill]]  ;;  %s5317_s15 = smov %s4614_s16 }
 0x264   : > { %s5310_s18 = sld [smem:[#allocation13_spill]] }
 0x265   : > { %s5311_s19 = sld [smem:[#allocation17_spill]] }
 0x266   : > { %s5312_s20 = sld [smem:[#allocation14_spill]]  ;;  %s5316_s13 = smov %s5306_s4 }
 0x267   : > { %s5313_s22 = sld [smem:[#allocation15_spill]] }
 0x268   : > { %s5314_s7 = sld [smem:[#allocation16_spill]]  ;;  %s5318_s16 = smov %s5308_s21 }
 0x269   : > { %s5319_s21 = smov %s4642_s23 }
 0x26a   :  { %18 = sbr.rel (!%p5230_p4) target bundleno = 14 (0xe), region = 162 }
 0x26e   : > { %s5320_s23 = smov %s5314_s7 }
 0x26f   :  { %3342 = vsyncpa [#allocation5], 1 }
 0x270   :  { %3344 = vsyncpa [#allocation5 + $0x1], 1 }
 0x271   :  { %3345 = vsyncpa [#allocation7], 1 }
 0x272   :  { %3347 = vsyncpa [#allocation7 + $0x1], 1 }

// kernel: dranet_encoder_forward.2
= control target key start
LH: loop header
LB: loop body
LE: loop exit
PB: predicated region body
PF: predicated region fallthrough
CT: control target
= control target key end

     0   :  { %12 = vsyncpa [#allocation5], 0  ;;  %s14764_s0 = inlined_call_operand.vmem [shape: bf16[1,128,96], index: 0, kind: input, shape index: {}]   ;;  %s14765_s1 = inlined_call_operand.vmem [shape: bf16[96,64], index: 1, kind: input, shape index: {}]   ;;  %s14766_s2 = inlined_call_operand.hbm [shape: f32[1,64], index: 2, kind: input, shape index: {}]   ;;  %s14767_s3 = inlined_call_operand.hbm [shape: bf16[36,64,64], index: 3, kind: input, shape index: {}]   ;;  %s14768_s4 = inlined_call_operand.hbm [shape: f32[4,1,64], index: 4, kind: input, shape index: {}]   ;;  %s14769_s5 = inlined_call_operand.hbm [shape: bf16[9,64,128], index: 5, kind: input, shape index: {}]   ;;  %s14770_s6 = inlined_call_operand.hbm [shape: f32[1,128], index: 6, kind: input, shape index: {}]   ;;  %s14771_s7 = inlined_call_operand.vmem [shape: bf16[1,128,128], index: 7, kind: output, shape index: {}]  }
   0x1   :  { %13 = vsyncpa [#allocation7], 0 }
   0x2   :  { %14 = vsyncpa [#allocation10], 0  ;;  %s12515_s24 = smov [#allocation6]  }
   0x3   :  { %s34_s25 = sshll.u32 %s12515_s24, 4  ;;  %s35_s25 = int_to_ptr.vmem [resolvable:$true] %s34_s25 }
   0x4   :  { %s12417_s26 = scalar_lea.vmem %s35_s25, 18432  ;;  %p12422_p1 = scmp.lt.s32.totalorder %s35_s25, %s35_s25 }
   0x5   :  { %p12418_p0 = scmp.ne.s32.totalorder %s35_s25, %s12417_s26  ;;  %p12423_p2 = scmp.lt.s32.totalorder %s12417_s26, %s12417_s26 }
   0x7   :  { %p12424_p3 = por %p12423_p2, %p12422_p1 }
   0x9   :  { %p12425_p4 = pnand %p12424_p3, %p12418_p0 }
   0xb   :  { %12428 = shalt.err (!%p12425_p4)
}
   0xc   :  { %s12516_s27 = smov 64   ;;  %s12517_s28 = smov 4  }
   0xd   :  { %40 = dma.hbm_to_vmem [thread:$0]  %s14767_s3, 18432, %s35_s25, [#allocation7], %s12516_s27, %s12516_s27, %s12517_s28  }
   0xe   :  { %s12518_s8 = smov [#allocation9]   ;;  %s12519_s10 = smov [#allocation4]  }
   0xf   :  { %s58_s9 = sshll.u32 %s12518_s8, 4  ;;  %s25_s11 = sshll.u32 %s12519_s10, 4  ;;  %s59_s9 = int_to_ptr.vmem [resolvable:$true] %s58_s9  ;;  %s26_s11 = int_to_ptr.vmem [resolvable:$true] %s25_s11 }
  0x10   :  { %s12437_s12 = scalar_lea.vmem %s59_s9, 4608  ;;  %p12442_p6 = scmp.lt.s32.totalorder %s59_s9, %s59_s9 }
  0x11   :  { %p12438_p5 = scmp.ne.s32.totalorder %s59_s9, %s12437_s12  ;;  %p12443_p7 = scmp.lt.s32.totalorder %s12437_s12, %s12437_s12 }
  0x13   :  { %p12444_p8 = por %p12443_p7, %p12442_p6 }
  0x15   :  { %p12445_p9 = pnand %p12444_p8, %p12438_p5 }
  0x17   :  { %12448 = shalt.err (!%p12445_p9)
}
  0x18   :  { %64 = dma.hbm_to_vmem [thread:$0]  %s14769_s5, 4608, %s59_s9, [#allocation10], %s12516_s27, %s12516_s27, %s12517_s28  }
  0x19   :  { %s12457_s15 = scalar_lea.vmem %s26_s11, 16  ;;  %s12461_s3 = scalar_lea.vmem %s26_s11, 32 }
  0x1a   :  { %p12458_p10 = scmp.ne.s32.totalorder %s26_s11, %s12457_s15  ;;  %p12462_p11 = scmp.lt.s32.totalorder %s26_s11, %s26_s11 }
  0x1b   :  { %p12463_p12 = scmp.lt.s32.totalorder %s12461_s3, %s12457_s15 }
  0x1d   :  { %p12464_p13 = por %p12463_p12, %p12462_p11 }
  0x1f   :  { %p12465_p0 = pnand %p12464_p13, %p12458_p10 }
  0x21   :  { %12468 = shalt.err (!%p12465_p0)
}
  0x22   :  { %28 = dma.hbm_to_vmem [thread:$0]  %s14766_s2, 16, %s26_s11, [#allocation5]  }
  0x23   :  { %s12520_s18 = smov [#allocation8]  }
  0x24   :  { %s46_s19 = sshll.u32 %s12520_s18, 4  ;;  %s47_s19 = int_to_ptr.vmem [resolvable:$true] %s46_s19 }
  0x25   :  { %s12477_s20 = scalar_lea.vmem %s47_s19, 64  ;;  %p12482_p2 = scmp.lt.s32.totalorder %s47_s19, %s47_s19 }
  0x26   :  { %p12478_p1 = scmp.ne.s32.totalorder %s47_s19, %s12477_s20  ;;  %p12483_p3 = scmp.lt.s32.totalorder %s12477_s20, %s12477_s20 }
  0x28   :  { %p12484_p4 = por %p12483_p3, %p12482_p2 }
  0x2a   :  { %p12485_p5 = pnand %p12484_p4, %p12478_p1 }
  0x2c   :  { %12488 = shalt.err (!%p12485_p5)
}
  0x2d   :  { %s12521_s5 = smov 16   ;;  %s12522_s21 = smov 1  }
  0x2e   :  { %52 = dma.hbm_to_vmem [thread:$0]  %s14768_s4, 64, %s47_s19, [#allocation7], %s12521_s5, %s12521_s5, %s12522_s21  }
  0x2f   :  { %s12523_s24 = smov [#allocation11]  }
  0x30   :  { %s71_s25 = sshll.u32 %s12523_s24, 4  ;;  %s72_s25 = int_to_ptr.vmem [resolvable:$true] %s71_s25 }
  0x31   :  { %s12497_s2 = scalar_lea.vmem %s72_s25, 16  ;;  %s12501_s26 = scalar_lea.vmem %s72_s25, 32 }
  0x32   :  { %p12498_p6 = scmp.ne.s32.totalorder %s72_s25, %s12497_s2  ;;  %p12502_p7 = scmp.lt.s32.totalorder %s72_s25, %s72_s25 }
  0x33   :  { %p12503_p8 = scmp.lt.s32.totalorder %s12501_s26, %s12497_s2 }
  0x35   :  { %p12504_p9 = por %p12503_p8, %p12502_p7 }
  0x37   :  { %p12505_p10 = pnand %p12504_p9, %p12498_p6 }
  0x39   :  { %12508 = shalt.err (!%p12505_p10)
}
  0x3a   :  { %74 = dma.hbm_to_vmem [thread:$0]  %s14770_s6, 16, %s72_s25, [#allocation10]  }
  0x3b   :  { %12509 = dma.done.wait [#allocation5], 16  }
  0x3c   :  { %12510 = vsyncadd [#allocation5], 4294967280 }
  0x3d   :  { %12511 = dma.done.wait [#allocation7], 18496  }
  0x3e   :  { %12512 = vsyncadd [#allocation7], 4294948800 }
  0x3f   :  { %12513 = dma.done.wait [#allocation10], 4624  }
  0x40   :  { %12514 = vsyncadd [#allocation10], 4294962672  ;;  %v349_v0 = vlaneseq  ;;  %vm211_vm0 = vcmask 785408   ;;  %vm467_vm2 = vcmask 105472   ;;  %v12215_v7 = vld [vmem:[%s14765_s1 + $0x28] sm:$0xff]   ;;  %v12524_v8 = vmov 0  }
  0x41   :  { %v12216_v10 = vld [vmem:[%s14765_s1 + $0x20] sm:$0xff]   ;;  %11095 = vmatprep.subr.bf16.mxu0 %v12215_v7  ;;  %v12217_v17 = vld [vmem:[%s14765_s1 + $0x18] sm:$0xff]   ;;  %v12218_v26 = vld [vmem:[%s14765_s1 + $0x10] sm:$0xff]  }
  0x42   :  { %v12582_v1 = vshrl.u32 %v349_v0, 7  ;;  %v384_v2 = vand.u32 127, %v349_v0  ;;  %11096 = vmatpush3.bf16.msra.mxu0 %v12215_v7  ;;  %v12221_v22 = vld [vmem:[%s14764_s0] sm:$0xff]   ;;  %v12219_v33 = vld [vmem:[%s14765_s1 + $0x8] sm:$0xff]  }
  0x43   :  { %11097 = vmatprep.subr.bf16.mxu0 %v12216_v10  ;;  %11107 = vmatprep.mubr.msk.bf16.mxu0 %vm211_vm0, %v12221_v22  ;;  %v12220_v47 = vld [vmem:[%s14765_s1] sm:$0xff]  }
  0x44   :  { %v12585_v3 = vadd.s32 8, %v12582_v1  ;;  %v12587_v4 = vmul.u32 10, %v384_v2  ;;  %v352_v5 = vadd.s32 16, %v12582_v1  ;;  %v353_v13 = vadd.s32 24, %v12582_v1 }
  0x45   :  { %v354_v16 = vadd.s32 32, %v12582_v1  ;;  %v355_v19 = vadd.s32 40, %v12582_v1  ;;  %v356_v21 = vadd.s32 48, %v12582_v1  ;;  %v357_v25 = vadd.s32 56, %v12582_v1 }
  0x46   :  { %vm387_vm1 = vcmp.eq.s32.totalorder %v12585_v3, %v12587_v4  ;;  %v12593_v6 = vadd.s32 9, %v12587_v4  ;;  %vm388_vm3 = vcmp.eq.s32.totalorder %v352_v5, %v12587_v4  ;;  %vm389_vm6 = vcmp.eq.s32.totalorder %v353_v13, %v12587_v4  ;;  %11098 = vmatpush3.bf16.msra.mxu0 %v12216_v10 }
  0x47   :  { %v403_v9 = vsel %vm387_vm1, 1, %v12524_v8  ;;  %v404_v11 = vsel %vm388_vm3, 1, %v12524_v8  ;;  %vm390_vm7 = vcmp.eq.s32.totalorder %v354_v16, %v12587_v4  ;;  %11099 = vmatprep.subr.bf16.mxu0 %v12217_v17  ;;  %vm391_vm9 = vcmp.eq.s32.totalorder %v355_v19, %v12587_v4 }
  0x48   :  { %vm420_vm4 = vcmp.eq.s32.totalorder %v12585_v3, %v12593_v6  ;;  %vm421_vm5 = vcmp.eq.s32.totalorder %v352_v5, %v12593_v6  ;;  %vm422_vm8 = vcmp.eq.s32.totalorder %v353_v13, %v12593_v6  ;;  %v405_v31 = vsel %vm389_vm6, 1, %v12524_v8 }
  0x49   :  { %v436_v12 = vsel %vm420_vm4, 1, %v12524_v8  ;;  %v437_v15 = vsel %vm421_vm5, 1, %v12524_v8  ;;  %vm423_vm10 = vcmp.eq.s32.totalorder %v354_v16, %v12593_v6  ;;  %vm424_vm11 = vcmp.eq.s32.totalorder %v355_v19, %v12593_v6  ;;  %v12223_v16 = vld [vmem:[%s14764_s0 + $0x10] sm:$0xff]  }
  0x4a   :  { %v452_v14 = vadd.s32 %v436_v12, %v403_v9  ;;  %v453_v18 = vadd.s32 %v437_v15, %v404_v11  ;;  %vm392_vm12 = vcmp.eq.s32.totalorder %v356_v21, %v12587_v4  ;;  %vm425_vm13 = vcmp.eq.s32.totalorder %v356_v21, %v12593_v6  ;;  %11100 = vmatpush3.bf16.msra.mxu0 %v12217_v17  ;;  %v12222_v12 = vld [vmem:[%s14764_s0 + $0x8] sm:$0xff]  }
  0x4b   :  { %v438_v35 = vsel %vm422_vm8, 1, %v12524_v8  ;;  %vm393_vm14 = vcmp.eq.s32.totalorder %v357_v25, %v12587_v4  ;;  %vm426_vm15 = vcmp.eq.s32.totalorder %v357_v25, %v12593_v6  ;;  %11101 = vmatprep.subr.bf16.mxu0 %v12218_v26  ;;  %v406_v38 = vsel %vm390_vm7, 1, %v12524_v8 }
  0x4c   :  { %v481_v20 = vsel %vm467_vm2, %v452_v14, 0  ;;  %v494_v28 = vsel %vm467_vm2, %v453_v18, 0  ;;  %v454_v37 = vadd.s32 %v438_v35, %v405_v31  ;;  %v439_v39 = vsel %vm423_vm10, 1, %v12524_v8 }
  0x4d   :  { %v483_v23 = vshrl.u32 %v481_v20, 16  ;;  %v482_v24 = vand.u32 65535, %v481_v20  ;;  %v496_v30 = vshrl.u32 %v494_v28, 16  ;;  %v495_v32 = vand.u32 65535, %v494_v28 }
  0x4e   :  { %v455_v40 = vadd.s32 %v439_v39, %v406_v38  ;;  %v407_v41 = vsel %vm391_vm9, 1, %v12524_v8  ;;  %v440_v42 = vsel %vm424_vm11, 1, %v12524_v8  ;;  %v408_v43 = vsel %vm392_vm12, 1, %v12524_v8  ;;  %11102 = vmatpush3.bf16.msra.mxu0 %v12218_v26 }
  0x4f   :  { %v485_v27 = vcvt.s32.f32 %v483_v23  ;;  %v484_v29 = vcvt.s32.f32 %v482_v24  ;;  %v498_v34 = vcvt.s32.f32 %v496_v30  ;;  %v497_v36 = vcvt.s32.f32 %v495_v32  ;;  %11103 = vmatprep.subr.bf16.mxu0 %v12219_v33  ;;  %v12224_v30 = vld [vmem:[%s14764_s0 + $0x18] sm:$0xff]  }
  0x50   :  { %v507_v44 = vsel %vm467_vm2, %v454_v37, 0  ;;  %v456_v45 = vadd.s32 %v440_v42, %v407_v41  ;;  %v441_v46 = vsel %vm425_vm13, 1, %v12524_v8  ;;  %v520_v49 = vsel %vm467_vm2, %v455_v40, 0 }
  0x51   :  { %488 = vadd.xlane.f32.xlu0 %v485_v27  ;;  %486 = vadd.xlane.f32.xlu1 %v484_v29  ;;  %v509_v48 = vshrl.u32 %v507_v44, 16  ;;  %v457_v50 = vadd.s32 %v441_v46, %v408_v43  ;;  %v409_v51 = vsel %vm393_vm14, 1, %v12524_v8  ;;  %v522_v52 = vshrl.u32 %v520_v49, 16 }
  0x52   :  { %v533_v53 = vsel %vm467_vm2, %v456_v45, 0  ;;  %v508_v54 = vand.u32 65535, %v507_v44  ;;  %v442_v55 = vsel %vm426_vm15, 1, %v12524_v8  ;;  %11104 = vmatpush3.bf16.msra.mxu0 %v12219_v33  ;;  %v521_v62 = vand.u32 65535, %v520_v49 }
  0x53   :  { %v511_v56 = vcvt.s32.f32 %v509_v48  ;;  %v535_v57 = vshrl.u32 %v533_v53, 16  ;;  %v546_v58 = vsel %vm467_vm2, %v457_v50, 0  ;;  %v524_v59 = vcvt.s32.f32 %v522_v52  ;;  %11105 = vmatprep.subr.bf16.mxu0 %v12220_v47 }
  0x54   :  { %v548_v60 = vshrl.u32 %v546_v58, 16  ;;  %v458_v63 = vadd.s32 %v442_v55, %v409_v51  ;;  %v358_v0 = vadd.s32 64, %v12582_v1  ;;  %v510_v5 = vcvt.s32.f32 %v508_v54  ;;  %v12227_v54 = vld [vmem:[#allocation6 + $0x38] sm:$0xff]  }
  0x55   :  { %501 = vadd.xlane.f32.xlu0 %v498_v34  ;;  %499 = vadd.xlane.f32.xlu1 %v497_v36  ;;  %v537_v61 = vcvt.s32.f32 %v535_v57  ;;  %v359_v7 = vadd.s32 72, %v12582_v1  ;;  %v360_v9 = vadd.s32 80, %v12582_v1  ;;  %v534_v10 = vand.u32 65535, %v533_v53  ;;  %v12228_v55 = vld [vmem:[#allocation6 + $0x58] sm:$0xff]   ;;  %v12230_v57 = vld [vmem:[#allocation6 + $0x50] sm:$0xff]  }
  0x56   :  { %v550_v2 = vcvt.s32.f32 %v548_v60  ;;  %v547_v11 = vand.u32 65535, %v546_v58  ;;  %vm394_vm1 = vcmp.eq.s32.totalorder %v358_v0, %v12587_v4  ;;  %vm427_vm3 = vcmp.eq.s32.totalorder %v358_v0, %v12593_v6  ;;  %11106 = vmatpush3.bf16.msra.mxu0 %v12220_v47  ;;  %11123 = vmatprep.subr.bf16.mxu1 %v12227_v54  ;;  %v12231_v58 = vld [vmem:[%s14764_s0 + $0x30] sm:$0xff]   ;;  %v12236_v0 = vld [vmem:[#allocation6 + $0x40] sm:$0xff]  }
  0x57   :  { %v559_v13 = vsel %vm467_vm2, %v458_v63, 0  ;;  %v410_v14 = vsel %vm394_vm1, 1, %v12524_v8  ;;  %v443_v15 = vsel %vm427_vm3, 1, %v12524_v8  ;;  %vm395_vm4 = vcmp.eq.s32.totalorder %v359_v7, %v12587_v4  ;;  %11171 = vmatprep.subr.bf16.mxu0 %v12228_v55  ;;  %11124 = vmatpush3.bf16.msra.mxu1 %v12227_v54  ;;  %v12232_v60 = vld [vmem:[#allocation6 + $0x28] sm:$0xff]   ;;  %v12235_v63 = vld [vmem:[#allocation6 + $0x20] sm:$0xff]  }
  0x58   :  { %v459_v17 = vadd.s32 %v443_v15, %v410_v14  ;;  %v411_v18 = vsel %vm395_vm4, 1, %v12524_v8  ;;  %vm428_vm5 = vcmp.eq.s32.totalorder %v359_v7, %v12593_v6  ;;  %vm396_vm6 = vcmp.eq.s32.totalorder %v360_v9, %v12587_v4 }
  0x59   :  { %514 = vadd.xlane.f32.xlu0 %v511_v56  ;;  %527 = vadd.xlane.f32.xlu1 %v524_v59  ;;  %v523_v19 = vcvt.s32.f32 %v521_v62  ;;  %v444_v20 = vsel %vm428_vm5, 1, %v12524_v8  ;;  %v412_v21 = vsel %vm396_vm6, 1, %v12524_v8  ;;  %vm429_vm7 = vcmp.eq.s32.totalorder %v360_v9, %v12593_v6  ;;  %v12229_v56 = vld [vmem:[#allocation6 + $0x30] sm:$0xff]   ;;  %v12234_v62 = vld [vmem:[#allocation6 + $0x48] sm:$0xff]  }
  0x5a   :  { %v572_v22 = vsel %vm467_vm2, %v459_v17, 0  ;;  %v460_v23 = vadd.s32 %v444_v20, %v411_v18  ;;  %v445_v24 = vsel %vm429_vm7, 1, %v12524_v8  ;;  %11108 = vmatmul.mubr.msk.bf16.vlgmr.msra.gmra.mxu0 %vm211_vm0, %v12222_v12  ;;  %v12697_v26 = vadd.s32 88, %v12582_v1  ;;  %v12225_v1 = vld [vmem:[%s14764_s0 + $0x20] sm:$0xff]   ;;  %11125 = vmatprep.subr.bf16.mxu1 %v12229_v56 }
  0x5b   :  { %v461_v25 = vadd.s32 %v445_v24, %v412_v21  ;;  %11111 = vmatprep.mubr.msk.bf16.mxu0 %vm211_vm0, %v12223_v16  ;;  %v536_v27 = vcvt.s32.f32 %v534_v10  ;;  %v561_v28 = vshrl.u32 %v559_v13, 16  ;;  %v549_v31 = vcvt.s32.f32 %v547_v11  ;;  %11172 = vmatpush3.bf16.msra.mxu0 %v12228_v55  ;;  %v12770_v12 = vld [vmem:[#allocation6 + $0x18] sm:$0xff]  }
  0x5c   :  { %v585_v29 = vsel %vm467_vm2, %v460_v23, 0  ;;  %v574_v32 = vshrl.u32 %v572_v22, 16  ;;  %v560_v35 = vand.u32 65535, %v559_v13  ;;  %v573_v36 = vand.u32 65535, %v572_v22  ;;  %11173 = vmatprep.subr.bf16.mxu0 %v12230_v57  ;;  %11126 = vmatpush3.bf16.msra.mxu1 %v12229_v56  ;;  %v12772_v13 = vld [vmem:[#allocation6 + $0x98] sm:$0xff]  }
  0x5d   :  { %540 = vadd.xlane.f32.xlu0 %v537_v61  ;;  %553 = vadd.xlane.f32.xlu1 %v550_v2  ;;  %v598_v33 = vsel %vm467_vm2, %v461_v25, 0  ;;  %v587_v34 = vshrl.u32 %v585_v29, 16  ;;  %vm397_vm8 = vcmp.eq.s32.totalorder %v12697_v26, %v12587_v4  ;;  %vm430_vm9 = vcmp.eq.s32.totalorder %v12697_v26, %v12593_v6  ;;  %v12226_v6 = vld [vmem:[%s14764_s0 + $0x28] sm:$0xff]   ;;  %v12233_v61 = vld [vmem:[%s14764_s0 + $0x38] sm:$0xff]  }
  0x5e   :  { %v600_v37 = vshrl.u32 %v598_v33, 16  ;;  %v413_v38 = vsel %vm397_vm8, 1, %v12524_v8  ;;  %v563_v39 = vcvt.s32.f32 %v561_v28  ;;  %v586_v40 = vand.u32 65535, %v585_v29  ;;  %11127 = vmatprep.subr.bf16.mxu1 %v12232_v60 }
  0x5f   :  { %v446_v41 = vsel %vm430_vm9, 1, %v12524_v8  ;;  %v576_v42 = vcvt.s32.f32 %v574_v32  ;;  %v599_v44 = vand.u32 65535, %v598_v33  ;;  %v589_v4 = vcvt.s32.f32 %v587_v34  ;;  %11174 = vmatpush3.bf16.msra.mxu0 %v12230_v57 }
  0x60   :  { %v462_v43 = vadd.s32 %v446_v41, %v413_v38  ;;  %v602_v8 = vcvt.s32.f32 %v600_v37  ;;  %v562_v48 = vcvt.s32.f32 %v560_v35  ;;  %v575_v49 = vcvt.s32.f32 %v573_v36  ;;  %11128 = vmatpush3.bf16.msra.mxu1 %v12232_v60  ;;  %11175 = vmatprep.subr.bf16.mxu0 %v12234_v62 }
  0x61   :  { %512 = vadd.xlane.f32.xlu0 %v510_v5  ;;  %525 = vadd.xlane.f32.xlu1 %v523_v19  ;;  %v588_v50 = vcvt.s32.f32 %v586_v40  ;;  %v601_v51 = vcvt.s32.f32 %v599_v44  ;;  %v14772_v59 = vmov 0.0   ;;  %vm12526_vm11 = vmmov 1  }
  0x62   :  { %11112 = vmatmul.mubr.msk.bf16.gmra.mxu0 %vm211_vm0, %v12224_v30  ;;  %v611_v45 = vsel %vm467_vm2, %v462_v43, 0  ;;  %vm91_vm2 = vcmask 523264   ;;  %11129 = vmatprep.subr.bf16.mxu1 %v12235_v63  ;;  %vm693_vm13 = vcmp.ge.s32.totalorder %v12585_v3, 10  ;;  %v14810_v3 = vmov 0 }
  0x63   :  { %11115 = vmatprep.mubr.msk.bf16.mxu0 %vm211_vm0, %v12225_v1  ;;  %v613_v46 = vshrl.u32 %v611_v45, 16  ;;  %v612_v47 = vand.u32 65535, %v611_v45  ;;  %834 = vst.msk [vmem:[#allocation2 + $0x70] sm:$0xff] %vm91_vm2, %v14772_v59  ;;  %835 = vst.msk [vmem:[#allocation2 + $0x78] sm:$0xff] %vm91_vm2, %v14772_v59  ;;  %11176 = vmatpush3.bf16.msra.mxu0 %v12234_v62 }
  0x64   :  { %92 = vst.msk [vmem:[#allocation2] sm:$0xff] %vm91_vm2, %v14772_v59  ;;  %93 = vst.msk [vmem:[#allocation2 + $0x8] sm:$0xff] %vm91_vm2, %v14772_v59  ;;  %11177 = vmatprep.subr.bf16.mxu0 %v12236_v0  ;;  %11130 = vmatpush3.bf16.msra.mxu1 %v12235_v63 }
  0x65   :  { %538 = vadd.xlane.f32.xlu0 %v536_v27  ;;  %551 = vadd.xlane.f32.xlu1 %v549_v31  ;;  %v615_v52 = vcvt.s32.f32 %v613_v46  ;;  %v614_v53 = vcvt.s32.f32 %v612_v47  ;;  %94 = vst.msk [vmem:[#allocation2 + $0x90] sm:$0xff] %vm91_vm2, %v14772_v59  ;;  %95 = vst.msk [vmem:[#allocation2 + $0x98] sm:$0xff] %vm91_vm2, %v14772_v59 }
  0x66   :  { %96 = vst.msk [vmem:[#allocation3] sm:$0xff] %vm91_vm2, %v14772_v59  ;;  %97 = vst.msk [vmem:[#allocation3 + $0x8] sm:$0xff] %vm91_vm2, %v14772_v59  ;;  %11147 = vmatprep.subr.bf16.mxu1 %v12770_v12 }
  0x67   :  { %98 = vst.msk [vmem:[#allocation3 + $0x90] sm:$0xff] %vm91_vm2, %v14772_v59  ;;  %99 = vst.msk [vmem:[#allocation3 + $0x98] sm:$0xff] %vm91_vm2, %v14772_v59  ;;  %11178 = vmatpush3.bf16.msra.mxu0 %v12236_v0 }
  0x68   :  { %822 = vst.msk [vmem:[#allocation2 + $0x10] sm:$0xff] %vm91_vm2, %v14772_v59  ;;  %836 = vst.msk [vmem:[#allocation2 + $0x80] sm:$0xff] %vm91_vm2, %v14772_v59  ;;  %11219 = vmatprep.subr.bf16.mxu0 %v12772_v13 }
  0x69   :  { %566 = vadd.xlane.f32.xlu0 %v563_v39  ;;  %579 = vadd.xlane.f32.xlu1 %v576_v42  ;;  %837 = vst.msk [vmem:[#allocation2 + $0x88] sm:$0xff] %vm91_vm2, %v14772_v59  ;;  %2623 = vst.msk [vmem:[#allocation3 + $0x10] sm:$0xff] %vm91_vm2, %v14772_v59 }
  0x6a   :  { %11116 = vmatmul.mubr.msk.bf16.gmra.mxu0 %vm211_vm0, %v12226_v6  ;;  %2635 = vst.msk [vmem:[#allocation3 + $0x70] sm:$0xff] %vm91_vm2, %v14772_v59  ;;  %2636 = vst.msk [vmem:[#allocation3 + $0x78] sm:$0xff] %vm91_vm2, %v14772_v59 }
  0x6b   :  { %2637 = vst.msk [vmem:[#allocation3 + $0x80] sm:$0xff] %vm91_vm2, %v14772_v59  ;;  %2638 = vst.msk [vmem:[#allocation3 + $0x88] sm:$0xff] %vm91_vm2, %v14772_v59  ;;  %11119 = vmatprep.mubr.msk.bf16.mxu0 %vm211_vm0, %v12231_v58  ;;  %v875_v2 = vld [vmem:[#allocation2 + $0x6] sm:$0xff] }
  0x6c   :  { %v1200_v7 = vld [vmem:[#allocation2 + $0x7] sm:$0xff] }
  0x6d   :  { %592 = vadd.xlane.f32.xlu0 %v589_v4  ;;  %605 = vadd.xlane.f32.xlu1 %v602_v8  ;;  %v12786_v4 = vld [vmem:[#allocation4] ss:$0 sm:$0xff] }
  0x6f   :  { %v876_v5 = vld [vmem:[#allocation2 + $0xe] sm:$0xff] }
  0x70   :  { %v891_v9 = vpack.c.bf16 %v876_v5, %v875_v2  ;;  %v12765_v10 = vld [vmem:[#allocation2 + $0xf] sm:$0xff] }
  0x71   :  { %564 = vadd.xlane.f32.xlu0 %v562_v48  ;;  %577 = vadd.xlane.f32.xlu1 %v575_v49  ;;  %v1216_v11 = vpack.c.bf16 %v12765_v10, %v1200_v7 }
  0x72   :  { %11120 = vmatmul.mubr.msk.bf16.gmra.mxu0 %vm211_vm0, %v12233_v61  ;;  %11131 = vmatprep.mubr.msk.bf16.mxu1 %vm91_vm2, %v891_v9 }
  0x73   :  { %11179 = vmatprep.mubr.msk.bf16.mxu0 %vm91_vm2, %v1216_v11 }
  0x75   :  { %590 = vadd.xlane.f32.xlu0 %v588_v50  ;;  %603 = vadd.xlane.f32.xlu1 %v601_v51 }
  0x79   :  { %618 = vadd.xlane.f32.xlu0 %v615_v52  ;;  %616 = vadd.xlane.f32.xlu1 %v614_v53 }
  0xda   :  { %v489_v14 = vpop.xlane.xlu0 %488  ;;  %v487_v15 = vpop.xlane.xlu1 %486 }
  0xdb   :  { %v491_v33 = vcvt.f32.s32 %v489_v14  ;;  %v490_v39 = vcvt.f32.s32 %v487_v15 }
  0xdd   :  { %v492_v38 = vshll.u32 %v491_v33, 16 }
  0xde   :  { %v502_v16 = vpop.xlane.xlu0 %501  ;;  %v500_v17 = vpop.xlane.xlu1 %499 }
  0xdf   :  { %v504_v32 = vcvt.f32.s32 %v502_v16  ;;  %v503_v35 = vcvt.f32.s32 %v500_v17  ;;  %v493_v47 = vadd.s32 %v492_v38, %v490_v39 }
  0xe1   :  { %v505_v34 = vshll.u32 %v504_v32, 16  ;;  %vm677_vm10 = vcmp.gt.s32.totalorder %v493_v47, 0 }
  0xe2   :  { %v515_v18 = vpop.xlane.xlu0 %514  ;;  %v528_v19 = vpop.xlane.xlu1 %527  ;;  %vm741_vm15 = vmxor %vm677_vm10, %vm12526_vm11 }
  0xe3   :  { %v517_v36 = vcvt.f32.s32 %v515_v18  ;;  %v506_v41 = vadd.s32 %v505_v34, %v503_v35  ;;  %v530_v43 = vcvt.f32.s32 %v528_v19  ;;  %vm12815_vm4 = vmand %vm693_vm13, %vm741_vm15  ;;  %v14807_v34 = vmov 0 }
  0xe4   :  { %v14808_v34 = vsel %vm12815_vm4, 4294967295, %v14807_v34 }
  0xe5   :  { %v518_v42 = vshll.u32 %v517_v36, 16  ;;  %vm678_vm0 = vcmp.gt.s32.totalorder %v506_v41, 0  ;;  %v531_v51 = vshll.u32 %v530_v43, 16  ;;  %14809 = vst [vmem:[#allocation16_spill] sm:$0xff] %v14808_v34 }
  0xe6   :  { %v541_v20 = vpop.xlane.xlu0 %540  ;;  %v554_v21 = vpop.xlane.xlu1 %553  ;;  %vm12790_vm12 = vmxor %vm678_vm0, %vm12526_vm11 }
  0xe7   :  { %v556_v40 = vcvt.f32.s32 %v554_v21  ;;  %v543_v6 = vcvt.f32.s32 %v541_v20 }
  0xe9   :  { %v557_v8 = vshll.u32 %v556_v40, 16  ;;  %v544_v63 = vshll.u32 %v543_v6, 16  ;;  %v14816_v6 = vmov 0 }
  0xea   :  { %v513_v22 = vpop.xlane.xlu0 %512  ;;  %v526_v23 = vpop.xlane.xlu1 %525 }
  0xeb   :  { %v516_v44 = vcvt.f32.s32 %v513_v22  ;;  %v529_v54 = vcvt.f32.s32 %v526_v23 }
  0xed   :  { %v519_v52 = vadd.s32 %v518_v42, %v516_v44  ;;  %v532_v15 = vadd.s32 %v531_v51, %v529_v54  ;;  %v14813_v42 = vmov 0  ;;  %v14822_v54 = vmov 0 }
  0xee   :  { %v12776_v24 = vpop.xlane.xlu0 %538  ;;  %v552_v25 = vpop.xlane.xlu1 %551 }
  0xef   :  { %v555_v48 = vcvt.f32.s32 %v552_v25  ;;  %v542_v0 = vcvt.f32.s32 %v12776_v24  ;;  %vm679_vm14 = vcmp.gt.s32.totalorder %v519_v52, 0  ;;  %v14804_v24 = vmov 0 }
  0xf0   :  { %vm12805_vm1 = vmxor %vm679_vm14, %vm12526_vm11  ;;  %vm680_vm5 = vcmp.gt.s32.totalorder %v532_v15, 0  ;;  %v14819_v52 = vmov 0 }
  0xf1   :  { %v558_v2 = vadd.s32 %v557_v8, %v555_v48  ;;  %v14805_v24 = vsel %vm12805_vm1, 4294967295, %v14804_v24  ;;  %v545_v25 = vadd.s32 %v544_v63, %v542_v0  ;;  %vm12832_vm9 = vmxor %vm680_vm5, %vm12526_vm11  ;;  %vm719_vm5 = vcmp.lt.s32.totalorder %v12697_v26, 90 }
  0xf2   :  { %v567_v27 = vpop.xlane.xlu0 %566  ;;  %v12778_v28 = vpop.xlane.xlu1 %579  ;;  %14806 = vst [vmem:[#allocation15_spill] sm:$0xff] %v14805_v24  ;;  %v14814_v42 = vsel %vm12832_vm9, 4294967295, %v14813_v42 }
  0xf3   :  { %v569_v45 = vcvt.f32.s32 %v567_v27  ;;  %v582_v5 = vcvt.f32.s32 %v12778_v28  ;;  %vm682_vm3 = vcmp.gt.s32.totalorder %v558_v2, 0  ;;  %vm681_vm7 = vcmp.gt.s32.totalorder %v545_v25, 0  ;;  %14815 = vst [vmem:[#allocation18_spill] sm:$0xff] %v14814_v42  ;;  %v12901_v25 = vld [vmem:[#allocation2 + $0xd] sm:$0xff] }
  0xf4   :  { %vm12826_vm8 = vmxor %vm682_vm3, %vm12526_vm11 }
  0xf5   :  { %v570_v55 = vshll.u32 %v569_v45, 16  ;;  %v583_v27 = vshll.u32 %v582_v5, 16  ;;  %v14811_v3 = vsel %vm12826_vm8, 4294967295, %v14810_v3  ;;  %vm12852_vm14 = vmxor %vm681_vm7, %vm12526_vm11 }
  0xf6   :  { %v12780_v29 = vpop.xlane.xlu0 %592  ;;  %v606_v30 = vpop.xlane.xlu1 %605  ;;  %14812 = vst [vmem:[#allocation17_spill] sm:$0xff] %v14811_v3  ;;  %v14820_v52 = vsel %vm12852_vm14, 4294967295, %v14819_v52 }
  0xf7   :  { %v608_v57 = vcvt.f32.s32 %v606_v30  ;;  %v595_v35 = vcvt.f32.s32 %v12780_v29  ;;  %14821 = vst [vmem:[#allocation20_spill] sm:$0xff] %v14820_v52 }
  0xf9   :  { %v609_v16 = vshll.u32 %v608_v57, 16  ;;  %v596_v47 = vshll.u32 %v595_v35, 16  ;;  %v12952_v57 = vld [vmem:[#allocation2 + $0x77] sm:$0xff] }
  0xfa   :  { %v565_v31 = vpop.xlane.xlu0 %564  ;;  %v12782_v1 = vpop.xlane.xlu1 %577 }
  0xfb   :  { %v568_v58 = vcvt.f32.s32 %v565_v31  ;;  %v581_v33 = vcvt.f32.s32 %v12782_v1 }
  0xfd   :  { %v571_v18 = vadd.s32 %v570_v55, %v568_v58  ;;  %v584_v44 = vadd.s32 %v583_v27, %v581_v33 }
  0xfe   :  { %v12784_v37 = vpop.xlane.xlu0 %590  ;;  %v604_v46 = vpop.xlane.xlu1 %603 }
  0xff   :  { %v607_v19 = vcvt.f32.s32 %v604_v46  ;;  %vm683_vm6 = vcmp.gt.s32.totalorder %v571_v18, 0  ;;  %v594_v8 = vcvt.f32.s32 %v12784_v37  ;;  %vm684_vm15 = vcmp.gt.s32.totalorder %v584_v44, 0 }
 0x100   :  { %vm12841_vm0 = vmxor %vm683_vm6, %vm12526_vm11 }
 0x101   :  { %v610_v38 = vadd.s32 %v609_v16, %v607_v19  ;;  %v14817_v6 = vsel %vm12841_vm0, 4294967295, %v14816_v6  ;;  %vm12879_vm7 = vmxor %vm684_vm15, %vm12526_vm11  ;;  %v14830_v19 = vmov 0 }
 0x102   :  { %v619_v50 = vpop.xlane.xlu0 %618  ;;  %v617_v9 = vpop.xlane.xlu1 %616  ;;  %14818 = vst [vmem:[#allocation19_spill] sm:$0xff] %v14817_v6 }
 0x103   :  { %v621_v61 = vcvt.f32.s32 %v619_v50  ;;  %v620_v23 = vcvt.f32.s32 %v617_v9  ;;  %vm686_vm10 = vcmp.gt.s32.totalorder %v610_v38, 0  ;;  %v14827_v9 = vmov 0 }
 0x104   :  { %vm12860_vm3 = vmxor %vm686_vm10, %vm12526_vm11  ;;  %v14828_v9 = vsel %vm12879_vm7, 4294967295, %v14827_v9 }
 0x105   :  { %v622_v22 = vshll.u32 %v621_v61, 16  ;;  %v14823_v54 = vsel %vm12860_vm3, 4294967295, %v14822_v54  ;;  %14829 = vst [vmem:[#allocation22_spill] sm:$0xff] %v14828_v9 }
 0x106   :  { %14824 = vst [vmem:[#allocation21_spill] sm:$0xff] %v14823_v54 }
 0x107   :  { %v623_v41 = vadd.s32 %v622_v22, %v620_v23  ;;  %v12241_v23 = vld [vmem:[#allocation6 + $0x90] sm:$0xff]  }
 0x109   :  { %vm687_vm13 = vcmp.gt.s32.totalorder %v623_v41, 0  ;;  %v12243_v41 = vld [vmem:[#allocation6 + $0x88] sm:$0xff]  }
 0x10a   :  { %vm12868_vm6 = vmxor %vm687_vm13, %vm12526_vm11 }
 0x10b   :  { %vm12894_vm10 = vmand %vm719_vm5, %vm12868_vm6 }
 0x10c   :  { %v14831_v19 = vsel %vm12894_vm10, 4294967295, %v14830_v19 }
 0x10d   :  { %14832 = vst [vmem:[#allocation23_spill] sm:$0xff] %v14831_v19 }
 0x11a   :  { %v11109_v49 = vpop.f32.mrf.mxu0 }
 0x11b   :  { %v279_v53 = vadd.f32 %v11109_v49, %v12786_v4 }
 0x11c   :  { %v270_v56 = vpop.f32.mrf.mxu0 }
 0x11d   :  { %v335_v60 = vmax.f32 %v279_v53, 0.0 }
 0x11e   :  { %v11110_v7 = vpop.f32.mrf.mxu0 }
 0x11f   :  { %v806_v11 = vsel %vm12790_vm12, %v335_v60, 0.0  ;;  %v282_v14 = vadd.f32 %v11110_v7, %v12786_v4  ;;  %v597_v60 = vadd.s32 %v596_v47, %v594_v8  ;;  %v12242_v8 = vld [vmem:[#allocation6] sm:$0xff]  }
 0x120   :  { %824 = vst.msk [vmem:[#allocation2 + $0x20] sm:$0xff] %vm91_vm2, %v806_v11  ;;  %v273_v17 = vpop.f32.mrf.mxu0 }
 0x121   :  { %v336_v20 = vmax.f32 %v282_v14, 0.0  ;;  %v274_v21 = vadd.f32 %v12786_v4, %v273_v17  ;;  %v12884_v14 = vld [vmem:[#allocation2 + $0x10] sm:$0xff]  ;;  %vm685_vm13 = vcmp.gt.s32.totalorder %v597_v60, 0 }
 0x122   :  { %v11113_v28 = vpop.f32.mrf.mxu0  ;;  %v12238_v17 = vld [vmem:[#allocation6 + $0x10] sm:$0xff]   ;;  %vm12928_vm15 = vmxor %vm685_vm13, %vm12526_vm11 }
 0x123   :  { %v807_v30 = vsel %vm12805_vm1, %v336_v20, 0.0  ;;  %v334_v31 = vmax.f32 %v274_v21, 0.0  ;;  %v295_v32 = vadd.f32 %v11113_v28, %v12786_v4  ;;  %v12956_v60 = vld [vmem:[#allocation2 + $0x71] sm:$0xff] }
 0x124   :  { %825 = vst.msk [vmem:[#allocation2 + $0x28] sm:$0xff] %vm91_vm2, %v807_v30  ;;  %v286_v36 = vpop.f32.mrf.mxu0 }
 0x125   :  { %v805_v39 = vsel %vm12815_vm4, %v334_v31, 0.0  ;;  %v339_v40 = vmax.f32 %v295_v32, 0.0  ;;  %v287_v1 = vadd.f32 %v12786_v4, %v286_v36 }
 0x126   :  { %823 = vst.msk [vmem:[#allocation2 + $0x18] sm:$0xff] %vm91_vm2, %v805_v39  ;;  %v11114_v29 = vpop.f32.mrf.mxu0 }
 0x127   :  { %v810_v43 = vsel %vm12826_vm8, %v339_v40, 0.0  ;;  %v337_v45 = vmax.f32 %v287_v1, 0.0  ;;  %v298_v46 = vadd.f32 %v11114_v29, %v12786_v4  ;;  %v14833_v29 = vmov 0 }
 0x128   :  { %828 = vst.msk [vmem:[#allocation2 + $0x40] sm:$0xff] %vm91_vm2, %v810_v43  ;;  %v289_v48 = vpop.f32.mrf.mxu0  ;;  %v14834_v29 = vsel %vm12928_vm15, 4294967295, %v14833_v29 }
 0x129   :  { %v808_v49 = vsel %vm12832_vm9, %v337_v45, 0.0  ;;  %v340_v50 = vmax.f32 %v298_v46, 0.0  ;;  %v290_v51 = vadd.f32 %v12786_v4, %v289_v48  ;;  %14835 = vst [vmem:[#allocation24_spill] sm:$0xff] %v14834_v29 }
 0x12a   :  { %826 = vst.msk [vmem:[#allocation2 + $0x30] sm:$0xff] %vm91_vm2, %v808_v49  ;;  %v11117_v53 = vpop.f32.mrf.mxu0  ;;  %v12244_v49 = vld [vmem:[#allocation6 + $0x80] sm:$0xff]  }
 0x12b   :  { %v811_v37 = vsel %vm12841_vm0, %v340_v50, 0.0  ;;  %v338_v55 = vmax.f32 %v290_v51, 0.0  ;;  %v311_v56 = vadd.f32 %v11117_v53, %v12786_v4  ;;  %v879_v28 = vld [vmem:[#allocation2 + $0x26] sm:$0xff] }
 0x12c   :  { %829 = vst.msk [vmem:[#allocation2 + $0x48] sm:$0xff] %vm91_vm2, %v811_v37  ;;  %v302_v58 = vpop.f32.mrf.mxu0  ;;  %v12914_v36 = vld [vmem:[#allocation2 + $0x27] sm:$0xff] }
 0x12d   :  { %v809_v61 = vsel %vm12852_vm14, %v338_v55, 0.0  ;;  %v343_v63 = vmax.f32 %v311_v56, 0.0  ;;  %v303_v0 = vadd.f32 %v12786_v4, %v302_v58  ;;  %v877_v2 = vld [vmem:[#allocation2 + $0x16] sm:$0xff]  ;;  %v878_v5 = vld [vmem:[#allocation2 + $0x1e] sm:$0xff] }
 0x12e   :  { %v12875_v7 = vld [vmem:[#allocation2 + $0x17] sm:$0xff]  ;;  %827 = vst.msk [vmem:[#allocation2 + $0x38] sm:$0xff] %vm91_vm2, %v809_v61  ;;  %v11118_v11 = vpop.f32.mrf.mxu0  ;;  %v892_v15 = vpack.c.bf16 %v878_v5, %v877_v2  ;;  %v12886_v16 = vld [vmem:[#allocation2 + $0x1f] sm:$0xff] }
 0x12f   :  { %v814_v18 = vsel %vm12860_vm3, %v343_v63, 0.0  ;;  %v341_v20 = vmax.f32 %v303_v0, 0.0  ;;  %v314_v21 = vadd.f32 %v11118_v11, %v12786_v4  ;;  %v1217_v22 = vpack.c.bf16 %v12886_v16, %v12875_v7  ;;  %v12905_v26 = vld [vmem:[#allocation2 + $0x15] sm:$0xff] }
 0x130   :  { %832 = vst.msk [vmem:[#allocation2 + $0x60] sm:$0xff] %vm91_vm2, %v814_v18  ;;  %v305_v27 = vpop.f32.mrf.mxu0  ;;  %11132 = vmatmul.mubr.msk.bf16.vlgmr.msra.gmra.mxu1 %vm91_vm2, %v892_v15  ;;  %v12907_v30 = vld [vmem:[#allocation2 + $0x11] sm:$0xff]  ;;  %v12245_v5 = vld [vmem:[#allocation6 + $0x78] sm:$0xff]  }
 0x131   :  { %v812_v31 = vsel %vm12879_vm7, %v341_v20, 0.0  ;;  %v344_v32 = vmax.f32 %v314_v21, 0.0  ;;  %v306_v33 = vadd.f32 %v12786_v4, %v305_v27  ;;  %11148 = vmatpush3.bf16.msra.mxu1 %v12770_v12  ;;  %11180 = vmatmul.mubr.msk.bf16.vlgmr.msra.gmra.mxu0 %vm91_vm2, %v1217_v22  ;;  %v880_v35 = vld [vmem:[#allocation2 + $0x2e] sm:$0xff]  ;;  %4433 = vst.msk [vmem:[#allocation2 + $0x10] sm:$0xff] %vm91_vm2, %v12884_v14  ;;  %v889_v56 = vld [vmem:[#allocation2 + $0x76] sm:$0xff] }
 0x132   :  { %v12916_v38 = vld [vmem:[#allocation2 + $0x2f] sm:$0xff]  ;;  %830 = vst.msk [vmem:[#allocation2 + $0x50] sm:$0xff] %vm91_vm2, %v812_v31  ;;  %v893_v39 = vpack.c.bf16 %v880_v35, %v879_v28  ;;  %11149 = vmatprep.subr.bf16.mxu1 %v12238_v17  ;;  %11220 = vmatpush3.bf16.msra.mxu0 %v12772_v13  ;;  %v12248_v11 = vld [vmem:[#allocation6 + $0xd8] sm:$0xff]  }
 0x133   :  { %v1218_v40 = vpack.c.bf16 %v12916_v38, %v12914_v36  ;;  %v12239_v4 = vld [vmem:[#allocation6 + $0x8] sm:$0xff]   ;;  %v815_v12 = vsel %vm12894_vm10, %v344_v32, 0.0  ;;  %v342_v1 = vmax.f32 %v306_v33, 0.0  ;;  %11221 = vmatprep.subr.bf16.mxu0 %v12241_v23  ;;  %v12950_v55 = vld [vmem:[#allocation2 + $0x75] sm:$0xff] }
 0x134   :  { %833 = vst.msk [vmem:[#allocation2 + $0x68] sm:$0xff] %vm91_vm2, %v815_v12  ;;  %11135 = vmatprep.mubr.msk.bf16.mxu1 %vm91_vm2, %v893_v39  ;;  %v883_v50 = vld [vmem:[#allocation2 + $0x46] sm:$0xff]  ;;  %v12954_v58 = vld [vmem:[#allocation2 + $0x70] sm:$0xff]  ;;  %v890_v12 = vld [vmem:[#allocation2 + $0x7e] sm:$0xff] }
 0x135   :  { %11183 = vmatprep.mubr.msk.bf16.mxu0 %vm91_vm2, %v1218_v40  ;;  %v813_v13 = vsel %vm12928_vm15, %v342_v1, 0.0  ;;  %v881_v43 = vld [vmem:[#allocation2 + $0x36] sm:$0xff]  ;;  %v882_v44 = vld [vmem:[#allocation2 + $0x3e] sm:$0xff]  ;;  %11150 = vmatpush3.bf16.msra.mxu1 %v12238_v17  ;;  %v12946_v53 = vld [vmem:[#allocation2 + $0x47] sm:$0xff] }
 0x136   :  { %v12937_v45 = vld [vmem:[#allocation2 + $0x37] sm:$0xff]  ;;  %831 = vst.msk [vmem:[#allocation2 + $0x58] sm:$0xff] %vm91_vm2, %v813_v13  ;;  %v894_v46 = vpack.c.bf16 %v882_v44, %v881_v43  ;;  %v12940_v47 = vld [vmem:[#allocation2 + $0x3f] sm:$0xff]  ;;  %11151 = vmatprep.subr.bf16.mxu1 %v12239_v4  ;;  %11222 = vmatpush3.bf16.msra.mxu0 %v12241_v23  ;;  %v898_v13 = vpack.c.bf16 %v890_v12, %v889_v56  ;;  %v12251_v12 = vld [vmem:[#allocation6 + $0xc8] sm:$0xff]  }
 0x137   :  { %v1219_v48 = vpack.c.bf16 %v12940_v47, %v12937_v45  ;;  %11223 = vmatprep.subr.bf16.mxu0 %v12243_v41  ;;  %v12958_v61 = vld [vmem:[#allocation2 + $0x72] sm:$0xff]  ;;  %v12992_v1 = vld [vmem:[#allocation2 + $0x7f] sm:$0xff] }
 0x138   :  { %11136 = vmatmul.mubr.msk.bf16.gmra.mxu1 %vm91_vm2, %v894_v46  ;;  %v12960_v63 = vld [vmem:[#allocation2 + $0x73] sm:$0xff]  ;;  %v1223_v43 = vpack.c.bf16 %v12992_v1, %v12952_v57 }
 0x139   :  { %11184 = vmatmul.mubr.msk.bf16.gmra.mxu0 %vm91_vm2, %v1219_v48  ;;  %v884_v51 = vld [vmem:[#allocation2 + $0x4e] sm:$0xff]  ;;  %11152 = vmatpush3.bf16.msra.mxu1 %v12239_v4  ;;  %v1591_v44 = vld [vmem:[#allocation2 + $0x18] sm:$0xff] }
 0x13a   :  { %v12948_v37 = vld [vmem:[#allocation2 + $0x4f] sm:$0xff]  ;;  %v895_v0 = vpack.c.bf16 %v884_v51, %v883_v50  ;;  %11153 = vmatprep.subr.bf16.mxu1 %v12242_v8  ;;  %11224 = vmatpush3.bf16.msra.mxu0 %v12243_v41  ;;  %v841_v41 = vld [vmem:[#allocation2 + $0x5] sm:$0xff]  ;;  %v844_v48 = vld [vmem:[#allocation2 + $0x1d] sm:$0xff] }
 0x13b   :  { %v1220_v2 = vpack.c.bf16 %v12948_v37, %v12946_v53  ;;  %v12964_v15 = vld [vmem:[#allocation2 + $0x6d] sm:$0xff]  ;;  %11225 = vmatprep.subr.bf16.mxu0 %v12244_v49  ;;  %v857_v46 = vpack.c.bf16 %v12901_v25, %v841_v41  ;;  %v1595_v51 = vld [vmem:[#allocation2 + $0x38] sm:$0xff]  ;;  %v858_v56 = vpack.c.bf16 %v844_v48, %v12905_v26  ;;  %v12250_v48 = vld [vmem:[#allocation6 + $0x60] sm:$0xff]  }
 0x13c   :  { %v888_v17 = vld [vmem:[#allocation2 + $0x6e] sm:$0xff]  ;;  %11139 = vmatprep.mubr.msk.bf16.mxu1 %vm91_vm2, %v895_v0  ;;  %v887_v33 = vld [vmem:[#allocation2 + $0x66] sm:$0xff] }
 0x13d   :  { %v12966_v18 = vld [vmem:[#allocation2 + $0x6f] sm:$0xff]  ;;  %11187 = vmatprep.mubr.msk.bf16.mxu0 %vm91_vm2, %v1220_v2  ;;  %v886_v27 = vld [vmem:[#allocation2 + $0x5e] sm:$0xff]  ;;  %11154 = vmatpush3.bf16.msra.mxu1 %v12242_v8  ;;  %v12982_v35 = vld [vmem:[#allocation2 + $0x67] sm:$0xff]  ;;  %v897_v40 = vpack.c.bf16 %v888_v17, %v887_v33  ;;  %v1606_v8 = vpack.c.bf16 %v1591_v44, %v12884_v14 }
 0x13e   :  { %v12968_v20 = vld [vmem:[#allocation2 + $0x69] sm:$0xff]  ;;  %v885_v23 = vld [vmem:[#allocation2 + $0x56] sm:$0xff]  ;;  %v12980_v32 = vld [vmem:[#allocation2 + $0x5f] sm:$0xff]  ;;  %11226 = vmatpush3.bf16.msra.mxu0 %v12244_v49  ;;  %11195 = vmatprep.subr.bf16.mxu1 %v12245_v5  ;;  %v1222_v4 = vpack.c.bf16 %v12966_v18, %v12982_v35 }
 0x13f   :  { %v12970_v21 = vld [vmem:[#allocation2 + $0x6a] sm:$0xff]  ;;  %v12978_v28 = vld [vmem:[#allocation2 + $0x57] sm:$0xff]  ;;  %v896_v31 = vpack.c.bf16 %v886_v27, %v885_v23  ;;  %11267 = vmatprep.subr.bf16.mxu0 %v12248_v11  ;;  %v1592_v0 = vld [vmem:[#allocation2 + $0x20] sm:$0xff] }
 0x140   :  { %v12972_v22 = vld [vmem:[#allocation2 + $0x6b] sm:$0xff]  ;;  %v1221_v39 = vpack.c.bf16 %v12980_v32, %v12978_v28  ;;  %v847_v26 = vld [vmem:[#allocation2 + $0x35] sm:$0xff] }
 0x141   :  { %4445 = vst.msk [vmem:[#allocation2 + $0x70] sm:$0xff] %vm91_vm2, %v12954_v58  ;;  %11140 = vmatmul.mubr.msk.bf16.gmra.mxu1 %vm91_vm2, %v896_v31  ;;  %v1593_v49 = vld [vmem:[#allocation2 + $0x28] sm:$0xff]  ;;  %v1594_v25 = vld [vmem:[#allocation2 + $0x30] sm:$0xff]  ;;  %v1599_v41 = vld [vmem:[#allocation2 + $0x58] sm:$0xff] }
 0x142   :  { %11188 = vmatmul.mubr.msk.bf16.gmra.mxu0 %vm91_vm2, %v1221_v39  ;;  %11143 = vmatprep.mubr.msk.bf16.mxu1 %vm91_vm2, %v897_v40  ;;  %v846_v50 = vld [vmem:[#allocation2 + $0x2d] sm:$0xff]  ;;  %v1607_v2 = vpack.c.bf16 %v1593_v49, %v1592_v0  ;;  %v845_v17 = vld [vmem:[#allocation2 + $0x25] sm:$0xff]  ;;  %v1608_v27 = vpack.c.bf16 %v1595_v51, %v1594_v25  ;;  %v848_v39 = vld [vmem:[#allocation2 + $0x3d] sm:$0xff] }
 0x143   :  { %11191 = vmatprep.mubr.msk.bf16.mxu0 %vm91_vm2, %v1222_v4  ;;  %v12246_v23 = vld [vmem:[#allocation6 + $0x70] sm:$0xff]   ;;  %v859_v14 = vpack.c.bf16 %v846_v50, %v845_v17  ;;  %v12247_v33 = vld [vmem:[#allocation6 + $0x68] sm:$0xff]   ;;  %v12253_v0 = vld [vmem:[#allocation6 + $0xb8] sm:$0xff]  }
 0x144   :  { %v12249_v31 = vld [vmem:[#allocation6 + $0xd0] sm:$0xff]   ;;  %v1597_v40 = vld [vmem:[#allocation2 + $0x48] sm:$0xff]  ;;  %v12256_v25 = vld [vmem:[#allocation6 + $0x118] sm:$0xff]  }
 0x145   :  { %v850_v4 = vld [vmem:[#allocation2 + $0x4d] sm:$0xff]  ;;  %v13010_v50 = vld [vmem:[#allocation2 + $0x78] sm:$0xff]  ;;  %v853_v17 = vld [vmem:[#allocation2 + $0x65] sm:$0xff] }
 0x146   :  { %v851_v51 = vld [vmem:[#allocation2 + $0x55] sm:$0xff] }
 0x149   :  { %11144 = vmatmul.mubr.msk.bf16.gmra.mxu1 %vm91_vm2, %v898_v13  ;;  %v860_v13 = vpack.c.bf16 %v848_v39, %v847_v26  ;;  %v863_v26 = vpack.c.bf16 %v12964_v15, %v853_v17  ;;  %v13019_v39 = vld [vmem:[#allocation2 + $0x80] sm:$0xff]  ;;  %v12259_v17 = vld [vmem:[#allocation6 + $0x108] sm:$0xff]  }
 0x14a   :  { %11192 = vmatmul.mubr.msk.bf16.gmra.mxu0 %vm91_vm2, %v1223_v43  ;;  %11155 = vmatprep.mubr.msk.bf16.mxu1 %vm91_vm2, %v857_v46  ;;  %v1596_v43 = vld [vmem:[#allocation2 + $0x40] sm:$0xff] }
 0x14b   :  { %11227 = vmatprep.mubr.msk.bf16.mxu0 %vm91_vm2, %v1606_v8  ;;  %v1609_v44 = vpack.c.bf16 %v1597_v40, %v1596_v43  ;;  %v1598_v8 = vld [vmem:[#allocation2 + $0x50] sm:$0xff]  ;;  %v13022_v40 = vld [vmem:[#allocation2 + $0x88] sm:$0xff]  ;;  %v11121_v43 = vpop.f32.mrf.mxu0 }
 0x14c   :  { %v1610_v49 = vpack.c.bf16 %v1599_v41, %v1598_v8  ;;  %v1613_v15 = vpack.c.bf16 %v13022_v40, %v13019_v39  ;;  %v13031_v41 = vld [vmem:[#allocation2 + $0x21] sm:$0xff] }
 0x151   :  { %11156 = vmatmul.mubr.msk.bf16.vlgmr.msra.gmra.mxu1 %vm91_vm2, %v858_v56  ;;  %v852_v56 = vld [vmem:[#allocation2 + $0x5d] sm:$0xff] }
 0x152   :  { %11196 = vmatpush3.bf16.msra.mxu1 %v12245_v5  ;;  %11228 = vmatmul.mubr.msk.bf16.vlgmr.msra.gmra.mxu0 %vm91_vm2, %v1607_v2  ;;  %v849_v5 = vld [vmem:[#allocation2 + $0x45] sm:$0xff] }
 0x153   :  { %11159 = vmatprep.mubr.msk.bf16.mxu1 %vm91_vm2, %v859_v14  ;;  %11231 = vmatprep.mubr.msk.bf16.mxu0 %vm91_vm2, %v1608_v27  ;;  %v861_v46 = vpack.c.bf16 %v850_v4, %v849_v5  ;;  %v1601_v2 = vld [vmem:[#allocation2 + $0x68] sm:$0xff]  ;;  %v1600_v14 = vld [vmem:[#allocation2 + $0x60] sm:$0xff]  ;;  %v1612_v27 = vpack.c.bf16 %v13010_v50, %v12954_v58  ;;  %v13039_v5 = vld [vmem:[#allocation2 + $0x31] sm:$0xff] }
 0x154   :  { %11197 = vmatprep.subr.bf16.mxu1 %v12246_v23  ;;  %11268 = vmatpush3.bf16.msra.mxu0 %v12248_v11  ;;  %v12252_v11 = vld [vmem:[#allocation6 + $0xc0] sm:$0xff]   ;;  %v13027_v4 = vld [vmem:[#allocation2 + $0x19] sm:$0xff] }
 0x155   :  { %11269 = vmatprep.subr.bf16.mxu0 %v12249_v31 }
 0x156   :  { %11198 = vmatpush3.bf16.msra.mxu1 %v12246_v23  ;;  %v862_v23 = vpack.c.bf16 %v852_v56, %v851_v51  ;;  %v1414_v51 = vpack.c.bf16 %v12937_v45, %v12916_v38  ;;  %v13061_v38 = vld [vmem:[#allocation2 + $0x59] sm:$0xff]  ;;  %v1415_v45 = vpack.c.bf16 %v12946_v53, %v12940_v47  ;;  %v12260_v47 = vld [vmem:[#allocation6 + $0x100] sm:$0xff]  }
 0x157   :  { %11199 = vmatprep.subr.bf16.mxu1 %v12247_v33  ;;  %v13079_v53 = vld [vmem:[#allocation2 + $0x79] sm:$0xff] }
 0x158   :  { %11270 = vmatpush3.bf16.msra.mxu0 %v12249_v31  ;;  %v1611_v31 = vpack.c.bf16 %v1601_v2, %v1600_v14  ;;  %v12257_v2 = vld [vmem:[#allocation6 + $0x110] sm:$0xff]   ;;  %v1416_v14 = vpack.c.bf16 %v12978_v28, %v12948_v37  ;;  %v13081_v37 = vld [vmem:[#allocation2 + $0x81] sm:$0xff] }
 0x159   :  { %11160 = vmatmul.mubr.msk.bf16.gmra.mxu1 %vm91_vm2, %v860_v13  ;;  %11271 = vmatprep.subr.bf16.mxu0 %v12251_v12  ;;  %v1998_v13 = vpack.c.bf16 %v13031_v41, %v13027_v4  ;;  %v12261_v28 = vld [vmem:[#allocation6 + $0xf8] sm:$0xff]  }
 0x15a   :  { %11232 = vmatmul.mubr.msk.bf16.gmra.mxu0 %vm91_vm2, %v1609_v44  ;;  %11163 = vmatprep.mubr.msk.bf16.mxu1 %vm91_vm2, %v861_v46  ;;  %v13041_v46 = vld [vmem:[#allocation2 + $0x39] sm:$0xff] }
 0x15b   :  { %11235 = vmatprep.mubr.msk.bf16.mxu0 %vm91_vm2, %v1610_v49  ;;  %11200 = vmatpush3.bf16.msra.mxu1 %v12247_v33  ;;  %v856_v33 = vld [vmem:[#allocation2 + $0x7d] sm:$0xff] }
 0x15c   :  { %11201 = vmatprep.subr.bf16.mxu1 %v12250_v48  ;;  %11272 = vmatpush3.bf16.msra.mxu0 %v12251_v12  ;;  %v864_v58 = vpack.c.bf16 %v856_v33, %v12950_v55  ;;  %v1412_v12 = vpack.c.bf16 %v12875_v7, %v12765_v10  ;;  %v318_v55 = vpop.f32.mrf.mxu0  ;;  %v1413_v10 = vpack.c.bf16 %v12914_v36, %v12886_v16  ;;  %v13045_v7 = vld [vmem:[#allocation2 + $0x29] sm:$0xff]  ;;  %v13049_v49 = vld [vmem:[#allocation2 + $0x41] sm:$0xff]  ;;  %v13059_v36 = vld [vmem:[#allocation2 + $0x51] sm:$0xff] }
 0x15d   :  { %11273 = vmatprep.subr.bf16.mxu0 %v12252_v11  ;;  %v2000_v56 = vpack.c.bf16 %v13049_v49, %v13041_v46  ;;  %v12255_v16 = vld [vmem:[#allocation6 + $0xa8] sm:$0xff]   ;;  %v2004_v33 = vpack.c.bf16 %v13081_v37, %v13079_v53  ;;  %v2374_v55 = vld [vmem:[#allocation2 + $0x1b] sm:$0xff] }
 0x15e   :  { %v11122_v44 = vpop.f32.mrf.mxu0 }
 0x15f   :  { %11202 = vmatpush3.bf16.msra.mxu1 %v12250_v48  ;;  %v1999_v48 = vpack.c.bf16 %v13039_v5, %v13045_v7 }
 0x160   :  { %11274 = vmatpush3.bf16.msra.mxu0 %v12252_v11  ;;  %11243 = vmatprep.subr.bf16.mxu1 %v12253_v0  ;;  %v321_v8 = vpop.f32.mrf.mxu0  ;;  %v12254_v11 = vld [vmem:[#allocation6 + $0xb0] sm:$0xff]  }
 0x161   :  { %11164 = vmatmul.mubr.msk.bf16.gmra.mxu1 %vm91_vm2, %v862_v23  ;;  %11315 = vmatprep.subr.bf16.mxu0 %v12256_v25  ;;  %v2378_v8 = vld [vmem:[#allocation2 + $0x3b] sm:$0xff] }
 0x162   :  { %11236 = vmatmul.mubr.msk.bf16.gmra.mxu0 %vm91_vm2, %v1611_v31  ;;  %11167 = vmatprep.mubr.msk.bf16.mxu1 %vm91_vm2, %v863_v26  ;;  %v1417_v26 = vpack.c.bf16 %v12982_v35, %v12980_v32  ;;  %v1996_v32 = vld [vmem:[#allocation2 + $0x89] sm:$0xff]  ;;  %v1997_v35 = vld [vmem:[#allocation2 + $0x91] sm:$0xff] }
 0x163   :  { %11239 = vmatprep.mubr.msk.bf16.mxu0 %vm91_vm2, %v1612_v27  ;;  %v12258_v27 = vld [vmem:[#allocation6 + $0xa0] sm:$0xff]   ;;  %v2005_v43 = vpack.c.bf16 %v1997_v35, %v1996_v32 }
 0x169   :  { %11168 = vmatmul.mubr.msk.bf16.gmra.mxu1 %vm91_vm2, %v864_v58  ;;  %v2003_v58 = vpack.c.bf16 %v12956_v60, %v12968_v20 }
 0x16a   :  { %11240 = vmatmul.mubr.msk.bf16.gmra.mxu0 %vm91_vm2, %v1613_v15  ;;  %11203 = vmatprep.mubr.msk.bf16.mxu1 %vm91_vm2, %v1412_v12  ;;  %v1418_v15 = vpack.c.bf16 %v12952_v57, %v12966_v18  ;;  %v1411_v12 = vld [vmem:[#allocation2 + $0x87] sm:$0xff]  ;;  %v1802_v57 = vpack.c.bf16 %v13027_v4, %v12907_v30  ;;  %v1804_v30 = vpack.c.bf16 %v13041_v46, %v13039_v5 }
 0x16b   :  { %11275 = vmatprep.mubr.msk.bf16.mxu0 %vm91_vm2, %v1998_v13  ;;  %v1419_v13 = vpack.c.bf16 %v1411_v12, %v12992_v1  ;;  %v2375_v18 = vld [vmem:[#allocation2 + $0x23] sm:$0xff]  ;;  %v1803_v1 = vpack.c.bf16 %v13045_v7, %v13031_v41  ;;  %v2381_v41 = vld [vmem:[#allocation2 + $0x53] sm:$0xff]  ;;  %v2382_v7 = vld [vmem:[#allocation2 + $0x5b] sm:$0xff]  ;;  %v1806_v5 = vpack.c.bf16 %v13061_v38, %v13059_v36  ;;  %v2199_v12 = vpack.c.bf16 %v12958_v61, %v12970_v21 }
 0x16c   :  { %v2390_v44 = vpack.c.bf16 %v2375_v18, %v2374_v55  ;;  %v2383_v46 = vld [vmem:[#allocation2 + $0x63] sm:$0xff] }
 0x171   :  { %11204 = vmatmul.mubr.msk.bf16.vlgmr.msra.gmra.mxu1 %vm91_vm2, %v1413_v10  ;;  %v2377_v10 = vld [vmem:[#allocation2 + $0x33] sm:$0xff] }
 0x172   :  { %11244 = vmatpush3.bf16.msra.mxu1 %v12253_v0  ;;  %11276 = vmatmul.mubr.msk.bf16.vlgmr.msra.gmra.mxu0 %vm91_vm2, %v1999_v48  ;;  %v13065_v0 = vld [vmem:[#allocation2 + $0x49] sm:$0xff] }
 0x173   :  { %11207 = vmatprep.mubr.msk.bf16.mxu1 %vm91_vm2, %v1414_v51  ;;  %11279 = vmatprep.mubr.msk.bf16.mxu0 %vm91_vm2, %v2000_v56  ;;  %v2001_v23 = vpack.c.bf16 %v13059_v36, %v13065_v0  ;;  %v2376_v48 = vld [vmem:[#allocation2 + $0x2b] sm:$0xff]  ;;  %v2379_v51 = vld [vmem:[#allocation2 + $0x43] sm:$0xff]  ;;  %v2395_v36 = vpack.c.bf16 %v12960_v63, %v12972_v22 }
 0x174   :  { %11245 = vmatprep.subr.bf16.mxu1 %v12254_v11  ;;  %11316 = vmatpush3.bf16.msra.mxu0 %v12256_v25  ;;  %v13071_v25 = vld [vmem:[#allocation2 + $0x61] sm:$0xff]  ;;  %v12262_v56 = vld [vmem:[#allocation6 + $0xf0] sm:$0xff]   ;;  %v2392_v4 = vpack.c.bf16 %v2379_v51, %v2378_v8 }
 0x175   :  { %11317 = vmatprep.subr.bf16.mxu0 %v12257_v2  ;;  %v2002_v31 = vpack.c.bf16 %v13071_v25, %v13061_v38  ;;  %v1809_v38 = vpack.c.bf16 %v1996_v32, %v13081_v37  ;;  %v2183_v63 = vld [vmem:[#allocation2 + $0x42] sm:$0xff]  ;;  %v2184_v37 = vld [vmem:[#allocation2 + $0x4a] sm:$0xff]  ;;  %v12265_v32 = vld [vmem:[#allocation6 + $0x158] sm:$0xff]  }
 0x176   :  { %11246 = vmatpush3.bf16.msra.mxu1 %v12254_v11  ;;  %v2391_v11 = vpack.c.bf16 %v2377_v10, %v2376_v48 }
 0x177   :  { %11247 = vmatprep.subr.bf16.mxu1 %v12255_v16 }
 0x178   :  { %11318 = vmatpush3.bf16.msra.mxu0 %v12257_v2  ;;  %v12263_v2 = vld [vmem:[#allocation6 + $0xe8] sm:$0xff]  }
 0x179   :  { %11208 = vmatmul.mubr.msk.bf16.gmra.mxu1 %vm91_vm2, %v1415_v45  ;;  %11319 = vmatprep.subr.bf16.mxu0 %v12259_v17 }
 0x17a   :  { %11280 = vmatmul.mubr.msk.bf16.gmra.mxu0 %vm91_vm2, %v2001_v23  ;;  %11211 = vmatprep.mubr.msk.bf16.mxu1 %vm91_vm2, %v1416_v14  ;;  %v12264_v23 = vld [vmem:[#allocation6 + $0xe0] sm:$0xff]   ;;  %v2394_v14 = vpack.c.bf16 %v2383_v46, %v2382_v7  ;;  %v12267_v7 = vld [vmem:[#allocation6 + $0x148] sm:$0xff]  }
 0x17b   :  { %11283 = vmatprep.mubr.msk.bf16.mxu0 %vm91_vm2, %v2002_v31  ;;  %11248 = vmatpush3.bf16.msra.mxu1 %v12255_v16  ;;  %v1805_v16 = vpack.c.bf16 %v13065_v0, %v13049_v49  ;;  %v1808_v49 = vpack.c.bf16 %v13079_v53, %v12956_v60  ;;  %v1807_v0 = vpack.c.bf16 %v12968_v20, %v13071_v25  ;;  %v2179_v31 = vld [vmem:[#allocation2 + $0x22] sm:$0xff]  ;;  %v2181_v60 = vld [vmem:[#allocation2 + $0x32] sm:$0xff]  ;;  %v2182_v20 = vld [vmem:[#allocation2 + $0x3a] sm:$0xff] }
 0x17c   :  { %11249 = vmatprep.subr.bf16.mxu1 %v12258_v27  ;;  %11320 = vmatpush3.bf16.msra.mxu0 %v12259_v17  ;;  %v2380_v17 = vld [vmem:[#allocation2 + $0x4b] sm:$0xff]  ;;  %v2196_v22 = vpack.c.bf16 %v2183_v63, %v2182_v20  ;;  %v2191_v46 = vld [vmem:[#allocation2 + $0x82] sm:$0xff] }
 0x17d   :  { %11321 = vmatprep.subr.bf16.mxu0 %v12260_v47  ;;  %v2393_v45 = vpack.c.bf16 %v2381_v41, %v2380_v17  ;;  %v2180_v25 = vld [vmem:[#allocation2 + $0x2a] sm:$0xff]  ;;  %v12270_v63 = vld [vmem:[#allocation6 + $0x140] sm:$0xff]  }
 0x17e   :  { %v2195_v53 = vpack.c.bf16 %v2181_v60, %v2180_v25  ;;  %v2386_v25 = vld [vmem:[#allocation2 + $0x7b] sm:$0xff] }
 0x17f   :  { %11250 = vmatpush3.bf16.msra.mxu1 %v12258_v27  ;;  %v2178_v27 = vld [vmem:[#allocation2 + $0x1a] sm:$0xff] }
 0x180   :  { %11322 = vmatpush3.bf16.msra.mxu0 %v12260_v47  ;;  %11291 = vmatprep.subr.bf16.mxu1 %v12261_v28  ;;  %v2194_v47 = vpack.c.bf16 %v2179_v31, %v2178_v27 }
 0x181   :  { %11212 = vmatmul.mubr.msk.bf16.gmra.mxu1 %vm91_vm2, %v1417_v26  ;;  %v2186_v26 = vld [vmem:[#allocation2 + $0x5a] sm:$0xff] }
 0x182   :  { %11284 = vmatmul.mubr.msk.bf16.gmra.mxu0 %vm91_vm2, %v2003_v58  ;;  %11215 = vmatprep.mubr.msk.bf16.mxu1 %vm91_vm2, %v1418_v15  ;;  %v2187_v58 = vld [vmem:[#allocation2 + $0x62] sm:$0xff] }
 0x183   :  { %11287 = vmatprep.mubr.msk.bf16.mxu0 %vm91_vm2, %v2004_v33  ;;  %v2198_v15 = vpack.c.bf16 %v2187_v58, %v2186_v26  ;;  %v12271_v58 = vld [vmem:[#allocation6 + $0x128] sm:$0xff]  }
 0x189   :  { %11216 = vmatmul.mubr.msk.bf16.gmra.mxu1 %vm91_vm2, %v1419_v13 }
 0x18a   :  { %11288 = vmatmul.mubr.msk.bf16.gmra.mxu0 %vm91_vm2, %v2005_v43  ;;  %11251 = vmatprep.mubr.msk.bf16.mxu1 %vm91_vm2, %v1802_v57 }
 0x18b   :  { %11323 = vmatprep.mubr.msk.bf16.mxu0 %vm91_vm2, %v2390_v44 }
 0x191   :  { %11252 = vmatmul.mubr.msk.bf16.vlgmr.msra.gmra.mxu1 %vm91_vm2, %v1803_v1  ;;  %v12266_v1 = vld [vmem:[#allocation6 + $0x150] sm:$0xff]  }
 0x192   :  { %11292 = vmatpush3.bf16.msra.mxu1 %v12261_v28  ;;  %11324 = vmatmul.mubr.msk.bf16.vlgmr.msra.gmra.mxu0 %vm91_vm2, %v2391_v11  ;;  %v2185_v28 = vld [vmem:[#allocation2 + $0x52] sm:$0xff] }
 0x193   :  { %11255 = vmatprep.mubr.msk.bf16.mxu1 %vm91_vm2, %v1804_v30  ;;  %11327 = vmatprep.mubr.msk.bf16.mxu0 %vm91_vm2, %v2392_v4  ;;  %v2197_v33 = vpack.c.bf16 %v2185_v28, %v2184_v37  ;;  %v2388_v37 = vld [vmem:[#allocation2 + $0x8b] sm:$0xff] }
 0x194   :  { %11293 = vmatprep.subr.bf16.mxu1 %v12262_v56 }
 0x196   :  { %11294 = vmatpush3.bf16.msra.mxu1 %v12262_v56 }
 0x197   :  { %11295 = vmatprep.subr.bf16.mxu1 %v12263_v2 }
 0x199   :  { %11256 = vmatmul.mubr.msk.bf16.gmra.mxu1 %vm91_vm2, %v1805_v16 }
 0x19a   :  { %11328 = vmatmul.mubr.msk.bf16.gmra.mxu0 %vm91_vm2, %v2393_v45  ;;  %11259 = vmatprep.mubr.msk.bf16.mxu1 %vm91_vm2, %v1806_v5  ;;  %v12268_v45 = vld [vmem:[#allocation6 + $0x138] sm:$0xff]  }
 0x19b   :  { %11331 = vmatprep.mubr.msk.bf16.mxu0 %vm91_vm2, %v2394_v14  ;;  %11296 = vmatpush3.bf16.msra.mxu1 %v12263_v2  ;;  %v2190_v5 = vld [vmem:[#allocation2 + $0x7a] sm:$0xff] }
 0x19c   :  { %11297 = vmatprep.subr.bf16.mxu1 %v12264_v23  ;;  %v2200_v14 = vpack.c.bf16 %v2191_v46, %v2190_v5  ;;  %11363 = vmatprep.subr.bf16.mxu0 %v12268_v45  ;;  %4446 = vst.msk [vmem:[#allocation2 + $0x78] sm:$0xff] %vm91_vm2, %v13010_v50 }
 0x19d   :  { %11364 = vmatpush3.bf16.msra.mxu0 %v12268_v45  ;;  %v2677_v45 = vld [vmem:[#allocation3 + $0xe] sm:$0xff] }
 0x19f   :  { %11298 = vmatpush3.bf16.msra.mxu1 %v12264_v23 }
 0x1a0   :  { %11339 = vmatprep.subr.bf16.mxu1 %v12265_v32 }
 0x1a1   :  { %11260 = vmatmul.mubr.msk.bf16.gmra.mxu1 %vm91_vm2, %v1807_v0 }
 0x1a2   :  { %11332 = vmatmul.mubr.msk.bf16.gmra.mxu0 %vm91_vm2, %v2395_v36  ;;  %11263 = vmatprep.mubr.msk.bf16.mxu1 %vm91_vm2, %v1808_v49  ;;  %v2192_v36 = vld [vmem:[#allocation2 + $0x8a] sm:$0xff] }
 0x1a9   :  { %11264 = vmatmul.mubr.msk.bf16.gmra.mxu1 %vm91_vm2, %v1809_v38  ;;  %v2193_v38 = vld [vmem:[#allocation2 + $0x92] sm:$0xff] }
 0x1aa   :  { %11299 = vmatprep.mubr.msk.bf16.mxu1 %vm91_vm2, %v2194_v47  ;;  %v2201_v31 = vpack.c.bf16 %v2193_v38, %v2192_v36  ;;  %v12269_v47 = vld [vmem:[#allocation6 + $0x130] sm:$0xff]  }
 0x1ab   :  { %11365 = vmatprep.subr.bf16.mxu0 %v12269_v47  ;;  %v2643_v36 = vld [vmem:[#allocation3 + $0xd] sm:$0xff] }
 0x1ac   :  { %11366 = vmatpush3.bf16.msra.mxu0 %v12269_v47 }
 0x1ad   :  { %11367 = vmatprep.subr.bf16.mxu0 %v12271_v58 }
 0x1b0   :  { %11368 = vmatpush3.bf16.msra.mxu0 %v12271_v58  ;;  %v13209_v58 = vld [vmem:[#allocation6 + $0x198] sm:$0xff]  }
 0x1b1   :  { %11300 = vmatmul.mubr.msk.bf16.vlgmr.msra.gmra.mxu1 %vm91_vm2, %v2195_v53  ;;  %v2387_v53 = vld [vmem:[#allocation2 + $0x83] sm:$0xff]  ;;  %14837 = vst [vmem:[#allocation26_spill] sm:$0xff] %v13209_v58 }
 0x1b2   :  { %11303 = vmatprep.mubr.msk.bf16.mxu1 %vm91_vm2, %v2196_v22  ;;  %11340 = vmatpush3.bf16.msra.mxu1 %v12265_v32  ;;  %v2396_v28 = vpack.c.bf16 %v2387_v53, %v2386_v25  ;;  %4447 = vst.msk [vmem:[#allocation2 + $0x80] sm:$0xff] %vm91_vm2, %v13019_v39  ;;  %4448 = vst.msk [vmem:[#allocation2 + $0x88] sm:$0xff] %vm91_vm2, %v13022_v40  ;;  %v13194_v40 = vld [vmem:[#allocation6 + $0x178] sm:$0xff]  }
 0x1b3   :  { %11341 = vmatprep.subr.bf16.mxu1 %v12266_v1  ;;  %14836 = vst [vmem:[#allocation25_spill] sm:$0xff] %v13194_v40 }
 0x1b4   :  { %11335 = vmatprep.mubr.msk.bf16.mxu0 %vm91_vm2, %v2396_v28 }
 0x1b6   :  { %11342 = vmatpush3.bf16.msra.mxu1 %v12266_v1  ;;  %v12272_v1 = vld [vmem:[#allocation6 + $0x120] sm:$0xff]  }
 0x1b7   :  { %11343 = vmatprep.subr.bf16.mxu1 %v12267_v7  ;;  %11369 = vmatprep.subr.bf16.mxu0 %v12272_v1 }
 0x1b8   :  { %11370 = vmatpush3.bf16.msra.mxu0 %v12272_v1 }
 0x1b9   :  { %11304 = vmatmul.mubr.msk.bf16.gmra.mxu1 %vm91_vm2, %v2197_v33  ;;  %v2389_v33 = vld [vmem:[#allocation2 + $0x93] sm:$0xff]  ;;  %11411 = vmatprep.subr.bf16.mxu0 %v13209_v58 }
 0x1ba   :  { %11307 = vmatprep.mubr.msk.bf16.mxu1 %vm91_vm2, %v2198_v15  ;;  %11344 = vmatpush3.bf16.msra.mxu1 %v12267_v7  ;;  %v2676_v7 = vld [vmem:[#allocation3 + $0x6] sm:$0xff] }
 0x1bb   :  { %11345 = vmatprep.subr.bf16.mxu1 %v12270_v63  ;;  %v2692_v46 = vpack.c.bf16 %v2677_v45, %v2676_v7 }
 0x1be   :  { %11346 = vmatpush3.bf16.msra.mxu1 %v12270_v63 }
 0x1bf   :  { %11387 = vmatprep.subr.bf16.mxu1 %v13194_v40 }
 0x1c1   :  { %11308 = vmatmul.mubr.msk.bf16.gmra.mxu1 %vm91_vm2, %v2199_v12  ;;  %v2397_v12 = vpack.c.bf16 %v2389_v33, %v2388_v37 }
 0x1c2   :  { %11311 = vmatprep.mubr.msk.bf16.mxu1 %vm91_vm2, %v2200_v14  ;;  %v2642_v14 = vld [vmem:[#allocation3 + $0x5] sm:$0xff] }
 0x1c3   :  { %11336 = vmatmul.mubr.msk.bf16.gmra.mxu0 %vm91_vm2, %v2397_v12 }
 0x1c9   :  { %11312 = vmatmul.mubr.msk.bf16.gmra.mxu1 %vm91_vm2, %v2201_v31  ;;  %v2658_v31 = vpack.c.bf16 %v2643_v36, %v2642_v14 }
 0x1ca   :  { %11347 = vmatprep.mubr.msk.bf16.mxu1 %vm91_vm2, %v2692_v46 }
 0x1cb   :  { %11371 = vmatprep.mubr.msk.bf16.mxu0 %vm91_vm2, %v2658_v31 }
 0x1f0   :  { %v13137_v35 = vpop.f32.mrf.mxu1 }
 0x1f1   :  { %v13139_v13 = vpop.f32.mrf.mxu0 }
 0x1f2   :  { %v990_v43 = vpop.f32.mrf.mxu1 }
 0x1f3   :  { %v1315_v55 = vpop.f32.mrf.mxu0 }
 0x1f4   :  { %v13141_v57 = vpop.f32.mrf.mxu1 }
 0x1f5   :  { %v13143_v18 = vpop.f32.mrf.mxu0 }
 0x1f6   :  { %v13145_v44 = vpop.f32.mrf.mxu1 }
 0x1f7   :  { %v13147_v10 = vpop.f32.mrf.mxu0 }
 0x1f8   :  { %v13149_v61 = vpop.f32.mrf.mxu1 }
 0x1f9   :  { %v13151_v21 = vpop.f32.mrf.mxu0 }
 0x1fa   :  { %v13153_v8 = vpop.f32.mrf.mxu1 }
 0x1fb   :  { %v13155_v48 = vpop.f32.mrf.mxu0 }
 0x1fc   :  { %v13157_v11 = vpop.f32.mrf.mxu1 }
 0x1fd   :  { %v13159_v51 = vpop.f32.mrf.mxu0 }
 0x1fe   :  { %v13161_v56 = vpop.f32.mrf.mxu1 }
 0x1ff   :  { %v13163_v30 = vpop.f32.mrf.mxu0 }
 0x201   :  { %v13165_v4 = vpop.f32.mrf.mxu1 }
 0x202   :  { %v13167_v2 = vpop.f32.mrf.mxu0 }
 0x203   :  { %v13169_v41 = vpop.f32.mrf.mxu1 }
 0x204   :  { %v13171_v16 = vpop.f32.mrf.mxu0 }
 0x205   :  { %v13173_v17 = vpop.f32.mrf.mxu1 }
 0x206   :  { %v13175_v23 = vpop.f32.mrf.mxu0 }
 0x207   :  { %v13177_v49 = vpop.f32.mrf.mxu1 }
 0x208   :  { %v13179_v0 = vpop.f32.mrf.mxu0 }
 0x209   :  { %v11145_v27 = vpop.f32.mrf.mxu1 }
 0x20a   :  { %v11193_v60 = vpop.f32.mrf.mxu0 }
 0x20b   :  { %v1038_v20 = vpop.f32.mrf.mxu1 }
 0x20c   :  { %v1363_v22 = vpop.f32.mrf.mxu0 }
 0x20d   :  { %v11146_v26 = vpop.f32.mrf.mxu1 }
 0x20e   :  { %v11194_v15 = vpop.f32.mrf.mxu0 }
 0x20f   :  { %v1041_v32 = vpop.f32.mrf.mxu1 }
 0x210   :  { %v1366_v43 = vpop.f32.mrf.mxu0 }
 0x211   :  { %v11157_v50 = vpop.f32.mrf.mxu1 }
 0x212   :  { %v1144_v39 = vadd.f32 %v11157_v50, %v13137_v35  ;;  %v13192_v55 = vpop.f32.mrf.mxu0 }
 0x213   :  { %v1135_v5 = vpop.f32.mrf.mxu1 }
 0x214   :  { %v1705_v38 = vpop.f32.mrf.mxu0  ;;  %v1380_v27 = vadd.f32 %v13139_v13, %v1144_v39 }
 0x215   :  { %v11158_v47 = vpop.f32.mrf.mxu1 }
 0x216   :  { %v1147_v35 = vadd.f32 %v11158_v47, %v13141_v57  ;;  %v11230_v60 = vpop.f32.mrf.mxu0 }
 0x217   :  { %v13201_v20 = vpop.f32.mrf.mxu1 }
 0x218   :  { %v13203_v25 = vpop.f32.mrf.mxu0  ;;  %v1381_v53 = vadd.f32 %v13143_v18, %v1147_v35 }
 0x219   :  { %v11161_v13 = vpop.f32.mrf.mxu1 }
 0x21a   :  { %v1160_v63 = vadd.f32 %v11161_v13, %v13149_v61  ;;  %v11233_v22 = vpop.f32.mrf.mxu0 }
 0x21b   :  { %v1151_v28 = vpop.f32.mrf.mxu1 }
 0x21c   :  { %v1152_v26 = vadd.f32 %v1151_v28, %v13153_v8  ;;  %v1721_v37 = vpop.f32.mrf.mxu0  ;;  %v1384_v57 = vadd.f32 %v13151_v21, %v1160_v63 }
 0x21d   :  { %v11162_v33 = vpop.f32.mrf.mxu1 }
 0x21e   :  { %v1163_v15 = vadd.f32 %v11162_v33, %v13157_v11  ;;  %v11234_v12 = vpop.f32.mrf.mxu0  ;;  %v1382_v32 = vadd.f32 %v13155_v48, %v1152_v26 }
 0x21f   :  { %v13213_v43 = vpop.f32.mrf.mxu1 }
 0x220   :  { %v13216_v18 = vpop.f32.mrf.mxu0  ;;  %v1385_v61 = vadd.f32 %v13159_v51, %v1163_v15  ;;  %v1155_v40 = vadd.f32 %v13213_v43, %v13161_v56 }
 0x221   :  { %v11165_v8 = vpop.f32.mrf.mxu1 }
 0x222   :  { %v1176_v50 = vadd.f32 %v11165_v8, %v13165_v4  ;;  %v11237_v21 = vpop.f32.mrf.mxu0 }
 0x223   :  { %v1167_v39 = vpop.f32.mrf.mxu1 }
 0x224   :  { %v1168_v1 = vadd.f32 %v1167_v39, %v13169_v41  ;;  %v1737_v7 = vpop.f32.mrf.mxu0  ;;  %v1388_v11 = vadd.f32 %v13167_v2, %v1176_v50 }
 0x225   :  { %v11166_v45 = vpop.f32.mrf.mxu1 }
 0x226   :  { %v1179_v48 = vadd.f32 %v11166_v45, %v13173_v17  ;;  %v11238_v5 = vpop.f32.mrf.mxu0  ;;  %v1386_v46 = vadd.f32 %v13171_v16, %v1168_v1 }
 0x227   :  { %v13224_v14 = vpop.f32.mrf.mxu1 }
 0x228   :  { %v13226_v36 = vpop.f32.mrf.mxu0  ;;  %v1389_v51 = vadd.f32 %v13175_v23, %v1179_v48 }
 0x229   :  { %v11169_v4 = vpop.f32.mrf.mxu1 }
 0x22a   :  { %v11241_v38 = vpop.f32.mrf.mxu0 }
 0x22b   :  { %v1183_v31 = vpop.f32.mrf.mxu1 }
 0x22c   :  { %v1753_v47 = vpop.f32.mrf.mxu0 }
 0x22d   :  { %v11170_v41 = vpop.f32.mrf.mxu1 }
 0x22e   :  { %v11242_v35 = vpop.f32.mrf.mxu0 }
 0x22f   :  { %v1186_v13 = vpop.f32.mrf.mxu1 }
 0x230   :  { %v1756_v2 = vpop.f32.mrf.mxu0 }
 0x231   :  { %v11205_v63 = vpop.f32.mrf.mxu1 }
 0x232   :  { %v1576_v28 = vadd.f32 %v11205_v63, %v1380_v27  ;;  %v13229_v17 = vpop.f32.mrf.mxu0 }
 0x233   :  { %v1511_v26 = vpop.f32.mrf.mxu1 }
 0x234   :  { %v2097_v16 = vpop.f32.mrf.mxu0  ;;  %v13232_v33 = vadd.f32 %v13192_v55, %v1576_v28 }
 0x235   :  { %v11206_v15 = vpop.f32.mrf.mxu1 }
 0x236   :  { %v1577_v8 = vadd.f32 %v11206_v15, %v1381_v53  ;;  %v13234_v23 = vpop.f32.mrf.mxu0 }
 0x237   :  { %v1514_v50 = vpop.f32.mrf.mxu1 }
 0x238   :  { %v13236_v39 = vpop.f32.mrf.mxu0  ;;  %v13238_v1 = vadd.f32 %v11230_v60, %v1577_v8 }
 0x239   :  { %v11209_v45 = vpop.f32.mrf.mxu1 }
 0x23a   :  { %v1580_v48 = vadd.f32 %v11209_v45, %v1384_v57  ;;  %v13240_v4 = vpop.f32.mrf.mxu0 }
 0x23b   :  { %v1527_v27 = vpop.f32.mrf.mxu1 }
 0x23c   :  { %v1578_v38 = vadd.f32 %v1527_v27, %v1382_v32  ;;  %v13242_v31 = vpop.f32.mrf.mxu0  ;;  %v13244_v47 = vadd.f32 %v11233_v22, %v1580_v48 }
 0x23d   :  { %v11210_v55 = vpop.f32.mrf.mxu1 }
 0x23e   :  { %v1581_v41 = vadd.f32 %v11210_v55, %v1385_v61  ;;  %v13246_v53 = vpop.f32.mrf.mxu0  ;;  %v13248_v35 = vadd.f32 %v1721_v37, %v1578_v38 }
 0x23f   :  { %v1530_v13 = vpop.f32.mrf.mxu1 }
 0x240   :  { %v13250_v2 = vpop.f32.mrf.mxu0  ;;  %v13252_v60 = vadd.f32 %v11234_v12, %v1581_v41 }
 0x241   :  { %v11213_v57 = vpop.f32.mrf.mxu1 }
 0x242   :  { %v1584_v63 = vadd.f32 %v11213_v57, %v1388_v11  ;;  %v13254_v28 = vpop.f32.mrf.mxu0 }
 0x243   :  { %v1543_v32 = vpop.f32.mrf.mxu1 }
 0x244   :  { %v1582_v26 = vadd.f32 %v1543_v32, %v1386_v46  ;;  %v13256_v16 = vpop.f32.mrf.mxu0  ;;  %v13258_v22 = vadd.f32 %v11237_v21, %v1584_v63 }
 0x245   :  { %v11214_v61 = vpop.f32.mrf.mxu1 }
 0x246   :  { %v1585_v15 = vadd.f32 %v11214_v61, %v1389_v51  ;;  %v13260_v8 = vpop.f32.mrf.mxu0  ;;  %v13262_v37 = vadd.f32 %v1737_v7, %v1582_v26 }
 0x247   :  { %v13264_v45 = vpop.f32.mrf.mxu1 }
 0x248   :  { %v13266_v12 = vpop.f32.mrf.mxu0  ;;  %v13268_v48 = vadd.f32 %v11238_v5, %v1585_v15 }
 0x249   :  { %14838 = vst [vmem:[#allocation27_spill] sm:$0xff] %v13266_v12  ;;  %v11217_v11 = vpop.f32.mrf.mxu1 }
 0x24a   :  { %v11289_v27 = vpop.f32.mrf.mxu0 }
 0x24b   :  { %v1559_v38 = vpop.f32.mrf.mxu1  ;;  %v1139_v27 = vadd.f32 %v13201_v20, %v13145_v44 }
 0x24c   :  { %v2145_v46 = vpop.f32.mrf.mxu0 }
 0x24d   :  { %v11218_v55 = vpop.f32.mrf.mxu1 }
 0x24e   :  { %v11290_v41 = vpop.f32.mrf.mxu0 }
 0x24f   :  { %v1562_v21 = vpop.f32.mrf.mxu1  ;;  %v1379_v41 = vadd.f32 %v13147_v10, %v1139_v27 }
 0x250   :  { %v2148_v57 = vpop.f32.mrf.mxu0 }
 0x251   :  { %v11253_v63 = vpop.f32.mrf.mxu1 }
 0x252   :  { %v11325_v51 = vpop.f32.mrf.mxu0 }
 0x253   :  { %v1901_v32 = vpop.f32.mrf.mxu1 }
 0x254   :  { %v2489_v61 = vpop.f32.mrf.mxu0  ;;  %v1575_v32 = vadd.f32 %v1514_v50, %v1379_v41 }
 0x255   :  { %v11254_v7 = vpop.f32.mrf.mxu1  ;;  %v1966_v61 = vadd.f32 %v11253_v63, %v13232_v33  ;;  %v13284_v33 = vld [vmem:[#allocation8] ss:$0 sm:$0xff] }
 0x256   :  { %v11326_v38 = vpop.f32.mrf.mxu0  ;;  %v1967_v12 = vadd.f32 %v11254_v7, %v13238_v1  ;;  %v1769_v44 = vadd.f32 %v13203_v25, %v1575_v32 }
 0x257   :  { %v1904_v26 = vpop.f32.mrf.mxu1  ;;  %v2162_v20 = vadd.f32 %v13229_v17, %v1966_v61 }
 0x258   :  { %v2492_v21 = vpop.f32.mrf.mxu0  ;;  %v1965_v27 = vadd.f32 %v1904_v26, %v1769_v44 }
 0x259   :  { %v11257_v59 = vpop.f32.mrf.mxu1 }
 0x25a   :  { %v11329_v54 = vpop.f32.mrf.mxu0 }
 0x25b   :  { %v1917_v29 = vpop.f32.mrf.mxu1 }
 0x25c   :  { %v1968_v43 = vadd.f32 %v1917_v29, %v13248_v35 }
 0x25d   :  { %v11258_v19 = vpop.f32.mrf.mxu1 }
 0x25e   :  { %v1971_v29 = vadd.f32 %v11258_v19, %v13252_v60 }
 0x25f   :  { %v1920_v58 = vpop.f32.mrf.mxu1 }
 0x261   :  { %v11261_v5 = vpop.f32.mrf.mxu1 }
 0x263   :  { %v1933_v15 = vpop.f32.mrf.mxu1 }
 0x265   :  { %v13270_v11 = vpop.f32.mrf.mxu1 }
 0x267   :  { %v13274_v46 = vpop.f32.mrf.mxu1 }
 0x269   :  { %v11265_v55 = vpop.f32.mrf.mxu1 }
 0x26a   :  { %v1383_v55 = vadd.f32 %v13163_v30, %v1155_v40  ;;  %v2161_v40 = vadd.f32 %v13236_v39, %v1965_v27 }
 0x26b   :  { %v1949_v57 = vpop.f32.mrf.mxu1 }
 0x26c   :  { %v2505_v57 = vpop.f32.mrf.mxu0  ;;  %v1579_v41 = vadd.f32 %v1530_v13, %v1383_v55  ;;  %v1171_v13 = vadd.f32 %v13224_v14, %v13177_v49  ;;  %v1972_v55 = vadd.f32 %v1933_v15, %v13262_v37 }
 0x26d   :  { %v11266_v9 = vpop.f32.mrf.mxu1 }
 0x26e   :  { %v1970_v9 = vadd.f32 %v11257_v59, %v13244_v47  ;;  %v11330_v1 = vpop.f32.mrf.mxu0  ;;  %v1773_v7 = vadd.f32 %v13216_v18, %v1579_v41  ;;  %v1387_v44 = vadd.f32 %v13179_v0, %v1171_v13 }
 0x26f   :  { %v1952_v52 = vpop.f32.mrf.mxu1 }
 0x270   :  { %v2163_v52 = vadd.f32 %v13234_v23, %v1967_v12  ;;  %v2166_v23 = vadd.f32 %v13240_v4, %v1970_v9  ;;  %v1969_v35 = vadd.f32 %v1920_v58, %v1773_v7  ;;  %v2508_v61 = vpop.f32.mrf.mxu0 }
 0x271   :  { %v11301_v10 = vpop.f32.mrf.mxu1 }
 0x272   :  { %v2358_v50 = vadd.f32 %v11301_v10, %v2162_v20  ;;  %v1583_v20 = vadd.f32 %v13264_v45, %v1387_v44  ;;  %v2167_v10 = vadd.f32 %v13246_v53, %v1971_v29  ;;  %v2165_v27 = vadd.f32 %v13250_v2, %v1969_v35  ;;  %v11333_v0 = vpop.f32.mrf.mxu0 }
 0x273   :  { %v2293_v63 = vpop.f32.mrf.mxu1 }
 0x274   :  { %v2554_v56 = vadd.f32 %v11325_v51, %v2358_v50  ;;  %v2164_v51 = vadd.f32 %v13242_v31, %v1968_v43 }
 0x275   :  { %v11302_v25 = vpop.f32.mrf.mxu1 }
 0x276   :  { %v2576_v17 = vadd.f32 %v13284_v33, %v2554_v56  ;;  %v2359_v30 = vadd.f32 %v11302_v25, %v2163_v52  ;;  %v1777_v56 = vadd.f32 %v13226_v36, %v1583_v20 }
 0x277   :  { %v2296_v26 = vpop.f32.mrf.mxu1 }
 0x278   :  { %v2592_v32 = vmax.f32 %v2576_v17, 0.0  ;;  %v2555_v59 = vadd.f32 %v11326_v38, %v2359_v30  ;;  %v2357_v47 = vadd.f32 %v2296_v26, %v2161_v40  ;;  %v1974_v38 = vadd.f32 %v11261_v5, %v13258_v22 }
 0x279   :  { %v11305_v12 = vpop.f32.mrf.mxu1  ;;  %v1973_v30 = vadd.f32 %v13274_v46, %v1777_v56  ;;  %v14844_v56 = vld [vmem:[#allocation25_spill] sm:$0xff] }
 0x27a   :  { %v2608_v39 = vsel %vm12790_vm12, %v2592_v32, 0.0  ;;  %v2577_v49 = vadd.f32 %v13284_v33, %v2555_v59  ;;  %v2553_v14 = vadd.f32 %v2492_v21, %v2357_v47  ;;  %v2362_v18 = vadd.f32 %v11305_v12, %v2166_v23  ;;  %v14839_v12 = vld [vmem:[#allocation27_spill] sm:$0xff] }
 0x27b   :  { %2625 = vst.msk [vmem:[#allocation3 + $0x20] sm:$0xff] %vm91_vm2, %v2608_v39  ;;  %v2309_v4 = vpop.f32.mrf.mxu1  ;;  %v2170_v53 = vadd.f32 %v13254_v28, %v1974_v38  ;;  %v12274_v39 = vld [vmem:[#allocation6 + $0x170] sm:$0xff]  }
 0x27c   :  { %v2593_v19 = vmax.f32 %v2577_v49, 0.0  ;;  %v2575_v58 = vadd.f32 %v13284_v33, %v2553_v14  ;;  %v2558_v60 = vadd.f32 %v11329_v54, %v2362_v18  ;;  %v2360_v31 = vadd.f32 %v2309_v4, %v2164_v51 }
 0x27d   :  { %v11306_v21 = vpop.f32.mrf.mxu1  ;;  %v1975_v54 = vadd.f32 %v13270_v11, %v13268_v48  ;;  %v2168_v48 = vadd.f32 %v13256_v16, %v1972_v55  ;;  %v2521_v11 = vpop.f32.mrf.mxu0  ;;  %v2169_v51 = vadd.f32 %v14839_v12, %v1973_v30  ;;  %v12277_v55 = vld [vmem:[#allocation6 + $0x190] sm:$0xff]  }
 0x27e   :  { %v2609_v22 = vsel %vm12805_vm1, %v2593_v19, 0.0  ;;  %v2591_v5 = vmax.f32 %v2575_v58, 0.0  ;;  %v2580_v50 = vadd.f32 %v13284_v33, %v2558_v60  ;;  %v2556_v41 = vadd.f32 %v2505_v57, %v2360_v31 }
 0x27f   :  { %2626 = vst.msk [vmem:[#allocation3 + $0x28] sm:$0xff] %vm91_vm2, %v2609_v22  ;;  %v2363_v45 = vadd.f32 %v11306_v21, %v2167_v10  ;;  %v2312_v37 = vpop.f32.mrf.mxu1  ;;  %v2171_v13 = vadd.f32 %v13260_v8, %v1975_v54  ;;  %v11334_v47 = vpop.f32.mrf.mxu0  ;;  %v13340_v10 = vld [vmem:[#allocation3 + $0xf] sm:$0xff] }
 0x280   :  { %v2607_v2 = vsel %vm12815_vm4, %v2591_v5, 0.0  ;;  %v2596_v15 = vmax.f32 %v2580_v50, 0.0  ;;  %v2578_v63 = vadd.f32 %v13284_v33, %v2556_v41  ;;  %v2361_v9 = vadd.f32 %v2312_v37, %v2165_v27  ;;  %v13347_v54 = vld [vmem:[#allocation3 + $0x10] sm:$0xff] }
 0x281   :  { %2624 = vst.msk [vmem:[#allocation3 + $0x18] sm:$0xff] %vm91_vm2, %v2607_v2  ;;  %v2559_v57 = vadd.f32 %v11330_v1, %v2363_v45  ;;  %v11309_v52 = vpop.f32.mrf.mxu1  ;;  %v2524_v21 = vpop.f32.mrf.mxu0  ;;  %v14842_v2 = vmov 0.0  }
 0x282   :  { %v2612_v43 = vsel %vm12826_vm8, %v2596_v15, 0.0  ;;  %v2594_v28 = vmax.f32 %v2578_v63, 0.0  ;;  %v2557_v25 = vadd.f32 %v2508_v61, %v2361_v9  ;;  %v2366_v17 = vadd.f32 %v11309_v52, %v2170_v53 }
 0x283   :  { %2629 = vst.msk [vmem:[#allocation3 + $0x40] sm:$0xff] %vm91_vm2, %v2612_v43  ;;  %v2581_v40 = vadd.f32 %v13284_v33, %v2559_v57  ;;  %v2325_v36 = vpop.f32.mrf.mxu1 }
 0x284   :  { %v2610_v1 = vsel %vm12832_vm9, %v2594_v28, 0.0  ;;  %v2579_v16 = vadd.f32 %v13284_v33, %v2557_v25  ;;  %v2562_v7 = vadd.f32 %v11333_v0, %v2366_v17  ;;  %v2364_v26 = vadd.f32 %v2325_v36, %v2168_v48  ;;  %v12275_v25 = vld [vmem:[#allocation6 + $0x168] sm:$0xff]   ;;  %v14845_v17 = vld [vmem:[#allocation26_spill] sm:$0xff] }
 0x285   :  { %2627 = vst.msk [vmem:[#allocation3 + $0x30] sm:$0xff] %vm91_vm2, %v2610_v1  ;;  %v2597_v32 = vmax.f32 %v2581_v40, 0.0  ;;  %v11310_v59 = vpop.f32.mrf.mxu1  ;;  %v12279_v36 = vld [vmem:[#allocation6 + $0x188] sm:$0xff]  }
 0x286   :  { %v2595_v46 = vmax.f32 %v2579_v16, 0.0  ;;  %v2584_v23 = vadd.f32 %v13284_v33, %v2562_v7  ;;  %v2560_v29 = vadd.f32 %v2521_v11, %v2364_v26  ;;  %v2367_v35 = vadd.f32 %v11310_v59, %v2171_v13  ;;  %v2680_v53 = vld [vmem:[#allocation3 + $0x26] sm:$0xff] }
 0x287   :  { %v2613_v8 = vsel %vm12841_vm0, %v2597_v32, 0.0  ;;  %v2328_v61 = vpop.f32.mrf.mxu1  ;;  %v2646_v52 = vld [vmem:[#allocation3 + $0x25] sm:$0xff] }
 0x288   :  { %2630 = vst.msk [vmem:[#allocation3 + $0x48] sm:$0xff] %vm91_vm2, %v2613_v8  ;;  %v2611_v14 = vsel %vm12852_vm14, %v2595_v46, 0.0  ;;  %v2600_v18 = vmax.f32 %v2584_v23, 0.0  ;;  %v2582_v44 = vadd.f32 %v13284_v33, %v2560_v29  ;;  %v2563_v38 = vadd.f32 %v11334_v47, %v2367_v35  ;;  %v2678_v4 = vld [vmem:[#allocation3 + $0x16] sm:$0xff]  ;;  %v2679_v19 = vld [vmem:[#allocation3 + $0x1e] sm:$0xff] }
 0x289   :  { %v2644_v58 = vld [vmem:[#allocation3 + $0x15] sm:$0xff]  ;;  %2628 = vst.msk [vmem:[#allocation3 + $0x38] sm:$0xff] %vm91_vm2, %v2611_v14  ;;  %v2365_v60 = vadd.f32 %v2328_v61, %v2169_v51  ;;  %v2693_v31 = vpack.c.bf16 %v2679_v19, %v2678_v4  ;;  %v2645_v20 = vld [vmem:[#allocation3 + $0x1d] sm:$0xff] }
 0x28a   :  { %v2616_v0 = vsel %vm12860_vm3, %v2600_v18, 0.0  ;;  %v2598_v22 = vmax.f32 %v2582_v44, 0.0  ;;  %v2585_v5 = vadd.f32 %v13284_v33, %v2563_v38  ;;  %v2659_v50 = vpack.c.bf16 %v2645_v20, %v2644_v58  ;;  %v13345_v41 = vld [vmem:[#allocation3 + $0x17] sm:$0xff]  ;;  %v12278_v47 = vld [vmem:[#allocation6 + $0x160] sm:$0xff]  }
 0x28b   :  { %v13349_v45 = vld [vmem:[#allocation3 + $0x11] sm:$0xff]  ;;  %2633 = vst.msk [vmem:[#allocation3 + $0x60] sm:$0xff] %vm91_vm2, %v2616_v0  ;;  %v2561_v37 = vadd.f32 %v2524_v21, %v2365_v60  ;;  %11348 = vmatmul.mubr.msk.bf16.vlgmr.msra.gmra.mxu1 %vm91_vm2, %v2693_v31  ;;  %v12280_v23 = vld [vmem:[#allocation6 + $0x180] sm:$0xff]   ;;  %v13372_v14 = vld [vmem:[#allocation6 + $0x1d8] sm:$0xff]  }
 0x28c   :  { %6219 = vst.msk [vmem:[#allocation3 + $0x10] sm:$0xff] %vm91_vm2, %v14842_v2  ;;  %v2614_v63 = vsel %vm12879_vm7, %v2598_v22, 0.0  ;;  %v2601_v9 = vmax.f32 %v2585_v5, 0.0  ;;  %11372 = vmatmul.mubr.msk.bf16.vlgmr.msra.gmra.mxu0 %vm91_vm2, %v2659_v50  ;;  %11388 = vmatpush3.bf16.msra.mxu1 %v14844_v56  ;;  %v2681_v57 = vld [vmem:[#allocation3 + $0x2e] sm:$0xff]  ;;  %v2690_v22 = vld [vmem:[#allocation3 + $0x76] sm:$0xff]  ;;  %v2691_v5 = vld [vmem:[#allocation3 + $0x7e] sm:$0xff] }
 0x28d   :  { %v2647_v48 = vld [vmem:[#allocation3 + $0x2d] sm:$0xff]  ;;  %2631 = vst.msk [vmem:[#allocation3 + $0x50] sm:$0xff] %vm91_vm2, %v2614_v63  ;;  %v2583_v11 = vadd.f32 %v13284_v33, %v2561_v37  ;;  %v2694_v43 = vpack.c.bf16 %v2681_v57, %v2680_v53  ;;  %11389 = vmatprep.subr.bf16.mxu1 %v12274_v39  ;;  %11412 = vmatpush3.bf16.msra.mxu0 %v14845_v17  ;;  %v2656_v50 = vld [vmem:[#allocation3 + $0x75] sm:$0xff]  ;;  %v2657_v37 = vld [vmem:[#allocation3 + $0x7d] sm:$0xff] }
 0x28e   :  { %v2660_v28 = vpack.c.bf16 %v2647_v48, %v2646_v52  ;;  %v2617_v40 = vsel %vm12894_vm10, %v2601_v9, 0.0  ;;  %11413 = vmatprep.subr.bf16.mxu0 %v12277_v55  ;;  %v3000_v53 = vld [vmem:[#allocation3 + $0x7] sm:$0xff]  ;;  %v13381_v63 = vld [vmem:[#allocation3 + $0x77] sm:$0xff]  ;;  %v2665_v17 = vpack.c.bf16 %v2657_v37, %v2656_v50 }
 0x28f   :  { %2634 = vst.msk [vmem:[#allocation3 + $0x68] sm:$0xff] %vm91_vm2, %v2617_v40  ;;  %v2599_v13 = vmax.f32 %v2583_v11, 0.0  ;;  %11351 = vmatprep.mubr.msk.bf16.mxu1 %vm91_vm2, %v2694_v43  ;;  %v2684_v29 = vld [vmem:[#allocation3 + $0x46] sm:$0xff]  ;;  %v13383_v9 = vld [vmem:[#allocation3 + $0x71] sm:$0xff]  ;;  %v2699_v11 = vpack.c.bf16 %v2691_v5, %v2690_v22  ;;  %v3016_v40 = vpack.c.bf16 %v13340_v10, %v3000_v53  ;;  %v13426_v37 = vld [vmem:[#allocation3 + $0x19] sm:$0xff] }
 0x290   :  { %11375 = vmatprep.mubr.msk.bf16.mxu0 %vm91_vm2, %v2660_v28  ;;  %v2682_v1 = vld [vmem:[#allocation3 + $0x36] sm:$0xff]  ;;  %v2683_v33 = vld [vmem:[#allocation3 + $0x3e] sm:$0xff]  ;;  %11390 = vmatpush3.bf16.msra.mxu1 %v12274_v39 }
 0x291   :  { %v2648_v16 = vld [vmem:[#allocation3 + $0x35] sm:$0xff]  ;;  %v2615_v26 = vsel %vm12928_vm15, %v2599_v13, 0.0  ;;  %v2695_v32 = vpack.c.bf16 %v2683_v33, %v2682_v1  ;;  %v2649_v59 = vld [vmem:[#allocation3 + $0x3d] sm:$0xff]  ;;  %11391 = vmatprep.subr.bf16.mxu1 %v12275_v25  ;;  %11414 = vmatpush3.bf16.msra.mxu0 %v12277_v55  ;;  %v2650_v8 = vld [vmem:[#allocation3 + $0x45] sm:$0xff] }
 0x292   :  { %2632 = vst.msk [vmem:[#allocation3 + $0x58] sm:$0xff] %vm91_vm2, %v2615_v26  ;;  %v2661_v46 = vpack.c.bf16 %v2649_v59, %v2648_v16  ;;  %11415 = vmatprep.subr.bf16.mxu0 %v12279_v36  ;;  %v12281_v39 = vld [vmem:[#allocation6 + $0x1b8] sm:$0xff]   ;;  %v13385_v56 = vld [vmem:[#allocation3 + $0x72] sm:$0xff]  ;;  %v3198_v26 = vld [vmem:[#allocation3 + $0x27] sm:$0xff] }
 0x293   :  { %11352 = vmatmul.mubr.msk.bf16.gmra.mxu1 %vm91_vm2, %v2695_v32  ;;  %v13389_v52 = vld [vmem:[#allocation3 + $0x70] sm:$0xff]  ;;  %v3003_v13 = vld [vmem:[#allocation3 + $0x1f] sm:$0xff] }
 0x294   :  { %11376 = vmatmul.mubr.msk.bf16.gmra.mxu0 %vm91_vm2, %v2661_v46  ;;  %v2685_v35 = vld [vmem:[#allocation3 + $0x4e] sm:$0xff]  ;;  %11392 = vmatpush3.bf16.msra.mxu1 %v12275_v25  ;;  %v3200_v33 = vld [vmem:[#allocation3 + $0x37] sm:$0xff]  ;;  %v3017_v16 = vpack.c.bf16 %v3003_v13, %v13345_v41  ;;  %v3212_v32 = vpack.c.bf16 %v3198_v26, %v3003_v13 }
 0x295   :  { %v2651_v12 = vld [vmem:[#allocation3 + $0x4d] sm:$0xff]  ;;  %v2696_v51 = vpack.c.bf16 %v2685_v35, %v2684_v29  ;;  %11393 = vmatprep.subr.bf16.mxu1 %v12278_v47  ;;  %11416 = vmatpush3.bf16.msra.mxu0 %v12279_v36  ;;  %v3211_v36 = vpack.c.bf16 %v13345_v41, %v13340_v10  ;;  %v3007_v29 = vld [vmem:[#allocation3 + $0x3f] sm:$0xff] }
 0x296   :  { %v2662_v61 = vpack.c.bf16 %v2651_v12, %v2650_v8  ;;  %11417 = vmatprep.subr.bf16.mxu0 %v12280_v23  ;;  %v2688_v18 = vld [vmem:[#allocation3 + $0x66] sm:$0xff]  ;;  %v2689_v44 = vld [vmem:[#allocation3 + $0x6e] sm:$0xff]  ;;  %v3019_v12 = vpack.c.bf16 %v3007_v29, %v3200_v33  ;;  %v3390_v5 = vld [vmem:[#allocation3 + $0x18] sm:$0xff] }
 0x297   :  { %11355 = vmatprep.mubr.msk.bf16.mxu1 %vm91_vm2, %v2696_v51  ;;  %v2654_v38 = vld [vmem:[#allocation3 + $0x65] sm:$0xff]  ;;  %v2655_v4 = vld [vmem:[#allocation3 + $0x6d] sm:$0xff]  ;;  %v2698_v21 = vpack.c.bf16 %v2689_v44, %v2688_v18  ;;  %v3405_v53 = vpack.c.bf16 %v3390_v5, %v13347_v54  ;;  %v13439_v13 = vld [vmem:[#allocation3 + $0x39] sm:$0xff] }
 0x298   :  { %11379 = vmatprep.mubr.msk.bf16.mxu0 %vm91_vm2, %v2662_v61  ;;  %11394 = vmatpush3.bf16.msra.mxu1 %v12278_v47  ;;  %v2664_v0 = vpack.c.bf16 %v2655_v4, %v2654_v38  ;;  %v13387_v57 = vld [vmem:[#allocation3 + $0x6f] sm:$0xff]  ;;  %v3202_v51 = vld [vmem:[#allocation3 + $0x47] sm:$0xff]  ;;  %v12289_v4 = vld [vmem:[#allocation6 + $0x1f8] sm:$0xff]  }
 0x299   :  { %v2686_v19 = vld [vmem:[#allocation3 + $0x56] sm:$0xff]  ;;  %v2687_v58 = vld [vmem:[#allocation3 + $0x5e] sm:$0xff]  ;;  %11418 = vmatpush3.bf16.msra.mxu0 %v12280_v23  ;;  %11435 = vmatprep.subr.bf16.mxu1 %v12281_v39  ;;  %v13393_v43 = vld [vmem:[#allocation3 + $0x69] sm:$0xff]  ;;  %v3214_v61 = vpack.c.bf16 %v3202_v51, %v3007_v29 }
 0x29a   :  { %v2652_v60 = vld [vmem:[#allocation3 + $0x55] sm:$0xff]  ;;  %v2697_v31 = vpack.c.bf16 %v2687_v58, %v2686_v19  ;;  %v2653_v20 = vld [vmem:[#allocation3 + $0x5d] sm:$0xff]  ;;  %11459 = vmatprep.subr.bf16.mxu0 %v13372_v14  ;;  %v13395_v28 = vld [vmem:[#allocation3 + $0x6a] sm:$0xff] }
 0x29b   :  { %v2663_v55 = vpack.c.bf16 %v2653_v20, %v2652_v60  ;;  %v13391_v48 = vld [vmem:[#allocation3 + $0x73] sm:$0xff]  ;;  %v13397_v25 = vld [vmem:[#allocation3 + $0x6b] sm:$0xff]  ;;  %v12288_v38 = vld [vmem:[#allocation6 + $0x1c0] sm:$0xff]  }
 0x29c   :  { %11356 = vmatmul.mubr.msk.bf16.gmra.mxu1 %vm91_vm2, %v2697_v31  ;;  %6231 = vst.msk [vmem:[#allocation3 + $0x70] sm:$0xff] %vm91_vm2, %v14842_v2  ;;  %v3005_v1 = vld [vmem:[#allocation3 + $0x2f] sm:$0xff]  ;;  %v3204_v8 = vld [vmem:[#allocation3 + $0x57] sm:$0xff]  ;;  %v3206_v19 = vld [vmem:[#allocation3 + $0x67] sm:$0xff] }
 0x29d   :  { %11380 = vmatmul.mubr.msk.bf16.gmra.mxu0 %vm91_vm2, %v2663_v55  ;;  %11359 = vmatprep.mubr.msk.bf16.mxu1 %vm91_vm2, %v2698_v21  ;;  %v12282_v59 = vld [vmem:[#allocation6 + $0x1b0] sm:$0xff]   ;;  %v3018_v47 = vpack.c.bf16 %v3005_v1, %v3198_v26  ;;  %v3213_v46 = vpack.c.bf16 %v3200_v33, %v3005_v1  ;;  %v12283_v10 = vld [vmem:[#allocation6 + $0x1a8] sm:$0xff]   ;;  %v12292_v58 = vld [vmem:[#allocation6 + $0x218] sm:$0xff]   ;;  %v3022_v20 = vpack.c.bf16 %v13387_v57, %v3206_v19  ;;  %v11313_v26 = vpop.f32.mrf.mxu1 }
 0x29e   :  { %11383 = vmatprep.mubr.msk.bf16.mxu0 %vm91_vm2, %v2664_v0  ;;  %v12285_v23 = vld [vmem:[#allocation6 + $0x1d0] sm:$0xff]   ;;  %v12287_v35 = vld [vmem:[#allocation6 + $0x1c8] sm:$0xff]   ;;  %v3217_v55 = vpack.c.bf16 %v13381_v63, %v13387_v57  ;;  %v3015_v21 = vld [vmem:[#allocation3 + $0x7f] sm:$0xff]  ;;  %v3600_v57 = vpack.c.bf16 %v13426_v37, %v13349_v45 }
 0x29f   :  { %v3009_v41 = vld [vmem:[#allocation3 + $0x4f] sm:$0xff]  ;;  %v3210_v0 = vld [vmem:[#allocation3 + $0x87] sm:$0xff]  ;;  %v3023_v22 = vpack.c.bf16 %v3015_v21, %v13381_v63  ;;  %v13467_v5 = vld [vmem:[#allocation3 + $0x79] sm:$0xff] }
 0x2a0   :  { %v3020_v18 = vpack.c.bf16 %v3009_v41, %v3202_v51  ;;  %v3215_v44 = vpack.c.bf16 %v3204_v8, %v3009_v41  ;;  %v3218_v50 = vpack.c.bf16 %v3210_v0, %v3015_v21  ;;  %v13435_v63 = vld [vmem:[#allocation3 + $0x29] sm:$0xff]  ;;  %v13441_v1 = vld [vmem:[#allocation3 + $0x21] sm:$0xff]  ;;  %v3402_v21 = vld [vmem:[#allocation3 + $0x78] sm:$0xff] }
 0x2a1   :  { %v3601_v45 = vpack.c.bf16 %v13435_v63, %v13441_v1  ;;  %v3393_v33 = vld [vmem:[#allocation3 + $0x30] sm:$0xff]  ;;  %v3395_v51 = vld [vmem:[#allocation3 + $0x40] sm:$0xff] }
 0x2a2   :  { %v13451_v41 = vld [vmem:[#allocation3 + $0x49] sm:$0xff] }
 0x2a4   :  { %11360 = vmatmul.mubr.msk.bf16.gmra.mxu1 %vm91_vm2, %v2699_v11  ;;  %v3392_v11 = vld [vmem:[#allocation3 + $0x28] sm:$0xff] }
 0x2a5   :  { %11384 = vmatmul.mubr.msk.bf16.gmra.mxu0 %vm91_vm2, %v2665_v17  ;;  %11395 = vmatprep.mubr.msk.bf16.mxu1 %vm91_vm2, %v3016_v40  ;;  %v3391_v17 = vld [vmem:[#allocation3 + $0x20] sm:$0xff]  ;;  %v3394_v40 = vld [vmem:[#allocation3 + $0x38] sm:$0xff] }
 0x2a6   :  { %11419 = vmatprep.mubr.msk.bf16.mxu0 %vm91_vm2, %v3211_v36  ;;  %v13437_v36 = vld [vmem:[#allocation3 + $0x31] sm:$0xff]  ;;  %v3406_v54 = vpack.c.bf16 %v3392_v11, %v3391_v17  ;;  %v3411_v11 = vpack.c.bf16 %v3402_v21, %v13389_v52  ;;  %v3598_v52 = vld [vmem:[#allocation3 + $0x81] sm:$0xff] }
 0x2a7   :  { %v4170_v21 = vld [vmem:[#allocation3 + $0x23] sm:$0xff] }
 0x2ac   :  { %11396 = vmatmul.mubr.msk.bf16.vlgmr.msra.gmra.mxu1 %vm91_vm2, %v3017_v16  ;;  %v12290_v16 = vld [vmem:[#allocation6 + $0x1f0] sm:$0xff]  }
 0x2ad   :  { %11420 = vmatmul.mubr.msk.bf16.vlgmr.msra.gmra.mxu0 %vm91_vm2, %v3212_v32  ;;  %11436 = vmatpush3.bf16.msra.mxu1 %v12281_v39  ;;  %v12286_v39 = vld [vmem:[#allocation6 + $0x1a0] sm:$0xff]   ;;  %v3407_v32 = vpack.c.bf16 %v3394_v40, %v3393_v33  ;;  %v3606_v40 = vpack.c.bf16 %v13467_v5, %v13383_v9 }
 0x2ae   :  { %11399 = vmatprep.mubr.msk.bf16.mxu1 %vm91_vm2, %v3018_v47  ;;  %11423 = vmatprep.mubr.msk.bf16.mxu0 %vm91_vm2, %v3213_v46  ;;  %v12293_v47 = vld [vmem:[#allocation6 + $0x210] sm:$0xff]   ;;  %v2341_v46 = vpop.f32.mrf.mxu1  ;;  %v3404_v33 = vld [vmem:[#allocation3 + $0x88] sm:$0xff] }
 0x2af   :  { %11437 = vmatprep.subr.bf16.mxu1 %v12282_v59  ;;  %11460 = vmatpush3.bf16.msra.mxu0 %v13372_v14  ;;  %v3011_v14 = vld [vmem:[#allocation3 + $0x5f] sm:$0xff] }
 0x2b0   :  { %11461 = vmatprep.subr.bf16.mxu0 %v12285_v23  ;;  %v3021_v60 = vpack.c.bf16 %v3011_v14, %v3204_v8  ;;  %v3216_v31 = vpack.c.bf16 %v3206_v19, %v3011_v14  ;;  %v11314_v29 = vpop.f32.mrf.mxu1  ;;  %v12295_v8 = vld [vmem:[#allocation6 + $0x208] sm:$0xff]   ;;  %v3975_v46 = vld [vmem:[#allocation3 + $0x22] sm:$0xff] }
 0x2b1   :  { %11438 = vmatpush3.bf16.msra.mxu1 %v12282_v59  ;;  %v3602_v59 = vpack.c.bf16 %v13439_v13, %v13437_v36  ;;  %v3397_v14 = vld [vmem:[#allocation3 + $0x50] sm:$0xff]  ;;  %v3978_v29 = vld [vmem:[#allocation3 + $0x3a] sm:$0xff] }
 0x2b2   :  { %11439 = vmatprep.subr.bf16.mxu1 %v12283_v10 }
 0x2b3   :  { %11462 = vmatpush3.bf16.msra.mxu0 %v12285_v23  ;;  %v12291_v23 = vld [vmem:[#allocation6 + $0x1e8] sm:$0xff]  }
 0x2b4   :  { %11400 = vmatmul.mubr.msk.bf16.gmra.mxu1 %vm91_vm2, %v3019_v12  ;;  %11463 = vmatprep.subr.bf16.mxu0 %v12287_v35  ;;  %v11337_v12 = vpop.f32.mrf.mxu0 }
 0x2b5   :  { %11424 = vmatmul.mubr.msk.bf16.gmra.mxu0 %vm91_vm2, %v3214_v61  ;;  %11403 = vmatprep.mubr.msk.bf16.mxu1 %vm91_vm2, %v3020_v18  ;;  %v13453_v61 = vld [vmem:[#allocation3 + $0x51] sm:$0xff]  ;;  %v13455_v18 = vld [vmem:[#allocation3 + $0x59] sm:$0xff] }
 0x2b6   :  { %11427 = vmatprep.mubr.msk.bf16.mxu0 %vm91_vm2, %v3215_v44  ;;  %11440 = vmatpush3.bf16.msra.mxu1 %v12283_v10  ;;  %v3396_v10 = vld [vmem:[#allocation3 + $0x48] sm:$0xff] }
 0x2b7   :  { %11441 = vmatprep.subr.bf16.mxu1 %v12286_v39  ;;  %11464 = vmatpush3.bf16.msra.mxu0 %v12287_v35  ;;  %v3398_v35 = vld [vmem:[#allocation3 + $0x58] sm:$0xff]  ;;  %v3408_v44 = vpack.c.bf16 %v3396_v10, %v3395_v51  ;;  %v3979_v51 = vld [vmem:[#allocation3 + $0x42] sm:$0xff] }
 0x2b8   :  { %11465 = vmatprep.subr.bf16.mxu0 %v12288_v38  ;;  %v3977_v10 = vld [vmem:[#allocation3 + $0x32] sm:$0xff] }
 0x2ba   :  { %11442 = vmatpush3.bf16.msra.mxu1 %v12286_v39  ;;  %v2344_v39 = vpop.f32.mrf.mxu1 }
 0x2bb   :  { %11466 = vmatpush3.bf16.msra.mxu0 %v12288_v38  ;;  %11483 = vmatprep.subr.bf16.mxu1 %v12289_v4  ;;  %v13457_v38 = vld [vmem:[#allocation3 + $0x41] sm:$0xff]  ;;  %v12298_v39 = vld [vmem:[#allocation6 + $0x230] sm:$0xff]  }
 0x2bc   :  { %11404 = vmatmul.mubr.msk.bf16.gmra.mxu1 %vm91_vm2, %v3021_v60  ;;  %11507 = vmatprep.subr.bf16.mxu0 %v12292_v58  ;;  %v3603_v19 = vpack.c.bf16 %v13451_v41, %v13457_v38  ;;  %v12294_v60 = vld [vmem:[#allocation6 + $0x1e0] sm:$0xff]  }
 0x2bd   :  { %11428 = vmatmul.mubr.msk.bf16.gmra.mxu0 %vm91_vm2, %v3216_v31  ;;  %11407 = vmatprep.mubr.msk.bf16.mxu1 %vm91_vm2, %v3022_v20  ;;  %v3604_v31 = vpack.c.bf16 %v13455_v18, %v13453_v61  ;;  %v12296_v20 = vld [vmem:[#allocation6 + $0x200] sm:$0xff]  }
 0x2be   :  { %11431 = vmatprep.mubr.msk.bf16.mxu0 %vm91_vm2, %v3217_v55 }
 0x2c4   :  { %11408 = vmatmul.mubr.msk.bf16.gmra.mxu1 %vm91_vm2, %v3023_v22  ;;  %v3400_v22 = vld [vmem:[#allocation3 + $0x68] sm:$0xff] }
 0x2c5   :  { %11432 = vmatmul.mubr.msk.bf16.gmra.mxu0 %vm91_vm2, %v3218_v50  ;;  %11443 = vmatprep.mubr.msk.bf16.mxu1 %vm91_vm2, %v3405_v53  ;;  %v12297_v50 = vld [vmem:[#allocation6 + $0x238] sm:$0xff]  }
 0x2c6   :  { %11467 = vmatprep.mubr.msk.bf16.mxu0 %vm91_vm2, %v3600_v57  ;;  %v3594_v53 = vld [vmem:[#allocation3 + $0x61] sm:$0xff] }
 0x2c7   :  { %v3399_v57 = vld [vmem:[#allocation3 + $0x60] sm:$0xff] }
 0x2c8   :  { %v3410_v17 = vpack.c.bf16 %v3400_v22, %v3399_v57  ;;  %v4171_v22 = vld [vmem:[#allocation3 + $0x2b] sm:$0xff] }
 0x2c9   :  { %v4175_v57 = vld [vmem:[#allocation3 + $0x4b] sm:$0xff] }
 0x2cc   :  { %11444 = vmatmul.mubr.msk.bf16.vlgmr.msra.gmra.mxu1 %vm91_vm2, %v3406_v54  ;;  %v3605_v54 = vpack.c.bf16 %v13393_v43, %v3594_v53 }
 0x2cd   :  { %11468 = vmatmul.mubr.msk.bf16.vlgmr.msra.gmra.mxu0 %vm91_vm2, %v3601_v45  ;;  %11484 = vmatpush3.bf16.msra.mxu1 %v12289_v4  ;;  %v2537_v4 = vpop.f32.mrf.mxu0  ;;  %v3403_v45 = vld [vmem:[#allocation3 + $0x80] sm:$0xff] }
 0x2ce   :  { %11447 = vmatprep.mubr.msk.bf16.mxu1 %vm91_vm2, %v3407_v32  ;;  %11471 = vmatprep.mubr.msk.bf16.mxu0 %vm91_vm2, %v3602_v59  ;;  %v3412_v26 = vpack.c.bf16 %v3404_v33, %v3403_v45  ;;  %v3974_v59 = vld [vmem:[#allocation3 + $0x1a] sm:$0xff]  ;;  %v3980_v4 = vld [vmem:[#allocation3 + $0x4a] sm:$0xff]  ;;  %v12302_v33 = vld [vmem:[#allocation6 + $0x270] sm:$0xff]  }
 0x2cf   :  { %11485 = vmatprep.subr.bf16.mxu1 %v12290_v16  ;;  %11508 = vmatpush3.bf16.msra.mxu0 %v12292_v58  ;;  %v3409_v58 = vpack.c.bf16 %v3398_v35, %v3397_v14  ;;  %v11338_v55 = vpop.f32.mrf.mxu0  ;;  %v3796_v35 = vpack.c.bf16 %v13437_v36, %v13435_v63  ;;  %v3981_v63 = vld [vmem:[#allocation3 + $0x52] sm:$0xff]  ;;  %v3982_v36 = vld [vmem:[#allocation3 + $0x5a] sm:$0xff]  ;;  %v3798_v14 = vpack.c.bf16 %v13453_v61, %v13451_v41 }
 0x2d0   :  { %11509 = vmatprep.subr.bf16.mxu0 %v12293_v47  ;;  %v3801_v41 = vpack.c.bf16 %v3598_v52, %v13467_v5  ;;  %v3800_v61 = vpack.c.bf16 %v13383_v9, %v13393_v43  ;;  %v4169_v55 = vld [vmem:[#allocation3 + $0x1b] sm:$0xff]  ;;  %v4172_v9 = vld [vmem:[#allocation3 + $0x33] sm:$0xff] }
 0x2d1   :  { %11486 = vmatpush3.bf16.msra.mxu1 %v12290_v16  ;;  %v2540_v0 = vpop.f32.mrf.mxu0  ;;  %v3599_v16 = vld [vmem:[#allocation3 + $0x89] sm:$0xff]  ;;  %v4173_v43 = vld [vmem:[#allocation3 + $0x3b] sm:$0xff]  ;;  %v4186_v5 = vpack.c.bf16 %v4172_v9, %v4171_v22 }
 0x2d2   :  { %11487 = vmatprep.subr.bf16.mxu1 %v12291_v23  ;;  %v3607_v32 = vpack.c.bf16 %v3599_v16, %v3598_v52  ;;  %v4185_v0 = vpack.c.bf16 %v4170_v21, %v4169_v55  ;;  %v12301_v45 = vld [vmem:[#allocation6 + $0x278] sm:$0xff]  }
 0x2d3   :  { %11510 = vmatpush3.bf16.msra.mxu0 %v12293_v47  ;;  %v3795_v47 = vpack.c.bf16 %v13441_v1, %v13426_v37  ;;  %v3797_v37 = vpack.c.bf16 %v13457_v38, %v13439_v13  ;;  %v3992_v1 = vpack.c.bf16 %v3979_v51, %v3978_v29  ;;  %v3799_v13 = vpack.c.bf16 %v3594_v53, %v13455_v18  ;;  %v3983_v38 = vld [vmem:[#allocation3 + $0x62] sm:$0xff] }
 0x2d4   :  { %11448 = vmatmul.mubr.msk.bf16.gmra.mxu1 %vm91_vm2, %v3408_v44  ;;  %11511 = vmatprep.subr.bf16.mxu0 %v12295_v8  ;;  %v12299_v44 = vld [vmem:[#allocation6 + $0x228] sm:$0xff]   ;;  %v3995_v18 = vpack.c.bf16 %v13385_v56, %v13395_v28  ;;  %v4177_v53 = vld [vmem:[#allocation3 + $0x5b] sm:$0xff] }
 0x2d5   :  { %11472 = vmatmul.mubr.msk.bf16.gmra.mxu0 %vm91_vm2, %v3603_v19  ;;  %11451 = vmatprep.mubr.msk.bf16.mxu1 %vm91_vm2, %v3409_v58  ;;  %v3993_v19 = vpack.c.bf16 %v3981_v63, %v3980_v4  ;;  %v12300_v58 = vld [vmem:[#allocation6 + $0x220] sm:$0xff]   ;;  %v12304_v4 = vld [vmem:[#allocation6 + $0x258] sm:$0xff]  }
 0x2d6   :  { %11475 = vmatprep.mubr.msk.bf16.mxu0 %vm91_vm2, %v3604_v31  ;;  %11488 = vmatpush3.bf16.msra.mxu1 %v12291_v23  ;;  %v3990_v23 = vpack.c.bf16 %v3975_v46, %v3974_v59  ;;  %v3794_v31 = vld [vmem:[#allocation3 + $0x91] sm:$0xff]  ;;  %v4174_v56 = vld [vmem:[#allocation3 + $0x43] sm:$0xff] }
 0x2d7   :  { %11489 = vmatprep.subr.bf16.mxu1 %v12294_v60  ;;  %11512 = vmatpush3.bf16.msra.mxu0 %v12295_v8  ;;  %v3976_v8 = vld [vmem:[#allocation3 + $0x2a] sm:$0xff]  ;;  %v4187_v28 = vpack.c.bf16 %v4174_v56, %v4173_v43 }
 0x2d8   :  { %11513 = vmatprep.subr.bf16.mxu0 %v12296_v20  ;;  %v3991_v12 = vpack.c.bf16 %v3977_v10, %v3976_v8  ;;  %v4182_v56 = vld [vmem:[#allocation3 + $0x83] sm:$0xff] }
 0x2da   :  { %11490 = vmatpush3.bf16.msra.mxu1 %v12294_v60  ;;  %v3994_v60 = vpack.c.bf16 %v3983_v38, %v3982_v36  ;;  %v12303_v36 = vld [vmem:[#allocation6 + $0x268] sm:$0xff]  }
 0x2db   :  { %11514 = vmatpush3.bf16.msra.mxu0 %v12296_v20  ;;  %11531 = vmatprep.subr.bf16.mxu1 %v12297_v50  ;;  %v3802_v20 = vpack.c.bf16 %v3794_v31, %v3599_v16 }
 0x2dc   :  { %11452 = vmatmul.mubr.msk.bf16.gmra.mxu1 %vm91_vm2, %v3410_v17  ;;  %v4178_v17 = vld [vmem:[#allocation3 + $0x63] sm:$0xff]  ;;  %11555 = vmatprep.subr.bf16.mxu0 %v12301_v45 }
 0x2dd   :  { %11476 = vmatmul.mubr.msk.bf16.gmra.mxu0 %vm91_vm2, %v3605_v54  ;;  %11455 = vmatprep.mubr.msk.bf16.mxu1 %vm91_vm2, %v3411_v11  ;;  %v4190_v54 = vpack.c.bf16 %v13391_v48, %v13397_v25 }
 0x2de   :  { %11479 = vmatprep.mubr.msk.bf16.mxu0 %vm91_vm2, %v3606_v40  ;;  %v4189_v40 = vpack.c.bf16 %v4178_v17, %v4177_v53  ;;  %v4184_v17 = vld [vmem:[#allocation3 + $0x93] sm:$0xff] }
 0x2e4   :  { %11456 = vmatmul.mubr.msk.bf16.gmra.mxu1 %vm91_vm2, %v3412_v26 }
 0x2e5   :  { %11480 = vmatmul.mubr.msk.bf16.gmra.mxu0 %vm91_vm2, %v3607_v32  ;;  %11491 = vmatprep.mubr.msk.bf16.mxu1 %vm91_vm2, %v3795_v47 }
 0x2e6   :  { %11515 = vmatprep.mubr.msk.bf16.mxu0 %vm91_vm2, %v3990_v23 }
 0x2ec   :  { %11492 = vmatmul.mubr.msk.bf16.vlgmr.msra.gmra.mxu1 %vm91_vm2, %v3796_v35 }
 0x2ed   :  { %11516 = vmatmul.mubr.msk.bf16.vlgmr.msra.gmra.mxu0 %vm91_vm2, %v3991_v12  ;;  %11532 = vmatpush3.bf16.msra.mxu1 %v12297_v50  ;;  %v4176_v50 = vld [vmem:[#allocation3 + $0x53] sm:$0xff] }
 0x2ee   :  { %11495 = vmatprep.mubr.msk.bf16.mxu1 %vm91_vm2, %v3797_v37  ;;  %11519 = vmatprep.mubr.msk.bf16.mxu0 %vm91_vm2, %v3992_v1  ;;  %v4188_v11 = vpack.c.bf16 %v4176_v50, %v4175_v57 }
 0x2ef   :  { %11533 = vmatprep.subr.bf16.mxu1 %v12298_v39  ;;  %11556 = vmatpush3.bf16.msra.mxu0 %v12301_v45 }
 0x2f0   :  { %11557 = vmatprep.subr.bf16.mxu0 %v12302_v33 }
 0x2f1   :  { %11534 = vmatpush3.bf16.msra.mxu1 %v12298_v39 }
 0x2f2   :  { %11535 = vmatprep.subr.bf16.mxu1 %v12299_v44 }
 0x2f3   :  { %11558 = vmatpush3.bf16.msra.mxu0 %v12302_v33 }
 0x2f4   :  { %11496 = vmatmul.mubr.msk.bf16.gmra.mxu1 %vm91_vm2, %v3798_v14  ;;  %11559 = vmatprep.subr.bf16.mxu0 %v12303_v36 }
 0x2f5   :  { %11520 = vmatmul.mubr.msk.bf16.gmra.mxu0 %vm91_vm2, %v3993_v19  ;;  %11499 = vmatprep.mubr.msk.bf16.mxu1 %vm91_vm2, %v3799_v13  ;;  %v3986_v19 = vld [vmem:[#allocation3 + $0x7a] sm:$0xff]  ;;  %v3987_v13 = vld [vmem:[#allocation3 + $0x82] sm:$0xff] }
 0x2f6   :  { %11523 = vmatprep.mubr.msk.bf16.mxu0 %vm91_vm2, %v3994_v60  ;;  %11536 = vmatpush3.bf16.msra.mxu1 %v12299_v44  ;;  %v3988_v60 = vld [vmem:[#allocation3 + $0x8a] sm:$0xff] }
 0x2f7   :  { %11537 = vmatprep.subr.bf16.mxu1 %v12300_v58  ;;  %11560 = vmatpush3.bf16.msra.mxu0 %v12303_v36 }
 0x2fa   :  { %11538 = vmatpush3.bf16.msra.mxu1 %v12300_v58  ;;  %v3996_v58 = vpack.c.bf16 %v3987_v13, %v3986_v19 }
 0x2fb   :  { %11579 = vmatprep.subr.bf16.mxu1 %v12304_v4 }
 0x2fc   :  { %11500 = vmatmul.mubr.msk.bf16.gmra.mxu1 %vm91_vm2, %v3800_v61 }
 0x2fd   :  { %11524 = vmatmul.mubr.msk.bf16.gmra.mxu0 %vm91_vm2, %v3995_v18  ;;  %11503 = vmatprep.mubr.msk.bf16.mxu1 %vm91_vm2, %v3801_v41  ;;  %v3989_v41 = vld [vmem:[#allocation3 + $0x92] sm:$0xff] }
 0x2fe   :  { %v3997_v31 = vpack.c.bf16 %v3989_v41, %v3988_v60  ;;  %11527 = vmatprep.mubr.msk.bf16.mxu0 %vm91_vm2, %v3996_v58 }
 0x304   :  { %11504 = vmatmul.mubr.msk.bf16.gmra.mxu1 %vm91_vm2, %v3802_v20 }
 0x305   :  { %11539 = vmatprep.mubr.msk.bf16.mxu1 %vm91_vm2, %v4185_v0  ;;  %11528 = vmatmul.mubr.msk.bf16.gmra.mxu0 %vm91_vm2, %v3997_v31  ;;  %v12305_v0 = vld [vmem:[#allocation6 + $0x250] sm:$0xff]  }
 0x30c   :  { %11540 = vmatmul.mubr.msk.bf16.vlgmr.msra.gmra.mxu1 %vm91_vm2, %v4186_v5  ;;  %v4181_v5 = vld [vmem:[#allocation3 + $0x7b] sm:$0xff] }
 0x30d   :  { %11543 = vmatprep.mubr.msk.bf16.mxu1 %vm91_vm2, %v4187_v28  ;;  %11580 = vmatpush3.bf16.msra.mxu1 %v12304_v4  ;;  %v12306_v28 = vld [vmem:[#allocation6 + $0x260] sm:$0xff]   ;;  %v4191_v53 = vpack.c.bf16 %v4182_v56, %v4181_v5  ;;  %6232 = vst.msk [vmem:[#allocation3 + $0x78] sm:$0xff] %vm91_vm2, %v14842_v2  ;;  %6233 = vst.msk [vmem:[#allocation3 + $0x80] sm:$0xff] %vm91_vm2, %v14842_v2 }
 0x30e   :  { %11581 = vmatprep.subr.bf16.mxu1 %v12305_v0  ;;  %11561 = vmatprep.subr.bf16.mxu0 %v12306_v28 }
 0x30f   :  { %11562 = vmatpush3.bf16.msra.mxu0 %v12306_v28 }
 0x311   :  { %11582 = vmatpush3.bf16.msra.mxu1 %v12305_v0 }
 0x314   :  { %11544 = vmatmul.mubr.msk.bf16.gmra.mxu1 %vm91_vm2, %v4188_v11  ;;  %v4183_v11 = vld [vmem:[#allocation3 + $0x8b] sm:$0xff] }
 0x315   :  { %11547 = vmatprep.mubr.msk.bf16.mxu1 %vm91_vm2, %v4189_v40  ;;  %v12307_v40 = vld [vmem:[#allocation6 + $0x248] sm:$0xff]   ;;  %v4192_v45 = vpack.c.bf16 %v4184_v17, %v4183_v11  ;;  %6234 = vst.msk [vmem:[#allocation3 + $0x88] sm:$0xff] %vm91_vm2, %v14842_v2 }
 0x316   :  { %11583 = vmatprep.subr.bf16.mxu1 %v12307_v40 }
 0x317   :  { %11584 = vmatpush3.bf16.msra.mxu1 %v12307_v40 }
 0x31c   :  { %11548 = vmatmul.mubr.msk.bf16.gmra.mxu1 %vm91_vm2, %v4190_v54 }
 0x31d   :  { %11551 = vmatprep.mubr.msk.bf16.mxu1 %vm91_vm2, %v4191_v53 }
 0x324   :  { %11552 = vmatmul.mubr.msk.bf16.gmra.mxu1 %vm91_vm2, %v4192_v45 }
 0x34b   :  { %v11349_v52 = vpop.f32.mrf.mxu1 }
 0x34c   :  { %v11373_v16 = vpop.f32.mrf.mxu0 }
 0x34d   :  { %v13515_v26 = vadd.f32 %v11373_v16, %v11349_v52  ;;  %v2791_v32 = vpop.f32.mrf.mxu1 }
 0x34e   :  { %v2936_v59 = vpop.f32.mrf.mxu0  ;;  %v12308_v32 = vld [vmem:[#allocation6 + $0x240] sm:$0xff]  }
 0x34f   :  { %v11350_v47 = vpop.f32.mrf.mxu1  ;;  %11585 = vmatprep.subr.bf16.mxu1 %v12308_v32 }
 0x350   :  { %v11374_v46 = vpop.f32.mrf.mxu0  ;;  %11586 = vmatpush3.bf16.msra.mxu1 %v12308_v32 }
 0x351   :  { %v13517_v23 = vadd.f32 %v11374_v46, %v11350_v47  ;;  %v13519_v10 = vpop.f32.mrf.mxu1  ;;  %v4484_v46 = vld [vmem:[#allocation2 + $0x6] sm:$0xff] }
 0x352   :  { %v13521_v48 = vpop.f32.mrf.mxu0 }
 0x353   :  { %v11353_v25 = vpop.f32.mrf.mxu1 }
 0x354   :  { %v11377_v29 = vpop.f32.mrf.mxu0 }
 0x355   :  { %v13523_v35 = vadd.f32 %v11377_v29, %v11353_v25  ;;  %v2807_v8 = vpop.f32.mrf.mxu1  ;;  %v4485_v25 = vld [vmem:[#allocation2 + $0xe] sm:$0xff]  ;;  %v4451_v29 = vld [vmem:[#allocation2 + $0x5] sm:$0xff] }
 0x356   :  { %v2952_v12 = vpop.f32.mrf.mxu0 }
 0x357   :  { %v13525_v51 = vadd.f32 %v2952_v12, %v2807_v8  ;;  %v11354_v39 = vpop.f32.mrf.mxu1  ;;  %v4500_v12 = vpack.c.bf16 %v4485_v25, %v4484_v46 }
 0x358   :  { %v11378_v37 = vpop.f32.mrf.mxu0 }
 0x359   :  { %v13527_v1 = vadd.f32 %v11378_v37, %v11354_v39  ;;  %v13529_v44 = vpop.f32.mrf.mxu1  ;;  %v4452_v39 = vld [vmem:[#allocation2 + $0xd] sm:$0xff]  ;;  %v13553_v37 = vld [vmem:[#allocation6 + $0x298] sm:$0xff]   ;;  %11563 = vmatprep.mubr.msk.bf16.mxu0 %vm91_vm2, %v4500_v12 }
 0x35a   :  { %v13531_v63 = vpop.f32.mrf.mxu0  ;;  %14848 = vst [vmem:[#allocation27_spill] sm:$0xff] %v13553_v37  ;;  %v4467_v36 = vpack.c.bf16 %v4452_v39, %v4451_v29  ;;  %11603 = vmatprep.subr.bf16.mxu0 %v13553_v37 }
 0x35c   :  { %v11357_v14 = vpop.f32.mrf.mxu1  ;;  %11587 = vmatprep.mubr.msk.bf16.mxu1 %vm91_vm2, %v4467_v36 }
 0x35d   :  { %v11381_v38 = vpop.f32.mrf.mxu0 }
 0x35e   :  { %v13533_v61 = vadd.f32 %v11381_v38, %v11357_v14  ;;  %v2823_v18 = vpop.f32.mrf.mxu1 }
 0x35f   :  { %v2968_v20 = vpop.f32.mrf.mxu0 }
 0x360   :  { %v13536_v55 = vadd.f32 %v2968_v20, %v2823_v18  ;;  %v11358_v21 = vpop.f32.mrf.mxu1 }
 0x361   :  { %v11382_v9 = vpop.f32.mrf.mxu0 }
 0x362   :  { %v13539_v43 = vadd.f32 %v11382_v9, %v11358_v21  ;;  %v13541_v22 = vpop.f32.mrf.mxu1  ;;  %v13569_v9 = vld [vmem:[#allocation6 + $0x2b8] sm:$0xff]  }
 0x363   :  { %v13543_v50 = vpop.f32.mrf.mxu0  ;;  %14849 = vst [vmem:[#allocation25_spill] sm:$0xff] %v13569_v9  ;;  %11627 = vmatprep.subr.bf16.mxu1 %v13569_v9 }
 0x364   :  { %v11361_v57 = vpop.f32.mrf.mxu1 }
 0x365   :  { %v11385_v54 = vpop.f32.mrf.mxu0 }
 0x366   :  { %v2839_v33 = vpop.f32.mrf.mxu1 }
 0x367   :  { %v2984_v52 = vpop.f32.mrf.mxu0 }
 0x368   :  { %v11362_v16 = vpop.f32.mrf.mxu1 }
 0x369   :  { %v11386_v59 = vpop.f32.mrf.mxu0 }
 0x36a   :  { %v2842_v47 = vpop.f32.mrf.mxu1 }
 0x36b   :  { %v2987_v8 = vpop.f32.mrf.mxu0 }
 0x36c   :  { %v11397_v2 = vpop.f32.mrf.mxu1 }
 0x36d   :  { %v3180_v14 = vadd.f32 %v11397_v2, %v13515_v26  ;;  %v11421_v4 = vpop.f32.mrf.mxu0 }
 0x36e   :  { %v3115_v19 = vpop.f32.mrf.mxu1 }
 0x36f   :  { %v13559_v13 = vadd.f32 %v11421_v4, %v3180_v14  ;;  %v3310_v38 = vpop.f32.mrf.mxu0 }
 0x370   :  { %v11398_v58 = vpop.f32.mrf.mxu1 }
 0x371   :  { %v3181_v60 = vadd.f32 %v11398_v58, %v13517_v23  ;;  %v11422_v41 = vpop.f32.mrf.mxu0 }
 0x372   :  { %v13562_v18 = vpop.f32.mrf.mxu1 }
 0x373   :  { %v13564_v31 = vadd.f32 %v11422_v41, %v3181_v60  ;;  %v13566_v26 = vpop.f32.mrf.mxu0 }
 0x374   :  { %v11401_v20 = vpop.f32.mrf.mxu1 }
 0x375   :  { %v3184_v21 = vadd.f32 %v11401_v20, %v13523_v35  ;;  %v11425_v0 = vpop.f32.mrf.mxu0 }
 0x376   :  { %v3131_v5 = vpop.f32.mrf.mxu1 }
 0x377   :  { %v13571_v56 = vadd.f32 %v11425_v0, %v3184_v21  ;;  %v3182_v28 = vadd.f32 %v3131_v5, %v13525_v51  ;;  %v3326_v53 = vpop.f32.mrf.mxu0 }
 0x378   :  { %v11402_v23 = vpop.f32.mrf.mxu1 }
 0x379   :  { %v13575_v57 = vadd.f32 %v3326_v53, %v3182_v28  ;;  %v3185_v11 = vadd.f32 %v11402_v23, %v13527_v1  ;;  %v11426_v17 = vpop.f32.mrf.mxu0 }
 0x37a   :  { %v13578_v40 = vpop.f32.mrf.mxu1 }
 0x37b   :  { %v13580_v35 = vadd.f32 %v11426_v17, %v3185_v11  ;;  %v13582_v54 = vpop.f32.mrf.mxu0 }
 0x37c   :  { %v11405_v45 = vpop.f32.mrf.mxu1 }
 0x37d   :  { %v3188_v33 = vadd.f32 %v11405_v45, %v13533_v61  ;;  %v11429_v52 = vpop.f32.mrf.mxu0 }
 0x37e   :  { %v3147_v51 = vpop.f32.mrf.mxu1 }
 0x37f   :  { %v13585_v16 = vadd.f32 %v11429_v52, %v3188_v33  ;;  %v3186_v32 = vadd.f32 %v3147_v51, %v13536_v55  ;;  %v3342_v59 = vpop.f32.mrf.mxu0 }
 0x380   :  { %v11406_v47 = vpop.f32.mrf.mxu1 }
 0x381   :  { %v13588_v46 = vadd.f32 %v3342_v59, %v3186_v32  ;;  %v3189_v1 = vadd.f32 %v11406_v47, %v13539_v43  ;;  %v11430_v25 = vpop.f32.mrf.mxu0 }
 0x382   :  { %v13591_v29 = vpop.f32.mrf.mxu1 }
 0x383   :  { %v13593_v8 = vadd.f32 %v11430_v25, %v3189_v1  ;;  %v13595_v12 = vpop.f32.mrf.mxu0 }
 0x384   :  { %v11409_v61 = vpop.f32.mrf.mxu1 }
 0x385   :  { %v11433_v39 = vpop.f32.mrf.mxu0 }
 0x386   :  { %v3163_v2 = vpop.f32.mrf.mxu1 }
 0x387   :  { %v3358_v36 = vpop.f32.mrf.mxu0 }
 0x388   :  { %v11410_v14 = vpop.f32.mrf.mxu1 }
 0x389   :  { %v11434_v4 = vpop.f32.mrf.mxu0 }
 0x38a   :  { %v3166_v55 = vpop.f32.mrf.mxu1 }
 0x38b   :  { %v3361_v19 = vpop.f32.mrf.mxu0 }
 0x38c   :  { %v11445_v38 = vpop.f32.mrf.mxu1 }
 0x38d   :  { %v11469_v58 = vpop.f32.mrf.mxu0 }
 0x38e   :  { %v3504_v60 = vpop.f32.mrf.mxu1 }
 0x38f   :  { %v3699_v41 = vpop.f32.mrf.mxu0 }
 0x390   :  { %v11446_v43 = vpop.f32.mrf.mxu1 }
 0x391   :  { %v11470_v20 = vpop.f32.mrf.mxu0  ;;  %v3570_v34 = vadd.f32 %v11446_v43, %v13564_v31 }
 0x392   :  { %v3507_v21 = vpop.f32.mrf.mxu1 }
 0x393   :  { %v3702_v0 = vpop.f32.mrf.mxu0 }
 0x394   :  { %v11449_v5 = vpop.f32.mrf.mxu1 }
 0x395   :  { %v13597_v28 = vpop.f32.mrf.mxu0 }
 0x396   :  { %v3520_v53 = vpop.f32.mrf.mxu1 }
 0x397   :  { %v13599_v23 = vpop.f32.mrf.mxu0 }
 0x398   :  { %v13601_v11 = vpop.f32.mrf.mxu1 }
 0x399   :  { %v13603_v17 = vpop.f32.mrf.mxu0 }
 0x39a   :  { %v13605_v45 = vpop.f32.mrf.mxu1 }
 0x39b   :  { %v13607_v33 = vpop.f32.mrf.mxu0 }
 0x39c   :  { %v13609_v52 = vpop.f32.mrf.mxu1 }
 0x39d   :  { %v13611_v51 = vpop.f32.mrf.mxu0 }
 0x39e   :  { %v13613_v32 = vpop.f32.mrf.mxu1 }
 0x39f   :  { %v13615_v59 = vpop.f32.mrf.mxu0 }
 0x3a0   :  { %v13617_v47 = vpop.f32.mrf.mxu1 }
 0x3a1   :  { %v13619_v1 = vpop.f32.mrf.mxu0 }
 0x3a2   :  { %14850 = vst [vmem:[#allocation26_spill] sm:$0xff] %v13619_v1  ;;  %v13621_v25 = vpop.f32.mrf.mxu1 }
 0x3a3   :  { %v13623_v61 = vpop.f32.mrf.mxu0 }
 0x3a4   :  { %14851 = vst [vmem:[#allocation28_spill] sm:$0xff] %v13623_v61  ;;  %v11457_v39 = vpop.f32.mrf.mxu1 }
 0x3a5   :  { %v11481_v2 = vpop.f32.mrf.mxu0 }
 0x3a6   :  { %v3552_v36 = vpop.f32.mrf.mxu1 }
 0x3a7   :  { %v3747_v14 = vpop.f32.mrf.mxu0  ;;  %v2940_v36 = vadd.f32 %v13521_v48, %v13519_v10 }
 0x3a8   :  { %v11458_v4 = vpop.f32.mrf.mxu1 }
 0x3a9   :  { %v11482_v55 = vpop.f32.mrf.mxu0 }
 0x3aa   :  { %v3555_v19 = vpop.f32.mrf.mxu1 }
 0x3ab   :  { %v3750_v60 = vpop.f32.mrf.mxu0 }
 0x3ac   :  { %v11493_v41 = vpop.f32.mrf.mxu1 }
 0x3ad   :  { %v11517_v7 = vpop.f32.mrf.mxu0 }
 0x3ae   :  { %v3894_v9 = vpop.f32.mrf.mxu1 }
 0x3af   :  { %v4089_v37 = vpop.f32.mrf.mxu0  ;;  %v3569_v9 = vadd.f32 %v11445_v38, %v13559_v13  ;;  %v3765_v13 = vadd.f32 %v11470_v20, %v3570_v34  ;;  %v3573_v38 = vadd.f32 %v11449_v5, %v13571_v56  ;;  %v2972_v56 = vadd.f32 %v13543_v50, %v13541_v22 }
 0x3b0   :  { %v11494_v30 = vpop.f32.mrf.mxu1  ;;  %v3179_v37 = vadd.f32 %v13562_v18, %v2940_v36 }
 0x3b1   :  { %v11518_v61 = vpop.f32.mrf.mxu0  ;;  %v3764_v1 = vadd.f32 %v11469_v58, %v3569_v9  ;;  %v3187_v5 = vadd.f32 %v13591_v29, %v2972_v56  ;;  %v14861_v56 = vld [vmem:[#allocation28_spill] sm:$0xff] }
 0x3b2   :  { %v3897_v15 = vpop.f32.mrf.mxu1  ;;  %v3374_v3 = vadd.f32 %v13566_v26, %v3179_v37  ;;  %v3960_v37 = vadd.f32 %v11494_v30, %v3765_v13 }
 0x3b3   :  { %v4092_v14 = vpop.f32.mrf.mxu0 }
 0x3b4   :  { %v11497_v27 = vpop.f32.mrf.mxu1  ;;  %v3568_v48 = vadd.f32 %v3507_v21, %v3374_v3 }
 0x3b5   :  { %v11521_v19 = vpop.f32.mrf.mxu0 }
 0x3b6   :  { %v3910_v49 = vpop.f32.mrf.mxu1  ;;  %v3763_v26 = vadd.f32 %v3702_v0, %v3568_v48 }
 0x3b7   :  { %v4105_v18 = vpop.f32.mrf.mxu0 }
 0x3b8   :  { %v11498_v6 = vpop.f32.mrf.mxu1  ;;  %v3958_v34 = vadd.f32 %v3897_v15, %v3763_v26 }
 0x3b9   :  { %v11522_v43 = vpop.f32.mrf.mxu0 }
 0x3ba   :  { %v13625_v42 = vpop.f32.mrf.mxu1  ;;  %v4153_v22 = vadd.f32 %v4092_v14, %v3958_v34 }
 0x3bb   :  { %v4108_v15 = vpop.f32.mrf.mxu0 }
 0x3bc   :  { %v13627_v39 = vpop.f32.mrf.mxu1 }
 0x3bd   :  { %14852 = vst [vmem:[#allocation29_spill] sm:$0xff] %v13627_v39  ;;  %v3959_v39 = vadd.f32 %v11493_v41, %v3764_v1  ;;  %v3575_v1 = vadd.f32 %v13613_v32, %v13588_v46  ;;  %v4404_v32 = vld [vmem:[#allocation2 + $0x28] sm:$0xff] }
 0x3be   :  { %v13629_v2 = vpop.f32.mrf.mxu1 }
 0x3bf   :  { %14853 = vst [vmem:[#allocation30_spill] sm:$0xff] %v13629_v2  ;;  %v2956_v2 = vadd.f32 %v13531_v63, %v13529_v44  ;;  %v4154_v58 = vadd.f32 %v11517_v7, %v3959_v39  ;;  %v13647_v44 = vld [vmem:[#allocation8 + $0x1] ss:$0 sm:$0xff]  ;;  %v3768_v63 = vadd.f32 %v13597_v28, %v3573_v38  ;;  %v3577_v28 = vadd.f32 %v13609_v52, %v13585_v16 }
 0x3c0   :  { %v13633_v4 = vpop.f32.mrf.mxu1 }
 0x3c1   :  { %14854 = vst [vmem:[#allocation31_spill] sm:$0xff] %v13633_v4  ;;  %v3183_v4 = vadd.f32 %v13578_v40, %v2956_v2  ;;  %v3574_v40 = vadd.f32 %v13601_v11, %v13580_v35  ;;  %v3963_v21 = vadd.f32 %v11497_v27, %v3768_v63  ;;  %v3772_v39 = vadd.f32 %v13611_v51, %v3577_v28 }
 0x3c2   :  { %v13637_v55 = vpop.f32.mrf.mxu1  ;;  %v3578_v2 = vadd.f32 %v13617_v47, %v13593_v8 }
 0x3c3   :  { %14855 = vst [vmem:[#allocation32_spill] sm:$0xff] %v13637_v55  ;;  %v3378_v31 = vadd.f32 %v13582_v54, %v3183_v4  ;;  %v4155_v54 = vadd.f32 %v11518_v61, %v3960_v37  ;;  %v3769_v11 = vadd.f32 %v13603_v17, %v3574_v40  ;;  %v4158_v41 = vadd.f32 %v11521_v19, %v3963_v21  ;;  %v11525_v4 = vpop.f32.mrf.mxu0  ;;  %v4407_v40 = vld [vmem:[#allocation2 + $0x40] sm:$0xff] }
 0x3c4   :  { %v11505_v60 = vpop.f32.mrf.mxu1  ;;  %v3382_v17 = vadd.f32 %v13595_v12, %v3187_v5  ;;  %v3770_v12 = vadd.f32 %v13615_v59, %v3575_v1  ;;  %v14856_v19 = vld [vmem:[#allocation29_spill] sm:$0xff] }
 0x3c5   :  { %v3571_v60 = vadd.f32 %v3520_v53, %v13575_v57  ;;  %v3572_v30 = vadd.f32 %v13605_v45, %v3378_v31  ;;  %v3964_v16 = vadd.f32 %v11498_v6, %v3769_v11  ;;  %v3967_v8 = vadd.f32 %v14856_v19, %v3772_v39  ;;  %v4121_v31 = vpop.f32.mrf.mxu0 }
 0x3c6   :  { %v3942_v10 = vpop.f32.mrf.mxu1  ;;  %v3576_v51 = vadd.f32 %v13621_v25, %v3382_v17 }
 0x3c7   :  { %v3766_v57 = vadd.f32 %v13599_v23, %v3571_v60  ;;  %v4403_v23 = vld [vmem:[#allocation2 + $0x20] sm:$0xff]  ;;  %v3767_v27 = vadd.f32 %v13607_v33, %v3572_v30  ;;  %v4159_v48 = vadd.f32 %v11522_v43, %v3964_v16  ;;  %v4162_v30 = vadd.f32 %v11525_v4, %v3967_v8 }
 0x3c8   :  { %v11506_v36 = vpop.f32.mrf.mxu1  ;;  %v14858_v60 = vld [vmem:[#allocation26_spill] sm:$0xff]  ;;  %v14862_v21 = vld [vmem:[#allocation31_spill] sm:$0xff] }
 0x3c9   :  { %v3961_v35 = vadd.f32 %v3910_v49, %v3766_v57  ;;  %v3962_v46 = vadd.f32 %v13625_v42, %v3767_v27  ;;  %v4402_v42 = vld [vmem:[#allocation2 + $0x18] sm:$0xff]  ;;  %v3773_v26 = vadd.f32 %v14858_v60, %v3578_v2  ;;  %v3771_v57 = vadd.f32 %v14861_v56, %v3576_v51 }
 0x3ca   :  { %v3945_v55 = vpop.f32.mrf.mxu1 }
 0x3cb   :  { %v4156_v14 = vadd.f32 %v4105_v18, %v3961_v35  ;;  %v4405_v35 = vld [vmem:[#allocation2 + $0x30] sm:$0xff] }
 0x3cc   :  { %v11541_v3 = vpop.f32.mrf.mxu1 }
 0x3cd   :  { %v4349_v20 = vadd.f32 %v11541_v3, %v4154_v58  ;;  %v14859_v58 = vld [vmem:[#allocation30_spill] sm:$0xff]  ;;  %v4157_v3 = vadd.f32 %v4108_v15, %v3962_v46  ;;  %v7989_v46 = vld [vmem:[#allocation2 + $0x10] sm:$0xff] }
 0x3ce   :  { %v4284_v7 = vpop.f32.mrf.mxu1  ;;  %v3965_v37 = vadd.f32 %v14859_v58, %v3770_v12  ;;  %v12310_v12 = vld [vmem:[#allocation6 + $0x290] sm:$0xff]  }
 0x3cf   :  { %v4371_v0 = vadd.f32 %v13647_v44, %v4349_v20 }
 0x3d0   :  { %v11542_v53 = vpop.f32.mrf.mxu1  ;;  %v4160_v11 = vadd.f32 %v4121_v31, %v3965_v37  ;;  %v12313_v37 = vld [vmem:[#allocation6 + $0x2b0] sm:$0xff]  }
 0x3d1   :  { %v4387_v50 = vsel %vm12790_vm12, %v4371_v0, 0.0  ;;  %v4350_v45 = vadd.f32 %v11542_v53, %v4155_v54  ;;  %v3968_v0 = vadd.f32 %v14862_v21, %v3773_v26  ;;  %v13708_v31 = vld [vmem:[#allocation2 + $0xf] sm:$0xff] }
 0x3d2   :  { %v4419_v29 = vadd.f32 %v4403_v23, %v4387_v50  ;;  %v4287_v61 = vpop.f32.mrf.mxu1 }
 0x3d3   :  { %v4372_v49 = vadd.f32 %v13647_v44, %v4350_v45  ;;  %v4348_v52 = vadd.f32 %v4287_v61, %v4153_v22  ;;  %v11526_v22 = vpop.f32.mrf.mxu0  ;;  %v14864_v45 = vld [vmem:[#allocation32_spill] sm:$0xff]  ;;  %v4408_v61 = vld [vmem:[#allocation2 + $0x48] sm:$0xff] }
 0x3d4   :  { %4435 = vst.msk [vmem:[#allocation2 + $0x20] sm:$0xff] %vm91_vm2, %v4419_v29  ;;  %v11545_v33 = vpop.f32.mrf.mxu1  ;;  %v3966_v27 = vadd.f32 %v14864_v45, %v3771_v57  ;;  %v4163_v17 = vadd.f32 %v11526_v22, %v3968_v0  ;;  %v14871_v45 = vld [vmem:[#allocation25_spill] sm:$0xff] }
 0x3d5   :  { %v4388_v6 = vsel %vm12805_vm1, %v4372_v49, 0.0  ;;  %v4370_v9 = vadd.f32 %v13647_v44, %v4348_v52  ;;  %v4353_v55 = vadd.f32 %v11545_v33, %v4158_v41 }
 0x3d6   :  { %v4420_v47 = vadd.f32 %v4404_v32, %v4388_v6  ;;  %v4300_v10 = vpop.f32.mrf.mxu1  ;;  %v4124_v6 = vpop.f32.mrf.mxu0 }
 0x3d7   :  { %v4386_v36 = vsel %vm12815_vm4, %v4370_v9, 0.0  ;;  %v4375_v13 = vadd.f32 %v13647_v44, %v4353_v55  ;;  %v4351_v38 = vadd.f32 %v4300_v10, %v4156_v14  ;;  %v4406_v14 = vld [vmem:[#allocation2 + $0x38] sm:$0xff]  ;;  %v4411_v9 = vld [vmem:[#allocation2 + $0x60] sm:$0xff]  ;;  %v4161_v51 = vadd.f32 %v4124_v6, %v3966_v27  ;;  %v4409_v10 = vld [vmem:[#allocation2 + $0x50] sm:$0xff] }
 0x3d8   :  { %4436 = vst.msk [vmem:[#allocation2 + $0x28] sm:$0xff] %vm91_vm2, %v4420_v47  ;;  %v4418_v59 = vadd.f32 %v4402_v42, %v4386_v36  ;;  %v11546_v25 = vpop.f32.mrf.mxu1 }
 0x3d9   :  { %v4391_v43 = vsel %vm12826_vm8, %v4375_v13, 0.0  ;;  %v4373_v34 = vadd.f32 %v13647_v44, %v4351_v38  ;;  %v4354_v20 = vadd.f32 %v11546_v25, %v4159_v48 }
 0x3da   :  { %4434 = vst.msk [vmem:[#allocation2 + $0x18] sm:$0xff] %vm91_vm2, %v4418_v59  ;;  %v4423_v7 = vadd.f32 %v4407_v40, %v4391_v43  ;;  %v4303_v54 = vpop.f32.mrf.mxu1 }
 0x3db   :  { %v4389_v28 = vsel %vm12832_vm9, %v4373_v34, 0.0  ;;  %v4376_v15 = vadd.f32 %v13647_v44, %v4354_v20  ;;  %v4352_v53 = vadd.f32 %v4303_v54, %v4157_v3  ;;  %v13715_v20 = vld [vmem:[#allocation2 + $0x10] sm:$0xff] }
 0x3dc   :  { %4439 = vst.msk [vmem:[#allocation2 + $0x40] sm:$0xff] %vm91_vm2, %v4423_v7  ;;  %v4421_v50 = vadd.f32 %v4405_v35, %v4389_v28  ;;  %v11549_v23 = vpop.f32.mrf.mxu1  ;;  %v14870_v28 = vld [vmem:[#allocation27_spill] sm:$0xff] }
 0x3dd   :  { %v4392_v29 = vsel %vm12841_vm0, %v4376_v15, 0.0  ;;  %v4374_v41 = vadd.f32 %v13647_v44, %v4352_v53  ;;  %v4357_v16 = vadd.f32 %v11549_v23, %v4162_v30  ;;  %v4412_v30 = vld [vmem:[#allocation2 + $0x68] sm:$0xff] }
 0x3de   :  { %4437 = vst.msk [vmem:[#allocation2 + $0x30] sm:$0xff] %vm91_vm2, %v4421_v50  ;;  %v4424_v49 = vadd.f32 %v4408_v61, %v4392_v29  ;;  %v4316_v52 = vpop.f32.mrf.mxu1  ;;  %v12311_v23 = vld [vmem:[#allocation6 + $0x288] sm:$0xff]  }
 0x3df   :  { %v4390_v2 = vsel %vm12852_vm14, %v4374_v41, 0.0  ;;  %v4379_v4 = vadd.f32 %v13647_v44, %v4357_v16  ;;  %v4355_v33 = vadd.f32 %v4316_v52, %v4160_v11  ;;  %v4488_v7 = vld [vmem:[#allocation2 + $0x26] sm:$0xff] }
 0x3e0   :  { %4440 = vst.msk [vmem:[#allocation2 + $0x48] sm:$0xff] %vm91_vm2, %v4424_v49  ;;  %v4422_v32 = vadd.f32 %v4406_v14, %v4390_v2  ;;  %v11550_v55 = vpop.f32.mrf.mxu1  ;;  %v4455_v15 = vld [vmem:[#allocation2 + $0x25] sm:$0xff] }
 0x3e1   :  { %v4395_v8 = vsel %vm12860_vm3, %v4379_v4, 0.0  ;;  %v4377_v47 = vadd.f32 %v13647_v44, %v4355_v33  ;;  %v4358_v48 = vadd.f32 %v11550_v55, %v4163_v17  ;;  %v4486_v36 = vld [vmem:[#allocation2 + $0x16] sm:$0xff]  ;;  %v4487_v42 = vld [vmem:[#allocation2 + $0x1e] sm:$0xff]  ;;  %v12315_v61 = vld [vmem:[#allocation6 + $0x2a8] sm:$0xff]  }
 0x3e2   :  { %v4453_v13 = vld [vmem:[#allocation2 + $0x15] sm:$0xff]  ;;  %4438 = vst.msk [vmem:[#allocation2 + $0x38] sm:$0xff] %vm91_vm2, %v4422_v32  ;;  %v4427_v38 = vadd.f32 %v4411_v9, %v4395_v8  ;;  %v4319_v60 = vpop.f32.mrf.mxu1  ;;  %v4501_v26 = vpack.c.bf16 %v4487_v42, %v4486_v36  ;;  %v4454_v58 = vld [vmem:[#allocation2 + $0x1d] sm:$0xff] }
 0x3e3   :  { %v4393_v25 = vsel %vm12879_vm7, %v4377_v47, 0.0  ;;  %v4380_v3 = vadd.f32 %v13647_v44, %v4358_v48  ;;  %v4356_v43 = vadd.f32 %v4319_v60, %v4161_v51  ;;  %v4468_v40 = vpack.c.bf16 %v4454_v58, %v4453_v13  ;;  %v13713_v34 = vld [vmem:[#allocation2 + $0x17] sm:$0xff]  ;;  %v12314_v14 = vld [vmem:[#allocation6 + $0x280] sm:$0xff]  }
 0x3e4   :  { %v13717_v56 = vld [vmem:[#allocation2 + $0x11] sm:$0xff]  ;;  %4443 = vst.msk [vmem:[#allocation2 + $0x60] sm:$0xff] %vm91_vm2, %v4427_v38  ;;  %v4425_v57 = vadd.f32 %v4409_v10, %v4393_v25  ;;  %11564 = vmatmul.mubr.msk.bf16.vlgmr.msra.gmra.mxu0 %vm91_vm2, %v4501_v26  ;;  %v12316_v33 = vld [vmem:[#allocation6 + $0x2a0] sm:$0xff]   ;;  %v12317_v51 = vld [vmem:[#allocation6 + $0x2d8] sm:$0xff]  }
 0x3e5   :  { %8021 = vst.msk [vmem:[#allocation2 + $0x10] sm:$0xff] %vm91_vm2, %v7989_v46  ;;  %v4396_v21 = vsel %vm12894_vm10, %v4380_v3, 0.0  ;;  %v4378_v0 = vadd.f32 %v13647_v44, %v4356_v43  ;;  %11588 = vmatmul.mubr.msk.bf16.vlgmr.msra.gmra.mxu1 %vm91_vm2, %v4468_v40  ;;  %11604 = vmatpush3.bf16.msra.mxu0 %v14870_v28  ;;  %v4489_v35 = vld [vmem:[#allocation2 + $0x2e] sm:$0xff]  ;;  %v4410_v44 = vld [vmem:[#allocation2 + $0x58] sm:$0xff] }
 0x3e6   :  { %v4456_v53 = vld [vmem:[#allocation2 + $0x2d] sm:$0xff]  ;;  %4441 = vst.msk [vmem:[#allocation2 + $0x50] sm:$0xff] %vm91_vm2, %v4425_v57  ;;  %v4428_v11 = vadd.f32 %v4412_v30, %v4396_v21  ;;  %v4502_v22 = vpack.c.bf16 %v4489_v35, %v4488_v7  ;;  %11605 = vmatprep.subr.bf16.mxu0 %v12310_v12  ;;  %11628 = vmatpush3.bf16.msra.mxu1 %v14871_v45  ;;  %v13737_v47 = vld [vmem:[#allocation6 + $0x2f8] sm:$0xff]  }
 0x3e7   :  { %v4469_v50 = vpack.c.bf16 %v4456_v53, %v4455_v15  ;;  %v4394_v29 = vsel %vm12928_vm15, %v4378_v0, 0.0  ;;  %11629 = vmatprep.subr.bf16.mxu1 %v12313_v37  ;;  %v4492_v46 = vld [vmem:[#allocation2 + $0x46] sm:$0xff]  ;;  %v8001_v3 = vld [vmem:[#allocation2 + $0x70] sm:$0xff]  ;;  %v4499_v40 = vld [vmem:[#allocation2 + $0x7e] sm:$0xff] }
 0x3e8   :  { %4444 = vst.msk [vmem:[#allocation2 + $0x68] sm:$0xff] %vm91_vm2, %v4428_v11  ;;  %v4426_v41 = vadd.f32 %v4410_v44, %v4394_v29  ;;  %11567 = vmatprep.mubr.msk.bf16.mxu0 %vm91_vm2, %v4502_v22  ;;  %v4459_v32 = vld [vmem:[#allocation2 + $0x45] sm:$0xff]  ;;  %v4498_v43 = vld [vmem:[#allocation2 + $0x76] sm:$0xff]  ;;  %v5017_v44 = vpack.c.bf16 %v13713_v34, %v13708_v31 }
 0x3e9   :  { %11591 = vmatprep.mubr.msk.bf16.mxu1 %vm91_vm2, %v4469_v50  ;;  %v4490_v16 = vld [vmem:[#allocation2 + $0x36] sm:$0xff]  ;;  %v4491_v49 = vld [vmem:[#allocation2 + $0x3e] sm:$0xff]  ;;  %11606 = vmatpush3.bf16.msra.mxu0 %v12310_v12  ;;  %v4807_v7 = vld [vmem:[#allocation2 + $0x7] sm:$0xff]  ;;  %v4507_v35 = vpack.c.bf16 %v4499_v40, %v4498_v43 }
 0x3ea   :  { %v4457_v52 = vld [vmem:[#allocation2 + $0x35] sm:$0xff]  ;;  %4442 = vst.msk [vmem:[#allocation2 + $0x58] sm:$0xff] %vm91_vm2, %v4426_v41  ;;  %v4503_v17 = vpack.c.bf16 %v4491_v49, %v4490_v16  ;;  %v4458_v2 = vld [vmem:[#allocation2 + $0x3d] sm:$0xff]  ;;  %11607 = vmatprep.subr.bf16.mxu0 %v12311_v23  ;;  %11630 = vmatpush3.bf16.msra.mxu1 %v12313_v37  ;;  %v4823_v50 = vpack.c.bf16 %v13708_v31, %v4807_v7  ;;  %v12319_v31 = vld [vmem:[#allocation6 + $0x2c8] sm:$0xff]  }
 0x3eb   :  { %v4470_v4 = vpack.c.bf16 %v4458_v2, %v4457_v52  ;;  %11631 = vmatprep.subr.bf16.mxu1 %v12315_v61  ;;  %v4465_v57 = vld [vmem:[#allocation2 + $0x75] sm:$0xff]  ;;  %v4466_v30 = vld [vmem:[#allocation2 + $0x7d] sm:$0xff]  ;;  %v5004_v52 = vld [vmem:[#allocation2 + $0x27] sm:$0xff] }
 0x3ec   :  { %11568 = vmatmul.mubr.msk.bf16.gmra.mxu0 %vm91_vm2, %v4503_v17  ;;  %v13746_v21 = vld [vmem:[#allocation2 + $0x77] sm:$0xff]  ;;  %v4474_v22 = vpack.c.bf16 %v4466_v30, %v4465_v57  ;;  %v4812_v41 = vld [vmem:[#allocation2 + $0x2f] sm:$0xff] }
 0x3ed   :  { %11592 = vmatmul.mubr.msk.bf16.gmra.mxu1 %vm91_vm2, %v4470_v4  ;;  %v4493_v6 = vld [vmem:[#allocation2 + $0x4e] sm:$0xff]  ;;  %11608 = vmatpush3.bf16.msra.mxu0 %v12311_v23  ;;  %v5006_v16 = vld [vmem:[#allocation2 + $0x37] sm:$0xff] }
 0x3ee   :  { %v4460_v9 = vld [vmem:[#allocation2 + $0x4d] sm:$0xff]  ;;  %v4504_v55 = vpack.c.bf16 %v4493_v6, %v4492_v46  ;;  %11609 = vmatprep.subr.bf16.mxu0 %v12314_v14  ;;  %11632 = vmatpush3.bf16.msra.mxu1 %v12315_v61  ;;  %v4810_v61 = vld [vmem:[#allocation2 + $0x1f] sm:$0xff]  ;;  %v5019_v4 = vpack.c.bf16 %v5006_v16, %v4812_v41 }
 0x3ef   :  { %v4471_v12 = vpack.c.bf16 %v4460_v9, %v4459_v32  ;;  %v4496_v8 = vld [vmem:[#allocation2 + $0x66] sm:$0xff]  ;;  %11633 = vmatprep.subr.bf16.mxu1 %v12316_v33  ;;  %v4497_v10 = vld [vmem:[#allocation2 + $0x6e] sm:$0xff]  ;;  %v4824_v49 = vpack.c.bf16 %v4810_v61, %v13713_v34  ;;  %v5018_v17 = vpack.c.bf16 %v5004_v52, %v4810_v61  ;;  %v5196_v43 = vld [vmem:[#allocation2 + $0x18] sm:$0xff] }
 0x3f0   :  { %11571 = vmatprep.mubr.msk.bf16.mxu0 %vm91_vm2, %v4504_v55  ;;  %v4463_v48 = vld [vmem:[#allocation2 + $0x65] sm:$0xff]  ;;  %v4464_v36 = vld [vmem:[#allocation2 + $0x6d] sm:$0xff]  ;;  %v4506_v37 = vpack.c.bf16 %v4497_v10, %v4496_v8  ;;  %v13790_v57 = vld [vmem:[#allocation2 + $0x19] sm:$0xff]  ;;  %v5211_v30 = vpack.c.bf16 %v5196_v43, %v13715_v20 }
 0x3f1   :  { %11595 = vmatprep.mubr.msk.bf16.mxu1 %vm91_vm2, %v4471_v12  ;;  %v4494_v42 = vld [vmem:[#allocation2 + $0x56] sm:$0xff]  ;;  %v4495_v13 = vld [vmem:[#allocation2 + $0x5e] sm:$0xff]  ;;  %11610 = vmatpush3.bf16.msra.mxu0 %v12314_v14  ;;  %v4473_v25 = vpack.c.bf16 %v4464_v36, %v4463_v48  ;;  %v13759_v23 = vld [vmem:[#allocation2 + $0x69] sm:$0xff]  ;;  %v4825_v14 = vpack.c.bf16 %v4812_v41, %v5004_v52  ;;  %v5405_v7 = vpack.c.bf16 %v13790_v57, %v13717_v56 }
 0x3f2   :  { %v4461_v38 = vld [vmem:[#allocation2 + $0x55] sm:$0xff]  ;;  %v4505_v60 = vpack.c.bf16 %v4495_v13, %v4494_v42  ;;  %v4462_v26 = vld [vmem:[#allocation2 + $0x5d] sm:$0xff]  ;;  %11634 = vmatpush3.bf16.msra.mxu1 %v12316_v33  ;;  %11651 = vmatprep.subr.bf16.mxu0 %v12317_v51  ;;  %v13761_v45 = vld [vmem:[#allocation2 + $0x6a] sm:$0xff] }
 0x3f3   :  { %v4472_v58 = vpack.c.bf16 %v4462_v26, %v4461_v38  ;;  %11675 = vmatprep.subr.bf16.mxu1 %v13737_v47  ;;  %v13748_v0 = vld [vmem:[#allocation2 + $0x71] sm:$0xff]  ;;  %v4814_v46 = vld [vmem:[#allocation2 + $0x3f] sm:$0xff]  ;;  %v5008_v55 = vld [vmem:[#allocation2 + $0x47] sm:$0xff] }
 0x3f4   :  { %11572 = vmatmul.mubr.msk.bf16.gmra.mxu0 %vm91_vm2, %v4505_v60  ;;  %v13750_v28 = vld [vmem:[#allocation2 + $0x72] sm:$0xff]  ;;  %v12323_v6 = vld [vmem:[#allocation6 + $0x2e8] sm:$0xff]   ;;  %v4826_v9 = vpack.c.bf16 %v4814_v46, %v5006_v16  ;;  %v5020_v12 = vpack.c.bf16 %v5008_v55, %v4814_v46  ;;  %v12324_v48 = vld [vmem:[#allocation6 + $0x2e0] sm:$0xff]  }
 0x3f5   :  { %11596 = vmatmul.mubr.msk.bf16.gmra.mxu1 %vm91_vm2, %v4472_v58  ;;  %11575 = vmatprep.mubr.msk.bf16.mxu0 %vm91_vm2, %v4506_v37  ;;  %v13752_v15 = vld [vmem:[#allocation2 + $0x6f] sm:$0xff]  ;;  %v5010_v32 = vld [vmem:[#allocation2 + $0x57] sm:$0xff]  ;;  %v5012_v42 = vld [vmem:[#allocation2 + $0x67] sm:$0xff] }
 0x3f6   :  { %11599 = vmatprep.mubr.msk.bf16.mxu1 %vm91_vm2, %v4473_v25  ;;  %v13754_v53 = vld [vmem:[#allocation2 + $0x70] sm:$0xff]  ;;  %v12325_v36 = vld [vmem:[#allocation6 + $0x318] sm:$0xff]   ;;  %v4829_v26 = vpack.c.bf16 %v13752_v15, %v5012_v42  ;;  %v5023_v58 = vpack.c.bf16 %v13746_v21, %v13752_v15  ;;  %v5016_v25 = vld [vmem:[#allocation2 + $0x87] sm:$0xff] }
 0x3f7   :  { %v13756_v11 = vld [vmem:[#allocation2 + $0x73] sm:$0xff]  ;;  %v13763_v29 = vld [vmem:[#allocation2 + $0x6b] sm:$0xff]  ;;  %v4822_v37 = vld [vmem:[#allocation2 + $0x7f] sm:$0xff] }
 0x3f8   :  { %8033 = vst.msk [vmem:[#allocation2 + $0x70] sm:$0xff] %vm91_vm2, %v8001_v3  ;;  %v12318_v2 = vld [vmem:[#allocation6 + $0x2d0] sm:$0xff]   ;;  %v12328_v13 = vld [vmem:[#allocation6 + $0x338] sm:$0xff]   ;;  %v4830_v3 = vpack.c.bf16 %v4822_v37, %v13746_v21  ;;  %v5024_v40 = vpack.c.bf16 %v5016_v25, %v4822_v37  ;;  %v13799_v21 = vld [vmem:[#allocation2 + $0x29] sm:$0xff] }
 0x3f9   :  { %v12321_v33 = vld [vmem:[#allocation6 + $0x2f0] sm:$0xff]   ;;  %v5197_v15 = vld [vmem:[#allocation2 + $0x20] sm:$0xff]  ;;  %v5202_v46 = vld [vmem:[#allocation2 + $0x48] sm:$0xff] }
 0x3fa   :  { %v4816_v34 = vld [vmem:[#allocation2 + $0x4f] sm:$0xff]  ;;  %v13803_v20 = vld [vmem:[#allocation2 + $0x39] sm:$0xff]  ;;  %v13805_v41 = vld [vmem:[#allocation2 + $0x21] sm:$0xff] }
 0x3fb   :  { %v4827_v8 = vpack.c.bf16 %v4816_v34, %v5008_v55  ;;  %v5021_v10 = vpack.c.bf16 %v5010_v32, %v4816_v34  ;;  %v5406_v16 = vpack.c.bf16 %v13799_v21, %v13805_v41  ;;  %v12326_v52 = vld [vmem:[#allocation6 + $0x310] sm:$0xff]   ;;  %v11553_v34 = vpop.f32.mrf.mxu1  ;;  %v5201_v55 = vld [vmem:[#allocation2 + $0x40] sm:$0xff]  ;;  %v5206_v25 = vld [vmem:[#allocation2 + $0x68] sm:$0xff] }
 0x3fc   :  { %11576 = vmatmul.mubr.msk.bf16.gmra.mxu0 %vm91_vm2, %v4507_v35  ;;  %v5198_v35 = vld [vmem:[#allocation2 + $0x28] sm:$0xff]  ;;  %v5208_v37 = vld [vmem:[#allocation2 + $0x78] sm:$0xff] }
 0x3fd   :  { %11600 = vmatmul.mubr.msk.bf16.gmra.mxu1 %vm91_vm2, %v4474_v22  ;;  %11611 = vmatprep.mubr.msk.bf16.mxu0 %vm91_vm2, %v4823_v50  ;;  %v11529_v22 = vpop.f32.mrf.mxu0  ;;  %v5200_v50 = vld [vmem:[#allocation2 + $0x38] sm:$0xff]  ;;  %v5212_v61 = vpack.c.bf16 %v5198_v35, %v5197_v15 }
 0x3fe   :  { %11635 = vmatprep.mubr.msk.bf16.mxu1 %vm91_vm2, %v5017_v44  ;;  %v13801_v44 = vld [vmem:[#allocation2 + $0x31] sm:$0xff]  ;;  %v12333_v43 = vld [vmem:[#allocation6 + $0x358] sm:$0xff]  }
 0x3ff   :  { %v4137_v56 = vpop.f32.mrf.mxu0 }
 0x400   :  { %v5404_v56 = vld [vmem:[#allocation2 + $0x89] sm:$0xff] }
 0x404   :  { %11612 = vmatmul.mubr.msk.bf16.vlgmr.msra.gmra.mxu0 %vm91_vm2, %v4824_v49  ;;  %v5199_v49 = vld [vmem:[#allocation2 + $0x30] sm:$0xff] }
 0x405   :  { %11636 = vmatmul.mubr.msk.bf16.vlgmr.msra.gmra.mxu1 %vm91_vm2, %v5018_v17  ;;  %11652 = vmatpush3.bf16.msra.mxu0 %v12317_v51  ;;  %v12322_v51 = vld [vmem:[#allocation6 + $0x2c0] sm:$0xff]   ;;  %v5213_v17 = vpack.c.bf16 %v5200_v50, %v5199_v49 }
 0x406   :  { %11615 = vmatprep.mubr.msk.bf16.mxu0 %vm91_vm2, %v4825_v14  ;;  %11639 = vmatprep.mubr.msk.bf16.mxu1 %vm91_vm2, %v5019_v4  ;;  %v12329_v14 = vld [vmem:[#allocation6 + $0x330] sm:$0xff]   ;;  %v11530_v4 = vpop.f32.mrf.mxu0  ;;  %v5209_v50 = vld [vmem:[#allocation2 + $0x80] sm:$0xff] }
 0x407   :  { %11653 = vmatprep.subr.bf16.mxu0 %v12318_v2  ;;  %11676 = vmatpush3.bf16.msra.mxu1 %v13737_v47  ;;  %v4818_v47 = vld [vmem:[#allocation2 + $0x5f] sm:$0xff]  ;;  %v5780_v4 = vld [vmem:[#allocation2 + $0x32] sm:$0xff] }
 0x408   :  { %11677 = vmatprep.subr.bf16.mxu1 %v12321_v33  ;;  %v4828_v38 = vpack.c.bf16 %v4818_v47, %v5010_v32  ;;  %v5022_v60 = vpack.c.bf16 %v5012_v42, %v4818_v47  ;;  %v5204_v32 = vld [vmem:[#allocation2 + $0x58] sm:$0xff]  ;;  %v5203_v47 = vld [vmem:[#allocation2 + $0x50] sm:$0xff] }
 0x409   :  { %11654 = vmatpush3.bf16.msra.mxu0 %v12318_v2  ;;  %v5407_v2 = vpack.c.bf16 %v13803_v20, %v13801_v44  ;;  %v5215_v42 = vpack.c.bf16 %v5204_v32, %v5203_v47  ;;  %v5782_v32 = vld [vmem:[#allocation2 + $0x42] sm:$0xff] }
 0x40a   :  { %11655 = vmatprep.subr.bf16.mxu0 %v12319_v31 }
 0x40b   :  { %11678 = vmatpush3.bf16.msra.mxu1 %v12321_v33  ;;  %v12327_v33 = vld [vmem:[#allocation6 + $0x308] sm:$0xff]  }
 0x40c   :  { %11616 = vmatmul.mubr.msk.bf16.gmra.mxu0 %vm91_vm2, %v4826_v9  ;;  %11679 = vmatprep.subr.bf16.mxu1 %v12323_v6  ;;  %v12331_v9 = vld [vmem:[#allocation6 + $0x328] sm:$0xff]  }
 0x40d   :  { %11640 = vmatmul.mubr.msk.bf16.gmra.mxu1 %vm91_vm2, %v5020_v12  ;;  %11619 = vmatprep.mubr.msk.bf16.mxu0 %vm91_vm2, %v4827_v8  ;;  %v13817_v12 = vld [vmem:[#allocation2 + $0x51] sm:$0xff]  ;;  %v13819_v8 = vld [vmem:[#allocation2 + $0x59] sm:$0xff] }
 0x40e   :  { %11643 = vmatprep.mubr.msk.bf16.mxu1 %vm91_vm2, %v5021_v10  ;;  %11656 = vmatpush3.bf16.msra.mxu0 %v12319_v31  ;;  %v4140_v31 = vpop.f32.mrf.mxu0  ;;  %v5214_v10 = vpack.c.bf16 %v5202_v46, %v5201_v55  ;;  %v5779_v46 = vld [vmem:[#allocation2 + $0x2a] sm:$0xff] }
 0x40f   :  { %11657 = vmatprep.subr.bf16.mxu0 %v12322_v51  ;;  %11680 = vmatpush3.bf16.msra.mxu1 %v12323_v6  ;;  %v13815_v6 = vld [vmem:[#allocation2 + $0x49] sm:$0xff]  ;;  %v5600_v31 = vpack.c.bf16 %v13801_v44, %v13799_v21  ;;  %v5794_v34 = vpack.c.bf16 %v5780_v4, %v5779_v46  ;;  %v5784_v21 = vld [vmem:[#allocation2 + $0x52] sm:$0xff]  ;;  %v5785_v44 = vld [vmem:[#allocation2 + $0x5a] sm:$0xff] }
 0x410   :  { %11681 = vmatprep.subr.bf16.mxu1 %v12324_v48  ;;  %v12335_v55 = vld [vmem:[#allocation6 + $0x348] sm:$0xff]  }
 0x412   :  { %11658 = vmatpush3.bf16.msra.mxu0 %v12322_v51  ;;  %v4332_v51 = vpop.f32.mrf.mxu1 }
 0x413   :  { %11682 = vmatpush3.bf16.msra.mxu1 %v12324_v48  ;;  %11699 = vmatprep.subr.bf16.mxu0 %v12325_v36  ;;  %v13821_v48 = vld [vmem:[#allocation2 + $0x41] sm:$0xff]  ;;  %v5602_v51 = vpack.c.bf16 %v13817_v12, %v13815_v6 }
 0x414   :  { %11620 = vmatmul.mubr.msk.bf16.gmra.mxu0 %vm91_vm2, %v4828_v38  ;;  %11723 = vmatprep.subr.bf16.mxu1 %v12328_v13  ;;  %v11554_v38 = vpop.f32.mrf.mxu1 }
 0x415   :  { %11644 = vmatmul.mubr.msk.bf16.gmra.mxu1 %vm91_vm2, %v5022_v60  ;;  %11623 = vmatprep.mubr.msk.bf16.mxu0 %vm91_vm2, %v4829_v26  ;;  %v5409_v60 = vpack.c.bf16 %v13819_v8, %v13817_v12  ;;  %v12332_v26 = vld [vmem:[#allocation6 + $0x320] sm:$0xff]   ;;  %v5604_v12 = vpack.c.bf16 %v13748_v0, %v13759_v23 }
 0x416   :  { %11647 = vmatprep.mubr.msk.bf16.mxu1 %vm91_vm2, %v5023_v58  ;;  %v4335_v58 = vpop.f32.mrf.mxu1 }
 0x41c   :  { %11624 = vmatmul.mubr.msk.bf16.gmra.mxu0 %vm91_vm2, %v4830_v3  ;;  %v13831_v3 = vld [vmem:[#allocation2 + $0x79] sm:$0xff] }
 0x41d   :  { %11648 = vmatmul.mubr.msk.bf16.gmra.mxu1 %vm91_vm2, %v5024_v40  ;;  %11659 = vmatprep.mubr.msk.bf16.mxu0 %vm91_vm2, %v5211_v30  ;;  %v5399_v40 = vld [vmem:[#allocation2 + $0x61] sm:$0xff]  ;;  %v5411_v15 = vpack.c.bf16 %v13831_v3, %v13748_v0  ;;  %v5974_v0 = vld [vmem:[#allocation2 + $0x33] sm:$0xff] }
 0x41e   :  { %11683 = vmatprep.mubr.msk.bf16.mxu1 %vm91_vm2, %v5405_v7  ;;  %v5205_v30 = vld [vmem:[#allocation2 + $0x60] sm:$0xff]  ;;  %v5217_v7 = vpack.c.bf16 %v5208_v37, %v13754_v53  ;;  %v5410_v22 = vpack.c.bf16 %v13759_v23, %v5399_v40  ;;  %v5973_v37 = vld [vmem:[#allocation2 + $0x2b] sm:$0xff] }
 0x41f   :  { %v5216_v35 = vpack.c.bf16 %v5206_v25, %v5205_v30  ;;  %v5403_v53 = vld [vmem:[#allocation2 + $0x81] sm:$0xff]  ;;  %v5988_v25 = vpack.c.bf16 %v5974_v0, %v5973_v37 }
 0x420   :  { %v5412_v49 = vpack.c.bf16 %v5404_v56, %v5403_v53  ;;  %v5975_v23 = vld [vmem:[#allocation2 + $0x3b] sm:$0xff] }
 0x424   :  { %11660 = vmatmul.mubr.msk.bf16.vlgmr.msra.gmra.mxu0 %vm91_vm2, %v5212_v61  ;;  %v5210_v61 = vld [vmem:[#allocation2 + $0x88] sm:$0xff] }
 0x425   :  { %11684 = vmatmul.mubr.msk.bf16.vlgmr.msra.gmra.mxu1 %vm91_vm2, %v5406_v16  ;;  %11700 = vmatpush3.bf16.msra.mxu0 %v12325_v36  ;;  %v5408_v36 = vpack.c.bf16 %v13815_v6, %v13821_v48  ;;  %v5218_v16 = vpack.c.bf16 %v5210_v61, %v5209_v50  ;;  %v5605_v6 = vpack.c.bf16 %v5403_v53, %v13831_v3  ;;  %v5978_v3 = vld [vmem:[#allocation2 + $0x53] sm:$0xff] }
 0x426   :  { %11663 = vmatprep.mubr.msk.bf16.mxu0 %vm91_vm2, %v5213_v17  ;;  %11687 = vmatprep.mubr.msk.bf16.mxu1 %vm91_vm2, %v5407_v2  ;;  %v5599_v17 = vpack.c.bf16 %v13805_v41, %v13790_v57  ;;  %v5778_v2 = vld [vmem:[#allocation2 + $0x22] sm:$0xff]  ;;  %v5601_v57 = vpack.c.bf16 %v13821_v48, %v13803_v20  ;;  %v5603_v20 = vpack.c.bf16 %v5399_v40, %v13819_v8  ;;  %v5977_v40 = vld [vmem:[#allocation2 + $0x4b] sm:$0xff] }
 0x427   :  { %11701 = vmatprep.subr.bf16.mxu0 %v12326_v52  ;;  %11724 = vmatpush3.bf16.msra.mxu1 %v12328_v13  ;;  %v12330_v13 = vld [vmem:[#allocation6 + $0x300] sm:$0xff]   ;;  %v5798_v8 = vpack.c.bf16 %v13750_v28, %v13761_v45  ;;  %v5990_v30 = vpack.c.bf16 %v5978_v3, %v5977_v40  ;;  %v12338_v50 = vld [vmem:[#allocation6 + $0x390] sm:$0xff]  }
 0x428   :  { %11725 = vmatprep.subr.bf16.mxu1 %v12329_v14  ;;  %v5786_v48 = vld [vmem:[#allocation2 + $0x62] sm:$0xff] }
 0x429   :  { %11702 = vmatpush3.bf16.msra.mxu0 %v12326_v52  ;;  %v5777_v52 = vld [vmem:[#allocation2 + $0x1a] sm:$0xff]  ;;  %v5976_v28 = vld [vmem:[#allocation2 + $0x43] sm:$0xff] }
 0x42a   :  { %11703 = vmatprep.subr.bf16.mxu0 %v12327_v33  ;;  %v5989_v45 = vpack.c.bf16 %v5976_v28, %v5975_v23  ;;  %v5984_v28 = vld [vmem:[#allocation2 + $0x83] sm:$0xff] }
 0x42b   :  { %11726 = vmatpush3.bf16.msra.mxu1 %v12329_v14  ;;  %v5793_v14 = vpack.c.bf16 %v5778_v2, %v5777_v52 }
 0x42c   :  { %11664 = vmatmul.mubr.msk.bf16.gmra.mxu0 %vm91_vm2, %v5214_v10  ;;  %11727 = vmatprep.subr.bf16.mxu1 %v12331_v9  ;;  %v5783_v10 = vld [vmem:[#allocation2 + $0x4a] sm:$0xff] }
 0x42d   :  { %11688 = vmatmul.mubr.msk.bf16.gmra.mxu1 %vm91_vm2, %v5408_v36  ;;  %11667 = vmatprep.mubr.msk.bf16.mxu0 %vm91_vm2, %v5215_v42  ;;  %v5796_v47 = vpack.c.bf16 %v5784_v21, %v5783_v10  ;;  %v12336_v36 = vld [vmem:[#allocation6 + $0x340] sm:$0xff]   ;;  %v5797_v42 = vpack.c.bf16 %v5786_v48, %v5785_v44  ;;  %v5789_v10 = vld [vmem:[#allocation2 + $0x7a] sm:$0xff] }
 0x42e   :  { %11691 = vmatprep.mubr.msk.bf16.mxu1 %vm91_vm2, %v5409_v60  ;;  %11704 = vmatpush3.bf16.msra.mxu0 %v12327_v33  ;;  %v5781_v33 = vld [vmem:[#allocation2 + $0x3a] sm:$0xff] }
 0x42f   :  { %11705 = vmatprep.subr.bf16.mxu0 %v12330_v13  ;;  %11728 = vmatpush3.bf16.msra.mxu1 %v12331_v9  ;;  %v12334_v9 = vld [vmem:[#allocation6 + $0x350] sm:$0xff]   ;;  %v5795_v41 = vpack.c.bf16 %v5782_v32, %v5781_v33  ;;  %v5971_v60 = vld [vmem:[#allocation2 + $0x1b] sm:$0xff] }
 0x430   :  { %11729 = vmatprep.subr.bf16.mxu1 %v12332_v26 }
 0x432   :  { %11706 = vmatpush3.bf16.msra.mxu0 %v12330_v13  ;;  %v5598_v13 = vld [vmem:[#allocation2 + $0x91] sm:$0xff] }
 0x433   :  { %11730 = vmatpush3.bf16.msra.mxu1 %v12332_v26  ;;  %11747 = vmatprep.subr.bf16.mxu0 %v12333_v43  ;;  %v5606_v38 = vpack.c.bf16 %v5598_v13, %v5404_v56  ;;  %v5972_v26 = vld [vmem:[#allocation2 + $0x23] sm:$0xff] }
 0x434   :  { %11668 = vmatmul.mubr.msk.bf16.gmra.mxu0 %vm91_vm2, %v5216_v35  ;;  %v5987_v58 = vpack.c.bf16 %v5972_v26, %v5971_v60  ;;  %v12341_v26 = vld [vmem:[#allocation6 + $0x370] sm:$0xff]  }
 0x435   :  { %11692 = vmatmul.mubr.msk.bf16.gmra.mxu1 %vm91_vm2, %v5410_v22  ;;  %11671 = vmatprep.mubr.msk.bf16.mxu0 %vm91_vm2, %v5217_v7  ;;  %v5980_v7 = vld [vmem:[#allocation2 + $0x63] sm:$0xff]  ;;  %v12337_v22 = vld [vmem:[#allocation6 + $0x398] sm:$0xff]  }
 0x436   :  { %11695 = vmatprep.mubr.msk.bf16.mxu1 %vm91_vm2, %v5411_v15  ;;  %v5992_v15 = vpack.c.bf16 %v13756_v11, %v13763_v29  ;;  %11771 = vmatprep.subr.bf16.mxu1 %v12337_v22 }
 0x43c   :  { %11672 = vmatmul.mubr.msk.bf16.gmra.mxu0 %vm91_vm2, %v5218_v16 }
 0x43d   :  { %11696 = vmatmul.mubr.msk.bf16.gmra.mxu1 %vm91_vm2, %v5412_v49  ;;  %11707 = vmatprep.mubr.msk.bf16.mxu0 %vm91_vm2, %v5599_v17 }
 0x43e   :  { %11731 = vmatprep.mubr.msk.bf16.mxu1 %vm91_vm2, %v5793_v14 }
 0x444   :  { %11708 = vmatmul.mubr.msk.bf16.vlgmr.msra.gmra.mxu0 %vm91_vm2, %v5600_v31 }
 0x445   :  { %11732 = vmatmul.mubr.msk.bf16.vlgmr.msra.gmra.mxu1 %vm91_vm2, %v5794_v34  ;;  %11748 = vmatpush3.bf16.msra.mxu0 %v12333_v43  ;;  %v5979_v43 = vld [vmem:[#allocation2 + $0x5b] sm:$0xff] }
 0x446   :  { %11711 = vmatprep.mubr.msk.bf16.mxu0 %vm91_vm2, %v5601_v57  ;;  %11735 = vmatprep.mubr.msk.bf16.mxu1 %vm91_vm2, %v5795_v41  ;;  %v5991_v35 = vpack.c.bf16 %v5980_v7, %v5979_v43  ;;  %v5986_v7 = vld [vmem:[#allocation2 + $0x93] sm:$0xff] }
 0x447   :  { %11749 = vmatprep.subr.bf16.mxu0 %v12334_v9  ;;  %11772 = vmatpush3.bf16.msra.mxu1 %v12337_v22 }
 0x448   :  { %11773 = vmatprep.subr.bf16.mxu1 %v12338_v50 }
 0x449   :  { %11750 = vmatpush3.bf16.msra.mxu0 %v12334_v9 }
 0x44a   :  { %11751 = vmatprep.subr.bf16.mxu0 %v12335_v55 }
 0x44b   :  { %11774 = vmatpush3.bf16.msra.mxu1 %v12338_v50 }
 0x44c   :  { %11712 = vmatmul.mubr.msk.bf16.gmra.mxu0 %vm91_vm2, %v5602_v51  ;;  %v12340_v51 = vld [vmem:[#allocation6 + $0x378] sm:$0xff]  }
 0x44d   :  { %11736 = vmatmul.mubr.msk.bf16.gmra.mxu1 %vm91_vm2, %v5796_v47  ;;  %11715 = vmatprep.mubr.msk.bf16.mxu0 %vm91_vm2, %v5603_v20  ;;  %v5790_v47 = vld [vmem:[#allocation2 + $0x82] sm:$0xff] }
 0x44e   :  { %11739 = vmatprep.mubr.msk.bf16.mxu1 %vm91_vm2, %v5797_v42  ;;  %11752 = vmatpush3.bf16.msra.mxu0 %v12335_v55  ;;  %v12339_v55 = vld [vmem:[#allocation6 + $0x388] sm:$0xff]   ;;  %v5799_v48 = vpack.c.bf16 %v5790_v47, %v5789_v10  ;;  %v5792_v42 = vld [vmem:[#allocation2 + $0x92] sm:$0xff] }
 0x44f   :  { %11753 = vmatprep.subr.bf16.mxu0 %v12336_v36  ;;  %11775 = vmatprep.subr.bf16.mxu1 %v12339_v55 }
 0x450   :  { %11776 = vmatpush3.bf16.msra.mxu1 %v12339_v55 }
 0x452   :  { %11754 = vmatpush3.bf16.msra.mxu0 %v12336_v36  ;;  %v5791_v36 = vld [vmem:[#allocation2 + $0x8a] sm:$0xff] }
 0x453   :  { %11795 = vmatprep.subr.bf16.mxu0 %v12340_v51 }
 0x454   :  { %11716 = vmatmul.mubr.msk.bf16.gmra.mxu0 %vm91_vm2, %v5604_v12 }
 0x455   :  { %11740 = vmatmul.mubr.msk.bf16.gmra.mxu1 %vm91_vm2, %v5798_v8  ;;  %11719 = vmatprep.mubr.msk.bf16.mxu0 %vm91_vm2, %v5605_v6  ;;  %v5800_v8 = vpack.c.bf16 %v5792_v42, %v5791_v36 }
 0x456   :  { %11743 = vmatprep.mubr.msk.bf16.mxu1 %vm91_vm2, %v5799_v48 }
 0x45c   :  { %11720 = vmatmul.mubr.msk.bf16.gmra.mxu0 %vm91_vm2, %v5606_v38 }
 0x45d   :  { %11755 = vmatprep.mubr.msk.bf16.mxu0 %vm91_vm2, %v5987_v58  ;;  %11744 = vmatmul.mubr.msk.bf16.gmra.mxu1 %vm91_vm2, %v5800_v8  ;;  %v8004_v58 = vld [vmem:[#allocation2 + $0x88] sm:$0xff] }
 0x464   :  { %11756 = vmatmul.mubr.msk.bf16.vlgmr.msra.gmra.mxu0 %vm91_vm2, %v5988_v25  ;;  %v5983_v25 = vld [vmem:[#allocation2 + $0x7b] sm:$0xff] }
 0x465   :  { %11759 = vmatprep.mubr.msk.bf16.mxu0 %vm91_vm2, %v5989_v45  ;;  %11796 = vmatpush3.bf16.msra.mxu0 %v12340_v51  ;;  %v12342_v45 = vld [vmem:[#allocation6 + $0x380] sm:$0xff]   ;;  %v5993_v43 = vpack.c.bf16 %v5984_v28, %v5983_v25  ;;  %v13928_v25 = vld [vmem:[#allocation6 + $0x3d8] sm:$0xff]  }
 0x466   :  { %11797 = vmatprep.subr.bf16.mxu0 %v12341_v26  ;;  %11777 = vmatprep.subr.bf16.mxu1 %v12342_v45  ;;  %14874 = vst [vmem:[#allocation26_spill] sm:$0xff] %v13928_v25 }
 0x467   :  { %11778 = vmatpush3.bf16.msra.mxu1 %v12342_v45 }
 0x469   :  { %11798 = vmatpush3.bf16.msra.mxu0 %v12341_v26 }
 0x46c   :  { %11760 = vmatmul.mubr.msk.bf16.gmra.mxu0 %vm91_vm2, %v5990_v30  ;;  %v5985_v30 = vld [vmem:[#allocation2 + $0x8b] sm:$0xff] }
 0x46d   :  { %11763 = vmatprep.mubr.msk.bf16.mxu0 %vm91_vm2, %v5991_v35  ;;  %v12343_v35 = vld [vmem:[#allocation6 + $0x368] sm:$0xff]   ;;  %v5994_v22 = vpack.c.bf16 %v5986_v7, %v5985_v30  ;;  %8036 = vst.msk [vmem:[#allocation2 + $0x88] sm:$0xff] %vm91_vm2, %v8004_v58 }
 0x46e   :  { %11799 = vmatprep.subr.bf16.mxu0 %v12343_v35 }
 0x46f   :  { %11800 = vmatpush3.bf16.msra.mxu0 %v12343_v35 }
 0x474   :  { %11764 = vmatmul.mubr.msk.bf16.gmra.mxu0 %vm91_vm2, %v5992_v15 }
 0x475   :  { %11767 = vmatprep.mubr.msk.bf16.mxu0 %vm91_vm2, %v5993_v43 }
 0x47c   :  { %11768 = vmatmul.mubr.msk.bf16.gmra.mxu0 %vm91_vm2, %v5994_v22 }
 0x4a4   :  { %v11565_v61 = vpop.f32.mrf.mxu0 }
 0x4a5   :  { %v11589_v53 = vpop.f32.mrf.mxu1 }
 0x4a6   :  { %v13879_v56 = vadd.f32 %v11589_v53, %v11565_v61  ;;  %v4599_v16 = vpop.f32.mrf.mxu0 }
 0x4a7   :  { %v4744_v49 = vpop.f32.mrf.mxu1  ;;  %v12344_v16 = vld [vmem:[#allocation6 + $0x360] sm:$0xff]  }
 0x4a8   :  { %v11566_v52 = vpop.f32.mrf.mxu0  ;;  %11801 = vmatprep.subr.bf16.mxu0 %v12344_v16 }
 0x4a9   :  { %v11590_v17 = vpop.f32.mrf.mxu1  ;;  %11802 = vmatpush3.bf16.msra.mxu0 %v12344_v16 }
 0x4aa   :  { %v13881_v2 = vadd.f32 %v11590_v17, %v11566_v52  ;;  %v13883_v14 = vpop.f32.mrf.mxu0  ;;  %v6270_v17 = vld [vmem:[#allocation3 + $0x6] sm:$0xff]  ;;  %11843 = vmatprep.subr.bf16.mxu0 %v13928_v25 }
 0x4ab   :  { %v13885_v11 = vpop.f32.mrf.mxu1 }
 0x4ac   :  { %v11569_v29 = vpop.f32.mrf.mxu0 }
 0x4ad   :  { %v11593_v4 = vpop.f32.mrf.mxu1 }
 0x4ae   :  { %v13887_v33 = vadd.f32 %v11593_v4, %v11569_v29  ;;  %v4615_v31 = vpop.f32.mrf.mxu0  ;;  %v6271_v29 = vld [vmem:[#allocation3 + $0xe] sm:$0xff]  ;;  %v6237_v4 = vld [vmem:[#allocation3 + $0x5] sm:$0xff] }
 0x4af   :  { %v4760_v46 = vpop.f32.mrf.mxu1 }
 0x4b0   :  { %v13889_v34 = vadd.f32 %v4760_v46, %v4615_v31  ;;  %v11570_v32 = vpop.f32.mrf.mxu0  ;;  %v6286_v46 = vpack.c.bf16 %v6271_v29, %v6270_v17 }
 0x4b1   :  { %v11594_v9 = vpop.f32.mrf.mxu1 }
 0x4b2   :  { %v13891_v57 = vadd.f32 %v11594_v9, %v11570_v32  ;;  %v13893_v41 = vpop.f32.mrf.mxu0  ;;  %v6238_v32 = vld [vmem:[#allocation3 + $0xd] sm:$0xff]  ;;  %v13912_v9 = vld [vmem:[#allocation6 + $0x3b8] sm:$0xff]   ;;  %11779 = vmatprep.mubr.msk.bf16.mxu1 %vm91_vm2, %v6286_v46 }
 0x4b3   :  { %v13895_v21 = vpop.f32.mrf.mxu1  ;;  %14873 = vst [vmem:[#allocation29_spill] sm:$0xff] %v13912_v9  ;;  %11819 = vmatprep.subr.bf16.mxu1 %v13912_v9 }
 0x4b4   :  { %v11573_v44 = vpop.f32.mrf.mxu0 }
 0x4b5   :  { %v11597_v20 = vpop.f32.mrf.mxu1 }
 0x4b6   :  { %v13897_v6 = vadd.f32 %v11597_v20, %v11573_v44  ;;  %v4631_v12 = vpop.f32.mrf.mxu0  ;;  %v6253_v44 = vpack.c.bf16 %v6238_v32, %v6237_v4 }
 0x4b7   :  { %v4776_v13 = vpop.f32.mrf.mxu1 }
 0x4b8   :  { %v13900_v38 = vadd.f32 %v4776_v13, %v4631_v12  ;;  %v11574_v60 = vpop.f32.mrf.mxu0  ;;  %11803 = vmatprep.mubr.msk.bf16.mxu0 %vm91_vm2, %v6253_v44 }
 0x4b9   :  { %v11598_v0 = vpop.f32.mrf.mxu1 }
 0x4ba   :  { %v13903_v23 = vadd.f32 %v11598_v0, %v11574_v60  ;;  %v13905_v37 = vpop.f32.mrf.mxu0 }
 0x4bb   :  { %v13907_v3 = vpop.f32.mrf.mxu1 }
 0x4bc   :  { %v11577_v40 = vpop.f32.mrf.mxu0 }
 0x4bd   :  { %v11601_v15 = vpop.f32.mrf.mxu1 }
 0x4be   :  { %v4647_v50 = vpop.f32.mrf.mxu0 }
 0x4bf   :  { %v4792_v61 = vpop.f32.mrf.mxu1 }
 0x4c0   :  { %v11578_v53 = vpop.f32.mrf.mxu0 }
 0x4c1   :  { %v11602_v49 = vpop.f32.mrf.mxu1 }
 0x4c2   :  { %v4650_v52 = vpop.f32.mrf.mxu0 }
 0x4c3   :  { %v4795_v31 = vpop.f32.mrf.mxu1 }
 0x4c4   :  { %v11613_v55 = vpop.f32.mrf.mxu0 }
 0x4c5   :  { %v4987_v51 = vadd.f32 %v11613_v55, %v13879_v56  ;;  %v11637_v10 = vpop.f32.mrf.mxu1 }
 0x4c6   :  { %v4922_v47 = vpop.f32.mrf.mxu0 }
 0x4c7   :  { %v13918_v20 = vadd.f32 %v11637_v10, %v4987_v51  ;;  %v5116_v48 = vpop.f32.mrf.mxu1 }
 0x4c8   :  { %v11614_v36 = vpop.f32.mrf.mxu0 }
 0x4c9   :  { %v4988_v42 = vadd.f32 %v11614_v36, %v13881_v2  ;;  %v11638_v12 = vpop.f32.mrf.mxu1 }
 0x4ca   :  { %v13921_v8 = vpop.f32.mrf.mxu0 }
 0x4cb   :  { %v13923_v13 = vadd.f32 %v11638_v12, %v4988_v42  ;;  %v13925_v56 = vpop.f32.mrf.mxu1 }
 0x4cc   :  { %v11617_v60 = vpop.f32.mrf.mxu0 }
 0x4cd   :  { %v4991_v26 = vadd.f32 %v11617_v60, %v13887_v33  ;;  %v11641_v58 = vpop.f32.mrf.mxu1 }
 0x4ce   :  { %v4938_v0 = vpop.f32.mrf.mxu0 }
 0x4cf   :  { %v13930_v28 = vadd.f32 %v11641_v58, %v4991_v26  ;;  %v4989_v45 = vadd.f32 %v4938_v0, %v13889_v34  ;;  %v5132_v43 = vpop.f32.mrf.mxu1 }
 0x4d0   :  { %v11618_v2 = vpop.f32.mrf.mxu0 }
 0x4d1   :  { %v13934_v40 = vadd.f32 %v5132_v43, %v4989_v45  ;;  %v4992_v30 = vadd.f32 %v11618_v2, %v13891_v57  ;;  %v11642_v7 = vpop.f32.mrf.mxu1 }
 0x4d2   :  { %v13937_v35 = vpop.f32.mrf.mxu0 }
 0x4d3   :  { %v13939_v33 = vadd.f32 %v11642_v7, %v4992_v30  ;;  %v13941_v15 = vpop.f32.mrf.mxu1 }
 0x4d4   :  { %v11621_v22 = vpop.f32.mrf.mxu0 }
 0x4d5   :  { %v4995_v50 = vadd.f32 %v11621_v22, %v13897_v6  ;;  %v11645_v61 = vpop.f32.mrf.mxu1 }
 0x4d6   :  { %v4954_v34 = vpop.f32.mrf.mxu0 }
 0x4d7   :  { %v13944_v53 = vadd.f32 %v11645_v61, %v4995_v50  ;;  %v4993_v16 = vadd.f32 %v4954_v34, %v13900_v38  ;;  %v5148_v49 = vpop.f32.mrf.mxu1 }
 0x4d8   :  { %v11622_v52 = vpop.f32.mrf.mxu0 }
 0x4d9   :  { %v13947_v17 = vadd.f32 %v5148_v49, %v4993_v16  ;;  %v4996_v57 = vadd.f32 %v11622_v52, %v13903_v23  ;;  %v11646_v29 = vpop.f32.mrf.mxu1 }
 0x4da   :  { %v13950_v4 = vpop.f32.mrf.mxu0 }
 0x4db   :  { %v13952_v31 = vadd.f32 %v11646_v29, %v4996_v57  ;;  %v13954_v46 = vpop.f32.mrf.mxu1 }
 0x4dc   :  { %v11625_v6 = vpop.f32.mrf.mxu0 }
 0x4dd   :  { %v11649_v32 = vpop.f32.mrf.mxu1 }
 0x4de   :  { %v4970_v55 = vpop.f32.mrf.mxu0 }
 0x4df   :  { %v5164_v44 = vpop.f32.mrf.mxu1 }
 0x4e0   :  { %v11626_v51 = vpop.f32.mrf.mxu0 }
 0x4e1   :  { %v11650_v10 = vpop.f32.mrf.mxu1 }
 0x4e2   :  { %v4973_v38 = vpop.f32.mrf.mxu0 }
 0x4e3   :  { %v5167_v47 = vpop.f32.mrf.mxu1 }
 0x4e4   :  { %v11661_v48 = vpop.f32.mrf.mxu0 }
 0x4e5   :  { %v11685_v36 = vpop.f32.mrf.mxu1 }
 0x4e6   :  { %v5310_v42 = vpop.f32.mrf.mxu0 }
 0x4e7   :  { %v5504_v12 = vpop.f32.mrf.mxu1 }
 0x4e8   :  { %v11662_v23 = vpop.f32.mrf.mxu0 }
 0x4e9   :  { %v11686_v60 = vpop.f32.mrf.mxu1 }
 0x4ea   :  { %v5313_v26 = vpop.f32.mrf.mxu0 }
 0x4eb   :  { %v5507_v58 = vpop.f32.mrf.mxu1 }
 0x4ec   :  { %v11665_v0 = vpop.f32.mrf.mxu0 }
 0x4ed   :  { %v13956_v45 = vpop.f32.mrf.mxu1 }
 0x4ee   :  { %v5326_v43 = vpop.f32.mrf.mxu0 }
 0x4ef   :  { %v13958_v2 = vpop.f32.mrf.mxu1 }
 0x4f0   :  { %v11666_v30 = vpop.f32.mrf.mxu0 }
 0x4f1   :  { %v13960_v7 = vpop.f32.mrf.mxu1 }
 0x4f2   :  { %v13962_v22 = vpop.f32.mrf.mxu0 }
 0x4f3   :  { %v13964_v50 = vpop.f32.mrf.mxu1 }
 0x4f4   :  { %v13966_v61 = vpop.f32.mrf.mxu0 }
 0x4f5   :  { %v13968_v34 = vpop.f32.mrf.mxu1 }
 0x4f6   :  { %v13970_v16 = vpop.f32.mrf.mxu0 }
 0x4f7   :  { %v13972_v49 = vpop.f32.mrf.mxu1 }
 0x4f8   :  { %v13974_v52 = vpop.f32.mrf.mxu0 }
 0x4f9   :  { %v13976_v57 = vpop.f32.mrf.mxu1 }
 0x4fa   :  { %14875 = vst [vmem:[#allocation30_spill] sm:$0xff] %v13976_v57  ;;  %v13978_v29 = vpop.f32.mrf.mxu0  ;;  %v5376_v57 = vadd.f32 %v11662_v23, %v13923_v13 }
 0x4fb   :  { %v13980_v6 = vpop.f32.mrf.mxu1 }
 0x4fc   :  { %14876 = vst [vmem:[#allocation28_spill] sm:$0xff] %v13980_v6  ;;  %v11673_v32 = vpop.f32.mrf.mxu0 }
 0x4fd   :  { %v11697_v55 = vpop.f32.mrf.mxu1 }
 0x4fe   :  { %v5358_v44 = vpop.f32.mrf.mxu0 }
 0x4ff   :  { %v5552_v51 = vpop.f32.mrf.mxu1  ;;  %v4748_v44 = vadd.f32 %v13885_v11, %v13883_v14 }
 0x500   :  { %v11674_v10 = vpop.f32.mrf.mxu0 }
 0x501   :  { %v11698_v38 = vpop.f32.mrf.mxu1 }
 0x502   :  { %v5361_v47 = vpop.f32.mrf.mxu0 }
 0x503   :  { %v5555_v42 = vpop.f32.mrf.mxu1 }
 0x504   :  { %v11709_v12 = vpop.f32.mrf.mxu0 }
 0x505   :  { %v11733_v27 = vpop.f32.mrf.mxu1 }
 0x506   :  { %v5698_v25 = vpop.f32.mrf.mxu0 }
 0x507   :  { %v5892_v54 = vpop.f32.mrf.mxu1  ;;  %v5375_v25 = vadd.f32 %v11661_v48, %v13918_v20  ;;  %v5570_v20 = vadd.f32 %v11686_v60, %v5376_v57  ;;  %v5379_v48 = vadd.f32 %v11665_v0, %v13930_v28  ;;  %v4780_v28 = vadd.f32 %v13907_v3, %v13905_v37 }
 0x508   :  { %v11710_v9 = vpop.f32.mrf.mxu0  ;;  %v4986_v54 = vadd.f32 %v13921_v8, %v4748_v44 }
 0x509   :  { %v11734_v63 = vpop.f32.mrf.mxu1  ;;  %v5569_v18 = vadd.f32 %v11685_v36, %v5375_v25  ;;  %v4994_v0 = vadd.f32 %v13950_v4, %v4780_v28 }
 0x50a   :  { %v5701_v59 = vpop.f32.mrf.mxu0  ;;  %v5180_v6 = vadd.f32 %v13925_v56, %v4986_v54  ;;  %v5377_v56 = vadd.f32 %v5326_v43, %v13934_v40  ;;  %v5764_v54 = vadd.f32 %v11710_v9, %v5570_v20 }
 0x50b   :  { %v5895_v51 = vpop.f32.mrf.mxu1  ;;  %v5763_v24 = vadd.f32 %v11709_v12, %v5569_v18 }
 0x50c   :  { %v11713_v19 = vpop.f32.mrf.mxu0  ;;  %v5374_v11 = vadd.f32 %v5313_v26, %v5180_v6 }
 0x50d   :  { %v11737_v47 = vpop.f32.mrf.mxu1  ;;  %v5957_v36 = vadd.f32 %v11733_v27, %v5763_v24  ;;  %v5571_v24 = vadd.f32 %v13958_v2, %v5377_v56  ;;  %v5958_v27 = vadd.f32 %v11734_v63, %v5764_v54  ;;  %v5381_v63 = vadd.f32 %v13970_v16, %v13947_v17 }
 0x50e   :  { %v5714_v39 = vpop.f32.mrf.mxu0 }
 0x50f   :  { %v5765_v37 = vadd.f32 %v5714_v39, %v5571_v24 }
 0x510   :  { %v11714_v1 = vpop.f32.mrf.mxu0 }
 0x512   :  { %v13982_v5 = vpop.f32.mrf.mxu0 }
 0x514   :  { %v13984_v32 = vpop.f32.mrf.mxu0 }
 0x516   :  { %v13986_v55 = vpop.f32.mrf.mxu0 }
 0x517   :  { %14877 = vst [vmem:[#allocation31_spill] sm:$0xff] %v13986_v55  ;;  %v4764_v55 = vadd.f32 %v13895_v21, %v13893_v41  ;;  %v5380_v41 = vadd.f32 %v11666_v30, %v13939_v33  ;;  %v14005_v21 = vld [vmem:[#allocation8 + $0x2] ss:$0 sm:$0xff] }
 0x518   :  { %v13990_v10 = vpop.f32.mrf.mxu0 }
 0x519   :  { %14878 = vst [vmem:[#allocation32_spill] sm:$0xff] %v13990_v10  ;;  %v5908_v10 = vpop.f32.mrf.mxu1  ;;  %v4990_v8 = vadd.f32 %v13937_v35, %v4764_v55  ;;  %v5573_v35 = vadd.f32 %v13956_v45, %v5379_v48  ;;  %v5574_v43 = vadd.f32 %v13960_v7, %v5380_v41 }
 0x51a   :  { %v13994_v38 = vpop.f32.mrf.mxu0  ;;  %v5959_v17 = vadd.f32 %v5908_v10, %v5765_v37 }
 0x51b   :  { %14879 = vst [vmem:[#allocation27_spill] sm:$0xff] %v13994_v38  ;;  %v11738_v13 = vpop.f32.mrf.mxu1  ;;  %v5184_v23 = vadd.f32 %v13941_v15, %v4990_v8  ;;  %v5767_v9 = vadd.f32 %v11713_v19, %v5573_v35  ;;  %v5768_v19 = vadd.f32 %v11714_v1, %v5574_v43 }
 0x51c   :  { %v11721_v42 = vpop.f32.mrf.mxu0 }
 0x51d   :  { %v5568_v42 = vadd.f32 %v5507_v58, %v5374_v11  ;;  %v5378_v58 = vadd.f32 %v13962_v22, %v5184_v23  ;;  %v5911_v15 = vpop.f32.mrf.mxu1  ;;  %v5961_v6 = vadd.f32 %v11737_v47, %v5767_v9  ;;  %v14884_v23 = vld [vmem:[#allocation28_spill] sm:$0xff] }
 0x51e   :  { %v5746_v14 = vpop.f32.mrf.mxu0 }
 0x51f   :  { %v5762_v26 = vadd.f32 %v5701_v59, %v5568_v42  ;;  %v5383_v59 = vadd.f32 %v13966_v61, %v13944_v53  ;;  %v5572_v57 = vadd.f32 %v13964_v50, %v5378_v58  ;;  %v11741_v12 = vpop.f32.mrf.mxu1  ;;  %v5188_v61 = vadd.f32 %v13954_v46, %v4994_v0  ;;  %v14882_v42 = vld [vmem:[#allocation31_spill] sm:$0xff] }
 0x520   :  { %v11722_v44 = vpop.f32.mrf.mxu0  ;;  %v5384_v50 = vadd.f32 %v13974_v52, %v13952_v31  ;;  %v5962_v46 = vadd.f32 %v11738_v13, %v5768_v19  ;;  %v14885_v35 = vld [vmem:[#allocation32_spill] sm:$0xff] }
 0x521   :  { %v5956_v30 = vadd.f32 %v5895_v51, %v5762_v26  ;;  %v5577_v39 = vadd.f32 %v13968_v34, %v5383_v59  ;;  %v5766_v55 = vadd.f32 %v13982_v5, %v5572_v57  ;;  %v5382_v47 = vadd.f32 %v13978_v29, %v5188_v61  ;;  %v5924_v11 = vpop.f32.mrf.mxu1  ;;  %v14881_v44 = vld [vmem:[#allocation30_spill] sm:$0xff] }
 0x522   :  { %v5749_v38 = vpop.f32.mrf.mxu0  ;;  %v5578_v20 = vadd.f32 %v14881_v44, %v5384_v50  ;;  %v12349_v44 = vld [vmem:[#allocation6 + $0x3d0] sm:$0xff]  }
 0x523   :  { %v5575_v38 = vadd.f32 %v13972_v49, %v5381_v63  ;;  %v5771_v34 = vadd.f32 %v13984_v32, %v5577_v39  ;;  %v5960_v48 = vadd.f32 %v5911_v15, %v5766_v55  ;;  %v5576_v41 = vadd.f32 %v14884_v23, %v5382_v47  ;;  %v11742_v28 = vpop.f32.mrf.mxu1 }
 0x524   :  { %v11757_v18 = vpop.f32.mrf.mxu0  ;;  %v5772_v26 = vadd.f32 %v14885_v35, %v5578_v20 }
 0x525   :  { %v6151_v60 = vadd.f32 %v11757_v18, %v5957_v36  ;;  %v5769_v56 = vadd.f32 %v14882_v42, %v5575_v38  ;;  %v5965_v18 = vadd.f32 %v11741_v12, %v5771_v34  ;;  %v5927_v63 = vpop.f32.mrf.mxu1 }
 0x526   :  { %v6086_v40 = vpop.f32.mrf.mxu0 }
 0x527   :  { %v6173_v33 = vadd.f32 %v14005_v21, %v6151_v60  ;;  %v5963_v15 = vadd.f32 %v5924_v11, %v5769_v56 }
 0x528   :  { %v11758_v45 = vpop.f32.mrf.mxu0 }
 0x529   :  { %v6189_v3 = vmax.f32 %v6173_v33, 0.0  ;;  %v6152_v22 = vadd.f32 %v11758_v45, %v5958_v27  ;;  %v14887_v33 = vld [vmem:[#allocation27_spill] sm:$0xff] }
 0x52a   :  { %v6089_v2 = vpop.f32.mrf.mxu0  ;;  %v5770_v0 = vadd.f32 %v14887_v33, %v5576_v41  ;;  %v12347_v41 = vld [vmem:[#allocation6 + $0x3a8] sm:$0xff]  }
 0x52b   :  { %v6205_v4 = vsel %vm12790_vm12, %v6189_v3, 0.0  ;;  %v6174_v7 = vadd.f32 %v14005_v21, %v6152_v22  ;;  %v6150_v53 = vadd.f32 %v6089_v2, %v5956_v30  ;;  %v5966_v22 = vadd.f32 %v11742_v28, %v5772_v26 }
 0x52c   :  { %6221 = vst.msk [vmem:[#allocation3 + $0x20] sm:$0xff] %vm91_vm2, %v6205_v4  ;;  %v11761_v1 = vpop.f32.mrf.mxu0 }
 0x52d   :  { %v6190_v16 = vmax.f32 %v6174_v7, 0.0  ;;  %v6172_v51 = vadd.f32 %v14005_v21, %v6150_v53  ;;  %v6155_v25 = vadd.f32 %v11761_v1, %v5961_v6  ;;  %v5964_v7 = vadd.f32 %v5927_v63, %v5770_v0  ;;  %v12350_v0 = vld [vmem:[#allocation6 + $0x3a0] sm:$0xff]  }
 0x52e   :  { %v6102_v14 = vpop.f32.mrf.mxu0 }
 0x52f   :  { %v6206_v5 = vsel %vm12805_vm1, %v6190_v16, 0.0  ;;  %v6188_v52 = vmax.f32 %v6172_v51, 0.0  ;;  %v6177_v8 = vadd.f32 %v14005_v21, %v6155_v25  ;;  %v6153_v10 = vadd.f32 %v6102_v14, %v5959_v17 }
 0x530   :  { %6222 = vst.msk [vmem:[#allocation3 + $0x28] sm:$0xff] %vm91_vm2, %v6206_v5  ;;  %v11762_v49 = vpop.f32.mrf.mxu0 }
 0x531   :  { %v6204_v32 = vsel %vm12815_vm4, %v6188_v52, 0.0  ;;  %v6193_v36 = vmax.f32 %v6177_v8, 0.0  ;;  %v6175_v54 = vadd.f32 %v14005_v21, %v6153_v10  ;;  %v6156_v13 = vadd.f32 %v11762_v49, %v5962_v46  ;;  %v12346_v46 = vld [vmem:[#allocation6 + $0x3b0] sm:$0xff]  }
 0x532   :  { %6220 = vst.msk [vmem:[#allocation3 + $0x18] sm:$0xff] %vm91_vm2, %v6204_v32  ;;  %v6105_v60 = vpop.f32.mrf.mxu0  ;;  %v14893_v49 = vld [vmem:[#allocation29_spill] sm:$0xff] }
 0x533   :  { %v6209_v40 = vsel %vm12826_vm8, %v6193_v36, 0.0  ;;  %v6191_v24 = vmax.f32 %v6175_v54, 0.0  ;;  %v6178_v27 = vadd.f32 %v14005_v21, %v6156_v13  ;;  %v6154_v9 = vadd.f32 %v6105_v60, %v5960_v48  ;;  %v14895_v60 = vld [vmem:[#allocation26_spill] sm:$0xff] }
 0x534   :  { %6225 = vst.msk [vmem:[#allocation3 + $0x40] sm:$0xff] %vm91_vm2, %v6209_v40  ;;  %v11765_v43 = vpop.f32.mrf.mxu0 }
 0x535   :  { %v6207_v45 = vsel %vm12832_vm9, %v6191_v24, 0.0  ;;  %v6194_v30 = vmax.f32 %v6178_v27, 0.0  ;;  %v6176_v37 = vadd.f32 %v14005_v21, %v6154_v9  ;;  %v6159_v3 = vadd.f32 %v11765_v43, %v5965_v18 }
 0x536   :  { %6223 = vst.msk [vmem:[#allocation3 + $0x30] sm:$0xff] %vm91_vm2, %v6207_v45  ;;  %v6118_v57 = vpop.f32.mrf.mxu0 }
 0x537   :  { %v6210_v2 = vsel %vm12841_vm0, %v6194_v30, 0.0  ;;  %v6192_v6 = vmax.f32 %v6176_v37, 0.0  ;;  %v6181_v12 = vadd.f32 %v14005_v21, %v6159_v3  ;;  %v6157_v4 = vadd.f32 %v6118_v57, %v5963_v15  ;;  %v6274_v10 = vld [vmem:[#allocation3 + $0x26] sm:$0xff] }
 0x538   :  { %6226 = vst.msk [vmem:[#allocation3 + $0x48] sm:$0xff] %vm91_vm2, %v6210_v2  ;;  %v11766_v53 = vpop.f32.mrf.mxu0  ;;  %v6241_v36 = vld [vmem:[#allocation3 + $0x25] sm:$0xff]  ;;  %v12353_v2 = vld [vmem:[#allocation6 + $0x3f8] sm:$0xff]  }
 0x539   :  { %v6208_v39 = vsel %vm12852_vm14, %v6192_v6, 0.0  ;;  %v6197_v50 = vmax.f32 %v6181_v12, 0.0  ;;  %v6179_v55 = vadd.f32 %v14005_v21, %v6157_v4  ;;  %v6160_v1 = vadd.f32 %v11766_v53, %v5966_v22  ;;  %v6272_v17 = vld [vmem:[#allocation3 + $0x16] sm:$0xff]  ;;  %v6273_v16 = vld [vmem:[#allocation3 + $0x1e] sm:$0xff] }
 0x53a   :  { %v6239_v51 = vld [vmem:[#allocation3 + $0x15] sm:$0xff]  ;;  %6224 = vst.msk [vmem:[#allocation3 + $0x38] sm:$0xff] %vm91_vm2, %v6208_v39  ;;  %v6121_v25 = vpop.f32.mrf.mxu0  ;;  %v6287_v38 = vpack.c.bf16 %v6273_v16, %v6272_v17  ;;  %v6240_v47 = vld [vmem:[#allocation3 + $0x1d] sm:$0xff] }
 0x53b   :  { %v6213_v14 = vsel %vm12860_vm3, %v6197_v50, 0.0  ;;  %v6195_v11 = vmax.f32 %v6179_v55, 0.0  ;;  %v6182_v5 = vadd.f32 %v14005_v21, %v6160_v1  ;;  %v6158_v52 = vadd.f32 %v6121_v25, %v5964_v7  ;;  %v12352_v30 = vld [vmem:[#allocation6 + $0x3c0] sm:$0xff]   ;;  %v12356_v4 = vld [vmem:[#allocation6 + $0x418] sm:$0xff]  }
 0x53c   :  { %6229 = vst.msk [vmem:[#allocation3 + $0x60] sm:$0xff] %vm91_vm2, %v6213_v14  ;;  %11780 = vmatmul.mubr.msk.bf16.vlgmr.msra.gmra.mxu1 %vm91_vm2, %v6287_v38  ;;  %v6254_v8 = vpack.c.bf16 %v6240_v47, %v6239_v51  ;;  %v6284_v38 = vld [vmem:[#allocation3 + $0x76] sm:$0xff]  ;;  %v6285_v47 = vld [vmem:[#allocation3 + $0x7e] sm:$0xff] }
 0x53d   :  { %v6211_v48 = vsel %vm12879_vm7, %v6195_v11, 0.0  ;;  %v6198_v42 = vmax.f32 %v6182_v5, 0.0  ;;  %v6180_v56 = vadd.f32 %v14005_v21, %v6158_v52  ;;  %11820 = vmatpush3.bf16.msra.mxu1 %v14893_v49  ;;  %v6275_v32 = vld [vmem:[#allocation3 + $0x2e] sm:$0xff]  ;;  %v6252_v11 = vld [vmem:[#allocation3 + $0x7d] sm:$0xff]  ;;  %v6293_v5 = vpack.c.bf16 %v6285_v47, %v6284_v38 }
 0x53e   :  { %v6242_v54 = vld [vmem:[#allocation3 + $0x2d] sm:$0xff]  ;;  %6227 = vst.msk [vmem:[#allocation3 + $0x50] sm:$0xff] %vm91_vm2, %v6211_v48  ;;  %11804 = vmatmul.mubr.msk.bf16.vlgmr.msra.gmra.mxu0 %vm91_vm2, %v6254_v8  ;;  %v6288_v13 = vpack.c.bf16 %v6275_v32, %v6274_v10  ;;  %11821 = vmatprep.subr.bf16.mxu1 %v12346_v46  ;;  %v6251_v14 = vld [vmem:[#allocation3 + $0x75] sm:$0xff] }
 0x53f   :  { %v6255_v23 = vpack.c.bf16 %v6242_v54, %v6241_v36  ;;  %v6214_v35 = vsel %vm12894_vm10, %v6198_v42, 0.0  ;;  %v6196_v26 = vmax.f32 %v6180_v56, 0.0  ;;  %11844 = vmatpush3.bf16.msra.mxu0 %v14895_v60  ;;  %v12351_v21 = vld [vmem:[#allocation6 + $0x3c8] sm:$0xff]   ;;  %v6260_v10 = vpack.c.bf16 %v6252_v11, %v6251_v14  ;;  %v6596_v42 = vld [vmem:[#allocation3 + $0x1f] sm:$0xff]  ;;  %v12354_v54 = vld [vmem:[#allocation6 + $0x3f0] sm:$0xff]  }
 0x540   :  { %6230 = vst.msk [vmem:[#allocation3 + $0x68] sm:$0xff] %vm91_vm2, %v6214_v35  ;;  %11783 = vmatprep.mubr.msk.bf16.mxu1 %vm91_vm2, %v6288_v13  ;;  %11845 = vmatprep.subr.bf16.mxu0 %v12349_v44  ;;  %v6278_v45 = vld [vmem:[#allocation3 + $0x46] sm:$0xff]  ;;  %v6787_v52 = vld [vmem:[#allocation3 + $0xf] sm:$0xff] }
 0x541   :  { %11807 = vmatprep.mubr.msk.bf16.mxu0 %vm91_vm2, %v6255_v23  ;;  %v6212_v40 = vsel %vm12928_vm15, %v6196_v26, 0.0  ;;  %v6276_v24 = vld [vmem:[#allocation3 + $0x36] sm:$0xff]  ;;  %v6277_v27 = vld [vmem:[#allocation3 + $0x3e] sm:$0xff]  ;;  %11822 = vmatpush3.bf16.msra.mxu1 %v12346_v46  ;;  %v6593_v46 = vld [vmem:[#allocation3 + $0x7] sm:$0xff] }
 0x542   :  { %v6243_v9 = vld [vmem:[#allocation3 + $0x35] sm:$0xff]  ;;  %6228 = vst.msk [vmem:[#allocation3 + $0x58] sm:$0xff] %vm91_vm2, %v6212_v40  ;;  %v6289_v15 = vpack.c.bf16 %v6277_v27, %v6276_v24  ;;  %v6244_v33 = vld [vmem:[#allocation3 + $0x3d] sm:$0xff]  ;;  %11823 = vmatprep.subr.bf16.mxu1 %v12347_v41  ;;  %v6245_v3 = vld [vmem:[#allocation3 + $0x45] sm:$0xff]  ;;  %v6609_v8 = vpack.c.bf16 %v6787_v52, %v6593_v46  ;;  %v11745_v46 = vpop.f32.mrf.mxu1 }
 0x543   :  { %v6256_v43 = vpack.c.bf16 %v6244_v33, %v6243_v9  ;;  %11846 = vmatpush3.bf16.msra.mxu0 %v12349_v44  ;;  %v6788_v44 = vld [vmem:[#allocation3 + $0x17] sm:$0xff]  ;;  %v6598_v56 = vld [vmem:[#allocation3 + $0x2f] sm:$0xff]  ;;  %v6790_v32 = vld [vmem:[#allocation3 + $0x27] sm:$0xff] }
 0x544   :  { %11784 = vmatmul.mubr.msk.bf16.gmra.mxu1 %vm91_vm2, %v6289_v15  ;;  %11847 = vmatprep.subr.bf16.mxu0 %v12351_v21  ;;  %v6803_v48 = vpack.c.bf16 %v6788_v44, %v6787_v52  ;;  %v6610_v49 = vpack.c.bf16 %v6596_v42, %v6788_v44  ;;  %v6792_v36 = vld [vmem:[#allocation3 + $0x37] sm:$0xff]  ;;  %v6611_v13 = vpack.c.bf16 %v6598_v56, %v6790_v32  ;;  %v12355_v26 = vld [vmem:[#allocation6 + $0x3e8] sm:$0xff]   ;;  %v6600_v60 = vld [vmem:[#allocation3 + $0x3f] sm:$0xff] }
 0x545   :  { %v6279_v37 = vld [vmem:[#allocation3 + $0x4e] sm:$0xff]  ;;  %11824 = vmatpush3.bf16.msra.mxu1 %v12347_v41  ;;  %v6804_v23 = vpack.c.bf16 %v6790_v32, %v6596_v42  ;;  %v6805_v35 = vpack.c.bf16 %v6792_v36, %v6598_v56  ;;  %v6612_v24 = vpack.c.bf16 %v6600_v60, %v6792_v36  ;;  %v12358_v15 = vld [vmem:[#allocation6 + $0x3e0] sm:$0xff]   ;;  %v6986_v47 = vld [vmem:[#allocation3 + $0x38] sm:$0xff] }
 0x546   :  { %v6246_v22 = vld [vmem:[#allocation3 + $0x4d] sm:$0xff]  ;;  %11808 = vmatmul.mubr.msk.bf16.gmra.mxu0 %vm91_vm2, %v6256_v43  ;;  %v6290_v57 = vpack.c.bf16 %v6279_v37, %v6278_v45  ;;  %11825 = vmatprep.subr.bf16.mxu1 %v12350_v0  ;;  %v12360_v43 = vld [vmem:[#allocation6 + $0x400] sm:$0xff]   ;;  %v14117_v44 = vld [vmem:[#allocation3 + $0x39] sm:$0xff] }
 0x547   :  { %v6257_v63 = vpack.c.bf16 %v6246_v22, %v6245_v3  ;;  %11848 = vmatpush3.bf16.msra.mxu0 %v12351_v21  ;;  %v6282_v6 = vld [vmem:[#allocation3 + $0x66] sm:$0xff]  ;;  %v6283_v12 = vld [vmem:[#allocation3 + $0x6e] sm:$0xff] }
 0x548   :  { %11787 = vmatprep.mubr.msk.bf16.mxu1 %vm91_vm2, %v6290_v57  ;;  %11849 = vmatprep.subr.bf16.mxu0 %v12352_v30  ;;  %v6249_v1 = vld [vmem:[#allocation3 + $0x65] sm:$0xff]  ;;  %v6250_v17 = vld [vmem:[#allocation3 + $0x6d] sm:$0xff]  ;;  %v6292_v51 = vpack.c.bf16 %v6283_v12, %v6282_v6  ;;  %v12364_v57 = vld [vmem:[#allocation6 + $0x458] sm:$0xff]  }
 0x549   :  { %11811 = vmatprep.mubr.msk.bf16.mxu0 %vm91_vm2, %v6257_v63  ;;  %v6280_v7 = vld [vmem:[#allocation3 + $0x56] sm:$0xff]  ;;  %v6281_v53 = vld [vmem:[#allocation3 + $0x5e] sm:$0xff]  ;;  %11826 = vmatpush3.bf16.msra.mxu1 %v12350_v0  ;;  %v6259_v25 = vpack.c.bf16 %v6250_v17, %v6249_v1  ;;  %v12359_v40 = vld [vmem:[#allocation6 + $0x408] sm:$0xff]  }
 0x54a   :  { %v6247_v39 = vld [vmem:[#allocation3 + $0x55] sm:$0xff]  ;;  %v6291_v50 = vpack.c.bf16 %v6281_v53, %v6280_v7  ;;  %v6248_v55 = vld [vmem:[#allocation3 + $0x5d] sm:$0xff]  ;;  %11867 = vmatprep.subr.bf16.mxu1 %v12353_v2  ;;  %v6794_v27 = vld [vmem:[#allocation3 + $0x47] sm:$0xff] }
 0x54b   :  { %v6258_v16 = vpack.c.bf16 %v6248_v55, %v6247_v39  ;;  %11850 = vmatpush3.bf16.msra.mxu0 %v12352_v30  ;;  %v12357_v41 = vld [vmem:[#allocation6 + $0x410] sm:$0xff]   ;;  %v6806_v0 = vpack.c.bf16 %v6794_v27, %v6600_v60  ;;  %v12361_v30 = vld [vmem:[#allocation6 + $0x438] sm:$0xff]   ;;  %v6798_v3 = vld [vmem:[#allocation3 + $0x67] sm:$0xff] }
 0x54c   :  { %11788 = vmatmul.mubr.msk.bf16.gmra.mxu1 %vm91_vm2, %v6291_v50  ;;  %11891 = vmatprep.subr.bf16.mxu0 %v12356_v4  ;;  %v6602_v21 = vld [vmem:[#allocation3 + $0x4f] sm:$0xff]  ;;  %v6796_v9 = vld [vmem:[#allocation3 + $0x57] sm:$0xff]  ;;  %v6604_v37 = vld [vmem:[#allocation3 + $0x5f] sm:$0xff] }
 0x54d   :  { %11791 = vmatprep.mubr.msk.bf16.mxu1 %vm91_vm2, %v6292_v51  ;;  %v6613_v33 = vpack.c.bf16 %v6602_v21, %v6794_v27  ;;  %v6807_v45 = vpack.c.bf16 %v6796_v9, %v6602_v21  ;;  %v6606_v22 = vld [vmem:[#allocation3 + $0x6f] sm:$0xff]  ;;  %v6614_v63 = vpack.c.bf16 %v6604_v37, %v6796_v9  ;;  %v6808_v12 = vpack.c.bf16 %v6798_v3, %v6604_v37  ;;  %v6608_v7 = vld [vmem:[#allocation3 + $0x7f] sm:$0xff]  ;;  %v6802_v53 = vld [vmem:[#allocation3 + $0x87] sm:$0xff] }
 0x54e   :  { %11812 = vmatmul.mubr.msk.bf16.gmra.mxu0 %vm91_vm2, %v6258_v16  ;;  %v6615_v6 = vpack.c.bf16 %v6606_v22, %v6798_v3  ;;  %v6981_v50 = vld [vmem:[#allocation3 + $0x10] sm:$0xff]  ;;  %v6982_v55 = vld [vmem:[#allocation3 + $0x18] sm:$0xff]  ;;  %v6810_v1 = vpack.c.bf16 %v6802_v53, %v6608_v7  ;;  %v6984_v38 = vld [vmem:[#allocation3 + $0x28] sm:$0xff] }
 0x54f   :  { %11815 = vmatprep.mubr.msk.bf16.mxu0 %vm91_vm2, %v6259_v25  ;;  %v7175_v17 = vld [vmem:[#allocation3 + $0x11] sm:$0xff]  ;;  %v14106_v16 = vld [vmem:[#allocation3 + $0x19] sm:$0xff]  ;;  %v6997_v51 = vpack.c.bf16 %v6982_v55, %v6981_v50  ;;  %v14113_v11 = vld [vmem:[#allocation3 + $0x29] sm:$0xff] }
 0x550   :  { %v7191_v25 = vpack.c.bf16 %v14106_v16, %v7175_v17  ;;  %v6983_v14 = vld [vmem:[#allocation3 + $0x20] sm:$0xff]  ;;  %v12365_v32 = vld [vmem:[#allocation6 + $0x450] sm:$0xff]   ;;  %v12367_v60 = vld [vmem:[#allocation6 + $0x448] sm:$0xff]  }
 0x551   :  { %v6998_v52 = vpack.c.bf16 %v6984_v38, %v6983_v14  ;;  %v14119_v42 = vld [vmem:[#allocation3 + $0x21] sm:$0xff]  ;;  %v7190_v46 = vld [vmem:[#allocation3 + $0x89] sm:$0xff] }
 0x552   :  { %v6987_v21 = vld [vmem:[#allocation3 + $0x40] sm:$0xff]  ;;  %v6996_v38 = vld [vmem:[#allocation3 + $0x88] sm:$0xff] }
 0x553   :  { %v12368_v3 = vld [vmem:[#allocation6 + $0x440] sm:$0xff]  }
 0x554   :  { %11792 = vmatmul.mubr.msk.bf16.gmra.mxu1 %vm91_vm2, %v6293_v5  ;;  %v12362_v5 = vld [vmem:[#allocation6 + $0x430] sm:$0xff]   ;;  %v7185_v53 = vld [vmem:[#allocation3 + $0x61] sm:$0xff] }
 0x555   :  { %11827 = vmatprep.mubr.msk.bf16.mxu1 %vm91_vm2, %v6609_v8  ;;  %v6985_v8 = vld [vmem:[#allocation3 + $0x30] sm:$0xff] }
 0x556   :  { %11816 = vmatmul.mubr.msk.bf16.gmra.mxu0 %vm91_vm2, %v6260_v10  ;;  %v14115_v10 = vld [vmem:[#allocation3 + $0x31] sm:$0xff]  ;;  %v6999_v56 = vpack.c.bf16 %v6986_v47, %v6985_v8  ;;  %v7189_v47 = vld [vmem:[#allocation3 + $0x81] sm:$0xff]  ;;  %v7385_v8 = vpack.c.bf16 %v14119_v42, %v14106_v16 }
 0x557   :  { %11851 = vmatprep.mubr.msk.bf16.mxu0 %vm91_vm2, %v6803_v48  ;;  %v5940_v48 = vpop.f32.mrf.mxu1 }
 0x558   :  { %v7564_v48 = vld [vmem:[#allocation3 + $0x22] sm:$0xff] }
 0x559   :  { %v11746_v36 = vpop.f32.mrf.mxu1 }
 0x55a   :  { %v7567_v36 = vld [vmem:[#allocation3 + $0x3a] sm:$0xff] }
 0x55c   :  { %11828 = vmatmul.mubr.msk.bf16.vlgmr.msra.gmra.mxu1 %vm91_vm2, %v6610_v49  ;;  %v7192_v49 = vpack.c.bf16 %v14113_v11, %v14119_v42  ;;  %v7568_v42 = vld [vmem:[#allocation3 + $0x42] sm:$0xff] }
 0x55d   :  { %11868 = vmatpush3.bf16.msra.mxu1 %v12353_v2  ;;  %11831 = vmatprep.mubr.msk.bf16.mxu1 %vm91_vm2, %v6611_v13  ;;  %v6800_v2 = vld [vmem:[#allocation3 + $0x77] sm:$0xff]  ;;  %v12363_v13 = vld [vmem:[#allocation6 + $0x428] sm:$0xff]  }
 0x55e   :  { %11852 = vmatmul.mubr.msk.bf16.vlgmr.msra.gmra.mxu0 %vm91_vm2, %v6804_v23  ;;  %11869 = vmatprep.subr.bf16.mxu1 %v12354_v54  ;;  %v6616_v39 = vpack.c.bf16 %v6608_v7, %v6800_v2  ;;  %v5943_v23 = vpop.f32.mrf.mxu1  ;;  %v6991_v7 = vld [vmem:[#allocation3 + $0x60] sm:$0xff] }
 0x55f   :  { %11855 = vmatprep.mubr.msk.bf16.mxu0 %vm91_vm2, %v6805_v35  ;;  %11892 = vmatpush3.bf16.msra.mxu0 %v12356_v4  ;;  %v6809_v4 = vpack.c.bf16 %v6800_v2, %v6606_v22  ;;  %v11769_v35 = vpop.f32.mrf.mxu0  ;;  %v6994_v2 = vld [vmem:[#allocation3 + $0x78] sm:$0xff] }
 0x560   :  { %11893 = vmatprep.subr.bf16.mxu0 %v12357_v41  ;;  %v12371_v35 = vld [vmem:[#allocation6 + $0x468] sm:$0xff]  }
 0x561   :  { %11870 = vmatpush3.bf16.msra.mxu1 %v12354_v54  ;;  %v7193_v54 = vpack.c.bf16 %v14117_v44, %v14115_v10  ;;  %v6134_v27 = vpop.f32.mrf.mxu0 }
 0x562   :  { %11871 = vmatprep.subr.bf16.mxu1 %v12355_v26  ;;  %v7572_v27 = vld [vmem:[#allocation3 + $0x62] sm:$0xff] }
 0x563   :  { %11894 = vmatpush3.bf16.msra.mxu0 %v12357_v41  ;;  %v6988_v41 = vld [vmem:[#allocation3 + $0x48] sm:$0xff] }
 0x564   :  { %11832 = vmatmul.mubr.msk.bf16.gmra.mxu1 %vm91_vm2, %v6612_v24  ;;  %11895 = vmatprep.subr.bf16.mxu0 %v12359_v40  ;;  %v12366_v24 = vld [vmem:[#allocation6 + $0x420] sm:$0xff]   ;;  %v7000_v9 = vpack.c.bf16 %v6988_v41, %v6987_v21  ;;  %v7581_v41 = vpack.c.bf16 %v7568_v42, %v7567_v36 }
 0x565   :  { %11835 = vmatprep.mubr.msk.bf16.mxu1 %vm91_vm2, %v6613_v33  ;;  %11872 = vmatpush3.bf16.msra.mxu1 %v12355_v26  ;;  %v6990_v26 = vld [vmem:[#allocation3 + $0x58] sm:$0xff] }
 0x566   :  { %11856 = vmatmul.mubr.msk.bf16.gmra.mxu0 %vm91_vm2, %v6806_v0  ;;  %11873 = vmatprep.subr.bf16.mxu1 %v12358_v15  ;;  %v14131_v33 = vld [vmem:[#allocation3 + $0x51] sm:$0xff]  ;;  %v14133_v0 = vld [vmem:[#allocation3 + $0x59] sm:$0xff] }
 0x567   :  { %11859 = vmatprep.mubr.msk.bf16.mxu0 %vm91_vm2, %v6807_v45  ;;  %11896 = vmatpush3.bf16.msra.mxu0 %v12359_v40  ;;  %v14129_v40 = vld [vmem:[#allocation3 + $0x49] sm:$0xff]  ;;  %v7195_v22 = vpack.c.bf16 %v14133_v0, %v14131_v33  ;;  %v7389_v21 = vpack.c.bf16 %v7185_v53, %v14133_v0 }
 0x568   :  { %11897 = vmatprep.subr.bf16.mxu0 %v12360_v43 }
 0x569   :  { %11874 = vmatpush3.bf16.msra.mxu1 %v12358_v15  ;;  %v6989_v15 = vld [vmem:[#allocation3 + $0x50] sm:$0xff] }
 0x56a   :  { %11915 = vmatprep.subr.bf16.mxu1 %v12361_v30  ;;  %v7001_v45 = vpack.c.bf16 %v6990_v26, %v6989_v15  ;;  %v12372_v26 = vld [vmem:[#allocation6 + $0x460] sm:$0xff]   ;;  %v7574_v15 = vld [vmem:[#allocation3 + $0x72] sm:$0xff] }
 0x56b   :  { %11898 = vmatpush3.bf16.msra.mxu0 %v12360_v43  ;;  %v7181_v43 = vld [vmem:[#allocation3 + $0x41] sm:$0xff] }
 0x56c   :  { %11836 = vmatmul.mubr.msk.bf16.gmra.mxu1 %vm91_vm2, %v6614_v63  ;;  %11939 = vmatprep.subr.bf16.mxu0 %v12364_v57  ;;  %v7194_v37 = vpack.c.bf16 %v14129_v40, %v7181_v43  ;;  %v6993_v63 = vld [vmem:[#allocation3 + $0x70] sm:$0xff]  ;;  %v7387_v23 = vpack.c.bf16 %v7181_v43, %v14117_v44  ;;  %v7571_v44 = vld [vmem:[#allocation3 + $0x5a] sm:$0xff] }
 0x56d   :  { %11839 = vmatprep.mubr.msk.bf16.mxu1 %vm91_vm2, %v6615_v6  ;;  %v12369_v6 = vld [vmem:[#allocation6 + $0x478] sm:$0xff]   ;;  %v7003_v50 = vpack.c.bf16 %v6994_v2, %v6993_v63  ;;  %v7759_v2 = vld [vmem:[#allocation3 + $0x2b] sm:$0xff] }
 0x56e   :  { %11860 = vmatmul.mubr.msk.bf16.gmra.mxu0 %vm91_vm2, %v6808_v12  ;;  %v6992_v12 = vld [vmem:[#allocation3 + $0x68] sm:$0xff]  ;;  %v7761_v63 = vld [vmem:[#allocation3 + $0x3b] sm:$0xff] }
 0x56f   :  { %11863 = vmatprep.mubr.msk.bf16.mxu0 %vm91_vm2, %v6809_v4  ;;  %v14142_v4 = vld [vmem:[#allocation3 + $0x79] sm:$0xff]  ;;  %v7002_v55 = vpack.c.bf16 %v6992_v12, %v6991_v7  ;;  %v7762_v12 = vld [vmem:[#allocation3 + $0x43] sm:$0xff] }
 0x570   :  { %v7764_v7 = vld [vmem:[#allocation3 + $0x53] sm:$0xff] }
 0x574   :  { %11840 = vmatmul.mubr.msk.bf16.gmra.mxu1 %vm91_vm2, %v6616_v39  ;;  %v14144_v39 = vld [vmem:[#allocation3 + $0x69] sm:$0xff] }
 0x575   :  { %11875 = vmatprep.mubr.msk.bf16.mxu1 %vm91_vm2, %v6997_v51  ;;  %v7196_v51 = vpack.c.bf16 %v14144_v39, %v7185_v53  ;;  %v7765_v53 = vld [vmem:[#allocation3 + $0x5b] sm:$0xff] }
 0x576   :  { %11864 = vmatmul.mubr.msk.bf16.gmra.mxu0 %vm91_vm2, %v6810_v1  ;;  %v7187_v1 = vld [vmem:[#allocation3 + $0x71] sm:$0xff] }
 0x577   :  { %11899 = vmatprep.mubr.msk.bf16.mxu0 %vm91_vm2, %v7191_v25  ;;  %v7197_v17 = vpack.c.bf16 %v14142_v4, %v7187_v1  ;;  %v6995_v25 = vld [vmem:[#allocation3 + $0x80] sm:$0xff]  ;;  %v7390_v0 = vpack.c.bf16 %v7187_v1, %v14144_v39  ;;  %v7763_v39 = vld [vmem:[#allocation3 + $0x4b] sm:$0xff] }
 0x578   :  { %v7004_v14 = vpack.c.bf16 %v6996_v38, %v6995_v25  ;;  %v12373_v38 = vld [vmem:[#allocation9 + $0x38] sm:$0xff]  }
 0x57c   :  { %11876 = vmatmul.mubr.msk.bf16.vlgmr.msra.gmra.mxu1 %vm91_vm2, %v6998_v52  ;;  %v7563_v52 = vld [vmem:[#allocation3 + $0x1a] sm:$0xff] }
 0x57d   :  { %11916 = vmatpush3.bf16.msra.mxu1 %v12361_v30  ;;  %11879 = vmatprep.mubr.msk.bf16.mxu1 %vm91_vm2, %v6999_v56  ;;  %v11770_v30 = vpop.f32.mrf.mxu0  ;;  %v7579_v56 = vpack.c.bf16 %v7564_v48, %v7563_v52 }
 0x57e   :  { %11900 = vmatmul.mubr.msk.bf16.vlgmr.msra.gmra.mxu0 %vm91_vm2, %v7192_v49  ;;  %11917 = vmatprep.subr.bf16.mxu1 %v12362_v5  ;;  %v7566_v49 = vld [vmem:[#allocation3 + $0x32] sm:$0xff] }
 0x57f   :  { %11903 = vmatprep.mubr.msk.bf16.mxu0 %vm91_vm2, %v7193_v54  ;;  %11940 = vmatpush3.bf16.msra.mxu0 %v12364_v57  ;;  %v6137_v57 = vpop.f32.mrf.mxu0  ;;  %v12370_v54 = vld [vmem:[#allocation6 + $0x470] sm:$0xff]  }
 0x580   :  { %11941 = vmatprep.subr.bf16.mxu0 %v12365_v32  ;;  %v7760_v57 = vld [vmem:[#allocation3 + $0x33] sm:$0xff] }
 0x581   :  { %11918 = vmatpush3.bf16.msra.mxu1 %v12362_v5  ;;  %v7198_v5 = vpack.c.bf16 %v7190_v46, %v7189_v47 }
 0x582   :  { %11919 = vmatprep.subr.bf16.mxu1 %v12363_v13 }
 0x583   :  { %11942 = vmatpush3.bf16.msra.mxu0 %v12365_v32  ;;  %v7386_v32 = vpack.c.bf16 %v14115_v10, %v14113_v11  ;;  %v7570_v11 = vld [vmem:[#allocation3 + $0x52] sm:$0xff]  ;;  %v7388_v10 = vpack.c.bf16 %v14131_v33, %v14129_v40  ;;  %v7573_v40 = vld [vmem:[#allocation3 + $0x6a] sm:$0xff]  ;;  %v7391_v33 = vpack.c.bf16 %v7189_v47, %v14142_v4  ;;  %v7775_v4 = vpack.c.bf16 %v7762_v12, %v7761_v63 }
 0x584   :  { %11880 = vmatmul.mubr.msk.bf16.gmra.mxu1 %vm91_vm2, %v7000_v9  ;;  %11943 = vmatprep.subr.bf16.mxu0 %v12367_v60  ;;  %v7583_v9 = vpack.c.bf16 %v7572_v27, %v7571_v44  ;;  %v7584_v43 = vpack.c.bf16 %v7574_v15, %v7573_v40  ;;  %v12374_v47 = vld [vmem:[#allocation9 + $0x30] sm:$0xff]   ;;  %v12375_v44 = vld [vmem:[#allocation9 + $0x28] sm:$0xff]   ;;  %v7770_v12 = vld [vmem:[#allocation3 + $0x83] sm:$0xff] }
 0x585   :  { %11883 = vmatprep.mubr.msk.bf16.mxu1 %vm91_vm2, %v7001_v45  ;;  %11920 = vmatpush3.bf16.msra.mxu1 %v12363_v13  ;;  %v7565_v13 = vld [vmem:[#allocation3 + $0x2a] sm:$0xff]  ;;  %v7575_v27 = vld [vmem:[#allocation3 + $0x7a] sm:$0xff] }
 0x586   :  { %11904 = vmatmul.mubr.msk.bf16.gmra.mxu0 %vm91_vm2, %v7194_v37  ;;  %11921 = vmatprep.subr.bf16.mxu1 %v12366_v24  ;;  %v7580_v16 = vpack.c.bf16 %v7566_v49, %v7565_v13  ;;  %v7384_v45 = vld [vmem:[#allocation3 + $0x91] sm:$0xff]  ;;  %v7757_v37 = vld [vmem:[#allocation3 + $0x1b] sm:$0xff] }
 0x587   :  { %11907 = vmatprep.mubr.msk.bf16.mxu0 %vm91_vm2, %v7195_v22  ;;  %11944 = vmatpush3.bf16.msra.mxu0 %v12367_v60  ;;  %v7569_v60 = vld [vmem:[#allocation3 + $0x4a] sm:$0xff]  ;;  %v7392_v30 = vpack.c.bf16 %v7384_v45, %v7190_v46 }
 0x588   :  { %11945 = vmatprep.subr.bf16.mxu0 %v12368_v3  ;;  %v7577_v15 = vld [vmem:[#allocation3 + $0x8a] sm:$0xff] }
 0x589   :  { %11922 = vmatpush3.bf16.msra.mxu1 %v12366_v24  ;;  %v7582_v24 = vpack.c.bf16 %v7570_v11, %v7569_v60 }
 0x58a   :  { %11963 = vmatprep.subr.bf16.mxu1 %v12369_v6 }
 0x58b   :  { %11946 = vmatpush3.bf16.msra.mxu0 %v12368_v3  ;;  %v7758_v3 = vld [vmem:[#allocation3 + $0x23] sm:$0xff] }
 0x58c   :  { %11884 = vmatmul.mubr.msk.bf16.gmra.mxu1 %vm91_vm2, %v7002_v55  ;;  %v7773_v22 = vpack.c.bf16 %v7758_v3, %v7757_v37  ;;  %v7766_v55 = vld [vmem:[#allocation3 + $0x63] sm:$0xff]  ;;  %11987 = vmatprep.subr.bf16.mxu0 %v12373_v38 }
 0x58d   :  { %11887 = vmatprep.mubr.msk.bf16.mxu1 %vm91_vm2, %v7003_v50  ;;  %v7776_v50 = vpack.c.bf16 %v7764_v7, %v7763_v39  ;;  %v7777_v1 = vpack.c.bf16 %v7766_v55, %v7765_v53  ;;  %v7771_v55 = vld [vmem:[#allocation3 + $0x8b] sm:$0xff] }
 0x58e   :  { %11908 = vmatmul.mubr.msk.bf16.gmra.mxu0 %vm91_vm2, %v7196_v51  ;;  %v7768_v51 = vld [vmem:[#allocation3 + $0x73] sm:$0xff] }
 0x58f   :  { %11911 = vmatprep.mubr.msk.bf16.mxu0 %vm91_vm2, %v7197_v17  ;;  %v7767_v17 = vld [vmem:[#allocation3 + $0x6b] sm:$0xff] }
 0x590   :  { %v7778_v25 = vpack.c.bf16 %v7768_v51, %v7767_v17  ;;  %v12379_v17 = vld [vmem:[#allocation9 + $0x8] sm:$0xff]  }
 0x594   :  { %11888 = vmatmul.mubr.msk.bf16.gmra.mxu1 %vm91_vm2, %v7004_v14 }
 0x595   :  { %11923 = vmatprep.mubr.msk.bf16.mxu1 %vm91_vm2, %v7385_v8 }
 0x596   :  { %11912 = vmatmul.mubr.msk.bf16.gmra.mxu0 %vm91_vm2, %v7198_v5 }
 0x597   :  { %11947 = vmatprep.mubr.msk.bf16.mxu0 %vm91_vm2, %v7579_v56 }
 0x59c   :  { %11924 = vmatmul.mubr.msk.bf16.vlgmr.msra.gmra.mxu1 %vm91_vm2, %v7386_v32 }
 0x59d   :  { %11964 = vmatpush3.bf16.msra.mxu1 %v12369_v6  ;;  %11927 = vmatprep.mubr.msk.bf16.mxu1 %vm91_vm2, %v7387_v23  ;;  %v7774_v6 = vpack.c.bf16 %v7760_v57, %v7759_v2 }
 0x59e   :  { %11948 = vmatmul.mubr.msk.bf16.vlgmr.msra.gmra.mxu0 %vm91_vm2, %v7580_v16  ;;  %11965 = vmatprep.subr.bf16.mxu1 %v12370_v54 }
 0x59f   :  { %11951 = vmatprep.mubr.msk.bf16.mxu0 %vm91_vm2, %v7581_v41  ;;  %11988 = vmatpush3.bf16.msra.mxu0 %v12373_v38 }
 0x5a0   :  { %11989 = vmatprep.subr.bf16.mxu0 %v12374_v47 }
 0x5a1   :  { %11966 = vmatpush3.bf16.msra.mxu1 %v12370_v54 }
 0x5a2   :  { %11967 = vmatprep.subr.bf16.mxu1 %v12371_v35 }
 0x5a3   :  { %11990 = vmatpush3.bf16.msra.mxu0 %v12374_v47 }
 0x5a4   :  { %11928 = vmatmul.mubr.msk.bf16.gmra.mxu1 %vm91_vm2, %v7388_v10  ;;  %11991 = vmatprep.subr.bf16.mxu0 %v12375_v44 }
 0x5a5   :  { %11931 = vmatprep.mubr.msk.bf16.mxu1 %vm91_vm2, %v7389_v21  ;;  %11968 = vmatpush3.bf16.msra.mxu1 %v12371_v35 }
 0x5a6   :  { %11952 = vmatmul.mubr.msk.bf16.gmra.mxu0 %vm91_vm2, %v7582_v24  ;;  %11969 = vmatprep.subr.bf16.mxu1 %v12372_v26  ;;  %v12376_v24 = vld [vmem:[#allocation9 + $0x18] sm:$0xff]  }
 0x5a7   :  { %11955 = vmatprep.mubr.msk.bf16.mxu0 %vm91_vm2, %v7583_v9  ;;  %v7576_v9 = vld [vmem:[#allocation3 + $0x82] sm:$0xff]  ;;  %11992 = vmatpush3.bf16.msra.mxu0 %v12375_v44 }
 0x5a8   :  { %v7585_v40 = vpack.c.bf16 %v7576_v9, %v7575_v27 }
 0x5a9   :  { %11970 = vmatpush3.bf16.msra.mxu1 %v12372_v26 }
 0x5aa   :  { %12011 = vmatprep.subr.bf16.mxu1 %v12376_v24 }
 0x5ac   :  { %11932 = vmatmul.mubr.msk.bf16.gmra.mxu1 %vm91_vm2, %v7390_v0 }
 0x5ad   :  { %11935 = vmatprep.mubr.msk.bf16.mxu1 %vm91_vm2, %v7391_v33  ;;  %v7578_v33 = vld [vmem:[#allocation3 + $0x92] sm:$0xff] }
 0x5ae   :  { %11956 = vmatmul.mubr.msk.bf16.gmra.mxu0 %vm91_vm2, %v7584_v43  ;;  %v7586_v45 = vpack.c.bf16 %v7578_v33, %v7577_v15 }
 0x5af   :  { %11959 = vmatprep.mubr.msk.bf16.mxu0 %vm91_vm2, %v7585_v40 }
 0x5b4   :  { %11936 = vmatmul.mubr.msk.bf16.gmra.mxu1 %vm91_vm2, %v7392_v30 }
 0x5b5   :  { %11971 = vmatprep.mubr.msk.bf16.mxu1 %vm91_vm2, %v7773_v22  ;;  %v12377_v22 = vld [vmem:[#allocation9 + $0x10] sm:$0xff]  }
 0x5b6   :  { %11960 = vmatmul.mubr.msk.bf16.gmra.mxu0 %vm91_vm2, %v7586_v45 }
 0x5bc   :  { %11972 = vmatmul.mubr.msk.bf16.vlgmr.msra.gmra.mxu1 %vm91_vm2, %v7774_v6  ;;  %v7769_v6 = vld [vmem:[#allocation3 + $0x7b] sm:$0xff] }
 0x5bd   :  { %11975 = vmatprep.mubr.msk.bf16.mxu1 %vm91_vm2, %v7775_v4  ;;  %12012 = vmatpush3.bf16.msra.mxu1 %v12376_v24  ;;  %v12378_v4 = vld [vmem:[#allocation9 + $0x20] sm:$0xff]   ;;  %v7779_v53 = vpack.c.bf16 %v7770_v12, %v7769_v6  ;;  %v8002_v12 = vld [vmem:[#allocation2 + $0x78] sm:$0xff] }
 0x5be   :  { %12013 = vmatprep.subr.bf16.mxu1 %v12377_v22  ;;  %11993 = vmatprep.subr.bf16.mxu0 %v12378_v4  ;;  %8034 = vst.msk [vmem:[#allocation2 + $0x78] sm:$0xff] %vm91_vm2, %v8002_v12 }
 0x5bf   :  { %11994 = vmatpush3.bf16.msra.mxu0 %v12378_v4 }
 0x5c1   :  { %12014 = vmatpush3.bf16.msra.mxu1 %v12377_v22  ;;  %v14232_v22 = vld [vmem:[#allocation9 + $0x78] sm:$0xff]  }
 0x5c2   :  { %12015 = vmatprep.subr.bf16.mxu1 %v12379_v17  ;;  %14898 = vst [vmem:[#allocation15_spill] sm:$0xff] %v14232_v22 }
 0x5c4   :  { %11976 = vmatmul.mubr.msk.bf16.gmra.mxu1 %vm91_vm2, %v7776_v50 }
 0x5c5   :  { %11979 = vmatprep.mubr.msk.bf16.mxu1 %vm91_vm2, %v7777_v1  ;;  %v7772_v1 = vld [vmem:[#allocation3 + $0x93] sm:$0xff]  ;;  %12016 = vmatpush3.bf16.msra.mxu1 %v12379_v17 }
 0x5c6   :  { %v7780_v51 = vpack.c.bf16 %v7772_v1, %v7771_v55 }
 0x5cc   :  { %11980 = vmatmul.mubr.msk.bf16.gmra.mxu1 %vm91_vm2, %v7778_v25 }
 0x5cd   :  { %11983 = vmatprep.mubr.msk.bf16.mxu1 %vm91_vm2, %v7779_v53 }
 0x5d4   :  { %11984 = vmatmul.mubr.msk.bf16.gmra.mxu1 %vm91_vm2, %v7780_v51 }
 0x5fc   :  { %v11781_v46 = vpop.f32.mrf.mxu1 }
 0x5fe   :  { %v11805_v14 = vpop.f32.mrf.mxu0  ;;  %v6385_v5 = vpop.f32.mrf.mxu1 }
 0x5ff   :  { %v14184_v52 = vadd.f32 %v11805_v14, %v11781_v46  ;;  %v12380_v14 = vld [vmem:[#allocation9] sm:$0xff]  }
 0x600   :  { %v6530_v8 = vpop.f32.mrf.mxu0  ;;  %v11782_v48 = vpop.f32.mrf.mxu1  ;;  %12017 = vmatprep.subr.bf16.mxu1 %v12380_v14 }
 0x601   :  { %12018 = vmatpush3.bf16.msra.mxu1 %v12380_v14 }
 0x602   :  { %v11806_v56 = vpop.f32.mrf.mxu0  ;;  %v14186_v49 = vpop.f32.mrf.mxu1  ;;  %12059 = vmatprep.subr.bf16.mxu1 %v14232_v22 }
 0x603   :  { %v14188_v32 = vadd.f32 %v11806_v56, %v11782_v48  ;;  %v8070_v48 = vld [vmem:[#allocation2 + $0x6] sm:$0xff]  ;;  %v8071_v56 = vld [vmem:[#allocation2 + $0xe] sm:$0xff] }
 0x604   :  { %v14190_v36 = vpop.f32.mrf.mxu0  ;;  %v11785_v54 = vpop.f32.mrf.mxu1 }
 0x606   :  { %v11809_v13 = vpop.f32.mrf.mxu0  ;;  %v6401_v23 = vpop.f32.mrf.mxu1 }
 0x607   :  { %v14192_v16 = vadd.f32 %v11809_v13, %v11785_v54  ;;  %v8038_v54 = vld [vmem:[#allocation2 + $0x5] sm:$0xff]  ;;  %v8086_v13 = vpack.c.bf16 %v8071_v56, %v8070_v48 }
 0x608   :  { %v6546_v42 = vpop.f32.mrf.mxu0  ;;  %v11786_v41 = vpop.f32.mrf.mxu1 }
 0x609   :  { %v14194_v35 = vadd.f32 %v6546_v42, %v6401_v23  ;;  %v8039_v23 = vld [vmem:[#allocation2 + $0xd] sm:$0xff]  ;;  %v14216_v42 = vld [vmem:[#allocation9 + $0x58] sm:$0xff]   ;;  %11995 = vmatprep.mubr.msk.bf16.mxu0 %vm91_vm2, %v8086_v13 }
 0x60a   :  { %v11810_v11 = vpop.f32.mrf.mxu0  ;;  %v14196_v10 = vpop.f32.mrf.mxu1  ;;  %14897 = vst [vmem:[#allocation25_spill] sm:$0xff] %v14216_v42  ;;  %v8054_v44 = vpack.c.bf16 %v8039_v23, %v8038_v54  ;;  %12035 = vmatprep.subr.bf16.mxu0 %v14216_v42 }
 0x60b   :  { %v14198_v26 = vadd.f32 %v11810_v11, %v11786_v41 }
 0x60c   :  { %v14200_v60 = vpop.f32.mrf.mxu0  ;;  %v11789_v21 = vpop.f32.mrf.mxu1  ;;  %12019 = vmatprep.mubr.msk.bf16.mxu1 %vm91_vm2, %v8054_v44 }
 0x60e   :  { %v11813_v0 = vpop.f32.mrf.mxu0  ;;  %v6417_v43 = vpop.f32.mrf.mxu1 }
 0x60f   :  { %v14202_v30 = vadd.f32 %v11813_v0, %v11789_v21 }
 0x610   :  { %v6562_v37 = vpop.f32.mrf.mxu0  ;;  %v11790_v3 = vpop.f32.mrf.mxu1 }
 0x611   :  { %v14206_v57 = vadd.f32 %v6562_v37, %v6417_v43 }
 0x612   :  { %v11814_v63 = vpop.f32.mrf.mxu0  ;;  %v14208_v2 = vpop.f32.mrf.mxu1 }
 0x613   :  { %v14210_v7 = vadd.f32 %v11814_v63, %v11790_v3 }
 0x614   :  { %v14212_v39 = vpop.f32.mrf.mxu0  ;;  %v11793_v50 = vpop.f32.mrf.mxu1 }
 0x616   :  { %v11817_v25 = vpop.f32.mrf.mxu0  ;;  %v6433_v38 = vpop.f32.mrf.mxu1 }
 0x618   :  { %v6578_v47 = vpop.f32.mrf.mxu0  ;;  %v11794_v46 = vpop.f32.mrf.mxu1 }
 0x61a   :  { %v11818_v5 = vpop.f32.mrf.mxu0  ;;  %v6436_v8 = vpop.f32.mrf.mxu1 }
 0x61c   :  { %v6581_v41 = vpop.f32.mrf.mxu0  ;;  %v11829_v11 = vpop.f32.mrf.mxu1 }
 0x61d   :  { %v6773_v21 = vadd.f32 %v11829_v11, %v14184_v52 }
 0x61e   :  { %v11853_v24 = vpop.f32.mrf.mxu0  ;;  %v6708_v27 = vpop.f32.mrf.mxu1 }
 0x61f   :  { %v14222_v9 = vadd.f32 %v11853_v24, %v6773_v21 }
 0x620   :  { %v6902_v40 = vpop.f32.mrf.mxu0  ;;  %v11830_v15 = vpop.f32.mrf.mxu1 }
 0x621   :  { %v6774_v33 = vadd.f32 %v11830_v15, %v14188_v32  ;;  %v8003_v32 = vld [vmem:[#allocation2 + $0x80] sm:$0xff] }
 0x622   :  { %v11854_v0 = vpop.f32.mrf.mxu0  ;;  %v14225_v43 = vpop.f32.mrf.mxu1  ;;  %8035 = vst.msk [vmem:[#allocation2 + $0x80] sm:$0xff] %vm91_vm2, %v8003_v32 }
 0x623   :  { %v14227_v45 = vadd.f32 %v11854_v0, %v6774_v33 }
 0x624   :  { %v14229_v52 = vpop.f32.mrf.mxu0  ;;  %v11833_v37 = vpop.f32.mrf.mxu1 }
 0x625   :  { %v6777_v3 = vadd.f32 %v11833_v37, %v14192_v16 }
 0x626   :  { %v11857_v63 = vpop.f32.mrf.mxu0  ;;  %v6724_v6 = vpop.f32.mrf.mxu1 }
 0x627   :  { %v14234_v4 = vadd.f32 %v11857_v63, %v6777_v3  ;;  %v6775_v53 = vadd.f32 %v6724_v6, %v14194_v35 }
 0x628   :  { %v6918_v50 = vpop.f32.mrf.mxu0  ;;  %v11834_v55 = vpop.f32.mrf.mxu1 }
 0x629   :  { %v14240_v1 = vadd.f32 %v6918_v50, %v6775_v53  ;;  %v6778_v16 = vadd.f32 %v11834_v55, %v14198_v26 }
 0x62a   :  { %v11858_v17 = vpop.f32.mrf.mxu0  ;;  %v14243_v51 = vpop.f32.mrf.mxu1 }
 0x62b   :  { %v14245_v25 = vadd.f32 %v11858_v17, %v6778_v16 }
 0x62c   :  { %v14247_v38 = vpop.f32.mrf.mxu0  ;;  %v11837_v35 = vpop.f32.mrf.mxu1 }
 0x62d   :  { %v6781_v47 = vadd.f32 %v11837_v35, %v14202_v30 }
 0x62e   :  { %v11861_v46 = vpop.f32.mrf.mxu0  ;;  %v6740_v14 = vpop.f32.mrf.mxu1 }
 0x62f   :  { %v14250_v5 = vadd.f32 %v11861_v46, %v6781_v47  ;;  %v6779_v8 = vadd.f32 %v6740_v14, %v14206_v57 }
 0x630   :  { %v6934_v48 = vpop.f32.mrf.mxu0  ;;  %v11838_v56 = vpop.f32.mrf.mxu1 }
 0x631   :  { %v14253_v54 = vadd.f32 %v6934_v48, %v6779_v8  ;;  %v6782_v26 = vadd.f32 %v11838_v56, %v14210_v7 }
 0x632   :  { %v11862_v13 = vpop.f32.mrf.mxu0  ;;  %v14256_v23 = vpop.f32.mrf.mxu1 }
 0x633   :  { %v14258_v41 = vadd.f32 %v11862_v13, %v6782_v26 }
 0x634   :  { %v14260_v11 = vpop.f32.mrf.mxu0  ;;  %v11841_v30 = vpop.f32.mrf.mxu1 }
 0x636   :  { %v11865_v44 = vpop.f32.mrf.mxu0  ;;  %v6756_v21 = vpop.f32.mrf.mxu1 }
 0x638   :  { %v6950_v24 = vpop.f32.mrf.mxu0  ;;  %v11842_v27 = vpop.f32.mrf.mxu1 }
 0x63a   :  { %v11866_v40 = vpop.f32.mrf.mxu0  ;;  %v6759_v57 = vpop.f32.mrf.mxu1 }
 0x63c   :  { %v6953_v15 = vpop.f32.mrf.mxu0  ;;  %v11877_v33 = vpop.f32.mrf.mxu1 }
 0x63e   :  { %v11901_v0 = vpop.f32.mrf.mxu0  ;;  %v7096_v37 = vpop.f32.mrf.mxu1 }
 0x640   :  { %v7290_v3 = vpop.f32.mrf.mxu0  ;;  %v11878_v7 = vpop.f32.mrf.mxu1 }
 0x641   :  { %v7162_v29 = vadd.f32 %v11878_v7, %v14227_v45 }
 0x642   :  { %v11902_v63 = vpop.f32.mrf.mxu0  ;;  %v7099_v6 = vpop.f32.mrf.mxu1 }
 0x644   :  { %v7293_v12 = vpop.f32.mrf.mxu0  ;;  %v11881_v53 = vpop.f32.mrf.mxu1 }
 0x646   :  { %v14262_v32 = vpop.f32.mrf.mxu0  ;;  %v7112_v50 = vpop.f32.mrf.mxu1 }
 0x648   :  { %v14264_v55 = vpop.f32.mrf.mxu0  ;;  %v14266_v16 = vpop.f32.mrf.mxu1 }
 0x64a   :  { %v14268_v17 = vpop.f32.mrf.mxu0  ;;  %v14270_v35 = vpop.f32.mrf.mxu1 }
 0x64c   :  { %v14272_v47 = vpop.f32.mrf.mxu0  ;;  %v14274_v46 = vpop.f32.mrf.mxu1 }
 0x64e   :  { %v14276_v14 = vpop.f32.mrf.mxu0  ;;  %v14278_v8 = vpop.f32.mrf.mxu1 }
 0x650   :  { %v14280_v48 = vpop.f32.mrf.mxu0  ;;  %v14282_v56 = vpop.f32.mrf.mxu1 }
 0x651   :  { %v7170_v62 = vadd.f32 %v14282_v56, %v14258_v41 }
 0x652   :  { %v14284_v26 = vpop.f32.mrf.mxu0  ;;  %v14286_v13 = vpop.f32.mrf.mxu1 }
 0x653   :  { %14899 = vst [vmem:[#allocation30_spill] sm:$0xff] %v14284_v26 }
 0x654   :  { %v14288_v30 = vpop.f32.mrf.mxu0  ;;  %v11889_v44 = vpop.f32.mrf.mxu1 }
 0x655   :  { %14900 = vst [vmem:[#allocation31_spill] sm:$0xff] %v14288_v30 }
 0x656   :  { %v11913_v21 = vpop.f32.mrf.mxu0  ;;  %v7144_v24 = vpop.f32.mrf.mxu1 }
 0x657   :  { %v6534_v24 = vadd.f32 %v14190_v36, %v14186_v49 }
 0x658   :  { %v7338_v27 = vpop.f32.mrf.mxu0  ;;  %v11890_v40 = vpop.f32.mrf.mxu1 }
 0x65a   :  { %v11914_v57 = vpop.f32.mrf.mxu0  ;;  %v7147_v15 = vpop.f32.mrf.mxu1 }
 0x65c   :  { %v7341_v37 = vpop.f32.mrf.mxu0  ;;  %v11925_v3 = vpop.f32.mrf.mxu1 }
 0x65e   :  { %v11949_v28 = vpop.f32.mrf.mxu0  ;;  %v7484_v22 = vpop.f32.mrf.mxu1 }
 0x65f   :  { %v7161_v22 = vadd.f32 %v11877_v33, %v14222_v9  ;;  %v7356_v9 = vadd.f32 %v11902_v63, %v7162_v29  ;;  %v7165_v33 = vadd.f32 %v11881_v53, %v14234_v4  ;;  %v6566_v4 = vadd.f32 %v14212_v39, %v14208_v2 }
 0x660   :  { %v7678_v42 = vpop.f32.mrf.mxu0  ;;  %v11926_v18 = vpop.f32.mrf.mxu1 }
 0x661   :  { %v6772_v42 = vadd.f32 %v14225_v43, %v6534_v24  ;;  %v7355_v26 = vadd.f32 %v11901_v0, %v7161_v22  ;;  %v6780_v53 = vadd.f32 %v14256_v23, %v6566_v4 }
 0x662   :  { %v7487_v20 = vpop.f32.mrf.mxu1  ;;  %v11950_v30 = vpop.f32.mrf.mxu0 }
 0x663   :  { %v6966_v58 = vadd.f32 %v14229_v52, %v6772_v42  ;;  %v7550_v42 = vadd.f32 %v11926_v18, %v7356_v9  ;;  %v14907_v9 = vld [vmem:[#allocation30_spill] sm:$0xff] }
 0x664   :  { %v11929_v34 = vpop.f32.mrf.mxu1  ;;  %v7681_v27 = vpop.f32.mrf.mxu0 }
 0x665   :  { %v7160_v36 = vadd.f32 %v7099_v6, %v6966_v58 }
 0x666   :  { %v7500_v61 = vpop.f32.mrf.mxu1  ;;  %v11953_v15 = vpop.f32.mrf.mxu0 }
 0x667   :  { %v7354_v52 = vadd.f32 %v7293_v12, %v7160_v36 }
 0x668   :  { %v11930_v19 = vpop.f32.mrf.mxu1  ;;  %v7694_v43 = vpop.f32.mrf.mxu0 }
 0x669   :  { %v7548_v29 = vadd.f32 %v7487_v20, %v7354_v52 }
 0x66a   :  { %v14290_v59 = vpop.f32.mrf.mxu1  ;;  %v11954_v7 = vpop.f32.mrf.mxu0 }
 0x66b   :  { %v7742_v2 = vadd.f32 %v7681_v27, %v7548_v29  ;;  %v14910_v29 = vld [vmem:[#allocation31_spill] sm:$0xff] }
 0x66c   :  { %v14292_v44 = vpop.f32.mrf.mxu1  ;;  %v7697_v20 = vpop.f32.mrf.mxu0 }
 0x66d   :  { %14901 = vst [vmem:[#allocation28_spill] sm:$0xff] %v14292_v44  ;;  %v7549_v44 = vadd.f32 %v11925_v3, %v7355_v26  ;;  %v7167_v26 = vadd.f32 %v14278_v8, %v14253_v54  ;;  %v7992_v8 = vld [vmem:[#allocation2 + $0x28] sm:$0xff] }
 0x66e   :  { %v14294_v21 = vpop.f32.mrf.mxu1  ;;  %v11957_v27 = vpop.f32.mrf.mxu0 }
 0x66f   :  { %14902 = vst [vmem:[#allocation32_spill] sm:$0xff] %v14294_v21  ;;  %v6550_v21 = vadd.f32 %v14200_v60, %v14196_v10  ;;  %v7743_v0 = vadd.f32 %v11949_v28, %v7549_v44  ;;  %v14312_v10 = vld [vmem:[#allocation8 + $0x3] ss:$0 sm:$0xff]  ;;  %v7359_v60 = vadd.f32 %v14262_v32, %v7165_v33  ;;  %v7169_v32 = vadd.f32 %v14274_v46, %v14250_v5 }
 0x670   :  { %v14298_v40 = vpop.f32.mrf.mxu1  ;;  %v7364_v33 = vadd.f32 %v14907_v9, %v7170_v62  ;;  %v7997_v9 = vld [vmem:[#allocation2 + $0x50] sm:$0xff] }
 0x671   :  { %14903 = vst [vmem:[#allocation27_spill] sm:$0xff] %v14298_v40  ;;  %v6776_v40 = vadd.f32 %v14243_v51, %v6550_v21  ;;  %v7166_v51 = vadd.f32 %v14266_v16, %v14245_v25  ;;  %v7553_v6 = vadd.f32 %v11929_v34, %v7359_v60  ;;  %v7363_v44 = vadd.f32 %v14276_v14, %v7169_v32 }
 0x672   :  { %v14302_v57 = vpop.f32.mrf.mxu1 }
 0x673   :  { %14904 = vst [vmem:[#allocation29_spill] sm:$0xff] %v14302_v57  ;;  %v6970_v45 = vadd.f32 %v14247_v38, %v6776_v40  ;;  %v7744_v38 = vadd.f32 %v11950_v30, %v7550_v42  ;;  %v7360_v16 = vadd.f32 %v14268_v17, %v7166_v51  ;;  %v7747_v3 = vadd.f32 %v11953_v15, %v7553_v6 }
 0x674   :  { %v11937_v37 = vpop.f32.mrf.mxu1  ;;  %v6974_v17 = vadd.f32 %v14260_v11, %v6780_v53  ;;  %v7361_v11 = vadd.f32 %v14280_v48, %v7167_v26  ;;  %v7993_v53 = vld [vmem:[#allocation2 + $0x30] sm:$0xff]  ;;  %v7996_v26 = vld [vmem:[#allocation2 + $0x48] sm:$0xff] }
 0x675   :  { %v7163_v37 = vadd.f32 %v7112_v50, %v14240_v1  ;;  %v7164_v18 = vadd.f32 %v14270_v35, %v6970_v45  ;;  %v7554_v5 = vadd.f32 %v11930_v19, %v7360_v16 }
 0x676   :  { %v7532_v49 = vpop.f32.mrf.mxu1  ;;  %v7168_v14 = vadd.f32 %v14286_v13, %v6974_v17 }
 0x677   :  { %v7357_v1 = vadd.f32 %v14264_v55, %v7163_v37  ;;  %v7991_v55 = vld [vmem:[#allocation2 + $0x20] sm:$0xff]  ;;  %v7358_v34 = vadd.f32 %v14272_v47, %v7164_v18  ;;  %v7748_v49 = vadd.f32 %v11954_v7, %v7554_v5  ;;  %v14908_v37 = vld [vmem:[#allocation32_spill] sm:$0xff] }
 0x678   :  { %v11938_v24 = vpop.f32.mrf.mxu1  ;;  %v7555_v52 = vadd.f32 %v14908_v37, %v7361_v11 }
 0x679   :  { %v7551_v25 = vadd.f32 %v7500_v61, %v7357_v1  ;;  %v7552_v54 = vadd.f32 %v14290_v59, %v7358_v34  ;;  %v7990_v59 = vld [vmem:[#allocation2 + $0x18] sm:$0xff] }
 0x67a   :  { %v7535_v57 = vpop.f32.mrf.mxu1 }
 0x67b   :  { %v7745_v21 = vadd.f32 %v7694_v43, %v7551_v25  ;;  %v14905_v57 = vld [vmem:[#allocation28_spill] sm:$0xff]  ;;  %v7746_v42 = vadd.f32 %v7697_v20, %v7552_v54  ;;  %v7999_v54 = vld [vmem:[#allocation2 + $0x60] sm:$0xff] }
 0x67c   :  { %v11973_v58 = vpop.f32.mrf.mxu1  ;;  %v7557_v41 = vadd.f32 %v14905_v57, %v7363_v44  ;;  %v7994_v44 = vld [vmem:[#allocation2 + $0x38] sm:$0xff] }
 0x67d   :  { %v7937_v63 = vadd.f32 %v11973_v58, %v7743_v0  ;;  %v7710_v0 = vpop.f32.mrf.mxu0  ;;  %v7995_v58 = vld [vmem:[#allocation2 + $0x40] sm:$0xff] }
 0x67e   :  { %v7872_v28 = vpop.f32.mrf.mxu1  ;;  %v7751_v4 = vadd.f32 %v11957_v27, %v7557_v41  ;;  %v7749_v20 = vadd.f32 %v7710_v0, %v7555_v52  ;;  %v12385_v0 = vld [vmem:[#allocation9 + $0x70] sm:$0xff]  }
 0x67f   :  { %v7959_v12 = vadd.f32 %v14312_v10, %v7937_v63  ;;  %v7362_v63 = vadd.f32 %v14910_v29, %v7168_v14  ;;  %v14911_v28 = vld [vmem:[#allocation27_spill] sm:$0xff] }
 0x680   :  { %v11974_v50 = vpop.f32.mrf.mxu1 }
 0x681   :  { %v7975_v39 = vsel %vm12790_vm12, %v7959_v12, 0.0  ;;  %v7938_v35 = vadd.f32 %v11974_v50, %v7744_v38  ;;  %v7558_v38 = vadd.f32 %v14911_v28, %v7364_v33  ;;  %v11958_v50 = vpop.f32.mrf.mxu0  ;;  %v12383_v28 = vld [vmem:[#allocation9 + $0x48] sm:$0xff]  }
 0x682   :  { %v8007_v23 = vadd.f32 %v7991_v55, %v7975_v39  ;;  %v7875_v30 = vpop.f32.mrf.mxu1  ;;  %v14913_v39 = vld [vmem:[#allocation29_spill] sm:$0xff] }
 0x683   :  { %v7960_v61 = vadd.f32 %v14312_v10, %v7938_v35  ;;  %v7936_v46 = vadd.f32 %v7875_v30, %v7742_v2  ;;  %v7556_v55 = vadd.f32 %v14913_v39, %v7362_v63  ;;  %v7713_v27 = vpop.f32.mrf.mxu0  ;;  %v12386_v39 = vld [vmem:[#allocation9 + $0x40] sm:$0xff]  }
 0x684   :  { %8023 = vst.msk [vmem:[#allocation2 + $0x20] sm:$0xff] %vm91_vm2, %v8007_v23  ;;  %v11977_v47 = vpop.f32.mrf.mxu1  ;;  %v12388_v35 = vld [vmem:[#allocation9 + $0x60] sm:$0xff]  }
 0x685   :  { %v7976_v19 = vsel %vm12805_vm1, %v7960_v61, 0.0  ;;  %v7958_v40 = vadd.f32 %v14312_v10, %v7936_v46  ;;  %v7941_v22 = vadd.f32 %v11977_v47, %v7747_v3  ;;  %v7752_v61 = vadd.f32 %v11958_v50, %v7558_v38  ;;  %v14920_v38 = vld [vmem:[#allocation15_spill] sm:$0xff] }
 0x686   :  { %v8008_v56 = vadd.f32 %v7992_v8, %v7976_v19  ;;  %v7888_v15 = vpop.f32.mrf.mxu1  ;;  %v7750_v8 = vadd.f32 %v7713_v27, %v7556_v55 }
 0x687   :  { %v7974_v43 = vsel %vm12815_vm4, %v7958_v40, 0.0  ;;  %v7963_v31 = vadd.f32 %v14312_v10, %v7941_v22  ;;  %v7939_v24 = vadd.f32 %v7888_v15, %v7745_v21 }
 0x688   :  { %8024 = vst.msk [vmem:[#allocation2 + $0x28] sm:$0xff] %vm91_vm2, %v8008_v56  ;;  %v8006_v48 = vadd.f32 %v7990_v59, %v7974_v43  ;;  %v11978_v13 = vpop.f32.mrf.mxu1  ;;  %v12382_v59 = vld [vmem:[#allocation9 + $0x50] sm:$0xff]  }
 0x689   :  { %v7979_v7 = vsel %vm12826_vm8, %v7963_v31, 0.0  ;;  %v7961_v60 = vadd.f32 %v14312_v10, %v7939_v24  ;;  %v7942_v51 = vadd.f32 %v11978_v13, %v7748_v49  ;;  %v8000_v13 = vld [vmem:[#allocation2 + $0x68] sm:$0xff] }
 0x68a   :  { %8022 = vst.msk [vmem:[#allocation2 + $0x18] sm:$0xff] %vm91_vm2, %v8006_v48  ;;  %v8011_v1 = vadd.f32 %v7995_v58, %v7979_v7  ;;  %v7891_v18 = vpop.f32.mrf.mxu1 }
 0x68b   :  { %v7977_v12 = vsel %vm12832_vm9, %v7961_v60, 0.0  ;;  %v7964_v32 = vadd.f32 %v14312_v10, %v7942_v51  ;;  %v7940_v25 = vadd.f32 %v7891_v18, %v7746_v42  ;;  %v14919_v60 = vld [vmem:[#allocation25_spill] sm:$0xff] }
 0x68c   :  { %8027 = vst.msk [vmem:[#allocation2 + $0x40] sm:$0xff] %vm91_vm2, %v8011_v1  ;;  %v8009_v16 = vadd.f32 %v7993_v53, %v7977_v12  ;;  %v11981_v2 = vpop.f32.mrf.mxu1  ;;  %v12387_v53 = vld [vmem:[#allocation9 + $0x68] sm:$0xff]  }
 0x68d   :  { %v7980_v34 = vsel %vm12841_vm0, %v7964_v32, 0.0  ;;  %v7962_v23 = vadd.f32 %v14312_v10, %v7940_v25  ;;  %v7945_v30 = vadd.f32 %v11981_v2, %v7751_v4 }
 0x68e   :  { %8025 = vst.msk [vmem:[#allocation2 + $0x30] sm:$0xff] %vm91_vm2, %v8009_v16  ;;  %v8012_v3 = vadd.f32 %v7996_v26, %v7980_v34  ;;  %v7904_v5 = vpop.f32.mrf.mxu1 }
 0x68f   :  { %v7978_v17 = vsel %vm12852_vm14, %v7962_v23, 0.0  ;;  %v7967_v62 = vadd.f32 %v14312_v10, %v7945_v30  ;;  %v7943_v21 = vadd.f32 %v7904_v5, %v7749_v20  ;;  %v8074_v42 = vld [vmem:[#allocation2 + $0x26] sm:$0xff] }
 0x690   :  { %8028 = vst.msk [vmem:[#allocation2 + $0x48] sm:$0xff] %vm91_vm2, %v8012_v3  ;;  %v8010_v47 = vadd.f32 %v7994_v44, %v7978_v17  ;;  %v11982_v19 = vpop.f32.mrf.mxu1  ;;  %v8042_v29 = vld [vmem:[#allocation2 + $0x25] sm:$0xff] }
 0x691   :  { %v7983_v22 = vsel %vm12860_vm3, %v7967_v62, 0.0  ;;  %v7965_v11 = vadd.f32 %v14312_v10, %v7943_v21  ;;  %v7946_v14 = vadd.f32 %v11982_v19, %v7752_v61  ;;  %v8072_v57 = vld [vmem:[#allocation2 + $0x16] sm:$0xff]  ;;  %v8073_v41 = vld [vmem:[#allocation2 + $0x1e] sm:$0xff] }
 0x692   :  { %v8040_v56 = vld [vmem:[#allocation2 + $0x15] sm:$0xff]  ;;  %8026 = vst.msk [vmem:[#allocation2 + $0x38] sm:$0xff] %vm91_vm2, %v8010_v47  ;;  %v8015_v15 = vadd.f32 %v7999_v54, %v7983_v22  ;;  %v7907_v49 = vpop.f32.mrf.mxu1  ;;  %v8087_v36 = vpack.c.bf16 %v8073_v41, %v8072_v57  ;;  %v8041_v43 = vld [vmem:[#allocation2 + $0x1d] sm:$0xff] }
 0x693   :  { %v7981_v24 = vsel %vm12879_vm7, %v7965_v11, 0.0  ;;  %v7968_v33 = vadd.f32 %v14312_v10, %v7946_v14  ;;  %v7944_v37 = vadd.f32 %v7907_v49, %v7750_v8  ;;  %v8055_v52 = vpack.c.bf16 %v8041_v43, %v8040_v56  ;;  %v12389_v61 = vld [vmem:[#allocation9 + $0x98] sm:$0xff]   ;;  %v8084_v14 = vld [vmem:[#allocation2 + $0x76] sm:$0xff] }
 0x694   :  { %8031 = vst.msk [vmem:[#allocation2 + $0x60] sm:$0xff] %vm91_vm2, %v8015_v15  ;;  %v8013_v48 = vadd.f32 %v7997_v9, %v7981_v24  ;;  %11996 = vmatmul.mubr.msk.bf16.vlgmr.msra.gmra.mxu0 %vm91_vm2, %v8087_v36  ;;  %v12392_v17 = vld [vmem:[#allocation9 + $0xb8] sm:$0xff]   ;;  %v8052_v41 = vld [vmem:[#allocation2 + $0x75] sm:$0xff]  ;;  %v8393_v15 = vld [vmem:[#allocation2 + $0x7] sm:$0xff] }
 0x695   :  { %v7984_v7 = vsel %vm12894_vm10, %v7968_v33, 0.0  ;;  %v7966_v58 = vadd.f32 %v14312_v10, %v7944_v37  ;;  %12020 = vmatmul.mubr.msk.bf16.vlgmr.msra.gmra.mxu1 %vm91_vm2, %v8055_v52  ;;  %12036 = vmatpush3.bf16.msra.mxu0 %v14919_v60  ;;  %v8075_v51 = vld [vmem:[#allocation2 + $0x2e] sm:$0xff]  ;;  %v7998_v10 = vld [vmem:[#allocation2 + $0x58] sm:$0xff] }
 0x696   :  { %v8043_v63 = vld [vmem:[#allocation2 + $0x2d] sm:$0xff]  ;;  %8029 = vst.msk [vmem:[#allocation2 + $0x50] sm:$0xff] %vm91_vm2, %v8013_v48  ;;  %v8016_v4 = vadd.f32 %v8000_v13, %v7984_v7  ;;  %v8088_v1 = vpack.c.bf16 %v8075_v51, %v8074_v42  ;;  %12037 = vmatprep.subr.bf16.mxu0 %v12382_v59  ;;  %12060 = vmatpush3.bf16.msra.mxu1 %v14920_v38  ;;  %v8085_v57 = vld [vmem:[#allocation2 + $0x7e] sm:$0xff]  ;;  %v12390_v13 = vld [vmem:[#allocation9 + $0x90] sm:$0xff]  }
 0x697   :  { %v8056_v18 = vpack.c.bf16 %v8043_v63, %v8042_v29  ;;  %v7982_v12 = vsel %vm12928_vm15, %v7966_v58, 0.0  ;;  %12061 = vmatprep.subr.bf16.mxu1 %v12385_v0  ;;  %v8078_v34 = vld [vmem:[#allocation2 + $0x46] sm:$0xff]  ;;  %v8053_v56 = vld [vmem:[#allocation2 + $0x7d] sm:$0xff]  ;;  %v8093_v49 = vpack.c.bf16 %v8085_v57, %v8084_v14  ;;  %v8587_v36 = vld [vmem:[#allocation2 + $0xf] sm:$0xff] }
 0x698   :  { %8032 = vst.msk [vmem:[#allocation2 + $0x68] sm:$0xff] %vm91_vm2, %v8016_v4  ;;  %v8014_v32 = vadd.f32 %v7998_v10, %v7982_v12  ;;  %11999 = vmatprep.mubr.msk.bf16.mxu0 %vm91_vm2, %v8088_v1  ;;  %v8046_v23 = vld [vmem:[#allocation2 + $0x45] sm:$0xff]  ;;  %v8061_v43 = vpack.c.bf16 %v8053_v56, %v8052_v41  ;;  %v8409_v31 = vpack.c.bf16 %v8587_v36, %v8393_v15  ;;  %v8398_v33 = vld [vmem:[#allocation2 + $0x2f] sm:$0xff] }
 0x699   :  { %12023 = vmatprep.mubr.msk.bf16.mxu1 %vm91_vm2, %v8056_v18  ;;  %v8076_v25 = vld [vmem:[#allocation2 + $0x36] sm:$0xff]  ;;  %v8077_v20 = vld [vmem:[#allocation2 + $0x3e] sm:$0xff]  ;;  %12038 = vmatpush3.bf16.msra.mxu0 %v12382_v59  ;;  %v12391_v58 = vld [vmem:[#allocation9 + $0x88] sm:$0xff]  }
 0x69a   :  { %v8044_v50 = vld [vmem:[#allocation2 + $0x35] sm:$0xff]  ;;  %8030 = vst.msk [vmem:[#allocation2 + $0x58] sm:$0xff] %vm91_vm2, %v8014_v32  ;;  %v8089_v16 = vpack.c.bf16 %v8077_v20, %v8076_v25  ;;  %v8045_v2 = vld [vmem:[#allocation2 + $0x3d] sm:$0xff]  ;;  %12039 = vmatprep.subr.bf16.mxu0 %v12383_v28  ;;  %12062 = vmatpush3.bf16.msra.mxu1 %v12385_v0  ;;  %v8590_v0 = vld [vmem:[#allocation2 + $0x27] sm:$0xff] }
 0x69b   :  { %v8057_v55 = vpack.c.bf16 %v8045_v2, %v8044_v50  ;;  %12063 = vmatprep.subr.bf16.mxu1 %v12387_v53  ;;  %v8588_v59 = vld [vmem:[#allocation2 + $0x17] sm:$0xff]  ;;  %v8396_v9 = vld [vmem:[#allocation2 + $0x1f] sm:$0xff]  ;;  %v8411_v42 = vpack.c.bf16 %v8398_v33, %v8590_v0  ;;  %v12395_v29 = vld [vmem:[#allocation9 + $0xa8] sm:$0xff]  }
 0x69c   :  { %12000 = vmatmul.mubr.msk.bf16.gmra.mxu0 %vm91_vm2, %v8089_v16  ;;  %v8603_v24 = vpack.c.bf16 %v8588_v59, %v8587_v36  ;;  %v8592_v37 = vld [vmem:[#allocation2 + $0x37] sm:$0xff]  ;;  %v8410_v52 = vpack.c.bf16 %v8396_v9, %v8588_v59  ;;  %v8604_v48 = vpack.c.bf16 %v8590_v0, %v8396_v9  ;;  %v8400_v60 = vld [vmem:[#allocation2 + $0x3f] sm:$0xff]  ;;  %v8594_v1 = vld [vmem:[#allocation2 + $0x47] sm:$0xff] }
 0x69d   :  { %12024 = vmatmul.mubr.msk.bf16.gmra.mxu1 %vm91_vm2, %v8057_v55  ;;  %v8079_v26 = vld [vmem:[#allocation2 + $0x4e] sm:$0xff]  ;;  %12040 = vmatpush3.bf16.msra.mxu0 %v12383_v28  ;;  %v8605_v45 = vpack.c.bf16 %v8592_v37, %v8398_v33  ;;  %v12393_v7 = vld [vmem:[#allocation9 + $0xb0] sm:$0xff]   ;;  %v8412_v4 = vpack.c.bf16 %v8400_v60, %v8592_v37  ;;  %v8606_v18 = vpack.c.bf16 %v8594_v1, %v8400_v60  ;;  %v12394_v38 = vld [vmem:[#allocation9 + $0x80] sm:$0xff]  }
 0x69e   :  { %v8047_v30 = vld [vmem:[#allocation2 + $0x4d] sm:$0xff]  ;;  %v8090_v3 = vpack.c.bf16 %v8079_v26, %v8078_v34  ;;  %12041 = vmatprep.subr.bf16.mxu0 %v12386_v39  ;;  %12064 = vmatpush3.bf16.msra.mxu1 %v12387_v53  ;;  %v12397_v53 = vld [vmem:[#allocation9 + $0xd8] sm:$0xff]   ;;  %v12398_v57 = vld [vmem:[#allocation9 + $0xd0] sm:$0xff]  }
 0x69f   :  { %v8058_v5 = vpack.c.bf16 %v8047_v30, %v8046_v23  ;;  %v8082_v46 = vld [vmem:[#allocation2 + $0x66] sm:$0xff]  ;;  %12065 = vmatprep.subr.bf16.mxu1 %v12388_v35  ;;  %v8083_v44 = vld [vmem:[#allocation2 + $0x6e] sm:$0xff]  ;;  %v12400_v20 = vld [vmem:[#allocation9 + $0xf8] sm:$0xff]  }
 0x6a0   :  { %12003 = vmatprep.mubr.msk.bf16.mxu0 %vm91_vm2, %v8090_v3  ;;  %v8050_v62 = vld [vmem:[#allocation2 + $0x65] sm:$0xff]  ;;  %v8051_v21 = vld [vmem:[#allocation2 + $0x6d] sm:$0xff]  ;;  %v8092_v22 = vpack.c.bf16 %v8083_v44, %v8082_v46  ;;  %v8600_v50 = vld [vmem:[#allocation2 + $0x77] sm:$0xff] }
 0x6a1   :  { %12027 = vmatprep.mubr.msk.bf16.mxu1 %vm91_vm2, %v8058_v5  ;;  %v8080_v27 = vld [vmem:[#allocation2 + $0x56] sm:$0xff]  ;;  %v8081_v47 = vld [vmem:[#allocation2 + $0x5e] sm:$0xff]  ;;  %12042 = vmatpush3.bf16.msra.mxu0 %v12386_v39  ;;  %v8060_v11 = vpack.c.bf16 %v8051_v21, %v8050_v62  ;;  %v12396_v12 = vld [vmem:[#allocation9 + $0xa0] sm:$0xff]  }
 0x6a2   :  { %v8048_v54 = vld [vmem:[#allocation2 + $0x55] sm:$0xff]  ;;  %v8091_v19 = vpack.c.bf16 %v8081_v47, %v8080_v27  ;;  %v8049_v8 = vld [vmem:[#allocation2 + $0x5d] sm:$0xff]  ;;  %12066 = vmatpush3.bf16.msra.mxu1 %v12388_v35  ;;  %12083 = vmatprep.subr.bf16.mxu0 %v12389_v61  ;;  %v8598_v32 = vld [vmem:[#allocation2 + $0x67] sm:$0xff]  ;;  %v11961_v27 = vpop.f32.mrf.mxu0 }
 0x6a3   :  { %v8059_v40 = vpack.c.bf16 %v8049_v8, %v8048_v54  ;;  %12107 = vmatprep.subr.bf16.mxu1 %v12392_v17  ;;  %v8402_v51 = vld [vmem:[#allocation2 + $0x4f] sm:$0xff]  ;;  %v8596_v63 = vld [vmem:[#allocation2 + $0x57] sm:$0xff]  ;;  %v8404_v10 = vld [vmem:[#allocation2 + $0x5f] sm:$0xff] }
 0x6a4   :  { %12004 = vmatmul.mubr.msk.bf16.gmra.mxu0 %vm91_vm2, %v8091_v19  ;;  %v8413_v28 = vpack.c.bf16 %v8402_v51, %v8594_v1  ;;  %v8607_v6 = vpack.c.bf16 %v8596_v63, %v8402_v51  ;;  %v8406_v25 = vld [vmem:[#allocation2 + $0x6f] sm:$0xff]  ;;  %v8414_v16 = vpack.c.bf16 %v8404_v10, %v8596_v63  ;;  %v8608_v2 = vpack.c.bf16 %v8598_v32, %v8404_v10  ;;  %v8408_v35 = vld [vmem:[#allocation2 + $0x7f] sm:$0xff]  ;;  %v8602_v34 = vld [vmem:[#allocation2 + $0x87] sm:$0xff] }
 0x6a5   :  { %12028 = vmatmul.mubr.msk.bf16.gmra.mxu1 %vm91_vm2, %v8059_v40  ;;  %12007 = vmatprep.mubr.msk.bf16.mxu0 %vm91_vm2, %v8092_v22  ;;  %v8415_v39 = vpack.c.bf16 %v8406_v25, %v8598_v32  ;;  %v8609_v55 = vpack.c.bf16 %v8600_v50, %v8406_v25  ;;  %v8416_v26 = vpack.c.bf16 %v8408_v35, %v8600_v50  ;;  %v8781_v23 = vld [vmem:[#allocation2 + $0x10] sm:$0xff]  ;;  %v8782_v30 = vld [vmem:[#allocation2 + $0x18] sm:$0xff]  ;;  %v8784_v44 = vld [vmem:[#allocation2 + $0x28] sm:$0xff]  ;;  %v7726_v22 = vpop.f32.mrf.mxu0 }
 0x6a6   :  { %12031 = vmatprep.mubr.msk.bf16.mxu1 %vm91_vm2, %v8060_v11  ;;  %v8610_v3 = vpack.c.bf16 %v8602_v34, %v8408_v35  ;;  %v8975_v5 = vld [vmem:[#allocation2 + $0x11] sm:$0xff]  ;;  %v8797_v46 = vpack.c.bf16 %v8782_v30, %v8781_v23  ;;  %v8783_v62 = vld [vmem:[#allocation2 + $0x20] sm:$0xff]  ;;  %v14422_v21 = vld [vmem:[#allocation2 + $0x29] sm:$0xff] }
 0x6a7   :  { %v8786_v47 = vld [vmem:[#allocation2 + $0x38] sm:$0xff]  ;;  %v8798_v8 = vpack.c.bf16 %v8784_v44, %v8783_v62  ;;  %v14428_v40 = vld [vmem:[#allocation2 + $0x21] sm:$0xff]  ;;  %v8785_v14 = vld [vmem:[#allocation2 + $0x30] sm:$0xff] }
 0x6a8   :  { %v14424_v54 = vld [vmem:[#allocation2 + $0x31] sm:$0xff]  ;;  %v14426_v19 = vld [vmem:[#allocation2 + $0x39] sm:$0xff]  ;;  %v8992_v11 = vpack.c.bf16 %v14422_v21, %v14428_v40  ;;  %v8799_v41 = vpack.c.bf16 %v8786_v47, %v8785_v14  ;;  %v8788_v59 = vld [vmem:[#allocation2 + $0x48] sm:$0xff] }
 0x6a9   :  { %v8993_v56 = vpack.c.bf16 %v14426_v19, %v14424_v54  ;;  %v12401_v15 = vld [vmem:[#allocation9 + $0xf0] sm:$0xff]   ;;  %v12399_v36 = vld [vmem:[#allocation9 + $0xc8] sm:$0xff]   ;;  %v8787_v37 = vld [vmem:[#allocation2 + $0x40] sm:$0xff]  ;;  %v9186_v44 = vpack.c.bf16 %v14424_v54, %v14422_v21 }
 0x6aa   :  { %v8790_v9 = vld [vmem:[#allocation2 + $0x58] sm:$0xff]  ;;  %v12403_v33 = vld [vmem:[#allocation9 + $0xe8] sm:$0xff]   ;;  %v12402_v60 = vld [vmem:[#allocation9 + $0xc0] sm:$0xff]  }
 0x6ab   :  { %v14442_v0 = vld [vmem:[#allocation2 + $0x59] sm:$0xff]  ;;  %v12404_v63 = vld [vmem:[#allocation9 + $0xe0] sm:$0xff]   ;;  %v8793_v1 = vld [vmem:[#allocation2 + $0x70] sm:$0xff] }
 0x6ac   :  { %12008 = vmatmul.mubr.msk.bf16.gmra.mxu0 %vm91_vm2, %v8093_v49  ;;  %v11962_v49 = vpop.f32.mrf.mxu0  ;;  %v14456_v10 = vld [vmem:[#allocation2 + $0x69] sm:$0xff]  ;;  %v14458_v25 = vld [vmem:[#allocation2 + $0x71] sm:$0xff]  ;;  %v9363_v23 = vld [vmem:[#allocation2 + $0x1a] sm:$0xff] }
 0x6ad   :  { %12032 = vmatmul.mubr.msk.bf16.gmra.mxu1 %vm91_vm2, %v8061_v43  ;;  %12043 = vmatprep.mubr.msk.bf16.mxu0 %vm91_vm2, %v8409_v31  ;;  %v11985_v31 = vpop.f32.mrf.mxu1  ;;  %v14467_v35 = vld [vmem:[#allocation2 + $0x89] sm:$0xff]  ;;  %v9370_v21 = vld [vmem:[#allocation2 + $0x52] sm:$0xff]  ;;  %v9371_v54 = vld [vmem:[#allocation2 + $0x5a] sm:$0xff] }
 0x6ae   :  { %12067 = vmatprep.mubr.msk.bf16.mxu1 %vm91_vm2, %v8603_v24  ;;  %v7729_v43 = vpop.f32.mrf.mxu0  ;;  %v14438_v24 = vld [vmem:[#allocation2 + $0x49] sm:$0xff]  ;;  %v9375_v49 = vld [vmem:[#allocation2 + $0x7a] sm:$0xff] }
 0x6af   :  { %v9365_v62 = vld [vmem:[#allocation2 + $0x2a] sm:$0xff]  ;;  %v9368_v47 = vld [vmem:[#allocation2 + $0x42] sm:$0xff] }
 0x6b0   :  { %v12407_v22 = vld [vmem:[#allocation9 + $0x108] sm:$0xff]  }
 0x6b1   :  { %v9369_v14 = vld [vmem:[#allocation2 + $0x4a] sm:$0xff] }
 0x6b2   :  { %v9373_v43 = vld [vmem:[#allocation2 + $0x6a] sm:$0xff] }
 0x6b4   :  { %12044 = vmatmul.mubr.msk.bf16.vlgmr.msra.gmra.mxu0 %vm91_vm2, %v8410_v52  ;;  %v14440_v52 = vld [vmem:[#allocation2 + $0x51] sm:$0xff] }
 0x6b5   :  { %12068 = vmatmul.mubr.msk.bf16.vlgmr.msra.gmra.mxu1 %vm91_vm2, %v8604_v48  ;;  %12084 = vmatpush3.bf16.msra.mxu0 %v12389_v61  ;;  %v14415_v61 = vld [vmem:[#allocation2 + $0x19] sm:$0xff]  ;;  %v7920_v48 = vpop.f32.mrf.mxu1 }
 0x6b6   :  { %12047 = vmatprep.mubr.msk.bf16.mxu0 %vm91_vm2, %v8411_v42  ;;  %12071 = vmatprep.mubr.msk.bf16.mxu1 %vm91_vm2, %v8605_v45  ;;  %v14444_v42 = vld [vmem:[#allocation2 + $0x41] sm:$0xff]  ;;  %v8789_v45 = vld [vmem:[#allocation2 + $0x50] sm:$0xff]  ;;  %v9185_v30 = vpack.c.bf16 %v14428_v40, %v14415_v61 }
 0x6b7   :  { %12085 = vmatprep.subr.bf16.mxu0 %v12390_v13  ;;  %12108 = vmatpush3.bf16.msra.mxu1 %v12392_v17  ;;  %v8991_v17 = vpack.c.bf16 %v14415_v61, %v8975_v5  ;;  %v11986_v51 = vpop.f32.mrf.mxu1  ;;  %v9187_v61 = vpack.c.bf16 %v14444_v42, %v14426_v19 }
 0x6b8   :  { %12109 = vmatprep.subr.bf16.mxu1 %v12393_v7  ;;  %v9559_v51 = vld [vmem:[#allocation2 + $0x2b] sm:$0xff] }
 0x6b9   :  { %12086 = vmatpush3.bf16.msra.mxu0 %v12390_v13  ;;  %v8800_v13 = vpack.c.bf16 %v8788_v59, %v8787_v37  ;;  %v9374_v59 = vld [vmem:[#allocation2 + $0x72] sm:$0xff] }
 0x6ba   :  { %12087 = vmatprep.subr.bf16.mxu0 %v12391_v58  ;;  %v9184_v37 = vld [vmem:[#allocation2 + $0x91] sm:$0xff] }
 0x6bb   :  { %12110 = vmatpush3.bf16.msra.mxu1 %v12393_v7  ;;  %v8994_v7 = vpack.c.bf16 %v14438_v24, %v14444_v42  ;;  %v9192_v48 = vpack.c.bf16 %v9184_v37, %v14467_v35 }
 0x6bc   :  { %12048 = vmatmul.mubr.msk.bf16.gmra.mxu0 %vm91_vm2, %v8412_v4  ;;  %12111 = vmatprep.subr.bf16.mxu1 %v12395_v29  ;;  %v7923_v4 = vpop.f32.mrf.mxu1 }
 0x6bd   :  { %12072 = vmatmul.mubr.msk.bf16.gmra.mxu1 %vm91_vm2, %v8606_v18  ;;  %12051 = vmatprep.mubr.msk.bf16.mxu0 %vm91_vm2, %v8413_v28  ;;  %v8794_v18 = vld [vmem:[#allocation2 + $0x78] sm:$0xff]  ;;  %v8792_v28 = vld [vmem:[#allocation2 + $0x68] sm:$0xff] }
 0x6be   :  { %12075 = vmatprep.mubr.msk.bf16.mxu1 %vm91_vm2, %v8607_v6  ;;  %12088 = vmatpush3.bf16.msra.mxu0 %v12391_v58  ;;  %v8801_v58 = vpack.c.bf16 %v8790_v9, %v8789_v45  ;;  %v12405_v6 = vld [vmem:[#allocation9 + $0x118] sm:$0xff]   ;;  %v8803_v32 = vpack.c.bf16 %v8794_v18, %v8793_v1  ;;  %v9564_v1 = vld [vmem:[#allocation2 + $0x53] sm:$0xff] }
 0x6bf   :  { %12089 = vmatprep.subr.bf16.mxu0 %v12394_v38  ;;  %12112 = vmatpush3.bf16.msra.mxu1 %v12395_v29  ;;  %v8995_v29 = vpack.c.bf16 %v14442_v0, %v14440_v52  ;;  %v9558_v45 = vld [vmem:[#allocation2 + $0x23] sm:$0xff]  ;;  %v9565_v18 = vld [vmem:[#allocation2 + $0x5b] sm:$0xff] }
 0x6c0   :  { %12113 = vmatprep.subr.bf16.mxu1 %v12396_v12 }
 0x6c2   :  { %12090 = vmatpush3.bf16.msra.mxu0 %v12394_v38  ;;  %v14454_v38 = vld [vmem:[#allocation2 + $0x79] sm:$0xff] }
 0x6c3   :  { %12114 = vmatpush3.bf16.msra.mxu1 %v12396_v12  ;;  %12131 = vmatprep.subr.bf16.mxu0 %v12397_v53  ;;  %v8985_v12 = vld [vmem:[#allocation2 + $0x61] sm:$0xff]  ;;  %v8997_v50 = vpack.c.bf16 %v14454_v38, %v14458_v25 }
 0x6c4   :  { %12052 = vmatmul.mubr.msk.bf16.gmra.mxu0 %vm91_vm2, %v8414_v16  ;;  %12155 = vmatprep.subr.bf16.mxu1 %v12400_v20  ;;  %v8996_v16 = vpack.c.bf16 %v14456_v10, %v8985_v12  ;;  %v9189_v19 = vpack.c.bf16 %v8985_v12, %v14442_v0  ;;  %v9378_v0 = vld [vmem:[#allocation2 + $0x92] sm:$0xff] }
 0x6c5   :  { %12076 = vmatmul.mubr.msk.bf16.gmra.mxu1 %vm91_vm2, %v8608_v2  ;;  %12055 = vmatprep.mubr.msk.bf16.mxu0 %vm91_vm2, %v8415_v39  ;;  %v8795_v2 = vld [vmem:[#allocation2 + $0x80] sm:$0xff]  ;;  %v8796_v39 = vld [vmem:[#allocation2 + $0x88] sm:$0xff] }
 0x6c6   :  { %12079 = vmatprep.mubr.msk.bf16.mxu1 %vm91_vm2, %v8609_v55  ;;  %v8989_v55 = vld [vmem:[#allocation2 + $0x81] sm:$0xff]  ;;  %v8804_v34 = vpack.c.bf16 %v8796_v39, %v8795_v2  ;;  %v9572_v2 = vld [vmem:[#allocation2 + $0x93] sm:$0xff] }
 0x6c7   :  { %v9191_v31 = vpack.c.bf16 %v8989_v55, %v14454_v38 }
 0x6cc   :  { %12056 = vmatmul.mubr.msk.bf16.gmra.mxu0 %vm91_vm2, %v8416_v26  ;;  %v8998_v26 = vpack.c.bf16 %v14467_v35, %v8989_v55 }
 0x6cd   :  { %12080 = vmatmul.mubr.msk.bf16.gmra.mxu1 %vm91_vm2, %v8610_v3  ;;  %12091 = vmatprep.mubr.msk.bf16.mxu0 %vm91_vm2, %v8797_v46  ;;  %v9364_v3 = vld [vmem:[#allocation2 + $0x22] sm:$0xff]  ;;  %v9366_v46 = vld [vmem:[#allocation2 + $0x32] sm:$0xff] }
 0x6ce   :  { %12115 = vmatprep.mubr.msk.bf16.mxu1 %vm91_vm2, %v8991_v17  ;;  %v9379_v5 = vpack.c.bf16 %v9364_v3, %v9363_v23  ;;  %v9367_v17 = vld [vmem:[#allocation2 + $0x3a] sm:$0xff]  ;;  %v9380_v27 = vpack.c.bf16 %v9366_v46, %v9365_v62 }
 0x6cf   :  { %v9381_v40 = vpack.c.bf16 %v9368_v47, %v9367_v17 }
 0x6d4   :  { %12092 = vmatmul.mubr.msk.bf16.vlgmr.msra.gmra.mxu0 %vm91_vm2, %v8798_v8  ;;  %v12406_v8 = vld [vmem:[#allocation9 + $0x110] sm:$0xff]  }
 0x6d5   :  { %12116 = vmatmul.mubr.msk.bf16.vlgmr.msra.gmra.mxu1 %vm91_vm2, %v8992_v11  ;;  %12132 = vmatpush3.bf16.msra.mxu0 %v12397_v53  ;;  %v8791_v53 = vld [vmem:[#allocation2 + $0x60] sm:$0xff]  ;;  %v9188_v11 = vpack.c.bf16 %v14440_v52, %v14438_v24  ;;  %v9190_v24 = vpack.c.bf16 %v14458_v25, %v14456_v10  ;;  %v9377_v52 = vld [vmem:[#allocation2 + $0x8a] sm:$0xff]  ;;  %v9568_v25 = vld [vmem:[#allocation2 + $0x73] sm:$0xff] }
 0x6d6   :  { %12095 = vmatprep.mubr.msk.bf16.mxu0 %vm91_vm2, %v8799_v41  ;;  %12119 = vmatprep.mubr.msk.bf16.mxu1 %vm91_vm2, %v8993_v56  ;;  %v9372_v41 = vld [vmem:[#allocation2 + $0x62] sm:$0xff]  ;;  %v9386_v42 = vpack.c.bf16 %v9378_v0, %v9377_v52 }
 0x6d7   :  { %12133 = vmatprep.subr.bf16.mxu0 %v12398_v57  ;;  %12156 = vmatpush3.bf16.msra.mxu1 %v12400_v20  ;;  %v8802_v20 = vpack.c.bf16 %v8792_v28, %v8791_v53  ;;  %v12408_v56 = vld [vmem:[#allocation9 + $0x100] sm:$0xff]   ;;  %v9569_v10 = vld [vmem:[#allocation2 + $0x7b] sm:$0xff] }
 0x6d8   :  { %12157 = vmatprep.subr.bf16.mxu1 %v12401_v15  ;;  %v9563_v28 = vld [vmem:[#allocation2 + $0x4b] sm:$0xff]  ;;  %v9570_v53 = vld [vmem:[#allocation2 + $0x83] sm:$0xff] }
 0x6d9   :  { %12134 = vmatpush3.bf16.msra.mxu0 %v12398_v57  ;;  %v9382_v57 = vpack.c.bf16 %v9370_v21, %v9369_v14  ;;  %v9576_v38 = vpack.c.bf16 %v9564_v1, %v9563_v28 }
 0x6da   :  { %12135 = vmatprep.subr.bf16.mxu0 %v12399_v36 }
 0x6db   :  { %12158 = vmatpush3.bf16.msra.mxu1 %v12401_v15  ;;  %v9383_v15 = vpack.c.bf16 %v9372_v41, %v9371_v54 }
 0x6dc   :  { %12096 = vmatmul.mubr.msk.bf16.gmra.mxu0 %vm91_vm2, %v8800_v13  ;;  %12159 = vmatprep.subr.bf16.mxu1 %v12403_v33  ;;  %v9557_v13 = vld [vmem:[#allocation2 + $0x1b] sm:$0xff] }
 0x6dd   :  { %12120 = vmatmul.mubr.msk.bf16.gmra.mxu1 %vm91_vm2, %v8994_v7  ;;  %12099 = vmatprep.mubr.msk.bf16.mxu0 %vm91_vm2, %v8801_v58  ;;  %v9573_v7 = vpack.c.bf16 %v9558_v45, %v9557_v13  ;;  %v9560_v58 = vld [vmem:[#allocation2 + $0x33] sm:$0xff] }
 0x6de   :  { %12123 = vmatprep.mubr.msk.bf16.mxu1 %vm91_vm2, %v8995_v29  ;;  %12136 = vmatpush3.bf16.msra.mxu0 %v12399_v36  ;;  %v9376_v36 = vld [vmem:[#allocation2 + $0x82] sm:$0xff]  ;;  %v9574_v29 = vpack.c.bf16 %v9560_v58, %v9559_v51 }
 0x6df   :  { %12137 = vmatprep.subr.bf16.mxu0 %v12402_v60  ;;  %12160 = vmatpush3.bf16.msra.mxu1 %v12403_v33  ;;  %v9385_v9 = vpack.c.bf16 %v9376_v36, %v9375_v49  ;;  %v9384_v33 = vpack.c.bf16 %v9374_v59, %v9373_v43 }
 0x6e0   :  { %12161 = vmatprep.subr.bf16.mxu1 %v12404_v63 }
 0x6e2   :  { %12138 = vmatpush3.bf16.msra.mxu0 %v12402_v60  ;;  %v9561_v60 = vld [vmem:[#allocation2 + $0x3b] sm:$0xff] }
 0x6e3   :  { %12162 = vmatpush3.bf16.msra.mxu1 %v12404_v63  ;;  %12179 = vmatprep.subr.bf16.mxu0 %v12405_v6  ;;  %v9562_v63 = vld [vmem:[#allocation2 + $0x43] sm:$0xff] }
 0x6e4   :  { %12100 = vmatmul.mubr.msk.bf16.gmra.mxu0 %vm91_vm2, %v8802_v20  ;;  %v9575_v4 = vpack.c.bf16 %v9562_v63, %v9561_v60  ;;  %v9579_v20 = vpack.c.bf16 %v9570_v53, %v9569_v10 }
 0x6e5   :  { %12124 = vmatmul.mubr.msk.bf16.gmra.mxu1 %vm91_vm2, %v8996_v16  ;;  %12103 = vmatprep.mubr.msk.bf16.mxu0 %vm91_vm2, %v8803_v32  ;;  %v9567_v32 = vld [vmem:[#allocation2 + $0x6b] sm:$0xff] }
 0x6e6   :  { %12127 = vmatprep.mubr.msk.bf16.mxu1 %vm91_vm2, %v8997_v50  ;;  %v9578_v50 = vpack.c.bf16 %v9568_v25, %v9567_v32  ;;  %v9571_v16 = vld [vmem:[#allocation2 + $0x8b] sm:$0xff] }
 0x6e7   :  { %v9580_v39 = vpack.c.bf16 %v9572_v2, %v9571_v16 }
 0x6ec   :  { %12104 = vmatmul.mubr.msk.bf16.gmra.mxu0 %vm91_vm2, %v8804_v34 }
 0x6ed   :  { %12128 = vmatmul.mubr.msk.bf16.gmra.mxu1 %vm91_vm2, %v8998_v26  ;;  %12139 = vmatprep.mubr.msk.bf16.mxu0 %vm91_vm2, %v9185_v30 }
 0x6ee   :  { %12163 = vmatprep.mubr.msk.bf16.mxu1 %vm91_vm2, %v9379_v5 }
 0x6f4   :  { %12140 = vmatmul.mubr.msk.bf16.vlgmr.msra.gmra.mxu0 %vm91_vm2, %v9186_v44 }
 0x6f5   :  { %12164 = vmatmul.mubr.msk.bf16.vlgmr.msra.gmra.mxu1 %vm91_vm2, %v9380_v27  ;;  %12180 = vmatpush3.bf16.msra.mxu0 %v12405_v6  ;;  %v9566_v6 = vld [vmem:[#allocation2 + $0x63] sm:$0xff] }
 0x6f6   :  { %12143 = vmatprep.mubr.msk.bf16.mxu0 %vm91_vm2, %v9187_v61  ;;  %12167 = vmatprep.mubr.msk.bf16.mxu1 %vm91_vm2, %v9381_v40  ;;  %v9577_v12 = vpack.c.bf16 %v9566_v6, %v9565_v18 }
 0x6f7   :  { %12181 = vmatprep.subr.bf16.mxu0 %v12406_v8 }
 0x6f9   :  { %12182 = vmatpush3.bf16.msra.mxu0 %v12406_v8 }
 0x6fa   :  { %12183 = vmatprep.subr.bf16.mxu0 %v12407_v22 }
 0x6fc   :  { %12144 = vmatmul.mubr.msk.bf16.gmra.mxu0 %vm91_vm2, %v9188_v11 }
 0x6fd   :  { %12168 = vmatmul.mubr.msk.bf16.gmra.mxu1 %vm91_vm2, %v9382_v57  ;;  %12147 = vmatprep.mubr.msk.bf16.mxu0 %vm91_vm2, %v9189_v19 }
 0x6fe   :  { %12171 = vmatprep.mubr.msk.bf16.mxu1 %vm91_vm2, %v9383_v15  ;;  %12184 = vmatpush3.bf16.msra.mxu0 %v12407_v22 }
 0x6ff   :  { %12185 = vmatprep.subr.bf16.mxu0 %v12408_v56 }
 0x702   :  { %12186 = vmatpush3.bf16.msra.mxu0 %v12408_v56 }
 0x704   :  { %12148 = vmatmul.mubr.msk.bf16.gmra.mxu0 %vm91_vm2, %v9190_v24 }
 0x705   :  { %12172 = vmatmul.mubr.msk.bf16.gmra.mxu1 %vm91_vm2, %v9384_v33  ;;  %12151 = vmatprep.mubr.msk.bf16.mxu0 %vm91_vm2, %v9191_v31 }
 0x706   :  { %12175 = vmatprep.mubr.msk.bf16.mxu1 %vm91_vm2, %v9385_v9 }
 0x70c   :  { %12152 = vmatmul.mubr.msk.bf16.gmra.mxu0 %vm91_vm2, %v9192_v48 }
 0x70d   :  { %12187 = vmatprep.mubr.msk.bf16.mxu0 %vm91_vm2, %v9573_v7  ;;  %12176 = vmatmul.mubr.msk.bf16.gmra.mxu1 %vm91_vm2, %v9386_v42 }
 0x714   :  { %12188 = vmatmul.mubr.msk.bf16.vlgmr.msra.gmra.mxu0 %vm91_vm2, %v9574_v29 }
 0x715   :  { %12191 = vmatprep.mubr.msk.bf16.mxu0 %vm91_vm2, %v9575_v4 }
 0x71c   :  { %12192 = vmatmul.mubr.msk.bf16.gmra.mxu0 %vm91_vm2, %v9576_v38 }
 0x71d   :  { %12195 = vmatprep.mubr.msk.bf16.mxu0 %vm91_vm2, %v9577_v12 }
 0x724   :  { %12196 = vmatmul.mubr.msk.bf16.gmra.mxu0 %vm91_vm2, %v9578_v50 }
 0x725   :  { %12199 = vmatprep.mubr.msk.bf16.mxu0 %vm91_vm2, %v9579_v20 }
 0x72c   :  { %12200 = vmatmul.mubr.msk.bf16.gmra.mxu0 %vm91_vm2, %v9580_v39 }
 0x754   :  { %v11997_v55 = vpop.f32.mrf.mxu0 }
 0x755   :  { %v12021_v35 = vpop.f32.mrf.mxu1 }
 0x756   :  { %v8339_v34 = vadd.f32 %v12021_v35, %v11997_v55  ;;  %v8185_v26 = vpop.f32.mrf.mxu0 }
 0x757   :  { %v8330_v23 = vpop.f32.mrf.mxu1 }
 0x758   :  { %v8331_v30 = vadd.f32 %v8330_v23, %v8185_v26  ;;  %v11998_v3 = vpop.f32.mrf.mxu0 }
 0x759   :  { %v12022_v5 = vpop.f32.mrf.mxu1 }
 0x75a   :  { %v8342_v46 = vadd.f32 %v12022_v5, %v11998_v3  ;;  %v8188_v17 = vpop.f32.mrf.mxu0 }
 0x75b   :  { %v8333_v44 = vpop.f32.mrf.mxu1 }
 0x75c   :  { %v8334_v62 = vadd.f32 %v8333_v44, %v8188_v17  ;;  %v12001_v27 = vpop.f32.mrf.mxu0 }
 0x75d   :  { %v12025_v47 = vpop.f32.mrf.mxu1 }
 0x75e   :  { %v8355_v8 = vadd.f32 %v12025_v47, %v12001_v27  ;;  %v8201_v61 = vpop.f32.mrf.mxu0 }
 0x75f   :  { %v8346_v40 = vpop.f32.mrf.mxu1 }
 0x760   :  { %v8347_v22 = vadd.f32 %v8346_v40, %v8201_v61  ;;  %v12002_v21 = vpop.f32.mrf.mxu0 }
 0x761   :  { %v12026_v54 = vpop.f32.mrf.mxu1 }
 0x762   :  { %v8358_v11 = vadd.f32 %v12026_v54, %v12002_v21  ;;  %v8204_v14 = vpop.f32.mrf.mxu0 }
 0x763   :  { %v8349_v57 = vpop.f32.mrf.mxu1 }
 0x764   :  { %v8350_v19 = vadd.f32 %v8349_v57, %v8204_v14  ;;  %v12005_v41 = vpop.f32.mrf.mxu0 }
 0x765   :  { %v12029_v56 = vpop.f32.mrf.mxu1 }
 0x766   :  { %v8371_v15 = vadd.f32 %v12029_v56, %v12005_v41  ;;  %v8217_v49 = vpop.f32.mrf.mxu0 }
 0x767   :  { %v8362_v36 = vpop.f32.mrf.mxu1 }
 0x768   :  { %v8363_v43 = vadd.f32 %v8362_v36, %v8217_v49  ;;  %v12006_v59 = vpop.f32.mrf.mxu0 }
 0x769   :  { %v12030_v31 = vpop.f32.mrf.mxu1 }
 0x76a   :  { %v8374_v24 = vadd.f32 %v12030_v31, %v12006_v59  ;;  %v8220_v9 = vpop.f32.mrf.mxu0 }
 0x76b   :  { %v8365_v33 = vpop.f32.mrf.mxu1 }
 0x76c   :  { %v8366_v37 = vadd.f32 %v8365_v33, %v8220_v9  ;;  %v12009_v52 = vpop.f32.mrf.mxu0 }
 0x76d   :  { %v12033_v0 = vpop.f32.mrf.mxu1 }
 0x76e   :  { %v8387_v48 = vadd.f32 %v12033_v0, %v12009_v52  ;;  %v8233_v13 = vpop.f32.mrf.mxu0 }
 0x76f   :  { %v8378_v42 = vpop.f32.mrf.mxu1 }
 0x770   :  { %v8379_v45 = vadd.f32 %v8378_v42, %v8233_v13  ;;  %v12010_v7 = vpop.f32.mrf.mxu0 }
 0x771   :  { %v12034_v58 = vpop.f32.mrf.mxu1 }
 0x772   :  { %v8390_v60 = vadd.f32 %v12034_v58, %v12010_v7  ;;  %v8236_v51 = vpop.f32.mrf.mxu0 }
 0x773   :  { %v8381_v29 = vpop.f32.mrf.mxu1 }
 0x774   :  { %v8382_v63 = vadd.f32 %v8381_v29, %v8236_v51  ;;  %v12045_v4 = vpop.f32.mrf.mxu0 }
 0x775   :  { %v14509_v1 = vadd.f32 %v12045_v4, %v8339_v34  ;;  %v14511_v18 = vpop.f32.mrf.mxu1 }
 0x776   :  { %v8508_v28 = vpop.f32.mrf.mxu0 }
 0x777   :  { %v14513_v38 = vadd.f32 %v8508_v28, %v8331_v30  ;;  %v14515_v6 = vpop.f32.mrf.mxu1 }
 0x778   :  { %v12046_v12 = vpop.f32.mrf.mxu0 }
 0x779   :  { %v14517_v10 = vadd.f32 %v12046_v12, %v8342_v46  ;;  %v14519_v53 = vpop.f32.mrf.mxu1 }
 0x77a   :  { %v8511_v32 = vpop.f32.mrf.mxu0 }
 0x77b   :  { %v14521_v25 = vadd.f32 %v8511_v32, %v8334_v62  ;;  %v14523_v20 = vpop.f32.mrf.mxu1 }
 0x77c   :  { %v12049_v50 = vpop.f32.mrf.mxu0 }
 0x77d   :  { %v14525_v16 = vadd.f32 %v12049_v50, %v8355_v8  ;;  %v14527_v2 = vpop.f32.mrf.mxu1 }
 0x77e   :  { %v8524_v39 = vpop.f32.mrf.mxu0 }
 0x77f   :  { %v14529_v55 = vadd.f32 %v8524_v39, %v8347_v22  ;;  %v14531_v35 = vpop.f32.mrf.mxu1 }
 0x780   :  { %v12050_v34 = vpop.f32.mrf.mxu0 }
 0x781   :  { %v14533_v26 = vadd.f32 %v12050_v34, %v8358_v11  ;;  %v14535_v23 = vpop.f32.mrf.mxu1 }
 0x782   :  { %v8527_v30 = vpop.f32.mrf.mxu0 }
 0x783   :  { %v14537_v3 = vadd.f32 %v8527_v30, %v8350_v19  ;;  %v14539_v5 = vpop.f32.mrf.mxu1 }
 0x784   :  { %v12053_v46 = vpop.f32.mrf.mxu0 }
 0x785   :  { %v14541_v17 = vadd.f32 %v12053_v46, %v8371_v15  ;;  %v14543_v44 = vpop.f32.mrf.mxu1 }
 0x786   :  { %v8540_v62 = vpop.f32.mrf.mxu0 }
 0x787   :  { %v14545_v27 = vadd.f32 %v8540_v62, %v8363_v43  ;;  %v14547_v47 = vpop.f32.mrf.mxu1 }
 0x788   :  { %v12054_v8 = vpop.f32.mrf.mxu0 }
 0x789   :  { %v14549_v61 = vadd.f32 %v12054_v8, %v8374_v24  ;;  %v14551_v40 = vpop.f32.mrf.mxu1 }
 0x78a   :  { %v8543_v22 = vpop.f32.mrf.mxu0 }
 0x78b   :  { %v14553_v21 = vadd.f32 %v8543_v22, %v8366_v37  ;;  %v14555_v54 = vpop.f32.mrf.mxu1 }
 0x78c   :  { %v12057_v11 = vpop.f32.mrf.mxu0 }
 0x78d   :  { %v14557_v14 = vadd.f32 %v12057_v11, %v8387_v48  ;;  %v14559_v57 = vpop.f32.mrf.mxu1 }
 0x78e   :  { %v8556_v19 = vpop.f32.mrf.mxu0 }
 0x78f   :  { %v14561_v41 = vadd.f32 %v8556_v19, %v8379_v45  ;;  %v14563_v56 = vpop.f32.mrf.mxu1 }
 0x790   :  { %v12058_v15 = vpop.f32.mrf.mxu0 }
 0x791   :  { %v14565_v49 = vadd.f32 %v12058_v15, %v8390_v60  ;;  %v14567_v36 = vpop.f32.mrf.mxu1 }
 0x792   :  { %14923 = vst [vmem:[#allocation28_spill] sm:$0xff] %v14567_v36  ;;  %v8559_v43 = vpop.f32.mrf.mxu0 }
 0x793   :  { %14922 = vst [vmem:[#allocation26_spill] sm:$0xff] %v14565_v49  ;;  %v14569_v59 = vadd.f32 %v8559_v43, %v8382_v63  ;;  %v14571_v31 = vpop.f32.mrf.mxu1 }
 0x794   :  { %14925 = vst [vmem:[#allocation30_spill] sm:$0xff] %v14571_v31  ;;  %v12093_v24 = vpop.f32.mrf.mxu0 }
 0x795   :  { %14924 = vst [vmem:[#allocation16_spill] sm:$0xff] %v14569_v59  ;;  %v12117_v9 = vpop.f32.mrf.mxu1 }
 0x796   :  { %v8896_v33 = vpop.f32.mrf.mxu0 }
 0x797   :  { %v9090_v37 = vpop.f32.mrf.mxu1 }
 0x798   :  { %v12094_v52 = vpop.f32.mrf.mxu0 }
 0x799   :  { %v14573_v0 = vpop.f32.mrf.mxu1 }
 0x79a   :  { %v8899_v48 = vpop.f32.mrf.mxu0 }
 0x79b   :  { %v14575_v13 = vpop.f32.mrf.mxu1 }
 0x79c   :  { %v12097_v42 = vpop.f32.mrf.mxu0 }
 0x79d   :  { %v14577_v45 = vpop.f32.mrf.mxu1 }
 0x79e   :  { %v8912_v7 = vpop.f32.mrf.mxu0 }
 0x79f   :  { %v14579_v58 = vpop.f32.mrf.mxu1 }
 0x7a0   :  { %v14581_v60 = vpop.f32.mrf.mxu0 }
 0x7a1   :  { %v14583_v51 = vpop.f32.mrf.mxu1 }
 0x7a2   :  { %v14585_v29 = vpop.f32.mrf.mxu0 }
 0x7a3   :  { %v14587_v63 = vpop.f32.mrf.mxu1 }
 0x7a4   :  { %14926 = vst [vmem:[#allocation32_spill] sm:$0xff] %v14587_v63  ;;  %v14589_v4 = vpop.f32.mrf.mxu0 }
 0x7a5   :  { %v14591_v28 = vpop.f32.mrf.mxu1 }
 0x7a6   :  { %14927 = vst [vmem:[#allocation17_spill] sm:$0xff] %v14591_v28  ;;  %v14593_v12 = vpop.f32.mrf.mxu0 }
 0x7a7   :  { %14928 = vst [vmem:[#allocation31_spill] sm:$0xff] %v14593_v12  ;;  %v14595_v32 = vpop.f32.mrf.mxu1  ;;  %v8765_v12 = vadd.f32 %v14515_v6, %v14513_v38  ;;  %v8771_v38 = vadd.f32 %v14527_v2, %v14525_v16 }
 0x7a8   :  { %14929 = vst [vmem:[#allocation27_spill] sm:$0xff] %v14595_v32  ;;  %v14597_v50 = vpop.f32.mrf.mxu0 }
 0x7a9   :  { %14930 = vst [vmem:[#allocation18_spill] sm:$0xff] %v14597_v50  ;;  %v14599_v39 = vpop.f32.mrf.mxu1 }
 0x7aa   :  { %14931 = vst [vmem:[#allocation29_spill] sm:$0xff] %v14599_v39  ;;  %v14601_v34 = vpop.f32.mrf.mxu0 }
 0x7ab   :  { %14932 = vst [vmem:[#allocation19_spill] sm:$0xff] %v14601_v34  ;;  %v14603_v30 = vpop.f32.mrf.mxu1 }
 0x7ac   :  { %14933 = vst [vmem:[#allocation20_spill] sm:$0xff] %v14603_v30  ;;  %v14605_v46 = vpop.f32.mrf.mxu0 }
 0x7ad   :  { %14934 = vst [vmem:[#allocation21_spill] sm:$0xff] %v14605_v46  ;;  %v14607_v62 = vpop.f32.mrf.mxu1 }
 0x7ae   :  { %14935 = vst [vmem:[#allocation22_spill] sm:$0xff] %v14607_v62  ;;  %v14609_v8 = vpop.f32.mrf.mxu0 }
 0x7af   :  { %14936 = vst [vmem:[#allocation23_spill] sm:$0xff] %v14609_v8  ;;  %v14611_v22 = vpop.f32.mrf.mxu1 }
 0x7b0   :  { %14937 = vst [vmem:[#allocation25_spill] sm:$0xff] %v14611_v22  ;;  %v14613_v11 = vpop.f32.mrf.mxu0 }
 0x7b1   :  { %14938 = vst [vmem:[#allocation15_spill] sm:$0xff] %v14613_v11  ;;  %v14615_v19 = vpop.f32.mrf.mxu1 }
 0x7b2   :  { %14939 = vst [vmem:[#allocation24_spill] sm:$0xff] %v14615_v19  ;;  %v14617_v15 = vpop.f32.mrf.mxu0 }
 0x7b3   :  { %14940 = vst [vmem:[#allocation33_spill] sm:$0xff] %v14617_v15  ;;  %v14619_v43 = vpop.f32.mrf.mxu1 }
 0x7b4   :  { %14941 = vst [vmem:[#allocation34_spill] sm:$0xff] %v14619_v43  ;;  %v12141_v31 = vpop.f32.mrf.mxu0  ;;  %v8767_v43 = vadd.f32 %v14511_v18, %v14509_v1  ;;  %v8766_v1 = vadd.f32 %v14523_v20, %v14521_v25  ;;  %v8965_v25 = vadd.f32 %v12097_v42, %v8771_v38 }
 0x7b5   :  { %v12165_v59 = vpop.f32.mrf.mxu1 }
 0x7b6   :  { %v9284_v39 = vpop.f32.mrf.mxu0  ;;  %v8961_v63 = vadd.f32 %v12093_v24, %v8767_v43  ;;  %v8960_v24 = vadd.f32 %v8899_v48, %v8766_v1  ;;  %v9159_v48 = vadd.f32 %v14577_v45, %v8965_v25 }
 0x7b7   :  { %v9478_v30 = vpop.f32.mrf.mxu1 }
 0x7b8   :  { %v12142_v36 = vpop.f32.mrf.mxu0  ;;  %v9155_v18 = vadd.f32 %v12117_v9, %v8961_v63  ;;  %v8772_v9 = vadd.f32 %v14535_v23, %v14533_v26  ;;  %v9154_v16 = vadd.f32 %v14575_v13, %v8960_v24  ;;  %v8775_v23 = vadd.f32 %v14543_v44, %v14541_v17 }
 0x7b9   :  { %v12166_v49 = vpop.f32.mrf.mxu1 }
 0x7ba   :  { %v9287_v46 = vpop.f32.mrf.mxu0  ;;  %v9349_v43 = vadd.f32 %v12141_v31, %v9155_v18  ;;  %v8969_v44 = vadd.f32 %v14589_v4, %v8775_v23 }
 0x7bb   :  { %v9481_v8 = vpop.f32.mrf.mxu1 }
 0x7bc   :  { %v12145_v62 = vpop.f32.mrf.mxu0  ;;  %v9543_v2 = vadd.f32 %v12165_v59, %v9349_v43  ;;  %v8773_v59 = vadd.f32 %v14547_v47, %v14545_v27 }
 0x7bd   :  { %v14625_v11 = vpop.f32.mrf.mxu1 }
 0x7be   :  { %v9300_v34 = vpop.f32.mrf.mxu0  ;;  %14944 = vst [vmem:[#allocation37_spill] sm:$0xff] %v14625_v11  ;;  %v8959_v11 = vadd.f32 %v8896_v33, %v8765_v12 }
 0x7bf   :  { %v14633_v50 = vpop.f32.mrf.mxu1 }
 0x7c0   :  { %v14621_v32 = vpop.f32.mrf.mxu0  ;;  %14947 = vst [vmem:[#allocation40_spill] sm:$0xff] %v14633_v50  ;;  %v9153_v6 = vadd.f32 %v9090_v37, %v8959_v11 }
 0x7c1   :  { %14942 = vst [vmem:[#allocation35_spill] sm:$0xff] %v14621_v32 }
 0x7c2   :  { %v14623_v22 = vpop.f32.mrf.mxu0  ;;  %v9347_v20 = vadd.f32 %v9284_v39, %v9153_v6  ;;  %v14954_v6 = vld [vmem:[#allocation18_spill] sm:$0xff] }
 0x7c3   :  { %14943 = vst [vmem:[#allocation36_spill] sm:$0xff] %v14623_v22  ;;  %v8768_v22 = vadd.f32 %v14519_v53, %v14517_v10  ;;  %v8769_v10 = vadd.f32 %v14531_v35, %v14529_v55  ;;  %v8770_v55 = vadd.f32 %v14539_v5, %v14537_v3  ;;  %v8966_v35 = vadd.f32 %v14581_v60, %v8772_v9  ;;  %v14677_v5 = vld [vmem:[#allocation11] ss:$0 sm:$0xff] }
 0x7c4   :  { %v14627_v19 = vpop.f32.mrf.mxu0  ;;  %v9541_v42 = vadd.f32 %v9478_v30, %v9347_v20  ;;  %v9353_v60 = vadd.f32 %v12145_v62, %v9159_v48  ;;  %v8774_v30 = vadd.f32 %v14555_v54, %v14553_v21  ;;  %v14950_v21 = vld [vmem:[#allocation31_spill] sm:$0xff] }
 0x7c5   :  { %14945 = vst [vmem:[#allocation38_spill] sm:$0xff] %v14627_v19  ;;  %v14643_v19 = vpop.f32.mrf.mxu1  ;;  %v8962_v50 = vadd.f32 %v12094_v52, %v8768_v22  ;;  %v8963_v52 = vadd.f32 %v8912_v7, %v8769_v10  ;;  %v8964_v3 = vadd.f32 %v14585_v29, %v8770_v55  ;;  %v8776_v7 = vadd.f32 %v14551_v40, %v14549_v61  ;;  %v14958_v55 = vld [vmem:[#allocation19_spill] sm:$0xff] }
 0x7c6   :  { %v14629_v15 = vpop.f32.mrf.mxu0  ;;  %v9160_v17 = vadd.f32 %v14583_v51, %v8966_v35  ;;  %v8779_v29 = vadd.f32 %v14559_v57, %v14557_v14  ;;  %v8777_v40 = vadd.f32 %v14563_v56, %v14561_v41  ;;  %v8967_v54 = vadd.f32 %v14950_v21, %v8773_v59 }
 0x7c7   :  { %14946 = vst [vmem:[#allocation39_spill] sm:$0xff] %v14629_v15  ;;  %v14655_v53 = vpop.f32.mrf.mxu1  ;;  %v9156_v12 = vadd.f32 %v14573_v0, %v8962_v50  ;;  %v9348_v50 = vadd.f32 %v9287_v46, %v9154_v16  ;;  %v8970_v24 = vadd.f32 %v14954_v6, %v8776_v7  ;;  %v14955_v43 = vld [vmem:[#allocation40_spill] sm:$0xff]  ;;  %v8968_v35 = vadd.f32 %v14958_v55, %v8774_v30 }
 0x7c8   :  { %v14635_v28 = vpop.f32.mrf.mxu0  ;;  %v14951_v51 = vld [vmem:[#allocation35_spill] sm:$0xff] }
 0x7c9   :  { %14948 = vst [vmem:[#allocation41_spill] sm:$0xff] %v14635_v28  ;;  %v9350_v31 = vadd.f32 %v12142_v36, %v9156_v12  ;;  %v14668_v37 = vpop.f32.mrf.mxu1  ;;  %v9157_v36 = vadd.f32 %v14579_v58, %v8963_v52  ;;  %v9542_v46 = vadd.f32 %v9481_v8, %v9348_v50  ;;  %v9354_v11 = vadd.f32 %v14951_v51, %v9160_v17  ;;  %v14953_v8 = vld [vmem:[#allocation17_spill] sm:$0xff] }
 0x7ca   :  { %v14639_v32 = vpop.f32.mrf.mxu0  ;;  %v9163_v38 = vadd.f32 %v14953_v8, %v8969_v44  ;;  %v14956_v56 = vld [vmem:[#allocation36_spill] sm:$0xff] }
 0x7cb   :  { %v9544_v45 = vadd.f32 %v12166_v49, %v9350_v31  ;;  %v9351_v27 = vadd.f32 %v9300_v34, %v9157_v36  ;;  %v9510_v47 = vpop.f32.mrf.mxu1  ;;  %v14949_v49 = vld [vmem:[#allocation32_spill] sm:$0xff]  ;;  %v14952_v34 = vld [vmem:[#allocation37_spill] sm:$0xff] }
 0x7cc   :  { %v14645_v15 = vpop.f32.mrf.mxu0  ;;  %v9158_v62 = vadd.f32 %v14949_v49, %v8964_v3  ;;  %v9547_v1 = vadd.f32 %v14952_v34, %v9353_v60  ;;  %v14959_v48 = vld [vmem:[#allocation38_spill] sm:$0xff]  ;;  %v14965_v49 = vld [vmem:[#allocation16_spill] sm:$0xff] }
 0x7cd   :  { %v9545_v41 = vadd.f32 %v14955_v43, %v9351_v27  ;;  %v12174_v12 = vpop.f32.mrf.mxu1  ;;  %v14960_v3 = vld [vmem:[#allocation26_spill] sm:$0xff] }
 0x7ce   :  { %v14649_v28 = vpop.f32.mrf.mxu0  ;;  %v9352_v10 = vadd.f32 %v14956_v56, %v9158_v62  ;;  %v14964_v44 = vld [vmem:[#allocation39_spill] sm:$0xff]  ;;  %v14966_v62 = vld [vmem:[#allocation30_spill] sm:$0xff] }
 0x7cf   :  { %v8778_v21 = vadd.f32 %v14966_v62, %v14965_v49 }
 0x7d0   :  { %v14657_v33 = vpop.f32.mrf.mxu0 }
 0x7d2   :  { %v14662_v63 = vpop.f32.mrf.mxu0 }
 0x7d4   :  { %v12189_v0 = vpop.f32.mrf.mxu0 }
 0x7d5   :  { %v9737_v26 = vadd.f32 %v12189_v0, %v9543_v2  ;;  %v14957_v2 = vld [vmem:[#allocation27_spill] sm:$0xff]  ;;  %v9548_v0 = vadd.f32 %v14643_v19, %v9354_v11  ;;  %v9546_v19 = vadd.f32 %v14655_v53, %v9352_v10 }
 0x7d6   :  { %v9672_v13 = vpop.f32.mrf.mxu0  ;;  %v9161_v31 = vadd.f32 %v14957_v2, %v8967_v54  ;;  %v14967_v54 = vld [vmem:[#allocation20_spill] sm:$0xff] }
 0x7d7   :  { %v9735_v39 = vadd.f32 %v9672_v13, %v9541_v42  ;;  %v9759_v22 = vadd.f32 %v14677_v5, %v9737_v26  ;;  %v9357_v42 = vadd.f32 %v14959_v48, %v9163_v38  ;;  %v14961_v13 = vld [vmem:[#allocation28_spill] sm:$0xff]  ;;  %v9162_v51 = vadd.f32 %v14967_v54, %v8968_v35  ;;  %v14970_v38 = vld [vmem:[#allocation22_spill] sm:$0xff] }
 0x7d8   :  { %v12190_v58 = vpop.f32.mrf.mxu0  ;;  %v8780_v7 = vadd.f32 %v14961_v13, %v14960_v3  ;;  %v9355_v27 = vadd.f32 %v14964_v44, %v9161_v31  ;;  %v14975_v13 = vld [vmem:[#allocation34_spill] sm:$0xff] }
 0x7d9   :  { %v9738_v61 = vadd.f32 %v12190_v58, %v9544_v45  ;;  %v9757_v18 = vadd.f32 %v14677_v5, %v9735_v39  ;;  %v9775_v20 = vmax.f32 %v9759_v22, 0.0  ;;  %v14962_v45 = vld [vmem:[#allocation29_spill] sm:$0xff]  ;;  %v9513_v58 = vpop.f32.mrf.mxu1  ;;  %v9551_v53 = vadd.f32 %v14668_v37, %v9357_v42 }
 0x7da   :  { %v9675_v4 = vpop.f32.mrf.mxu0  ;;  %v9164_v60 = vadd.f32 %v14962_v45, %v8970_v24  ;;  %v14963_v39 = vld [vmem:[#allocation21_spill] sm:$0xff]  ;;  %v14971_v24 = vld [vmem:[#allocation15_spill] sm:$0xff] }
 0x7db   :  { %v9760_v14 = vadd.f32 %v14677_v5, %v9738_v61  ;;  %v9736_v57 = vadd.f32 %v9675_v4, %v9542_v46  ;;  %v9773_v26 = vmax.f32 %v9757_v18, 0.0  ;;  %v8973_v17 = vadd.f32 %v14963_v39, %v8779_v29  ;;  %v14968_v29 = vld [vmem:[#allocation23_spill] sm:$0xff]  ;;  %v14969_v4 = vld [vmem:[#allocation41_spill] sm:$0xff] }
 0x7dc   :  { %v12193_v25 = vpop.f32.mrf.mxu0  ;;  %v8971_v11 = vadd.f32 %v14968_v29, %v8777_v40  ;;  %v9358_v34 = vadd.f32 %v14969_v4, %v9164_v60  ;;  %v8974_v43 = vadd.f32 %v14971_v24, %v8780_v7  ;;  %v9549_v40 = vadd.f32 %v9510_v47, %v9355_v27 }
 0x7dd   :  { %v9776_v9 = vmax.f32 %v9760_v14, 0.0  ;;  %v9758_v52 = vadd.f32 %v14677_v5, %v9736_v57  ;;  %v9741_v16 = vadd.f32 %v12193_v25, %v9547_v1  ;;  %v12177_v1 = vpop.f32.mrf.mxu1  ;;  %v9167_v6 = vadd.f32 %v14970_v38, %v8973_v17 }
 0x7de   :  { %v9688_v50 = vpop.f32.mrf.mxu0  ;;  %v9552_v31 = vadd.f32 %v12174_v12, %v9358_v34 }
 0x7df   :  { %v10502_v23 = vpack.c.bf16 %v9776_v9, %v9775_v20  ;;  %v9774_v59 = vmax.f32 %v9758_v52, 0.0  ;;  %v9739_v36 = vadd.f32 %v9688_v50, %v9545_v41  ;;  %v9763_v22 = vadd.f32 %v14677_v5, %v9741_v16  ;;  %v14972_v9 = vld [vmem:[#allocation25_spill] sm:$0xff]  ;;  %v9526_v35 = vpop.f32.mrf.mxu1 }
 0x7e0   :  { %v12194_v30 = vpop.f32.mrf.mxu0  ;;  %v9356_v41 = vadd.f32 %v14639_v32, %v9162_v51  ;;  %v9165_v52 = vadd.f32 %v14972_v9, %v8971_v11  ;;  %v14973_v16 = vld [vmem:[#allocation33_spill] sm:$0xff]  ;;  %v9361_v55 = vadd.f32 %v14645_v15, %v9167_v6  ;;  %v14974_v32 = vld [vmem:[#allocation24_spill] sm:$0xff] }
 0x7e1   :  { %10534 = vst [vmem:[%s14771_s7 + $0x8] sm:$0xff] %v10502_v23   ;;  %v10497_v46 = vpack.c.bf16 %v9774_v59, %v9773_v26  ;;  %v9742_v61 = vadd.f32 %v12194_v30, %v9548_v0  ;;  %v9761_v14 = vadd.f32 %v14677_v5, %v9739_v36  ;;  %v9779_v10 = vmax.f32 %v9763_v22, 0.0  ;;  %v12178_v60 = vpop.f32.mrf.mxu1 }
 0x7e2   :  { %v9691_v18 = vpop.f32.mrf.mxu0  ;;  %v8972_v2 = vadd.f32 %v14973_v16, %v8778_v21  ;;  %v9168_v26 = vadd.f32 %v14974_v32, %v8974_v43  ;;  %v9359_v23 = vadd.f32 %v14649_v28, %v9165_v52  ;;  %v9550_v36 = vadd.f32 %v9513_v58, %v9356_v41 }
 0x7e3   :  { %10498 = vst [vmem:[%s14771_s7] sm:$0xff] %v10497_v46   ;;  %v9764_v57 = vadd.f32 %v14677_v5, %v9742_v61  ;;  %v9740_v8 = vadd.f32 %v9691_v18, %v9546_v19  ;;  %v9777_v48 = vmax.f32 %v9761_v14, 0.0  ;;  %v9555_v17 = vadd.f32 %v12177_v1, %v9361_v55  ;;  %v9529_v62 = vpop.f32.mrf.mxu1 }
 0x7e4   :  { %v12197_v56 = vpop.f32.mrf.mxu0  ;;  %v9166_v7 = vadd.f32 %v14975_v13, %v8972_v2  ;;  %v9362_v45 = vadd.f32 %v14657_v33, %v9168_v26  ;;  %v9553_v58 = vadd.f32 %v9526_v35, %v9359_v23 }
 0x7e5   :  { %v9780_v25 = vmax.f32 %v9764_v57, 0.0  ;;  %v9762_v37 = vadd.f32 %v14677_v5, %v9740_v8  ;;  %v9745_v20 = vadd.f32 %v12197_v56, %v9551_v53 }
 0x7e6   :  { %v9704_v0 = vpop.f32.mrf.mxu0  ;;  %v9360_v30 = vadd.f32 %v14662_v63, %v9166_v7  ;;  %v9556_v49 = vadd.f32 %v12178_v60, %v9362_v45 }
 0x7e7   :  { %v10512_v42 = vpack.c.bf16 %v9780_v25, %v9779_v10  ;;  %v9778_v47 = vmax.f32 %v9762_v37, 0.0  ;;  %v9743_v50 = vadd.f32 %v9704_v0, %v9549_v40  ;;  %v9767_v12 = vadd.f32 %v14677_v5, %v9745_v20 }
 0x7e8   :  { %v12198_v59 = vpop.f32.mrf.mxu0  ;;  %v9554_v34 = vadd.f32 %v9529_v62, %v9360_v30 }
 0x7e9   :  { %10536 = vst [vmem:[%s14771_s7 + $0x18] sm:$0xff] %v10512_v42   ;;  %v10507_v3 = vpack.c.bf16 %v9778_v47, %v9777_v48  ;;  %v9746_v15 = vadd.f32 %v12198_v59, %v9552_v31  ;;  %v9765_v28 = vadd.f32 %v14677_v5, %v9743_v50  ;;  %v9783_v46 = vmax.f32 %v9767_v12, 0.0 }
 0x7ea   :  { %v9707_v39 = vpop.f32.mrf.mxu0 }
 0x7eb   :  { %10535 = vst [vmem:[%s14771_s7 + $0x10] sm:$0xff] %v10507_v3   ;;  %v9768_v44 = vadd.f32 %v14677_v5, %v9746_v15  ;;  %v9744_v27 = vadd.f32 %v9707_v39, %v9550_v36  ;;  %v9781_v54 = vmax.f32 %v9765_v28, 0.0 }
 0x7ec   :  { %v12201_v19 = vpop.f32.mrf.mxu0 }
 0x7ed   :  { %v9784_v22 = vmax.f32 %v9768_v44, 0.0  ;;  %v9766_v33 = vadd.f32 %v14677_v5, %v9744_v27  ;;  %v9749_v61 = vadd.f32 %v12201_v19, %v9555_v17 }
 0x7ee   :  { %v9720_v21 = vpop.f32.mrf.mxu0 }
 0x7ef   :  { %v10522_v51 = vpack.c.bf16 %v9784_v22, %v9783_v46  ;;  %v9782_v29 = vmax.f32 %v9766_v33, 0.0  ;;  %v9747_v11 = vadd.f32 %v9720_v21, %v9553_v58  ;;  %v9771_v1 = vadd.f32 %v14677_v5, %v9749_v61 }
 0x7f0   :  { %v12202_v4 = vpop.f32.mrf.mxu0 }
 0x7f1   :  { %10538 = vst [vmem:[%s14771_s7 + $0x28] sm:$0xff] %v10522_v51   ;;  %v10517_v63 = vpack.c.bf16 %v9782_v29, %v9781_v54  ;;  %v9750_v18 = vadd.f32 %v12202_v4, %v9556_v49  ;;  %v9769_v14 = vadd.f32 %v14677_v5, %v9747_v11  ;;  %v9787_v38 = vmax.f32 %v9771_v1, 0.0 }
 0x7f2   :  { %v9723_v53 = vpop.f32.mrf.mxu0 }
 0x7f3   :  { %10537 = vst [vmem:[%s14771_s7 + $0x20] sm:$0xff] %v10517_v63   ;;  %v9772_v57 = vadd.f32 %v14677_v5, %v9750_v18  ;;  %v9748_v8 = vadd.f32 %v9723_v53, %v9554_v34  ;;  %v9785_v43 = vmax.f32 %v9769_v14, 0.0 }
 0x7f5   :  { %v9788_v6 = vmax.f32 %v9772_v57, 0.0  ;;  %v9770_v24 = vadd.f32 %v14677_v5, %v9748_v8 }
 0x7f7   :  { %v10532_v40 = vpack.c.bf16 %v9788_v6, %v9787_v38  ;;  %v9786_v41 = vmax.f32 %v9770_v24, 0.0 }
 0x7f9   :  { %10540 = vst [vmem:[%s14771_s7 + $0x38] sm:$0xff] %v10532_v40   ;;  %v10527_v56 = vpack.c.bf16 %v9786_v41, %v9785_v43 }
 0x7fb   :  { %10539 = vst [vmem:[%s14771_s7 + $0x30] sm:$0xff] %v10527_v56  }
 0x7fc   :  { %9873 = vsyncpa [#allocation5], 1 }
 0x7fd   :  { %9874 = vsyncpa [#allocation7], 1 }
 0x7fe   :  { %9875 = vsyncpa [#allocation10], 1 }

</bundles_post_ra>
